<compile_context>
chip_gen: v6e
topology: v6e:2x2x1
jax: 0.10.0
libtpu: 0.0.40
codegen_flags: <defaults>
</compile_context>

<pallas_src>
import jax
import jax.numpy as jnp
from jax.experimental import pallas as pl
from jax.experimental.pallas import tpu as pltpu


# -----------------------------------------------------------------------------
# Fused conv3x3(pad=1) + folded-BN scale/shift + ReLU + 2x2 maxpool kernel
# -----------------------------------------------------------------------------
def _conv_bn_relu_pool_kernel(xe_ref, xo_ref, w_ref, scale_ref, bias_ref,
                              out_ref):
    """One batch element per grid step.

    xe_ref : (Hp*Cp, Wh)     zero-padded input, EVEN columns, (row, chan) flat
    xo_ref : (Hp*Cp, Wh)     zero-padded input, ODD columns
    w_ref  : (3, Cout, 3*Cp) conv weights, one (Cout, 3*Cp) slab per kw tap,
                             slab columns ordered (kh, cin)
    scale_ref, bias_ref : (Cout, 1)  per-output-channel affine (BN folded in)
    out_ref: (Ho, Cout, Wo)
    """
    Ho, Cout, Wo = out_ref.shape
    Cp = w_ref.shape[2] // 3

    # Loop-invariant values hoisted out of the row loop (weights + broadcasts).
    w0 = w_ref[0]
    w1 = w_ref[1]
    w2 = w_ref[2]
    scale = jnp.broadcast_to(scale_ref[...], (Cout, Wo))
    bias = jnp.broadcast_to(bias_ref[...], (Cout, Wo))

    def dot(a, b):
        return jnp.dot(a, b, preferred_element_type=jnp.float32)

    def body(r, carry):
        def conv_row(off):
            # Flattened padded rows (y+kh)*Cp + cin for conv row y = 2r + off/Cp.
            row0 = pl.multiple_of(2 * r * Cp + off, Cp)
            ev = xe_ref[pl.ds(row0, 3 * Cp), :]        # (3*Cp, Wo+1)
            od = xo_ref[pl.ds(row0, 3 * Cp), :]        # (3*Cp, Wo+1)
            e0 = ev[:, 0:Wo]                           # padded cols 2c
            e1 = ev[:, 1:Wo + 1]                       # padded cols 2c+2
            o0 = od[:, 0:Wo]                           # padded cols 2c+1
            o1 = od[:, 1:Wo + 1]                       # padded cols 2c+3
            # conv output at the even / odd output columns of this row
            ce = dot(w0, e0) + dot(w1, o0) + dot(w2, e1)
            co = dot(w0, o0) + dot(w1, e1) + dot(w2, o1)
            ye = jnp.maximum(ce * scale + bias, 0.0)
            yo = jnp.maximum(co * scale + bias, 0.0)
            return jnp.maximum(ye, yo)                 # max over the W pair

        out_ref[r] = jnp.maximum(conv_row(0), conv_row(Cp))   # max over H pair
        return carry

    jax.lax.fori_loop(0, Ho, body, 0)


def conv_bn_relu_pool(x, w, conv_bias, bn_scale, bn_shift):
    """x: (N, H, Cin, W) f32 (NHCW).  w: (Cout, Cin, 3, 3).

    Returns (N, H//2, Cout, W//2) in NHCW layout."""
    N, H, Cin, W = x.shape
    Cout = w.shape[0]
    Ho, Wo = H // 2, W // 2
    Hp, Wp = H + 2, W + 2
    Wh = Wp // 2                         # = Wo + 1
    Cp = ((Cin + 7) // 8) * 8            # pad channels so slab starts stay 8-aligned

    xp = jnp.pad(x.astype(jnp.float32),
                 ((0, 0), (1, 1), (0, Cp - Cin), (1, 1)))      # (N, Hp, Cp, Wp)
    xps = xp.reshape(N, Hp * Cp, Wh, 2)                        # col = 2*c + parity
    xe = xps[..., 0]                                           # (N, Hp*Cp, Wh)
    xo = xps[..., 1]                                           # (N, Hp*Cp, Wh)

    wpad = jnp.pad(w.astype(jnp.float32),
                   ((0, 0), (0, Cp - Cin), (0, 0), (0, 0)))
    # wt[kw, cout, kh*Cp + cin] = w[cout, cin, kh, kw]
    wt = jnp.transpose(wpad, (3, 0, 2, 1)).reshape(3, Cout, 3 * Cp)

    eff_scale = bn_scale.reshape(Cout, 1).astype(jnp.float32)
    eff_bias = (conv_bias * bn_scale + bn_shift).reshape(Cout, 1).astype(jnp.float32)

    return pl.pallas_call(
        _conv_bn_relu_pool_kernel,
        out_shape=jax.ShapeDtypeStruct((N, Ho, Cout, Wo), jnp.float32),
        grid=(N,),
        in_specs=[
            pl.BlockSpec((None, Hp * Cp, Wh), lambda n: (n, 0, 0)),
            pl.BlockSpec((None, Hp * Cp, Wh), lambda n: (n, 0, 0)),
            pl.BlockSpec((3, Cout, 3 * Cp), lambda n: (0, 0, 0)),
            pl.BlockSpec((Cout, 1), lambda n: (0, 0)),
            pl.BlockSpec((Cout, 1), lambda n: (0, 0)),
        ],
        out_specs=pl.BlockSpec((None, Ho, Cout, Wo), lambda n: (n, 0, 0, 0)),
        compiler_params=pltpu.CompilerParams(
            dimension_semantics=("parallel",),        # batch is independent -> v7x megacore
            vmem_limit_bytes=32 * 1024 * 1024),
    )(xe, xo, wt, eff_scale, eff_bias)


# -----------------------------------------------------------------------------
# Fused FC head: fc1 + ReLU + (dropout = identity in eval) + fc2 + sigmoid
# -----------------------------------------------------------------------------
def _fc_head_kernel(x_ref, w1_ref, b1_ref, w2_ref, b2_ref, out_ref, acc_ref):
    k = pl.program_id(0)

    @pl.when(k == 0)
    def _():
        acc_ref[...] = jnp.zeros_like(acc_ref)

    acc_ref[...] += jnp.dot(x_ref[...], w1_ref[...],
                            preferred_element_type=jnp.float32)

    @pl.when(k == pl.num_programs(0) - 1)
    def _():
        h = jnp.maximum(acc_ref[...] + b1_ref[...], 0.0)
        # TODO(synk): nn.Dropout(0.3) is identity in eval mode; training-mode RNG mask not implemented.
        z = jnp.dot(h, w2_ref[...], preferred_element_type=jnp.float32) + b2_ref[...]
        out_ref[...] = 1.0 / (1.0 + jnp.exp(-z))


def fc_head(xf, w1, b1, w2, b2, tk=7168):
    """xf: (N, K); w1: (K, H1); w2: (H1, 1).  K = 50176 = 7 * 7168."""
    N, K = xf.shape
    H1 = w1.shape[1]
    assert K % tk == 0, (K, tk)
    return pl.pallas_call(
        _fc_head_kernel,
        out_shape=jax.ShapeDtypeStruct((N, 1), jnp.float32),
        grid=(K // tk,),
        in_specs=[
            pl.BlockSpec((N, tk), lambda k: (0, k)),
            pl.BlockSpec((tk, H1), lambda k: (k, 0)),
            pl.BlockSpec((1, H1), lambda k: (0, 0)),
            pl.BlockSpec((H1, 1), lambda k: (0, 0)),
            pl.BlockSpec((1, 1), lambda k: (0, 0)),
        ],
        out_specs=pl.BlockSpec((N, 1), lambda k: (0, 0)),
        scratch_shapes=[pltpu.VMEM((N, H1), jnp.float32)],
        compiler_params=pltpu.CompilerParams(
            dimension_semantics=("arbitrary",),       # K reduction with accumulator
            vmem_limit_bytes=32 * 1024 * 1024),
    )(xf.astype(jnp.float32), w1.astype(jnp.float32),
      b1.reshape(1, H1).astype(jnp.float32), w2.astype(jnp.float32),
      b2.reshape(1, 1).astype(jnp.float32))


# -----------------------------------------------------------------------------
# Full forward (eval semantics)
# -----------------------------------------------------------------------------
def bird_drone_cnn_forward(x_nchw, p):
    eps = 1e-5
    bn_scale = p["bn1_gamma"] / jnp.sqrt(p["bn1_var"] + eps)
    bn_shift = p["bn1_beta"] - p["bn1_mean"] * bn_scale

    x = jnp.transpose(x_nchw, (0, 2, 1, 3))               # NCHW -> NHCW
    x = conv_bn_relu_pool(x, p["conv1_w"], p["conv1_b"], bn_scale, bn_shift)
    x = conv_bn_relu_pool(x, p["conv2_w"], p["conv2_b"],
                          jnp.ones((32,), jnp.float32), jnp.zeros((32,), jnp.float32))
    x = conv_bn_relu_pool(x, p["conv3_w"], p["conv3_b"],
                          jnp.ones((64,), jnp.float32), jnp.zeros((64,), jnp.float32))
    # flatten in PyTorch NCHW order: NHCW -> NCHW -> (N, C*H*W)
    xf = jnp.transpose(x, (0, 2, 1, 3)).reshape(x.shape[0], -1)
    return fc_head(xf, p["fc1_w"], p["fc1_b"], p["fc2_w"], p["fc2_b"])


def init_params(key):
    ks = jax.random.split(key, 16)
    f32 = jnp.float32
    return {
        "conv1_w": jax.random.normal(ks[0], (16, 3, 3, 3), f32) * 0.2,
        "conv1_b": jax.random.normal(ks[1], (16,), f32) * 0.1,
        "bn1_gamma": 1.0 + 0.1 * jax.random.normal(ks[2], (16,), f32),
        "bn1_beta": 0.1 * jax.random.normal(ks[3], (16,), f32),
        "bn1_mean": 0.1 * jax.random.normal(ks[4], (16,), f32),
        "bn1_var": 1.0 + 0.1 * jnp.abs(jax.random.normal(ks[5], (16,), f32)),
        "conv2_w": jax.random.normal(ks[6], (32, 16, 3, 3), f32) * 0.08,
        "conv2_b": jax.random.normal(ks[7], (32,), f32) * 0.1,
        "conv3_w": jax.random.normal(ks[8], (64, 32, 3, 3), f32) * 0.06,
        "conv3_b": jax.random.normal(ks[9], (64,), f32) * 0.1,
        "fc1_w": jax.random.normal(ks[10], (64 * 28 * 28, 128), f32) * 0.004,
        "fc1_b": jax.random.normal(ks[11], (128,), f32) * 0.1,
        "fc2_w": jax.random.normal(ks[12], (128, 1), f32) * 0.1,
        "fc2_b": jax.random.normal(ks[13], (1,), f32) * 0.1,
    }


if __name__ == "__main__":
    key = jax.random.PRNGKey(0)
    kx, kp = jax.random.split(key)
    # fc1 = Linear(64*28*28, 128) forces 224x224 spatial input; batch kept small.
    x = jax.random.normal(kx, (2, 3, 224, 224), jnp.float32)
    params = init_params(kp)

    fwd = jax.jit(bird_drone_cnn_forward)
    y = jax.block_until_ready(fwd(x, params))

    assert y.shape == (2, 1), y.shape
    assert bool(jnp.all(jnp.isfinite(y)))
    assert bool(jnp.all((y > 0.0) & (y < 1.0)))   # sigmoid output range
    print("KERNEL_OK")
</pallas_src>

<mosaic_0001>
module attributes {stable_mosaic.version = 11 : i64} {
  func.func @_conv_bn_relu_pool_kernel(%arg0: i32, %arg1: memref<1x1808x113xf32, #tpu.memory_space<vmem>>, %arg2: memref<1x1808x113xf32, #tpu.memory_space<vmem>>, %arg3: memref<3x16x24xf32, #tpu.memory_space<vmem>>, %arg4: memref<16x1xf32, #tpu.memory_space<vmem>>, %arg5: memref<16x1xf32, #tpu.memory_space<vmem>>, %arg6: memref<1x112x16x112xf32, #tpu.memory_space<vmem>>) attributes {dimension_semantics = [#tpu.dimension_semantics<parallel>], iteration_bounds = array<i64: 2>, scalar_prefetch = 0 : i64, scratch_operands = 0 : i64, tpu.core_type = #tpu.core_type<tc>, window_params = [{transform_indices = @transform_0, window_bounds = array<i64: 1, 1808, 113>}, {transform_indices = @transform_1, window_bounds = array<i64: 1, 1808, 113>}, {pipeline_mode = #tpu.pipeline_mode<synchronous>, transform_indices = @transform_2, window_bounds = array<i64: 3, 16, 24>}, {pipeline_mode = #tpu.pipeline_mode<synchronous>, transform_indices = @transform_3, window_bounds = array<i64: 16, 1>}, {pipeline_mode = #tpu.pipeline_mode<synchronous>, transform_indices = @transform_4, window_bounds = array<i64: 16, 1>}, {transform_indices = @transform_5, window_bounds = array<i64: 1, 112, 16, 112>}]} {
    %c0 = arith.constant 0 : index
    %c0_0 = arith.constant 0 : index
    %c0_1 = arith.constant 0 : index
    %0 = vector.load %arg3[%c0, %c0_0, %c0_1] : memref<3x16x24xf32, #tpu.memory_space<vmem>>, vector<1x16x24xf32>
    %1 = vector.shape_cast %0 : vector<1x16x24xf32> to vector<16x24xf32>
    %c1 = arith.constant 1 : index
    %c0_2 = arith.constant 0 : index
    %c0_3 = arith.constant 0 : index
    %2 = vector.load %arg3[%c1, %c0_2, %c0_3] : memref<3x16x24xf32, #tpu.memory_space<vmem>>, vector<1x16x24xf32>
    %3 = vector.shape_cast %2 : vector<1x16x24xf32> to vector<16x24xf32>
    %c2 = arith.constant 2 : index
    %c0_4 = arith.constant 0 : index
    %c0_5 = arith.constant 0 : index
    %4 = vector.load %arg3[%c2, %c0_4, %c0_5] : memref<3x16x24xf32, #tpu.memory_space<vmem>>, vector<1x16x24xf32>
    %5 = vector.shape_cast %4 : vector<1x16x24xf32> to vector<16x24xf32>
    %c0_6 = arith.constant 0 : index
    %c0_7 = arith.constant 0 : index
    %6 = vector.load %arg4[%c0_6, %c0_7] : memref<16x1xf32, #tpu.memory_space<vmem>>, vector<16x1xf32>
    %7 = vector.shape_cast %6 : vector<16x1xf32> to vector<16x1xf32>
    %8 = vector.broadcast %7 : vector<16x1xf32> to vector<16x112xf32>
    %c0_8 = arith.constant 0 : index
    %c0_9 = arith.constant 0 : index
    %9 = vector.load %arg5[%c0_8, %c0_9] : memref<16x1xf32, #tpu.memory_space<vmem>>, vector<16x1xf32>
    %10 = vector.shape_cast %9 : vector<16x1xf32> to vector<16x1xf32>
    %11 = vector.broadcast %10 : vector<16x1xf32> to vector<16x112xf32>
    %c0_i32 = arith.constant 0 : i32
    %c112_i32 = arith.constant 112 : i32
    %12 = arith.addi %c0_i32, %c112_i32 : i32
    %c1_i32 = arith.constant 1 : i32
    scf.for %arg7 = %c0_i32 to %12 step %c1_i32  : i32 {
      %c2_i32 = arith.constant 2 : i32
      %13 = arith.muli %c2_i32, %arg7 : i32
      %c8_i32 = arith.constant 8 : i32
      %14 = arith.muli %13, %c8_i32 : i32
      %c0_i32_11 = arith.constant 0 : i32
      %15 = arith.addi %14, %c0_i32_11 : i32
      %16 = tpu.assume_multiple %15, 8 : i32
      %c0_12 = arith.constant 0 : index
      %17 = arith.index_cast %16 : i32 to index
      %c0_13 = arith.constant 0 : index
      %18 = vector.load %arg1[%c0_12, %17, %c0_13] : memref<1x1808x113xf32, #tpu.memory_space<vmem>>, vector<1x24x113xf32>
      %19 = vector.shape_cast %18 : vector<1x24x113xf32> to vector<24x113xf32>
      %c0_14 = arith.constant 0 : index
      %20 = arith.index_cast %16 : i32 to index
      %c0_15 = arith.constant 0 : index
      %21 = vector.load %arg2[%c0_14, %20, %c0_15] : memref<1x1808x113xf32, #tpu.memory_space<vmem>>, vector<1x24x113xf32>
      %22 = vector.shape_cast %21 : vector<1x24x113xf32> to vector<24x113xf32>
      %23 = vector.extract_strided_slice %19 {offsets = [0, 0], sizes = [24, 112], strides = [1, 1]} : vector<24x113xf32> to vector<24x112xf32>
      %24 = vector.extract_strided_slice %19 {offsets = [0, 1], sizes = [24, 112], strides = [1, 1]} : vector<24x113xf32> to vector<24x112xf32>
      %25 = vector.extract_strided_slice %22 {offsets = [0, 0], sizes = [24, 112], strides = [1, 1]} : vector<24x113xf32> to vector<24x112xf32>
      %26 = vector.extract_strided_slice %22 {offsets = [0, 1], sizes = [24, 112], strides = [1, 1]} : vector<24x113xf32> to vector<24x112xf32>
      %cst = arith.constant dense<0.000000e+00> : vector<16x112xf32>
      %27 = tpu.matmul %1, %23, %cst {dimension_numbers = #tpu.dot_dimension_numbers<[1], [0], [0], [1], [0, 0, 1, 1], [], []>} : vector<16x24xf32>, vector<24x112xf32>, vector<16x112xf32> -> vector<16x112xf32>
      %cst_16 = arith.constant dense<0.000000e+00> : vector<16x112xf32>
      %28 = tpu.matmul %3, %25, %cst_16 {dimension_numbers = #tpu.dot_dimension_numbers<[1], [0], [0], [1], [0, 0, 1, 1], [], []>} : vector<16x24xf32>, vector<24x112xf32>, vector<16x112xf32> -> vector<16x112xf32>
      %29 = arith.addf %27, %28 : vector<16x112xf32>
      %cst_17 = arith.constant dense<0.000000e+00> : vector<16x112xf32>
      %30 = tpu.matmul %5, %24, %cst_17 {dimension_numbers = #tpu.dot_dimension_numbers<[1], [0], [0], [1], [0, 0, 1, 1], [], []>} : vector<16x24xf32>, vector<24x112xf32>, vector<16x112xf32> -> vector<16x112xf32>
      %31 = arith.addf %29, %30 : vector<16x112xf32>
      %cst_18 = arith.constant dense<0.000000e+00> : vector<16x112xf32>
      %32 = tpu.matmul %1, %25, %cst_18 {dimension_numbers = #tpu.dot_dimension_numbers<[1], [0], [0], [1], [0, 0, 1, 1], [], []>} : vector<16x24xf32>, vector<24x112xf32>, vector<16x112xf32> -> vector<16x112xf32>
      %cst_19 = arith.constant dense<0.000000e+00> : vector<16x112xf32>
      %33 = tpu.matmul %3, %24, %cst_19 {dimension_numbers = #tpu.dot_dimension_numbers<[1], [0], [0], [1], [0, 0, 1, 1], [], []>} : vector<16x24xf32>, vector<24x112xf32>, vector<16x112xf32> -> vector<16x112xf32>
      %34 = arith.addf %32, %33 : vector<16x112xf32>
      %cst_20 = arith.constant dense<0.000000e+00> : vector<16x112xf32>
      %35 = tpu.matmul %5, %26, %cst_20 {dimension_numbers = #tpu.dot_dimension_numbers<[1], [0], [0], [1], [0, 0, 1, 1], [], []>} : vector<16x24xf32>, vector<24x112xf32>, vector<16x112xf32> -> vector<16x112xf32>
      %36 = arith.addf %34, %35 : vector<16x112xf32>
      %37 = arith.mulf %31, %8 : vector<16x112xf32>
      %38 = arith.addf %37, %11 : vector<16x112xf32>
      %cst_21 = arith.constant 0.000000e+00 : f32
      %39 = vector.broadcast %cst_21 : f32 to vector<16x112xf32>
      %40 = arith.maximumf %38, %39 : vector<16x112xf32>
      %41 = arith.mulf %36, %8 : vector<16x112xf32>
      %42 = arith.addf %41, %11 : vector<16x112xf32>
      %cst_22 = arith.constant 0.000000e+00 : f32
      %43 = vector.broadcast %cst_22 : f32 to vector<16x112xf32>
      %44 = arith.maximumf %42, %43 : vector<16x112xf32>
      %45 = arith.maximumf %40, %44 : vector<16x112xf32>
      %c2_i32_23 = arith.constant 2 : i32
      %46 = arith.muli %c2_i32_23, %arg7 : i32
      %c8_i32_24 = arith.constant 8 : i32
      %47 = arith.muli %46, %c8_i32_24 : i32
      %c8_i32_25 = arith.constant 8 : i32
      %48 = arith.addi %47, %c8_i32_25 : i32
      %49 = tpu.assume_multiple %48, 8 : i32
      %c0_26 = arith.constant 0 : index
      %50 = arith.index_cast %49 : i32 to index
      %c0_27 = arith.constant 0 : index
      %51 = vector.load %arg1[%c0_26, %50, %c0_27] : memref<1x1808x113xf32, #tpu.memory_space<vmem>>, vector<1x24x113xf32>
      %52 = vector.shape_cast %51 : vector<1x24x113xf32> to vector<24x113xf32>
      %c0_28 = arith.constant 0 : index
      %53 = arith.index_cast %49 : i32 to index
      %c0_29 = arith.constant 0 : index
      %54 = vector.load %arg2[%c0_28, %53, %c0_29] : memref<1x1808x113xf32, #tpu.memory_space<vmem>>, vector<1x24x113xf32>
      %55 = vector.shape_cast %54 : vector<1x24x113xf32> to vector<24x113xf32>
      %56 = vector.extract_strided_slice %52 {offsets = [0, 0], sizes = [24, 112], strides = [1, 1]} : vector<24x113xf32> to vector<24x112xf32>
      %57 = vector.extract_strided_slice %52 {offsets = [0, 1], sizes = [24, 112], strides = [1, 1]} : vector<24x113xf32> to vector<24x112xf32>
      %58 = vector.extract_strided_slice %55 {offsets = [0, 0], sizes = [24, 112], strides = [1, 1]} : vector<24x113xf32> to vector<24x112xf32>
      %59 = vector.extract_strided_slice %55 {offsets = [0, 1], sizes = [24, 112], strides = [1, 1]} : vector<24x113xf32> to vector<24x112xf32>
      %cst_30 = arith.constant dense<0.000000e+00> : vector<16x112xf32>
      %60 = tpu.matmul %1, %56, %cst_30 {dimension_numbers = #tpu.dot_dimension_numbers<[1], [0], [0], [1], [0, 0, 1, 1], [], []>} : vector<16x24xf32>, vector<24x112xf32>, vector<16x112xf32> -> vector<16x112xf32>
      %cst_31 = arith.constant dense<0.000000e+00> : vector<16x112xf32>
      %61 = tpu.matmul %3, %58, %cst_31 {dimension_numbers = #tpu.dot_dimension_numbers<[1], [0], [0], [1], [0, 0, 1, 1], [], []>} : vector<16x24xf32>, vector<24x112xf32>, vector<16x112xf32> -> vector<16x112xf32>
      %62 = arith.addf %60, %61 : vector<16x112xf32>
      %cst_32 = arith.constant dense<0.000000e+00> : vector<16x112xf32>
      %63 = tpu.matmul %5, %57, %cst_32 {dimension_numbers = #tpu.dot_dimension_numbers<[1], [0], [0], [1], [0, 0, 1, 1], [], []>} : vector<16x24xf32>, vector<24x112xf32>, vector<16x112xf32> -> vector<16x112xf32>
      %64 = arith.addf %62, %63 : vector<16x112xf32>
      %cst_33 = arith.constant dense<0.000000e+00> : vector<16x112xf32>
      %65 = tpu.matmul %1, %58, %cst_33 {dimension_numbers = #tpu.dot_dimension_numbers<[1], [0], [0], [1], [0, 0, 1, 1], [], []>} : vector<16x24xf32>, vector<24x112xf32>, vector<16x112xf32> -> vector<16x112xf32>
      %cst_34 = arith.constant dense<0.000000e+00> : vector<16x112xf32>
      %66 = tpu.matmul %3, %57, %cst_34 {dimension_numbers = #tpu.dot_dimension_numbers<[1], [0], [0], [1], [0, 0, 1, 1], [], []>} : vector<16x24xf32>, vector<24x112xf32>, vector<16x112xf32> -> vector<16x112xf32>
      %67 = arith.addf %65, %66 : vector<16x112xf32>
      %cst_35 = arith.constant dense<0.000000e+00> : vector<16x112xf32>
      %68 = tpu.matmul %5, %59, %cst_35 {dimension_numbers = #tpu.dot_dimension_numbers<[1], [0], [0], [1], [0, 0, 1, 1], [], []>} : vector<16x24xf32>, vector<24x112xf32>, vector<16x112xf32> -> vector<16x112xf32>
      %69 = arith.addf %67, %68 : vector<16x112xf32>
      %70 = arith.mulf %64, %8 : vector<16x112xf32>
      %71 = arith.addf %70, %11 : vector<16x112xf32>
      %cst_36 = arith.constant 0.000000e+00 : f32
      %72 = vector.broadcast %cst_36 : f32 to vector<16x112xf32>
      %73 = arith.maximumf %71, %72 : vector<16x112xf32>
      %74 = arith.mulf %69, %8 : vector<16x112xf32>
      %75 = arith.addf %74, %11 : vector<16x112xf32>
      %cst_37 = arith.constant 0.000000e+00 : f32
      %76 = vector.broadcast %cst_37 : f32 to vector<16x112xf32>
      %77 = arith.maximumf %75, %76 : vector<16x112xf32>
      %78 = arith.maximumf %73, %77 : vector<16x112xf32>
      %79 = arith.maximumf %45, %78 : vector<16x112xf32>
      %c0_38 = arith.constant 0 : index
      %80 = arith.index_cast %arg7 : i32 to index
      %c0_39 = arith.constant 0 : index
      %c0_40 = arith.constant 0 : index
      %81 = vector.load %arg6[%c0_38, %80, %c0_39, %c0_40] : memref<1x112x16x112xf32, #tpu.memory_space<vmem>>, vector<1x1x16x112xf32>
      %82 = vector.shape_cast %81 : vector<1x1x16x112xf32> to vector<16x112xf32>
      %83 = vector.shape_cast %79 : vector<16x112xf32> to vector<1x1x16x112xf32>
      tpu.vector_store %arg6[%c0_38, %80, %c0_39, %c0_40], %83 {strides = array<i32>} : memref<1x112x16x112xf32, #tpu.memory_space<vmem>>, vector<1x1x16x112xf32>,
    }
    %c112_i32_10 = arith.constant 112 : i32
    return
  }
  func.func @transform_0(%arg0: i32) -> (i32, i32, i32) {
    %c0_i32 = arith.constant 0 : i32
    %c0_i32_0 = arith.constant 0 : i32
    %c0_i32_1 = arith.constant 0 : i32
    return %arg0, %c0_i32, %c0_i32_0 : i32, i32, i32
  }
  func.func @transform_1(%arg0: i32) -> (i32, i32, i32) {
    %c0_i32 = arith.constant 0 : i32
    %c0_i32_0 = arith.constant 0 : i32
    %c0_i32_1 = arith.constant 0 : i32
    return %arg0, %c0_i32, %c0_i32_0 : i32, i32, i32
  }
  func.func @transform_2(%arg0: i32) -> (i32, i32, i32) {
    %c0_i32 = arith.constant 0 : i32
    %c0_i32_0 = arith.constant 0 : i32
    %c0_i32_1 = arith.constant 0 : i32
    %c0_i32_2 = arith.constant 0 : i32
    return %c0_i32, %c0_i32_0, %c0_i32_1 : i32, i32, i32
  }
  func.func @transform_3(%arg0: i32) -> (i32, i32) {
    %c0_i32 = arith.constant 0 : i32
    %c0_i32_0 = arith.constant 0 : i32
    %c0_i32_1 = arith.constant 0 : i32
    return %c0_i32, %c0_i32_0 : i32, i32
  }
  func.func @transform_4(%arg0: i32) -> (i32, i32) {
    %c0_i32 = arith.constant 0 : i32
    %c0_i32_0 = arith.constant 0 : i32
    %c0_i32_1 = arith.constant 0 : i32
    return %c0_i32, %c0_i32_0 : i32, i32
  }
  func.func @transform_5(%arg0: i32) -> (i32, i32, i32, i32) {
    %c0_i32 = arith.constant 0 : i32
    %c0_i32_0 = arith.constant 0 : i32
    %c0_i32_1 = arith.constant 0 : i32
    %c0_i32_2 = arith.constant 0 : i32
    return %arg0, %c0_i32, %c0_i32_0, %c0_i32_1 : i32, i32, i32, i32
  }
}

module attributes {stable_mosaic.version = 11 : i64} {
  func.func @_conv_bn_relu_pool_kernel(%arg0: i32, %arg1: memref<1x1824x57xf32, #tpu.memory_space<vmem>>, %arg2: memref<1x1824x57xf32, #tpu.memory_space<vmem>>, %arg3: memref<3x32x48xf32, #tpu.memory_space<vmem>>, %arg4: memref<32x1xf32, #tpu.memory_space<vmem>>, %arg5: memref<32x1xf32, #tpu.memory_space<vmem>>, %arg6: memref<1x56x32x56xf32, #tpu.memory_space<vmem>>) attributes {dimension_semantics = [#tpu.dimension_semantics<parallel>], iteration_bounds = array<i64: 2>, scalar_prefetch = 0 : i64, scratch_operands = 0 : i64, tpu.core_type = #tpu.core_type<tc>, window_params = [{transform_indices = @transform_0, window_bounds = array<i64: 1, 1824, 57>}, {transform_indices = @transform_1, window_bounds = array<i64: 1, 1824, 57>}, {pipeline_mode = #tpu.pipeline_mode<synchronous>, transform_indices = @transform_2, window_bounds = array<i64: 3, 32, 48>}, {pipeline_mode = #tpu.pipeline_mode<synchronous>, transform_indices = @transform_3, window_bounds = array<i64: 32, 1>}, {pipeline_mode = #tpu.pipeline_mode<synchronous>, transform_indices = @transform_4, window_bounds = array<i64: 32, 1>}, {transform_indices = @transform_5, window_bounds = array<i64: 1, 56, 32, 56>}]} {
    %c0 = arith.constant 0 : index
    %c0_0 = arith.constant 0 : index
    %c0_1 = arith.constant 0 : index
    %0 = vector.load %arg3[%c0, %c0_0, %c0_1] : memref<3x32x48xf32, #tpu.memory_space<vmem>>, vector<1x32x48xf32>
    %1 = vector.shape_cast %0 : vector<1x32x48xf32> to vector<32x48xf32>
    %c1 = arith.constant 1 : index
    %c0_2 = arith.constant 0 : index
    %c0_3 = arith.constant 0 : index
    %2 = vector.load %arg3[%c1, %c0_2, %c0_3] : memref<3x32x48xf32, #tpu.memory_space<vmem>>, vector<1x32x48xf32>
    %3 = vector.shape_cast %2 : vector<1x32x48xf32> to vector<32x48xf32>
    %c2 = arith.constant 2 : index
    %c0_4 = arith.constant 0 : index
    %c0_5 = arith.constant 0 : index
    %4 = vector.load %arg3[%c2, %c0_4, %c0_5] : memref<3x32x48xf32, #tpu.memory_space<vmem>>, vector<1x32x48xf32>
    %5 = vector.shape_cast %4 : vector<1x32x48xf32> to vector<32x48xf32>
    %c0_6 = arith.constant 0 : index
    %c0_7 = arith.constant 0 : index
    %6 = vector.load %arg4[%c0_6, %c0_7] : memref<32x1xf32, #tpu.memory_space<vmem>>, vector<32x1xf32>
    %7 = vector.shape_cast %6 : vector<32x1xf32> to vector<32x1xf32>
    %8 = vector.broadcast %7 : vector<32x1xf32> to vector<32x56xf32>
    %c0_8 = arith.constant 0 : index
    %c0_9 = arith.constant 0 : index
    %9 = vector.load %arg5[%c0_8, %c0_9] : memref<32x1xf32, #tpu.memory_space<vmem>>, vector<32x1xf32>
    %10 = vector.shape_cast %9 : vector<32x1xf32> to vector<32x1xf32>
    %11 = vector.broadcast %10 : vector<32x1xf32> to vector<32x56xf32>
    %c0_i32 = arith.constant 0 : i32
    %c56_i32 = arith.constant 56 : i32
    %12 = arith.addi %c0_i32, %c56_i32 : i32
    %c1_i32 = arith.constant 1 : i32
    scf.for %arg7 = %c0_i32 to %12 step %c1_i32  : i32 {
      %c2_i32 = arith.constant 2 : i32
      %13 = arith.muli %c2_i32, %arg7 : i32
      %c16_i32 = arith.constant 16 : i32
      %14 = arith.muli %13, %c16_i32 : i32
      %c0_i32_11 = arith.constant 0 : i32
      %15 = arith.addi %14, %c0_i32_11 : i32
      %16 = tpu.assume_multiple %15, 16 : i32
      %c0_12 = arith.constant 0 : index
      %17 = arith.index_cast %16 : i32 to index
      %c0_13 = arith.constant 0 : index
      %18 = vector.load %arg1[%c0_12, %17, %c0_13] : memref<1x1824x57xf32, #tpu.memory_space<vmem>>, vector<1x48x57xf32>
      %19 = vector.shape_cast %18 : vector<1x48x57xf32> to vector<48x57xf32>
      %c0_14 = arith.constant 0 : index
      %20 = arith.index_cast %16 : i32 to index
      %c0_15 = arith.constant 0 : index
      %21 = vector.load %arg2[%c0_14, %20, %c0_15] : memref<1x1824x57xf32, #tpu.memory_space<vmem>>, vector<1x48x57xf32>
      %22 = vector.shape_cast %21 : vector<1x48x57xf32> to vector<48x57xf32>
      %23 = vector.extract_strided_slice %19 {offsets = [0, 0], sizes = [48, 56], strides = [1, 1]} : vector<48x57xf32> to vector<48x56xf32>
      %24 = vector.extract_strided_slice %19 {offsets = [0, 1], sizes = [48, 56], strides = [1, 1]} : vector<48x57xf32> to vector<48x56xf32>
      %25 = vector.extract_strided_slice %22 {offsets = [0, 0], sizes = [48, 56], strides = [1, 1]} : vector<48x57xf32> to vector<48x56xf32>
      %26 = vector.extract_strided_slice %22 {offsets = [0, 1], sizes = [48, 56], strides = [1, 1]} : vector<48x57xf32> to vector<48x56xf32>
      %cst = arith.constant dense<0.000000e+00> : vector<32x56xf32>
      %27 = tpu.matmul %1, %23, %cst {dimension_numbers = #tpu.dot_dimension_numbers<[1], [0], [0], [1], [0, 0, 1, 1], [], []>} : vector<32x48xf32>, vector<48x56xf32>, vector<32x56xf32> -> vector<32x56xf32>
      %cst_16 = arith.constant dense<0.000000e+00> : vector<32x56xf32>
      %28 = tpu.matmul %3, %25, %cst_16 {dimension_numbers = #tpu.dot_dimension_numbers<[1], [0], [0], [1], [0, 0, 1, 1], [], []>} : vector<32x48xf32>, vector<48x56xf32>, vector<32x56xf32> -> vector<32x56xf32>
      %29 = arith.addf %27, %28 : vector<32x56xf32>
      %cst_17 = arith.constant dense<0.000000e+00> : vector<32x56xf32>
      %30 = tpu.matmul %5, %24, %cst_17 {dimension_numbers = #tpu.dot_dimension_numbers<[1], [0], [0], [1], [0, 0, 1, 1], [], []>} : vector<32x48xf32>, vector<48x56xf32>, vector<32x56xf32> -> vector<32x56xf32>
      %31 = arith.addf %29, %30 : vector<32x56xf32>
      %cst_18 = arith.constant dense<0.000000e+00> : vector<32x56xf32>
      %32 = tpu.matmul %1, %25, %cst_18 {dimension_numbers = #tpu.dot_dimension_numbers<[1], [0], [0], [1], [0, 0, 1, 1], [], []>} : vector<32x48xf32>, vector<48x56xf32>, vector<32x56xf32> -> vector<32x56xf32>
      %cst_19 = arith.constant dense<0.000000e+00> : vector<32x56xf32>
      %33 = tpu.matmul %3, %24, %cst_19 {dimension_numbers = #tpu.dot_dimension_numbers<[1], [0], [0], [1], [0, 0, 1, 1], [], []>} : vector<32x48xf32>, vector<48x56xf32>, vector<32x56xf32> -> vector<32x56xf32>
      %34 = arith.addf %32, %33 : vector<32x56xf32>
      %cst_20 = arith.constant dense<0.000000e+00> : vector<32x56xf32>
      %35 = tpu.matmul %5, %26, %cst_20 {dimension_numbers = #tpu.dot_dimension_numbers<[1], [0], [0], [1], [0, 0, 1, 1], [], []>} : vector<32x48xf32>, vector<48x56xf32>, vector<32x56xf32> -> vector<32x56xf32>
      %36 = arith.addf %34, %35 : vector<32x56xf32>
      %37 = arith.mulf %31, %8 : vector<32x56xf32>
      %38 = arith.addf %37, %11 : vector<32x56xf32>
      %cst_21 = arith.constant 0.000000e+00 : f32
      %39 = vector.broadcast %cst_21 : f32 to vector<32x56xf32>
      %40 = arith.maximumf %38, %39 : vector<32x56xf32>
      %41 = arith.mulf %36, %8 : vector<32x56xf32>
      %42 = arith.addf %41, %11 : vector<32x56xf32>
      %cst_22 = arith.constant 0.000000e+00 : f32
      %43 = vector.broadcast %cst_22 : f32 to vector<32x56xf32>
      %44 = arith.maximumf %42, %43 : vector<32x56xf32>
      %45 = arith.maximumf %40, %44 : vector<32x56xf32>
      %c2_i32_23 = arith.constant 2 : i32
      %46 = arith.muli %c2_i32_23, %arg7 : i32
      %c16_i32_24 = arith.constant 16 : i32
      %47 = arith.muli %46, %c16_i32_24 : i32
      %c16_i32_25 = arith.constant 16 : i32
      %48 = arith.addi %47, %c16_i32_25 : i32
      %49 = tpu.assume_multiple %48, 16 : i32
      %c0_26 = arith.constant 0 : index
      %50 = arith.index_cast %49 : i32 to index
      %c0_27 = arith.constant 0 : index
      %51 = vector.load %arg1[%c0_26, %50, %c0_27] : memref<1x1824x57xf32, #tpu.memory_space<vmem>>, vector<1x48x57xf32>
      %52 = vector.shape_cast %51 : vector<1x48x57xf32> to vector<48x57xf32>
      %c0_28 = arith.constant 0 : index
      %53 = arith.index_cast %49 : i32 to index
      %c0_29 = arith.constant 0 : index
      %54 = vector.load %arg2[%c0_28, %53, %c0_29] : memref<1x1824x57xf32, #tpu.memory_space<vmem>>, vector<1x48x57xf32>
      %55 = vector.shape_cast %54 : vector<1x48x57xf32> to vector<48x57xf32>
      %56 = vector.extract_strided_slice %52 {offsets = [0, 0], sizes = [48, 56], strides = [1, 1]} : vector<48x57xf32> to vector<48x56xf32>
      %57 = vector.extract_strided_slice %52 {offsets = [0, 1], sizes = [48, 56], strides = [1, 1]} : vector<48x57xf32> to vector<48x56xf32>
      %58 = vector.extract_strided_slice %55 {offsets = [0, 0], sizes = [48, 56], strides = [1, 1]} : vector<48x57xf32> to vector<48x56xf32>
      %59 = vector.extract_strided_slice %55 {offsets = [0, 1], sizes = [48, 56], strides = [1, 1]} : vector<48x57xf32> to vector<48x56xf32>
      %cst_30 = arith.constant dense<0.000000e+00> : vector<32x56xf32>
      %60 = tpu.matmul %1, %56, %cst_30 {dimension_numbers = #tpu.dot_dimension_numbers<[1], [0], [0], [1], [0, 0, 1, 1], [], []>} : vector<32x48xf32>, vector<48x56xf32>, vector<32x56xf32> -> vector<32x56xf32>
      %cst_31 = arith.constant dense<0.000000e+00> : vector<32x56xf32>
      %61 = tpu.matmul %3, %58, %cst_31 {dimension_numbers = #tpu.dot_dimension_numbers<[1], [0], [0], [1], [0, 0, 1, 1], [], []>} : vector<32x48xf32>, vector<48x56xf32>, vector<32x56xf32> -> vector<32x56xf32>
      %62 = arith.addf %60, %61 : vector<32x56xf32>
      %cst_32 = arith.constant dense<0.000000e+00> : vector<32x56xf32>
      %63 = tpu.matmul %5, %57, %cst_32 {dimension_numbers = #tpu.dot_dimension_numbers<[1], [0], [0], [1], [0, 0, 1, 1], [], []>} : vector<32x48xf32>, vector<48x56xf32>, vector<32x56xf32> -> vector<32x56xf32>
      %64 = arith.addf %62, %63 : vector<32x56xf32>
      %cst_33 = arith.constant dense<0.000000e+00> : vector<32x56xf32>
      %65 = tpu.matmul %1, %58, %cst_33 {dimension_numbers = #tpu.dot_dimension_numbers<[1], [0], [0], [1], [0, 0, 1, 1], [], []>} : vector<32x48xf32>, vector<48x56xf32>, vector<32x56xf32> -> vector<32x56xf32>
      %cst_34 = arith.constant dense<0.000000e+00> : vector<32x56xf32>
      %66 = tpu.matmul %3, %57, %cst_34 {dimension_numbers = #tpu.dot_dimension_numbers<[1], [0], [0], [1], [0, 0, 1, 1], [], []>} : vector<32x48xf32>, vector<48x56xf32>, vector<32x56xf32> -> vector<32x56xf32>
      %67 = arith.addf %65, %66 : vector<32x56xf32>
      %cst_35 = arith.constant dense<0.000000e+00> : vector<32x56xf32>
      %68 = tpu.matmul %5, %59, %cst_35 {dimension_numbers = #tpu.dot_dimension_numbers<[1], [0], [0], [1], [0, 0, 1, 1], [], []>} : vector<32x48xf32>, vector<48x56xf32>, vector<32x56xf32> -> vector<32x56xf32>
      %69 = arith.addf %67, %68 : vector<32x56xf32>
      %70 = arith.mulf %64, %8 : vector<32x56xf32>
      %71 = arith.addf %70, %11 : vector<32x56xf32>
      %cst_36 = arith.constant 0.000000e+00 : f32
      %72 = vector.broadcast %cst_36 : f32 to vector<32x56xf32>
      %73 = arith.maximumf %71, %72 : vector<32x56xf32>
      %74 = arith.mulf %69, %8 : vector<32x56xf32>
      %75 = arith.addf %74, %11 : vector<32x56xf32>
      %cst_37 = arith.constant 0.000000e+00 : f32
      %76 = vector.broadcast %cst_37 : f32 to vector<32x56xf32>
      %77 = arith.maximumf %75, %76 : vector<32x56xf32>
      %78 = arith.maximumf %73, %77 : vector<32x56xf32>
      %79 = arith.maximumf %45, %78 : vector<32x56xf32>
      %c0_38 = arith.constant 0 : index
      %80 = arith.index_cast %arg7 : i32 to index
      %c0_39 = arith.constant 0 : index
      %c0_40 = arith.constant 0 : index
      %81 = vector.load %arg6[%c0_38, %80, %c0_39, %c0_40] : memref<1x56x32x56xf32, #tpu.memory_space<vmem>>, vector<1x1x32x56xf32>
      %82 = vector.shape_cast %81 : vector<1x1x32x56xf32> to vector<32x56xf32>
      %83 = vector.shape_cast %79 : vector<32x56xf32> to vector<1x1x32x56xf32>
      tpu.vector_store %arg6[%c0_38, %80, %c0_39, %c0_40], %83 {strides = array<i32>} : memref<1x56x32x56xf32, #tpu.memory_space<vmem>>, vector<1x1x32x56xf32>,
    }
    %c56_i32_10 = arith.constant 56 : i32
    return
  }
  func.func @transform_0(%arg0: i32) -> (i32, i32, i32) {
    %c0_i32 = arith.constant 0 : i32
    %c0_i32_0 = arith.constant 0 : i32
    %c0_i32_1 = arith.constant 0 : i32
    return %arg0, %c0_i32, %c0_i32_0 : i32, i32, i32
  }
  func.func @transform_1(%arg0: i32) -> (i32, i32, i32) {
    %c0_i32 = arith.constant 0 : i32
    %c0_i32_0 = arith.constant 0 : i32
    %c0_i32_1 = arith.constant 0 : i32
    return %arg0, %c0_i32, %c0_i32_0 : i32, i32, i32
  }
  func.func @transform_2(%arg0: i32) -> (i32, i32, i32) {
    %c0_i32 = arith.constant 0 : i32
    %c0_i32_0 = arith.constant 0 : i32
    %c0_i32_1 = arith.constant 0 : i32
    %c0_i32_2 = arith.constant 0 : i32
    return %c0_i32, %c0_i32_0, %c0_i32_1 : i32, i32, i32
  }
  func.func @transform_3(%arg0: i32) -> (i32, i32) {
    %c0_i32 = arith.constant 0 : i32
    %c0_i32_0 = arith.constant 0 : i32
    %c0_i32_1 = arith.constant 0 : i32
    return %c0_i32, %c0_i32_0 : i32, i32
  }
  func.func @transform_4(%arg0: i32) -> (i32, i32) {
    %c0_i32 = arith.constant 0 : i32
    %c0_i32_0 = arith.constant 0 : i32
    %c0_i32_1 = arith.constant 0 : i32
    return %c0_i32, %c0_i32_0 : i32, i32
  }
  func.func @transform_5(%arg0: i32) -> (i32, i32, i32, i32) {
    %c0_i32 = arith.constant 0 : i32
    %c0_i32_0 = arith.constant 0 : i32
    %c0_i32_1 = arith.constant 0 : i32
    %c0_i32_2 = arith.constant 0 : i32
    return %arg0, %c0_i32, %c0_i32_0, %c0_i32_1 : i32, i32, i32, i32
  }
}

module attributes {stable_mosaic.version = 11 : i64} {
  func.func @_conv_bn_relu_pool_kernel(%arg0: i32, %arg1: memref<1x1856x29xf32, #tpu.memory_space<vmem>>, %arg2: memref<1x1856x29xf32, #tpu.memory_space<vmem>>, %arg3: memref<3x64x96xf32, #tpu.memory_space<vmem>>, %arg4: memref<64x1xf32, #tpu.memory_space<vmem>>, %arg5: memref<64x1xf32, #tpu.memory_space<vmem>>, %arg6: memref<1x28x64x28xf32, #tpu.memory_space<vmem>>) attributes {dimension_semantics = [#tpu.dimension_semantics<parallel>], iteration_bounds = array<i64: 2>, scalar_prefetch = 0 : i64, scratch_operands = 0 : i64, tpu.core_type = #tpu.core_type<tc>, window_params = [{transform_indices = @transform_0, window_bounds = array<i64: 1, 1856, 29>}, {transform_indices = @transform_1, window_bounds = array<i64: 1, 1856, 29>}, {pipeline_mode = #tpu.pipeline_mode<synchronous>, transform_indices = @transform_2, window_bounds = array<i64: 3, 64, 96>}, {pipeline_mode = #tpu.pipeline_mode<synchronous>, transform_indices = @transform_3, window_bounds = array<i64: 64, 1>}, {pipeline_mode = #tpu.pipeline_mode<synchronous>, transform_indices = @transform_4, window_bounds = array<i64: 64, 1>}, {transform_indices = @transform_5, window_bounds = array<i64: 1, 28, 64, 28>}]} {
    %c0 = arith.constant 0 : index
    %c0_0 = arith.constant 0 : index
    %c0_1 = arith.constant 0 : index
    %0 = vector.load %arg3[%c0, %c0_0, %c0_1] : memref<3x64x96xf32, #tpu.memory_space<vmem>>, vector<1x64x96xf32>
    %1 = vector.shape_cast %0 : vector<1x64x96xf32> to vector<64x96xf32>
    %c1 = arith.constant 1 : index
    %c0_2 = arith.constant 0 : index
    %c0_3 = arith.constant 0 : index
    %2 = vector.load %arg3[%c1, %c0_2, %c0_3] : memref<3x64x96xf32, #tpu.memory_space<vmem>>, vector<1x64x96xf32>
    %3 = vector.shape_cast %2 : vector<1x64x96xf32> to vector<64x96xf32>
    %c2 = arith.constant 2 : index
    %c0_4 = arith.constant 0 : index
    %c0_5 = arith.constant 0 : index
    %4 = vector.load %arg3[%c2, %c0_4, %c0_5] : memref<3x64x96xf32, #tpu.memory_space<vmem>>, vector<1x64x96xf32>
    %5 = vector.shape_cast %4 : vector<1x64x96xf32> to vector<64x96xf32>
    %c0_6 = arith.constant 0 : index
    %c0_7 = arith.constant 0 : index
    %6 = vector.load %arg4[%c0_6, %c0_7] : memref<64x1xf32, #tpu.memory_space<vmem>>, vector<64x1xf32>
    %7 = vector.shape_cast %6 : vector<64x1xf32> to vector<64x1xf32>
    %8 = vector.broadcast %7 : vector<64x1xf32> to vector<64x28xf32>
    %c0_8 = arith.constant 0 : index
    %c0_9 = arith.constant 0 : index
    %9 = vector.load %arg5[%c0_8, %c0_9] : memref<64x1xf32, #tpu.memory_space<vmem>>, vector<64x1xf32>
    %10 = vector.shape_cast %9 : vector<64x1xf32> to vector<64x1xf32>
    %11 = vector.broadcast %10 : vector<64x1xf32> to vector<64x28xf32>
    %c0_i32 = arith.constant 0 : i32
    %c28_i32 = arith.constant 28 : i32
    %12 = arith.addi %c0_i32, %c28_i32 : i32
    %c1_i32 = arith.constant 1 : i32
    scf.for %arg7 = %c0_i32 to %12 step %c1_i32  : i32 {
      %c2_i32 = arith.constant 2 : i32
      %13 = arith.muli %c2_i32, %arg7 : i32
      %c32_i32 = arith.constant 32 : i32
      %14 = arith.muli %13, %c32_i32 : i32
      %c0_i32_11 = arith.constant 0 : i32
      %15 = arith.addi %14, %c0_i32_11 : i32
      %16 = tpu.assume_multiple %15, 32 : i32
      %c0_12 = arith.constant 0 : index
      %17 = arith.index_cast %16 : i32 to index
      %c0_13 = arith.constant 0 : index
      %18 = vector.load %arg1[%c0_12, %17, %c0_13] : memref<1x1856x29xf32, #tpu.memory_space<vmem>>, vector<1x96x29xf32>
      %19 = vector.shape_cast %18 : vector<1x96x29xf32> to vector<96x29xf32>
      %c0_14 = arith.constant 0 : index
      %20 = arith.index_cast %16 : i32 to index
      %c0_15 = arith.constant 0 : index
      %21 = vector.load %arg2[%c0_14, %20, %c0_15] : memref<1x1856x29xf32, #tpu.memory_space<vmem>>, vector<1x96x29xf32>
      %22 = vector.shape_cast %21 : vector<1x96x29xf32> to vector<96x29xf32>
      %23 = vector.extract_strided_slice %19 {offsets = [0, 0], sizes = [96, 28], strides = [1, 1]} : vector<96x29xf32> to vector<96x28xf32>
      %24 = vector.extract_strided_slice %19 {offsets = [0, 1], sizes = [96, 28], strides = [1, 1]} : vector<96x29xf32> to vector<96x28xf32>
      %25 = vector.extract_strided_slice %22 {offsets = [0, 0], sizes = [96, 28], strides = [1, 1]} : vector<96x29xf32> to vector<96x28xf32>
      %26 = vector.extract_strided_slice %22 {offsets = [0, 1], sizes = [96, 28], strides = [1, 1]} : vector<96x29xf32> to vector<96x28xf32>
      %cst = arith.constant dense<0.000000e+00> : vector<64x28xf32>
      %27 = tpu.matmul %1, %23, %cst {dimension_numbers = #tpu.dot_dimension_numbers<[1], [0], [0], [1], [0, 0, 1, 1], [], []>} : vector<64x96xf32>, vector<96x28xf32>, vector<64x28xf32> -> vector<64x28xf32>
      %cst_16 = arith.constant dense<0.000000e+00> : vector<64x28xf32>
      %28 = tpu.matmul %3, %25, %cst_16 {dimension_numbers = #tpu.dot_dimension_numbers<[1], [0], [0], [1], [0, 0, 1, 1], [], []>} : vector<64x96xf32>, vector<96x28xf32>, vector<64x28xf32> -> vector<64x28xf32>
      %29 = arith.addf %27, %28 : vector<64x28xf32>
      %cst_17 = arith.constant dense<0.000000e+00> : vector<64x28xf32>
      %30 = tpu.matmul %5, %24, %cst_17 {dimension_numbers = #tpu.dot_dimension_numbers<[1], [0], [0], [1], [0, 0, 1, 1], [], []>} : vector<64x96xf32>, vector<96x28xf32>, vector<64x28xf32> -> vector<64x28xf32>
      %31 = arith.addf %29, %30 : vector<64x28xf32>
      %cst_18 = arith.constant dense<0.000000e+00> : vector<64x28xf32>
      %32 = tpu.matmul %1, %25, %cst_18 {dimension_numbers = #tpu.dot_dimension_numbers<[1], [0], [0], [1], [0, 0, 1, 1], [], []>} : vector<64x96xf32>, vector<96x28xf32>, vector<64x28xf32> -> vector<64x28xf32>
      %cst_19 = arith.constant dense<0.000000e+00> : vector<64x28xf32>
      %33 = tpu.matmul %3, %24, %cst_19 {dimension_numbers = #tpu.dot_dimension_numbers<[1], [0], [0], [1], [0, 0, 1, 1], [], []>} : vector<64x96xf32>, vector<96x28xf32>, vector<64x28xf32> -> vector<64x28xf32>
      %34 = arith.addf %32, %33 : vector<64x28xf32>
      %cst_20 = arith.constant dense<0.000000e+00> : vector<64x28xf32>
      %35 = tpu.matmul %5, %26, %cst_20 {dimension_numbers = #tpu.dot_dimension_numbers<[1], [0], [0], [1], [0, 0, 1, 1], [], []>} : vector<64x96xf32>, vector<96x28xf32>, vector<64x28xf32> -> vector<64x28xf32>
      %36 = arith.addf %34, %35 : vector<64x28xf32>
      %37 = arith.mulf %31, %8 : vector<64x28xf32>
      %38 = arith.addf %37, %11 : vector<64x28xf32>
      %cst_21 = arith.constant 0.000000e+00 : f32
      %39 = vector.broadcast %cst_21 : f32 to vector<64x28xf32>
      %40 = arith.maximumf %38, %39 : vector<64x28xf32>
      %41 = arith.mulf %36, %8 : vector<64x28xf32>
      %42 = arith.addf %41, %11 : vector<64x28xf32>
      %cst_22 = arith.constant 0.000000e+00 : f32
      %43 = vector.broadcast %cst_22 : f32 to vector<64x28xf32>
      %44 = arith.maximumf %42, %43 : vector<64x28xf32>
      %45 = arith.maximumf %40, %44 : vector<64x28xf32>
      %c2_i32_23 = arith.constant 2 : i32
      %46 = arith.muli %c2_i32_23, %arg7 : i32
      %c32_i32_24 = arith.constant 32 : i32
      %47 = arith.muli %46, %c32_i32_24 : i32
      %c32_i32_25 = arith.constant 32 : i32
      %48 = arith.addi %47, %c32_i32_25 : i32
      %49 = tpu.assume_multiple %48, 32 : i32
      %c0_26 = arith.constant 0 : index
      %50 = arith.index_cast %49 : i32 to index
      %c0_27 = arith.constant 0 : index
      %51 = vector.load %arg1[%c0_26, %50, %c0_27] : memref<1x1856x29xf32, #tpu.memory_space<vmem>>, vector<1x96x29xf32>
      %52 = vector.shape_cast %51 : vector<1x96x29xf32> to vector<96x29xf32>
      %c0_28 = arith.constant 0 : index
      %53 = arith.index_cast %49 : i32 to index
      %c0_29 = arith.constant 0 : index
      %54 = vector.load %arg2[%c0_28, %53, %c0_29] : memref<1x1856x29xf32, #tpu.memory_space<vmem>>, vector<1x96x29xf32>
      %55 = vector.shape_cast %54 : vector<1x96x29xf32> to vector<96x29xf32>
      %56 = vector.extract_strided_slice %52 {offsets = [0, 0], sizes = [96, 28], strides = [1, 1]} : vector<96x29xf32> to vector<96x28xf32>
      %57 = vector.extract_strided_slice %52 {offsets = [0, 1], sizes = [96, 28], strides = [1, 1]} : vector<96x29xf32> to vector<96x28xf32>
      %58 = vector.extract_strided_slice %55 {offsets = [0, 0], sizes = [96, 28], strides = [1, 1]} : vector<96x29xf32> to vector<96x28xf32>
      %59 = vector.extract_strided_slice %55 {offsets = [0, 1], sizes = [96, 28], strides = [1, 1]} : vector<96x29xf32> to vector<96x28xf32>
      %cst_30 = arith.constant dense<0.000000e+00> : vector<64x28xf32>
      %60 = tpu.matmul %1, %56, %cst_30 {dimension_numbers = #tpu.dot_dimension_numbers<[1], [0], [0], [1], [0, 0, 1, 1], [], []>} : vector<64x96xf32>, vector<96x28xf32>, vector<64x28xf32> -> vector<64x28xf32>
      %cst_31 = arith.constant dense<0.000000e+00> : vector<64x28xf32>
      %61 = tpu.matmul %3, %58, %cst_31 {dimension_numbers = #tpu.dot_dimension_numbers<[1], [0], [0], [1], [0, 0, 1, 1], [], []>} : vector<64x96xf32>, vector<96x28xf32>, vector<64x28xf32> -> vector<64x28xf32>
      %62 = arith.addf %60, %61 : vector<64x28xf32>
      %cst_32 = arith.constant dense<0.000000e+00> : vector<64x28xf32>
      %63 = tpu.matmul %5, %57, %cst_32 {dimension_numbers = #tpu.dot_dimension_numbers<[1], [0], [0], [1], [0, 0, 1, 1], [], []>} : vector<64x96xf32>, vector<96x28xf32>, vector<64x28xf32> -> vector<64x28xf32>
      %64 = arith.addf %62, %63 : vector<64x28xf32>
      %cst_33 = arith.constant dense<0.000000e+00> : vector<64x28xf32>
      %65 = tpu.matmul %1, %58, %cst_33 {dimension_numbers = #tpu.dot_dimension_numbers<[1], [0], [0], [1], [0, 0, 1, 1], [], []>} : vector<64x96xf32>, vector<96x28xf32>, vector<64x28xf32> -> vector<64x28xf32>
      %cst_34 = arith.constant dense<0.000000e+00> : vector<64x28xf32>
      %66 = tpu.matmul %3, %57, %cst_34 {dimension_numbers = #tpu.dot_dimension_numbers<[1], [0], [0], [1], [0, 0, 1, 1], [], []>} : vector<64x96xf32>, vector<96x28xf32>, vector<64x28xf32> -> vector<64x28xf32>
      %67 = arith.addf %65, %66 : vector<64x28xf32>
      %cst_35 = arith.constant dense<0.000000e+00> : vector<64x28xf32>
      %68 = tpu.matmul %5, %59, %cst_35 {dimension_numbers = #tpu.dot_dimension_numbers<[1], [0], [0], [1], [0, 0, 1, 1], [], []>} : vector<64x96xf32>, vector<96x28xf32>, vector<64x28xf32> -> vector<64x28xf32>
      %69 = arith.addf %67, %68 : vector<64x28xf32>
      %70 = arith.mulf %64, %8 : vector<64x28xf32>
      %71 = arith.addf %70, %11 : vector<64x28xf32>
      %cst_36 = arith.constant 0.000000e+00 : f32
      %72 = vector.broadcast %cst_36 : f32 to vector<64x28xf32>
      %73 = arith.maximumf %71, %72 : vector<64x28xf32>
      %74 = arith.mulf %69, %8 : vector<64x28xf32>
      %75 = arith.addf %74, %11 : vector<64x28xf32>
      %cst_37 = arith.constant 0.000000e+00 : f32
      %76 = vector.broadcast %cst_37 : f32 to vector<64x28xf32>
      %77 = arith.maximumf %75, %76 : vector<64x28xf32>
      %78 = arith.maximumf %73, %77 : vector<64x28xf32>
      %79 = arith.maximumf %45, %78 : vector<64x28xf32>
      %c0_38 = arith.constant 0 : index
      %80 = arith.index_cast %arg7 : i32 to index
      %c0_39 = arith.constant 0 : index
      %c0_40 = arith.constant 0 : index
      %81 = vector.load %arg6[%c0_38, %80, %c0_39, %c0_40] : memref<1x28x64x28xf32, #tpu.memory_space<vmem>>, vector<1x1x64x28xf32>
      %82 = vector.shape_cast %81 : vector<1x1x64x28xf32> to vector<64x28xf32>
      %83 = vector.shape_cast %79 : vector<64x28xf32> to vector<1x1x64x28xf32>
      tpu.vector_store %arg6[%c0_38, %80, %c0_39, %c0_40], %83 {strides = array<i32>} : memref<1x28x64x28xf32, #tpu.memory_space<vmem>>, vector<1x1x64x28xf32>,
    }
    %c28_i32_10 = arith.constant 28 : i32
    return
  }
  func.func @transform_0(%arg0: i32) -> (i32, i32, i32) {
    %c0_i32 = arith.constant 0 : i32
    %c0_i32_0 = arith.constant 0 : i32
    %c0_i32_1 = arith.constant 0 : i32
    return %arg0, %c0_i32, %c0_i32_0 : i32, i32, i32
  }
  func.func @transform_1(%arg0: i32) -> (i32, i32, i32) {
    %c0_i32 = arith.constant 0 : i32
    %c0_i32_0 = arith.constant 0 : i32
    %c0_i32_1 = arith.constant 0 : i32
    return %arg0, %c0_i32, %c0_i32_0 : i32, i32, i32
  }
  func.func @transform_2(%arg0: i32) -> (i32, i32, i32) {
    %c0_i32 = arith.constant 0 : i32
    %c0_i32_0 = arith.constant 0 : i32
    %c0_i32_1 = arith.constant 0 : i32
    %c0_i32_2 = arith.constant 0 : i32
    return %c0_i32, %c0_i32_0, %c0_i32_1 : i32, i32, i32
  }
  func.func @transform_3(%arg0: i32) -> (i32, i32) {
    %c0_i32 = arith.constant 0 : i32
    %c0_i32_0 = arith.constant 0 : i32
    %c0_i32_1 = arith.constant 0 : i32
    return %c0_i32, %c0_i32_0 : i32, i32
  }
  func.func @transform_4(%arg0: i32) -> (i32, i32) {
    %c0_i32 = arith.constant 0 : i32
    %c0_i32_0 = arith.constant 0 : i32
    %c0_i32_1 = arith.constant 0 : i32
    return %c0_i32, %c0_i32_0 : i32, i32
  }
  func.func @transform_5(%arg0: i32) -> (i32, i32, i32, i32) {
    %c0_i32 = arith.constant 0 : i32
    %c0_i32_0 = arith.constant 0 : i32
    %c0_i32_1 = arith.constant 0 : i32
    %c0_i32_2 = arith.constant 0 : i32
    return %arg0, %c0_i32, %c0_i32_0, %c0_i32_1 : i32, i32, i32, i32
  }
}

module attributes {stable_mosaic.version = 11 : i64} {
  func.func @_fc_head_kernel(%arg0: i32, %arg1: memref<2x7168xf32, #tpu.memory_space<vmem>>, %arg2: memref<7168x128xf32, #tpu.memory_space<vmem>>, %arg3: memref<1x128xf32, #tpu.memory_space<vmem>>, %arg4: memref<128x1xf32, #tpu.memory_space<vmem>>, %arg5: memref<1x1xf32, #tpu.memory_space<vmem>>, %arg6: memref<2x1xf32, #tpu.memory_space<vmem>>, %arg7: memref<2x128xf32, #tpu.memory_space<vmem>>) attributes {dimension_semantics = [#tpu.dimension_semantics<arbitrary>], iteration_bounds = array<i64: 7>, scalar_prefetch = 0 : i64, scratch_operands = 1 : i64, tpu.core_type = #tpu.core_type<tc>, window_params = [{transform_indices = @transform_0, window_bounds = array<i64: 2, 7168>}, {transform_indices = @transform_1, window_bounds = array<i64: 7168, 128>}, {pipeline_mode = #tpu.pipeline_mode<synchronous>, transform_indices = @transform_2, window_bounds = array<i64: 1, 128>}, {pipeline_mode = #tpu.pipeline_mode<synchronous>, transform_indices = @transform_3, window_bounds = array<i64: 128, 1>}, {pipeline_mode = #tpu.pipeline_mode<synchronous>, transform_indices = @transform_4, window_bounds = array<i64: 1, 1>}, {pipeline_mode = #tpu.pipeline_mode<synchronous>, transform_indices = @transform_5, window_bounds = array<i64: 2, 1>}]} {
    %c0_i32 = arith.constant 0 : i32
    %0 = arith.cmpi eq, %arg0, %c0_i32 : i32
    %1 = arith.extui %0 : i1 to i32
    %c0_i32_0 = arith.constant 0 : i32
    %2 = arith.cmpi ne, %1, %c0_i32_0 : i32
    scf.if %2 {
      %cst_9 = arith.constant 0.000000e+00 : f32
      %12 = vector.broadcast %cst_9 : f32 to vector<2x128xf32>
      %c0_10 = arith.constant 0 : index
      %c0_11 = arith.constant 0 : index
      %13 = vector.load %arg7[%c0_10, %c0_11] : memref<2x128xf32, #tpu.memory_space<vmem>>, vector<2x128xf32>
      tpu.vector_store %arg7[%c0_10, %c0_11], %12 {strides = array<i32>} : memref<2x128xf32, #tpu.memory_space<vmem>>, vector<2x128xf32>,
    } else {
    }
    %c0 = arith.constant 0 : index
    %c0_1 = arith.constant 0 : index
    %3 = vector.load %arg7[%c0, %c0_1] : memref<2x128xf32, #tpu.memory_space<vmem>>, vector<2x128xf32>
    %c0_2 = arith.constant 0 : index
    %c0_3 = arith.constant 0 : index
    %4 = vector.load %arg1[%c0_2, %c0_3] : memref<2x7168xf32, #tpu.memory_space<vmem>>, vector<2x7168xf32>
    %c0_4 = arith.constant 0 : index
    %c0_5 = arith.constant 0 : index
    %5 = vector.load %arg2[%c0_4, %c0_5] : memref<7168x128xf32, #tpu.memory_space<vmem>>, vector<7168x128xf32>
    %cst = arith.constant dense<0.000000e+00> : vector<2x128xf32>
    %6 = tpu.matmul %4, %5, %cst {dimension_numbers = #tpu.dot_dimension_numbers<[1], [0], [0], [1], [0, 0, 1, 1], [], []>} : vector<2x7168xf32>, vector<7168x128xf32>, vector<2x128xf32> -> vector<2x128xf32>
    %7 = arith.addf %3, %6 : vector<2x128xf32>
    %c0_6 = arith.constant 0 : index
    %c0_7 = arith.constant 0 : index
    %8 = vector.load %arg7[%c0_6, %c0_7] : memref<2x128xf32, #tpu.memory_space<vmem>>, vector<2x128xf32>
    tpu.vector_store %arg7[%c0_6, %c0_7], %7 {strides = array<i32>} : memref<2x128xf32, #tpu.memory_space<vmem>>, vector<2x128xf32>,
    %c6_i32 = arith.constant 6 : i32
    %9 = arith.cmpi eq, %arg0, %c6_i32 : i32
    %10 = arith.extui %9 : i1 to i32
    %c0_i32_8 = arith.constant 0 : i32
    %11 = arith.cmpi ne, %10, %c0_i32_8 : i32
    scf.if %11 {
      %c0_9 = arith.constant 0 : index
      %c0_10 = arith.constant 0 : index
      %12 = vector.load %arg7[%c0_9, %c0_10] : memref<2x128xf32, #tpu.memory_space<vmem>>, vector<2x128xf32>
      %c0_11 = arith.constant 0 : index
      %c0_12 = arith.constant 0 : index
      %13 = vector.load %arg3[%c0_11, %c0_12] : memref<1x128xf32, #tpu.memory_space<vmem>>, vector<1x128xf32>
      %14 = vector.broadcast %13 : vector<1x128xf32> to vector<2x128xf32>
      %15 = arith.addf %12, %14 : vector<2x128xf32>
      %cst_13 = arith.constant 0.000000e+00 : f32
      %16 = vector.broadcast %cst_13 : f32 to vector<2x128xf32>
      %17 = arith.maximumf %15, %16 : vector<2x128xf32>
      %c0_14 = arith.constant 0 : index
      %c0_15 = arith.constant 0 : index
      %18 = vector.load %arg4[%c0_14, %c0_15] : memref<128x1xf32, #tpu.memory_space<vmem>>, vector<128x1xf32>
      %cst_16 = arith.constant dense<0.000000e+00> : vector<2x1xf32>
      %19 = tpu.matmul %17, %18, %cst_16 {dimension_numbers = #tpu.dot_dimension_numbers<[1], [0], [0], [1], [0, 0, 1, 1], [], []>} : vector<2x128xf32>, vector<128x1xf32>, vector<2x1xf32> -> vector<2x1xf32>
      %c0_17 = arith.constant 0 : index
      %c0_18 = arith.constant 0 : index
      %20 = vector.load %arg5[%c0_17, %c0_18] : memref<1x1xf32, #tpu.memory_space<vmem>>, vector<1x1xf32>
      %21 = vector.broadcast %20 : vector<1x1xf32> to vector<2x1xf32>
      %22 = arith.addf %19, %21 : vector<2x1xf32>
      %cst_19 = arith.constant 0.000000e+00 : f32
      %23 = vector.broadcast %cst_19 : f32 to vector<2x1xf32>
      %24 = arith.subf %23, %22 : vector<2x1xf32>
      %25 = math.exp %24 : vector<2x1xf32>
      %cst_20 = arith.constant 1.000000e+00 : f32
      %26 = vector.broadcast %cst_20 : f32 to vector<2x1xf32>
      %27 = arith.addf %26, %25 : vector<2x1xf32>
      %cst_21 = arith.constant 1.000000e+00 : f32
      %28 = vector.broadcast %cst_21 : f32 to vector<2x1xf32>
      %29 = arith.divf %28, %27 : vector<2x1xf32>
      %c0_22 = arith.constant 0 : index
      %c0_23 = arith.constant 0 : index
      %30 = vector.load %arg6[%c0_22, %c0_23] : memref<2x1xf32, #tpu.memory_space<vmem>>, vector<2x1xf32>
      tpu.vector_store %arg6[%c0_22, %c0_23], %29 {strides = array<i32>} : memref<2x1xf32, #tpu.memory_space<vmem>>, vector<2x1xf32>,
    } else {
    }
    return
  }
  func.func @transform_0(%arg0: i32) -> (i32, i32) {
    %c0_i32 = arith.constant 0 : i32
    %c0_i32_0 = arith.constant 0 : i32
    return %c0_i32, %arg0 : i32, i32
  }
  func.func @transform_1(%arg0: i32) -> (i32, i32) {
    %c0_i32 = arith.constant 0 : i32
    %c0_i32_0 = arith.constant 0 : i32
    return %arg0, %c0_i32 : i32, i32
  }
  func.func @transform_2(%arg0: i32) -> (i32, i32) {
    %c0_i32 = arith.constant 0 : i32
    %c0_i32_0 = arith.constant 0 : i32
    %c0_i32_1 = arith.constant 0 : i32
    return %c0_i32, %c0_i32_0 : i32, i32
  }
  func.func @transform_3(%arg0: i32) -> (i32, i32) {
    %c0_i32 = arith.constant 0 : i32
    %c0_i32_0 = arith.constant 0 : i32
    %c0_i32_1 = arith.constant 0 : i32
    return %c0_i32, %c0_i32_0 : i32, i32
  }
  func.func @transform_4(%arg0: i32) -> (i32, i32) {
    %c0_i32 = arith.constant 0 : i32
    %c0_i32_0 = arith.constant 0 : i32
    %c0_i32_1 = arith.constant 0 : i32
    return %c0_i32, %c0_i32_0 : i32, i32
  }
  func.func @transform_5(%arg0: i32) -> (i32, i32) {
    %c0_i32 = arith.constant 0 : i32
    %c0_i32_0 = arith.constant 0 : i32
    %c0_i32_1 = arith.constant 0 : i32
    return %c0_i32, %c0_i32_0 : i32, i32
  }
}

</mosaic_0001>

<bundles_post_ra>
// kernel: bird_drone_cnn_forward.4
= control target key start
LH: loop header
LB: loop body
LE: loop exit
PB: predicated region body
PF: predicated region fallthrough
CT: control target
= control target key end

     0   :  { %s1679_s18 = smov 0   ;;  %s1901_s0 = inlined_call_operand.vmem [shape: f32[2,1808,113], index: 0, kind: input, shape index: {}]   ;;  %s1902_s1 = inlined_call_operand.vmem [shape: f32[2,1808,113], index: 1, kind: input, shape index: {}]   ;;  %s1903_s2 = inlined_call_operand.vmem [shape: f32[3,16,24], index: 2, kind: input, shape index: {}]   ;;  %s1904_s3 = inlined_call_operand.vmem [shape: f32[16,1], index: 3, kind: input, shape index: {}]   ;;  %s1905_s4 = inlined_call_operand.vmem [shape: f32[16,1], index: 4, kind: input, shape index: {}]   ;;  %s1906_s5 = inlined_call_operand.vmem [shape: f32[2,112,16,112], index: 5, kind: output, shape index: {}]  }
   0x1 LB: > { %s1394_s19 = sadd.s32 4294967295, %s1641_s18   ;;  %p1398_p0 = scmp.ge.s32.totalorder %s1641_s18, 1  ;;  %s1641_s18 = sphi %s1679_s18, %s15_s18  }
   0x2   : > { %p197_p1 = scmp.lt.s32.totalorder %s1641_s18, 3 }
   0x4   : > { %p198_p2 = pnand %p1398_p0, %p197_p1 }
   0x5   : > { %p230_p3 = scmp.lt.s32.totalorder (!%p198_p2), %s1394_s19, 1 }
   0x6   : > { %201 = sbr.rel (%p198_p2) target bundleno = 509 (0x1fd), region = 40 }
   0xb   : > { %v265_v0 = vld [vmem:[%s1905_s4] sm:$0xff]  ;;  %v1647_v2 = vmov 0   ;;  %v1701_v4 = vld [vmem:[%s1903_s2 + $0x8] sm:$0xff]  ;;  %s1908_s19 = smov (!%p230_p3, %s1394_s19), 1  ;;  %v1706_v5 = vld [vmem:[%s1903_s2 + $0x10] sm:$0xff] }
   0xc   : > { %v253_v1 = vld [vmem:[%s1904_s3] sm:$0xff]  ;;  %1630 = vset.pattern.permute.xlu1 %v1647_v2  ;;  %1629 = vset.pattern.permute.xlu0 %v1647_v2  ;;  %v1711_v6 = vld [vmem:[%s1903_s2 + $0x18] sm:$0xff]  ;;  %v266_v8 = vld [vmem:[%s1905_s4 + $0x8] sm:$0xff]  ;;  %s1609_s15 = smul.u32 1808, %s1908_s19 }
   0xd   : > { %v1696_v3 = vld [vmem:[%s1903_s2] sm:$0xff]  ;;  %269 = vperm.xlu1 %1630, %v265_v0   ;;  %257 = vperm.xlu0 %1629, %v253_v1   ;;  %v254_v9 = vld [vmem:[%s1904_s3 + $0x8] sm:$0xff]  ;;  %s1610_s16 = smul.u32 1792, %s1908_s19  ;;  %s1752_s19 = smov 0  }
   0xe   : > { %v1716_v7 = vld [vmem:[%s1903_s2 + $0x20] sm:$0xff]  ;;  %v1727_v10 = vld [vmem:[%s1903_s2 + $0x28] sm:$0xff]  ;;  %s1732_s21 = scalar_lea.vmem %s1901_s0, %s1609_s15  ;;  %s1737_s24 = scalar_lea.vmem %s1902_s1, %s1609_s15 }
   0xf   : > { %s1742_s27 = scalar_lea.vmem %s1906_s5, %s1610_s16 }
  0x11   : > { %274 = vperm.xlu1 %1630, %v266_v8   ;;  %262 = vperm.xlu0 %1629, %v254_v9  }
  0x88   : > { %v1744_v11 = vpop.permute.xlu1 %269  ;;  %v1746_v12 = vpop.permute.xlu0 %257 }
  0x8c   : > { %v1748_v13 = vpop.permute.xlu1 %274  ;;  %v1750_v14 = vpop.permute.xlu0 %262 }
  0x8d LB: >> { %vm292_vm0 = vcmask 195584   ;;  %s1762_s28 = sshll.u32 %s1645_s19, 4  ;;  %s1648_s6 = smov 127   ;;  %vm1307_vm1 = vcmask 916480   ;;  %s1645_s19 = sphi %s1752_s19, %s282_s19  }
  0x8e   : >> { %1507 = vmatprep.mubr.msk.f32.mxu0 %vm292_vm0, %v1706_v5  ;;  %1516 = vmatprep.mubr.msk.f32.mxu1 %vm292_vm0, %v1696_v3  ;;  %s284_s29 = scalar_lea.vmem %s1732_s21, %s1762_s28  ;;  %s1768_s30 = scalar_lea.vmem %s1737_s24, %s1762_s28 }
  0x8f   : >> { %v1770_v15 = vld [vmem:[%s284_s29 + $0x10] sm:$0xff]  ;;  %v285_v16 = vld [vmem:[%s284_s29] sm:$0xff]  ;;  %v1778_v18 = vld [vmem:[%s284_s29 + $0x8] sm:$0xff]  ;;  %s1306_s7 = scalar_lea.vmem %s1742_s27, %s1762_s28  ;;  %s282_s19 = sadd.s32 1, %s1645_s19  }
  0x90   : >> { %462 = vrot.lane.b32.xlu0 %v1770_v15, %s1648_s6  ;;  %458 = vrot.lane.b32.xlu1 %v285_v16, %s1648_s6  ;;  %v1776_v17 = vld [vmem:[%s1768_s30 + $0x10] sm:$0xff]  ;;  %v1783_v19 = vld [vmem:[%s1768_s30 + $0x8] sm:$0xff]  ;;  %p279_p4 = scmp.ge.s32.totalorder %s282_s19, 112  }
  0x91   : >> { %1501 = vmatprep.subr.mxu0 %v1776_v17  ;;  %1510 = vmatprep.subr.mxu1 %v1770_v15  ;;  %v289_v20 = vld [vmem:[%s1768_s30] sm:$0xff]  ;;  %v1422_v21 = vld [vmem:[%s284_s29 + $0x18] sm:$0xff] }
  0x92   : >> { %1502 = vmatpush3.msra.mxu0 %v1776_v17  ;;  %1511 = vmatpush3.msra.mxu1 %v1770_v15  ;;  %v1811_v22 = vld [vmem:[%s1768_s30 + $0x18] sm:$0xff] }
  0x93   : >> { %1503 = vmatprep.subr.mxu0 %v1783_v19  ;;  %1512 = vmatprep.subr.mxu1 %v1778_v18 }
  0x94   : >> { %460 = vrot.lane.b32.xlu0 %v1778_v18, %s1648_s6  ;;  %707 = vrot.lane.b32.xlu1 %v1776_v17, %s1648_s6 }
  0x95   : >> { %1504 = vmatpush3.msra.mxu0 %v1783_v19  ;;  %1513 = vmatpush3.msra.mxu1 %v1778_v18 }
  0x96   : >> { %1505 = vmatprep.subr.mxu0 %v289_v20  ;;  %1514 = vmatprep.subr.mxu1 %v285_v16 }
  0x97   : >> { %1506 = vmatpush3.msra.mxu0 %v289_v20  ;;  %1515 = vmatpush3.msra.mxu1 %v285_v16 }
  0x98   : >> { %705 = vrot.lane.b32.xlu0 %v1783_v19, %s1648_s6  ;;  %703 = vrot.lane.b32.xlu1 %v289_v20, %s1648_s6 }
  0x99   : >> { %1508 = vmatmul.mubr.msk.f32.vlgmr.msra.gmra.mxu0 %vm292_vm0, %v1711_v6  ;;  %1517 = vmatmul.mubr.msk.f32.vlgmr.msra.gmra.mxu1 %vm292_vm0, %v1701_v4 }
  0x9a   : >> { %1525 = vmatprep.mubr.msk.f32.mxu0 %vm292_vm0, %v1716_v7  ;;  %1534 = vmatprep.mubr.msk.f32.mxu1 %vm292_vm0, %v1706_v5 }
  0x9c   : >> { %969 = vrot.lane.b32.xlu0 %v1422_v21, %s1648_s6  ;;  %967 = vrot.lane.b32.xlu1 %v1770_v15, %s1648_s6 }
  0xa0   : >> { %965 = vrot.lane.b32.xlu0 %v1778_v18, %s1648_s6  ;;  %1208 = vrot.lane.b32.xlu1 %v1811_v22, %s1648_s6 }
  0xa4   : >> { %1206 = vrot.lane.b32.xlu0 %v1776_v17, %s1648_s6  ;;  %1204 = vrot.lane.b32.xlu1 %v1783_v19, %s1648_s6 }
 0x102   : >> { %v463_v23 = vpop.permute.xlu0 %462  ;;  %v459_v24 = vpop.permute.xlu1 %458 }
 0x103   : >> { %1519 = vmatprep.subr.mxu0 %v463_v23  ;;  %1528 = vmatprep.subr.mxu1 %v463_v23 }
 0x104   : >> { %1520 = vmatpush3.msra.mxu0 %v463_v23  ;;  %1529 = vmatpush3.msra.mxu1 %v463_v23 }
 0x106   : >> { %v461_v25 = vpop.permute.xlu0 %460  ;;  %v708_v26 = vpop.permute.xlu1 %707 }
 0x107   : >> { %1521 = vmatprep.subr.mxu0 %v461_v25  ;;  %1530 = vmatprep.subr.mxu1 %v461_v25 }
 0x108   : >> { %1522 = vmatpush3.msra.mxu0 %v461_v25  ;;  %1531 = vmatpush3.msra.mxu1 %v461_v25 }
 0x109   : >> { %1523 = vmatprep.subr.mxu0 %v459_v24  ;;  %1532 = vmatprep.subr.mxu1 %v459_v24 }
 0x10a   : >> { %1524 = vmatpush3.msra.mxu0 %v459_v24  ;;  %1533 = vmatpush3.msra.mxu1 %v459_v24  ;;  %v706_v27 = vpop.permute.xlu0 %705  ;;  %v704_v28 = vpop.permute.xlu1 %703 }
 0x10b   : >> { %1526 = vmatmul.mubr.msk.f32.vlgmr.msra.gmra.mxu0 %vm292_vm0, %v1727_v10  ;;  %1537 = vmatprep.subr.mxu0 %v1776_v17 }
 0x10c   : >> { %1546 = vmatprep.subr.mxu1 %v708_v26  ;;  %1535 = vmatmul.mubr.msk.f32.vlgmr.msra.gmra.mxu1 %vm292_vm0, %v1711_v6 }
 0x10d   : >> { %1538 = vmatpush3.msra.mxu0 %v1776_v17  ;;  %1547 = vmatpush3.msra.mxu1 %v708_v26 }
 0x10e   : >> { %1539 = vmatprep.subr.mxu0 %v1783_v19  ;;  %1548 = vmatprep.subr.mxu1 %v706_v27  ;;  %v970_v29 = vpop.permute.xlu0 %969  ;;  %v968_v30 = vpop.permute.xlu1 %967 }
 0x10f   : >> { %1540 = vmatpush3.msra.mxu0 %v1783_v19  ;;  %1549 = vmatpush3.msra.mxu1 %v706_v27 }
 0x110   : >> { %1541 = vmatprep.subr.mxu0 %v289_v20  ;;  %1550 = vmatprep.subr.mxu1 %v704_v28 }
 0x111   : >> { %1542 = vmatpush3.msra.mxu0 %v289_v20  ;;  %1543 = vmatprep.mubr.msk.f32.mxu0 %vm292_vm0, %v1696_v3 }
 0x112   : >> { %1551 = vmatpush3.msra.mxu1 %v704_v28  ;;  %1544 = vmatmul.mubr.msk.f32.vlgmr.msra.gmra.mxu0 %vm292_vm0, %v1701_v4  ;;  %v966_v31 = vpop.permute.xlu0 %965  ;;  %v1209_v32 = vpop.permute.xlu1 %1208 }
 0x113   : >> { %1552 = vmatprep.mubr.msk.f32.mxu1 %vm292_vm0, %v1716_v7  ;;  %1555 = vmatprep.subr.mxu0 %v1811_v22 }
 0x114   : >> { %1564 = vmatprep.subr.mxu1 %v1422_v21  ;;  %1553 = vmatmul.mubr.msk.f32.vlgmr.msra.gmra.mxu1 %vm292_vm0, %v1727_v10 }
 0x115   : >> { %1556 = vmatpush3.msra.mxu0 %v1811_v22  ;;  %1565 = vmatpush3.msra.mxu1 %v1422_v21 }
 0x116   : >> { %1557 = vmatprep.subr.mxu0 %v1776_v17  ;;  %1566 = vmatprep.subr.mxu1 %v1770_v15  ;;  %v1207_v33 = vpop.permute.xlu0 %1206  ;;  %v1205_v34 = vpop.permute.xlu1 %1204 }
 0x117   : >> { %1558 = vmatpush3.msra.mxu0 %v1776_v17  ;;  %1567 = vmatpush3.msra.mxu1 %v1770_v15 }
 0x118   : >> { %1559 = vmatprep.subr.mxu0 %v1783_v19  ;;  %1568 = vmatprep.subr.mxu1 %v1778_v18 }
 0x119   : >> { %1560 = vmatpush3.msra.mxu0 %v1783_v19  ;;  %1561 = vmatprep.mubr.msk.f32.mxu0 %vm292_vm0, %v1706_v5 }
 0x11a   : >> { %1569 = vmatpush3.msra.mxu1 %v1778_v18  ;;  %1570 = vmatprep.mubr.msk.f32.mxu1 %vm292_vm0, %v1696_v3 }
 0x11b   : >> { %1562 = vmatmul.mubr.msk.f32.vlgmr.msra.gmra.mxu0 %vm292_vm0, %v1711_v6  ;;  %1571 = vmatmul.mubr.msk.f32.vlgmr.msra.gmra.mxu1 %vm292_vm0, %v1701_v4 }
 0x11c   : >> { %1573 = vmatprep.subr.mxu0 %v970_v29  ;;  %1582 = vmatprep.subr.mxu1 %v970_v29 }
 0x11d   : >> { %1574 = vmatpush3.msra.mxu0 %v970_v29  ;;  %1583 = vmatpush3.msra.mxu1 %v970_v29 }
 0x11e   : >> { %1575 = vmatprep.subr.mxu0 %v968_v30  ;;  %1584 = vmatprep.subr.mxu1 %v968_v30 }
 0x11f   : >> { %1576 = vmatpush3.msra.mxu0 %v968_v30  ;;  %1585 = vmatpush3.msra.mxu1 %v968_v30 }
 0x120   : >> { %1577 = vmatprep.subr.mxu0 %v966_v31  ;;  %1586 = vmatprep.subr.mxu1 %v966_v31 }
 0x121   : >> { %1578 = vmatpush3.msra.mxu0 %v966_v31  ;;  %1579 = vmatprep.mubr.msk.f32.mxu0 %vm292_vm0, %v1716_v7 }
 0x122   : >> { %1587 = vmatpush3.msra.mxu1 %v966_v31  ;;  %1580 = vmatmul.mubr.msk.f32.vlgmr.msra.gmra.mxu0 %vm292_vm0, %v1727_v10 }
 0x123   : >> { %1588 = vmatprep.mubr.msk.f32.mxu1 %vm292_vm0, %v1706_v5  ;;  %1591 = vmatprep.subr.mxu0 %v1811_v22 }
 0x124   : >> { %1600 = vmatprep.subr.mxu1 %v1209_v32  ;;  %1589 = vmatmul.mubr.msk.f32.vlgmr.msra.gmra.mxu1 %vm292_vm0, %v1711_v6 }
 0x125   : >> { %1592 = vmatpush3.msra.mxu0 %v1811_v22  ;;  %1601 = vmatpush3.msra.mxu1 %v1209_v32 }
 0x126   : >> { %1593 = vmatprep.subr.mxu0 %v1776_v17  ;;  %1602 = vmatprep.subr.mxu1 %v1207_v33 }
 0x127   : >> { %1594 = vmatpush3.msra.mxu0 %v1776_v17  ;;  %1603 = vmatpush3.msra.mxu1 %v1207_v33 }
 0x128   : >> { %1595 = vmatprep.subr.mxu0 %v1783_v19  ;;  %1604 = vmatprep.subr.mxu1 %v1205_v34 }
 0x129   : >> { %1596 = vmatpush3.msra.mxu0 %v1783_v19  ;;  %1597 = vmatprep.mubr.msk.f32.mxu0 %vm292_vm0, %v1696_v3 }
 0x12a   : >> { %1605 = vmatpush3.msra.mxu1 %v1205_v34  ;;  %1606 = vmatprep.mubr.msk.f32.mxu1 %vm292_vm0, %v1716_v7 }
 0x12b   : >> { %1598 = vmatmul.mubr.msk.f32.vlgmr.msra.gmra.mxu0 %vm292_vm0, %v1701_v4  ;;  %1607 = vmatmul.mubr.msk.f32.vlgmr.msra.gmra.mxu1 %vm292_vm0, %v1727_v10 }
 0x159   : >> { %v1518_v35 = vpop.f32.mrf.mxu1  ;;  %v1509_v36 = vpop.f32.mrf.mxu0 }
 0x15a   : >> { %v452_v55 = vadd.f32 %v1518_v35, %v1509_v36 }
 0x15b   : >> { %v446_v37 = vpop.f32.mrf.mxu1  ;;  %v365_v38 = vpop.f32.mrf.mxu0 }
 0x15c   : >> { %v447_v58 = vadd.f32 %v446_v37, %v365_v38 }
 0x1cb   : >> { %v1527_v40 = vpop.f32.mrf.mxu0 }
 0x1cc   : >> { %v1536_v39 = vpop.f32.mrf.mxu1  ;;  %v549_v59 = vadd.f32 %v1527_v40, %v452_v55 }
 0x1cd   : >> { %v539_v42 = vpop.f32.mrf.mxu0 }
 0x1ce   : >> { %v616_v41 = vpop.f32.mrf.mxu1  ;;  %v548_v1 = vadd.f32 %v539_v42, %v447_v58  ;;  %v790_v9 = vmul.f32 %v549_v59, %v1750_v14 }
 0x1d0   : >> { %v789_v20 = vmul.f32 %v548_v1, %v1746_v12  ;;  %v792_v26 = vadd.f32 %v790_v9, %v1748_v13 }
 0x1d2   : >> { %v1545_v44 = vpop.f32.mrf.mxu0  ;;  %v791_v32 = vadd.f32 %v789_v20, %v1744_v11  ;;  %v794_v37 = vmax.f32 %v792_v26, 0.0 }
 0x1d3   : >> { %v697_v50 = vadd.f32 %v1545_v44, %v1536_v39 }
 0x1d4   : >> { %v1554_v43 = vpop.f32.mrf.mxu1  ;;  %v691_v46 = vpop.f32.mrf.mxu0  ;;  %v793_v42 = vmax.f32 %v791_v32, 0.0 }
 0x1d5   : >> { %v692_v53 = vadd.f32 %v691_v46, %v616_v41  ;;  %v788_v56 = vadd.f32 %v1554_v43, %v697_v50 }
 0x1d6   : >> { %v778_v45 = vpop.f32.mrf.mxu1 }
 0x1d7   : >> { %v787_v62 = vadd.f32 %v778_v45, %v692_v53  ;;  %v796_v2 = vmul.f32 %v788_v56, %v1750_v14 }
 0x1d9   : >> { %v795_v17 = vmul.f32 %v787_v62, %v1746_v12  ;;  %v798_v22 = vadd.f32 %v796_v2, %v1748_v13 }
 0x1db   : >> { %v1563_v47 = vpop.f32.mrf.mxu0  ;;  %v1572_v48 = vpop.f32.mrf.mxu1  ;;  %v797_v28 = vadd.f32 %v795_v17, %v1744_v11  ;;  %v800_v33 = vmax.f32 %v798_v22, 0.0 }
 0x1dc   : >> { %v959_v57 = vadd.f32 %v1572_v48, %v1563_v47 }
 0x1dd   : >> { %v878_v49 = vpop.f32.mrf.mxu0  ;;  %v953_v51 = vpop.f32.mrf.mxu1  ;;  %v799_v38 = vmax.f32 %v797_v28, 0.0  ;;  %v802_v43 = vmax.f32 %v794_v37, %v800_v33 }
 0x1de   : >> { %v954_v63 = vadd.f32 %v953_v51, %v878_v49 }
 0x1df   : >> { %v801_v47 = vmax.f32 %v793_v42, %v799_v38 }
 0x1e2   : >> { %v1581_v52 = vpop.f32.mrf.mxu0 }
 0x1e3   : >> { %v1050_v0 = vadd.f32 %v1581_v52, %v959_v57 }
 0x1e4   : >> { %v1590_v54 = vpop.f32.mrf.mxu1  ;;  %v1040_v60 = vpop.f32.mrf.mxu0 }
 0x1e5   : >> { %v1049_v8 = vadd.f32 %v1040_v60, %v954_v63  ;;  %v1291_v18 = vmul.f32 %v1050_v0, %v1750_v14 }
 0x1e6   : >> { %v1117_v61 = vpop.f32.mrf.mxu1 }
 0x1e7   : >> { %v1290_v23 = vmul.f32 %v1049_v8, %v1746_v12  ;;  %v1293_v29 = vadd.f32 %v1291_v18, %v1748_v13 }
 0x1e9   : >> { %v1292_v34 = vadd.f32 %v1290_v23, %v1744_v11  ;;  %v1295_v39 = vmax.f32 %v1293_v29, 0.0 }
 0x1eb   : >> { %v1599_v15 = vpop.f32.mrf.mxu0  ;;  %v1608_v16 = vpop.f32.mrf.mxu1  ;;  %v1294_v44 = vmax.f32 %v1292_v34, 0.0 }
 0x1ec   : >> { %v1198_v19 = vadd.f32 %v1599_v15, %v1590_v54 }
 0x1ed   : >> { %v1192_v21 = vpop.f32.mrf.mxu0  ;;  %v1279_v27 = vpop.f32.mrf.mxu1 }
 0x1ee   : >> { %v1289_v24 = vadd.f32 %v1608_v16, %v1198_v19  ;;  %v1193_v25 = vadd.f32 %v1192_v21, %v1117_v61 }
 0x1f0   : >> { %v1297_v30 = vmul.f32 %v1289_v24, %v1750_v14  ;;  %v1288_v31 = vadd.f32 %v1279_v27, %v1193_v25 }
 0x1f2   : >> { %v1299_v35 = vadd.f32 %v1297_v30, %v1748_v13  ;;  %v1296_v36 = vmul.f32 %v1288_v31, %v1746_v12 }
 0x1f4   : >> { %v1301_v40 = vmax.f32 %v1299_v35, 0.0  ;;  %v1298_v41 = vadd.f32 %v1296_v36, %v1744_v11 }
 0x1f6   : >> { %v1303_v45 = vmax.f32 %v1295_v39, %v1301_v40  ;;  %v1300_v46 = vmax.f32 %v1298_v41, 0.0 }
 0x1f8   : >> { %v1305_v48 = vmax.f32 %v802_v43, %v1303_v45  ;;  %v1302_v49 = vmax.f32 %v1294_v44, %v1300_v46  ;;  %281 = sbr.rel (!%p279_p4) target bundleno = 141 (0x8d), region = 87 }
 0x1fa   : >> { %1309 = vst.msk [vmem:[%s1306_s7 + $0x8] sm:$0xff] %vm1307_vm1, %v1305_v48  ;;  %v1304_v50 = vmax.f32 %v801_v47, %v1302_v49 }
 0x1fc   : >> { %1308 = vst.msk [vmem:[%s1306_s7] sm:$0xff] %vm1307_vm1, %v1304_v50 }
 0x1fd PF: > { %s15_s18 = sadd.s32 1, %s1641_s18  }
 0x1fe   : > { %p12_p5 = scmp.ge.s32.totalorder %s15_s18, 4  }
 0x200   :  { %14 = sbr.rel (!%p12_p5) target bundleno = 1 (0x1), region = 98 }

// kernel: bird_drone_cnn_forward.5
= control target key start
LH: loop header
LB: loop body
LE: loop exit
PB: predicated region body
PF: predicated region fallthrough
CT: control target
= control target key end

     0   :  { %s2149_s18 = smov 0   ;;  %s2586_s0 = inlined_call_operand.vmem [shape: f32[2,1824,57], index: 0, kind: input, shape index: {}]   ;;  %s2587_s1 = inlined_call_operand.vmem [shape: f32[2,1824,57], index: 1, kind: input, shape index: {}]   ;;  %s2588_s2 = inlined_call_operand.vmem [shape: f32[3,32,48], index: 2, kind: input, shape index: {}]   ;;  %s2589_s3 = inlined_call_operand.vmem [shape: f32[32,1], index: 3, kind: input, shape index: {}]   ;;  %s2590_s4 = inlined_call_operand.vmem [shape: f32[32,1], index: 4, kind: input, shape index: {}]   ;;  %s2591_s5 = inlined_call_operand.vmem [shape: f32[2,56,32,56], index: 5, kind: output, shape index: {}]  }
   0x1 LB: > { %s1662_s19 = sadd.s32 4294967295, %s2111_s18   ;;  %p1666_p0 = scmp.ge.s32.totalorder %s2111_s18, 1  ;;  %s2111_s18 = sphi %s2149_s18, %s15_s18  }
   0x2   : > { %p197_p1 = scmp.lt.s32.totalorder %s2111_s18, 3 }
   0x4   : > { %p198_p2 = pnand %p1666_p0, %p197_p1 }
   0x5   : > { %p230_p3 = scmp.lt.s32.totalorder (!%p198_p2), %s1662_s19, 1  ;;  %s2272_s25 = smov (!%p198_p2), 0  }
   0x6   : > { %201 = sbr.rel (%p198_p2) target bundleno = 559 (0x22f), region = 40 }
   0xb   : > { %v261_v0 = vld [vmem:[%s2589_s3 + $0x10] sm:$0xff]  ;;  %v259_v1 = vld [vmem:[%s2589_s3] sm:$0xff]  ;;  %v2117_v2 = vmov 0   ;;  %v262_v3 = vld [vmem:[%s2589_s3 + $0x18] sm:$0xff]  ;;  %s2611_s19 = smov (!%p230_p3, %s1662_s19), 1 }
   0xc   : > { %2100 = vset.pattern.permute.xlu1 %v2117_v2  ;;  %2099 = vset.pattern.permute.xlu0 %v2117_v2  ;;  %v260_v4 = vld [vmem:[%s2589_s3 + $0x8] sm:$0xff]  ;;  %v283_v6 = vld [vmem:[%s2590_s4] sm:$0xff]  ;;  %s2079_s7 = smul.u32 1824, %s2611_s19  ;;  %v286_v7 = vld [vmem:[%s2590_s4 + $0x18] sm:$0xff] }
   0xd   : > { %275 = vperm.xlu1 %2100, %v261_v0   ;;  %265 = vperm.xlu0 %2099, %v259_v1   ;;  %v284_v5 = vld [vmem:[%s2590_s4 + $0x8] sm:$0xff]  ;;  %s2080_s8 = smul.u32 1792, %s2611_s19  ;;  %v285_v8 = vld [vmem:[%s2590_s4 + $0x10] sm:$0xff]  ;;  %v2194_v9 = vld [vmem:[%s2588_s2] sm:$0xff] }
   0xe   : > { %s2184_s15 = scalar_lea.vmem %s2586_s0, %s2079_s7  ;;  %s2189_s20 = scalar_lea.vmem %s2587_s1, %s2079_s7  ;;  %2598 = vst [vmem:[#allocation2_spill] sm:$0xff] %v2194_v9  ;;  %v2199_v10 = vld [vmem:[%s2588_s2 + $0x8] sm:$0xff]  ;;  %v2204_v11 = vld [vmem:[%s2588_s2 + $0x10] sm:$0xff]  ;;  %v2214_v12 = vld [vmem:[%s2588_s2 + $0x18] sm:$0xff] }
   0xf   : > { %2599 = vst [vmem:[#allocation3_spill] sm:$0xff] %v2199_v10  ;;  %2600 = vst [vmem:[#allocation4_spill] sm:$0xff] %v2204_v11  ;;  %s2209_s28 = scalar_lea.vmem %s2591_s5, %s2080_s8  ;;  %v2219_v13 = vld [vmem:[%s2588_s2 + $0x20] sm:$0xff]  ;;  %v2224_v14 = vld [vmem:[%s2588_s2 + $0x28] sm:$0xff] }
  0x10   : > { %2601 = vst [vmem:[#allocation5_spill] sm:$0xff] %v2214_v12  ;;  %2602 = vst [vmem:[#allocation6_spill] sm:$0xff] %v2219_v13  ;;  %v2229_v15 = vld [vmem:[%s2588_s2 + $0x30] sm:$0xff]  ;;  %v2234_v16 = vld [vmem:[%s2588_s2 + $0x38] sm:$0xff] }
  0x11   : > { %280 = vperm.xlu1 %2100, %v262_v3   ;;  %270 = vperm.xlu0 %2099, %v260_v4   ;;  %2603 = vst [vmem:[#allocation7_spill] sm:$0xff] %v2224_v14  ;;  %v2239_v17 = vld [vmem:[%s2588_s2 + $0x40] sm:$0xff]  ;;  %v2244_v18 = vld [vmem:[%s2588_s2 + $0x48] sm:$0xff]  ;;  %v2249_v19 = vld [vmem:[%s2588_s2 + $0x50] sm:$0xff] }
  0x12   : > { %v2254_v20 = vld [vmem:[%s2588_s2 + $0x58] sm:$0xff] }
  0x15   : > { %294 = vperm.xlu1 %2100, %v284_v5   ;;  %289 = vperm.xlu0 %2099, %v283_v6  }
  0x19   : > { %304 = vperm.xlu1 %2100, %v286_v7   ;;  %299 = vperm.xlu0 %2099, %v285_v8  }
  0x88   : > { %v2256_v21 = vpop.permute.xlu1 %275  ;;  %v2258_v22 = vpop.permute.xlu0 %265 }
  0x8c   : > { %v2260_v23 = vpop.permute.xlu1 %280  ;;  %v2262_v24 = vpop.permute.xlu0 %270 }
  0x90   : > { %v2264_v25 = vpop.permute.xlu1 %294  ;;  %v2266_v26 = vpop.permute.xlu0 %289 }
  0x94   : > { %v2268_v27 = vpop.permute.xlu1 %304  ;;  %v2270_v28 = vpop.permute.xlu0 %299 }
  0x95 LB: >> { %v2604_v14 = vld [vmem:[#allocation7_spill] sm:$0xff]  ;;  %v2605_v13 = vld [vmem:[#allocation6_spill] sm:$0xff]  ;;  %v2606_v12 = vld [vmem:[#allocation5_spill] sm:$0xff]  ;;  %vm328_vm0 = vcmask 392192   ;;  %s2282_s26 = sshll.u32 %s2115_s25, 5  ;;  %s2118_s30 = smov 127   ;;  %s2115_s25 = sphi %s2272_s25, %s312_s25  }
  0x96   : >> { %v2607_v11 = vld [vmem:[#allocation4_spill] sm:$0xff]  ;;  %v2608_v10 = vld [vmem:[#allocation3_spill] sm:$0xff]  ;;  %v2609_v9 = vld [vmem:[#allocation2_spill] sm:$0xff]  ;;  %1875 = vmatprep.mubr.msk.f32.mxu0 %vm328_vm0, %v2605_v13  ;;  %s2286_s27 = scalar_lea.vmem %s2184_s15, %s2282_s26  ;;  %s2290_s29 = scalar_lea.vmem %s2189_s20, %s2282_s26  ;;  %vm1573_vm1 = vcmask 457728  }
  0x97   : >> { %1893 = vmatprep.mubr.msk.f32.mxu1 %vm328_vm0, %v2609_v9  ;;  %v2293_v29 = vld [vmem:[%s2286_s27 + $0x28] sm:$0xff]  ;;  %v2296_v30 = vld [vmem:[%s2286_s27 + $0x18] sm:$0xff]  ;;  %v2303_v31 = vld [vmem:[%s2286_s27 + $0x20] sm:$0xff]  ;;  %s1572_s6 = scalar_lea.vmem %s2209_s28, %s2282_s26  ;;  %s312_s25 = sadd.s32 1, %s2115_s25  }
  0x98   : >> { %539 = vrot.lane.b32.xlu0 %v2293_v29, %s2118_s30  ;;  %535 = vrot.lane.b32.xlu1 %v2296_v30, %s2118_s30  ;;  %v2306_v32 = vld [vmem:[%s2286_s27 + $0x10] sm:$0xff]  ;;  %v2309_v33 = vld [vmem:[%s2290_s29 + $0x28] sm:$0xff]  ;;  %p309_p4 = scmp.ge.s32.totalorder %s312_s25, 56  }
  0x99   : >> { %1881 = vmatprep.subr.mxu1 %v2293_v29  ;;  %1863 = vmatprep.subr.mxu0 %v2309_v33  ;;  %v2321_v34 = vld [vmem:[%s2290_s29 + $0x20] sm:$0xff]  ;;  %v316_v35 = vld [vmem:[%s2286_s27 + $0x8] sm:$0xff]  ;;  %v2328_v37 = vld [vmem:[%s2290_s29 + $0x18] sm:$0xff] }
  0x9a   : >> { %1882 = vmatpush3.msra.mxu1 %v2293_v29  ;;  %1864 = vmatpush3.msra.mxu0 %v2309_v33  ;;  %v315_v36 = vld [vmem:[%s2286_s27] sm:$0xff]  ;;  %v2337_v38 = vld [vmem:[%s2290_s29 + $0x10] sm:$0xff]  ;;  %v2349_v39 = vld [vmem:[%s2290_s29 + $0x8] sm:$0xff] }
  0x9b   : >> { %1883 = vmatprep.subr.mxu1 %v2303_v31  ;;  %1865 = vmatprep.subr.mxu0 %v2321_v34  ;;  %v2353_v40 = vld [vmem:[%s2290_s29] sm:$0xff]  ;;  %v2375_v41 = vld [vmem:[%s2286_s27 + $0x38] sm:$0xff]  ;;  %v2378_v42 = vld [vmem:[%s2286_s27 + $0x30] sm:$0xff] }
  0x9c   : >> { %537 = vrot.lane.b32.xlu0 %v2303_v31, %s2118_s30  ;;  %533 = vrot.lane.b32.xlu1 %v2306_v32, %s2118_s30  ;;  %v2401_v43 = vld [vmem:[%s2290_s29 + $0x38] sm:$0xff]  ;;  %v2404_v44 = vld [vmem:[%s2290_s29 + $0x30] sm:$0xff] }
  0x9d   : >> { %1884 = vmatpush3.msra.mxu1 %v2303_v31  ;;  %1866 = vmatpush3.msra.mxu0 %v2321_v34 }
  0x9e   : >> { %1885 = vmatprep.subr.mxu1 %v2296_v30  ;;  %1867 = vmatprep.subr.mxu0 %v2328_v37 }
  0x9f   : >> { %1886 = vmatpush3.msra.mxu1 %v2296_v30  ;;  %1868 = vmatpush3.msra.mxu0 %v2328_v37 }
  0xa0   : >> { %531 = vrot.lane.b32.xlu0 %v316_v35, %s2118_s30  ;;  %529 = vrot.lane.b32.xlu1 %v315_v36, %s2118_s30 }
  0xa1   : >> { %1887 = vmatprep.subr.mxu1 %v2306_v32  ;;  %1869 = vmatprep.subr.mxu0 %v2337_v38 }
  0xa2   : >> { %1888 = vmatpush3.msra.mxu1 %v2306_v32  ;;  %1870 = vmatpush3.msra.mxu0 %v2337_v38 }
  0xa3   : >> { %1889 = vmatprep.subr.mxu1 %v316_v35  ;;  %1871 = vmatprep.subr.mxu0 %v2349_v39 }
  0xa4   : >> { %834 = vrot.lane.b32.xlu0 %v2309_v33, %s2118_s30  ;;  %832 = vrot.lane.b32.xlu1 %v2321_v34, %s2118_s30 }
  0xa5   : >> { %1890 = vmatpush3.msra.mxu1 %v316_v35  ;;  %1872 = vmatpush3.msra.mxu0 %v2349_v39 }
  0xa6   : >> { %1891 = vmatprep.subr.mxu1 %v315_v36  ;;  %1873 = vmatprep.subr.mxu0 %v2353_v40 }
  0xa7   : >> { %1892 = vmatpush3.msra.mxu1 %v315_v36  ;;  %1874 = vmatpush3.msra.mxu0 %v2353_v40 }
  0xa8   : >> { %830 = vrot.lane.b32.xlu0 %v2328_v37, %s2118_s30  ;;  %828 = vrot.lane.b32.xlu1 %v2337_v38, %s2118_s30 }
  0xa9   : >> { %1894 = vmatmul.mubr.msk.f32.vlgmr.msra.gmra.mxu1 %vm328_vm0, %v2608_v10  ;;  %1876 = vmatmul.mubr.msk.f32.vlgmr.msra.gmra.mxu0 %vm328_vm0, %v2604_v14 }
  0xaa   : >> { %1896 = vmatprep.mubr.msk.f32.mxu1 %vm328_vm0, %v2607_v11  ;;  %1878 = vmatprep.mubr.msk.f32.mxu0 %vm328_vm0, %v2229_v15 }
  0xac   : >> { %826 = vrot.lane.b32.xlu0 %v2349_v39, %s2118_s30  ;;  %824 = vrot.lane.b32.xlu1 %v2353_v40, %s2118_s30 }
  0xad   : >> { %1897 = vmatmul.mubr.msk.f32.gmra.mxu1 %vm328_vm0, %v2606_v12  ;;  %1879 = vmatmul.mubr.msk.f32.gmra.mxu0 %vm328_vm0, %v2234_v16 }
  0xae   : >> { %1929 = vmatprep.mubr.msk.f32.mxu1 %vm328_vm0, %v2605_v13  ;;  %1911 = vmatprep.mubr.msk.f32.mxu0 %vm328_vm0, %v2239_v17 }
  0xb0   : >> { %1160 = vrot.lane.b32.xlu0 %v2375_v41, %s2118_s30  ;;  %1158 = vrot.lane.b32.xlu1 %v2378_v42, %s2118_s30 }
  0xb4   : >> { %1156 = vrot.lane.b32.xlu0 %v2293_v29, %s2118_s30  ;;  %1154 = vrot.lane.b32.xlu1 %v2303_v31, %s2118_s30 }
  0xb8   : >> { %1152 = vrot.lane.b32.xlu0 %v2296_v30, %s2118_s30  ;;  %1150 = vrot.lane.b32.xlu1 %v2306_v32, %s2118_s30 }
  0xbc   : >> { %1443 = vrot.lane.b32.xlu0 %v2401_v43, %s2118_s30  ;;  %1441 = vrot.lane.b32.xlu1 %v2404_v44, %s2118_s30 }
  0xc0   : >> { %1439 = vrot.lane.b32.xlu0 %v2309_v33, %s2118_s30  ;;  %1437 = vrot.lane.b32.xlu1 %v2321_v34, %s2118_s30 }
  0xc4   : >> { %1435 = vrot.lane.b32.xlu0 %v2328_v37, %s2118_s30  ;;  %1433 = vrot.lane.b32.xlu1 %v2337_v38, %s2118_s30 }
 0x10a   : >> { %v540_v45 = vpop.permute.xlu0 %539  ;;  %v536_v46 = vpop.permute.xlu1 %535 }
 0x10b   : >> { %1899 = vmatprep.subr.mxu0 %v540_v45  ;;  %1917 = vmatprep.subr.mxu1 %v540_v45 }
 0x10c   : >> { %1900 = vmatpush3.msra.mxu0 %v540_v45  ;;  %1918 = vmatpush3.msra.mxu1 %v540_v45 }
 0x10e   : >> { %v538_v47 = vpop.permute.xlu0 %537  ;;  %v534_v48 = vpop.permute.xlu1 %533 }
 0x10f   : >> { %1901 = vmatprep.subr.mxu0 %v538_v47  ;;  %1919 = vmatprep.subr.mxu1 %v538_v47 }
 0x110   : >> { %1902 = vmatpush3.msra.mxu0 %v538_v47  ;;  %1920 = vmatpush3.msra.mxu1 %v538_v47 }
 0x111   : >> { %1903 = vmatprep.subr.mxu0 %v536_v46  ;;  %1921 = vmatprep.subr.mxu1 %v536_v46 }
 0x112   : >> { %1904 = vmatpush3.msra.mxu0 %v536_v46  ;;  %1922 = vmatpush3.msra.mxu1 %v536_v46  ;;  %v532_v49 = vpop.permute.xlu0 %531  ;;  %v530_v50 = vpop.permute.xlu1 %529 }
 0x113   : >> { %1905 = vmatprep.subr.mxu0 %v534_v48  ;;  %1923 = vmatprep.subr.mxu1 %v534_v48 }
 0x114   : >> { %1906 = vmatpush3.msra.mxu0 %v534_v48  ;;  %1924 = vmatpush3.msra.mxu1 %v534_v48 }
 0x115   : >> { %1907 = vmatprep.subr.mxu0 %v532_v49  ;;  %1925 = vmatprep.subr.mxu1 %v532_v49 }
 0x116   : >> { %1908 = vmatpush3.msra.mxu0 %v532_v49  ;;  %1926 = vmatpush3.msra.mxu1 %v532_v49  ;;  %v835_v51 = vpop.permute.xlu0 %834  ;;  %v833_v52 = vpop.permute.xlu1 %832 }
 0x117   : >> { %1909 = vmatprep.subr.mxu0 %v530_v50  ;;  %1927 = vmatprep.subr.mxu1 %v530_v50 }
 0x118   : >> { %1910 = vmatpush3.msra.mxu0 %v530_v50  ;;  %1928 = vmatpush3.msra.mxu1 %v530_v50 }
 0x119   : >> { %1912 = vmatmul.mubr.msk.f32.vlgmr.msra.gmra.mxu0 %vm328_vm0, %v2244_v18  ;;  %1935 = vmatprep.subr.mxu0 %v2309_v33 }
 0x11a   : >> { %1953 = vmatprep.subr.mxu1 %v835_v51  ;;  %1936 = vmatpush3.msra.mxu0 %v2309_v33  ;;  %v831_v53 = vpop.permute.xlu0 %830  ;;  %v829_v54 = vpop.permute.xlu1 %828 }
 0x11b   : >> { %1930 = vmatmul.mubr.msk.f32.vlgmr.msra.gmra.mxu1 %vm328_vm0, %v2604_v14  ;;  %1937 = vmatprep.subr.mxu0 %v2321_v34 }
 0x11c   : >> { %1954 = vmatpush3.msra.mxu1 %v835_v51  ;;  %1914 = vmatprep.mubr.msk.f32.mxu0 %vm328_vm0, %v2249_v19 }
 0x11d   : >> { %1955 = vmatprep.subr.mxu1 %v833_v52  ;;  %1938 = vmatpush3.msra.mxu0 %v2321_v34 }
 0x11e   : >> { %1956 = vmatpush3.msra.mxu1 %v833_v52  ;;  %1915 = vmatmul.mubr.msk.f32.gmra.mxu0 %vm328_vm0, %v2254_v20  ;;  %v827_v55 = vpop.permute.xlu0 %826  ;;  %v825_v56 = vpop.permute.xlu1 %824 }
 0x11f   : >> { %1939 = vmatprep.subr.mxu0 %v2328_v37  ;;  %1957 = vmatprep.subr.mxu1 %v831_v53 }
 0x120   : >> { %1940 = vmatpush3.msra.mxu0 %v2328_v37  ;;  %1958 = vmatpush3.msra.mxu1 %v831_v53 }
 0x121   : >> { %1941 = vmatprep.subr.mxu0 %v2337_v38  ;;  %1959 = vmatprep.subr.mxu1 %v829_v54 }
 0x122   : >> { %1942 = vmatpush3.msra.mxu0 %v2337_v38  ;;  %1960 = vmatpush3.msra.mxu1 %v829_v54  ;;  %v1161_v57 = vpop.permute.xlu0 %1160  ;;  %v1159_v58 = vpop.permute.xlu1 %1158 }
 0x123   : >> { %1932 = vmatprep.mubr.msk.f32.mxu1 %vm328_vm0, %v2229_v15  ;;  %1943 = vmatprep.subr.mxu0 %v2349_v39 }
 0x124   : >> { %1961 = vmatprep.subr.mxu1 %v827_v55  ;;  %1944 = vmatpush3.msra.mxu0 %v2349_v39 }
 0x125   : >> { %1933 = vmatmul.mubr.msk.f32.gmra.mxu1 %vm328_vm0, %v2234_v16  ;;  %1945 = vmatprep.subr.mxu0 %v2353_v40 }
 0x126   : >> { %1962 = vmatpush3.msra.mxu1 %v827_v55  ;;  %1946 = vmatpush3.msra.mxu0 %v2353_v40  ;;  %v1157_v59 = vpop.permute.xlu0 %1156  ;;  %v1155_v60 = vpop.permute.xlu1 %1154 }
 0x127   : >> { %1963 = vmatprep.subr.mxu1 %v825_v56  ;;  %1947 = vmatprep.mubr.msk.f32.mxu0 %vm328_vm0, %v2609_v9 }
 0x128   : >> { %1964 = vmatpush3.msra.mxu1 %v825_v56  ;;  %1948 = vmatmul.mubr.msk.f32.vlgmr.msra.gmra.mxu0 %vm328_vm0, %v2608_v10 }
 0x129   : >> { %1965 = vmatprep.mubr.msk.f32.mxu1 %vm328_vm0, %v2239_v17  ;;  %1971 = vmatprep.subr.mxu0 %v2401_v43 }
 0x12a   : >> { %1989 = vmatprep.subr.mxu1 %v2375_v41  ;;  %1966 = vmatmul.mubr.msk.f32.vlgmr.msra.gmra.mxu1 %vm328_vm0, %v2244_v18  ;;  %v1153_v61 = vpop.permute.xlu0 %1152  ;;  %v1151_v62 = vpop.permute.xlu1 %1150 }
 0x12b   : >> { %1972 = vmatpush3.msra.mxu0 %v2401_v43  ;;  %1990 = vmatpush3.msra.mxu1 %v2375_v41 }
 0x12c   : >> { %1973 = vmatprep.subr.mxu0 %v2404_v44  ;;  %1991 = vmatprep.subr.mxu1 %v2378_v42 }
 0x12d   : >> { %1950 = vmatprep.mubr.msk.f32.mxu0 %vm328_vm0, %v2607_v11  ;;  %1974 = vmatpush3.msra.mxu0 %v2404_v44 }
 0x12e   : >> { %1992 = vmatpush3.msra.mxu1 %v2378_v42  ;;  %1951 = vmatmul.mubr.msk.f32.gmra.mxu0 %vm328_vm0, %v2606_v12  ;;  %v1444_v63 = vpop.permute.xlu0 %1443  ;;  %v1442_v0 = vpop.permute.xlu1 %1441 }
 0x12f   : >> { %1975 = vmatprep.subr.mxu0 %v2309_v33  ;;  %1993 = vmatprep.subr.mxu1 %v2293_v29 }
 0x130   : >> { %1968 = vmatprep.mubr.msk.f32.mxu1 %vm328_vm0, %v2249_v19  ;;  %1976 = vmatpush3.msra.mxu0 %v2309_v33 }
 0x131   : >> { %1994 = vmatpush3.msra.mxu1 %v2293_v29  ;;  %1977 = vmatprep.subr.mxu0 %v2321_v34 }
 0x132   : >> { %1969 = vmatmul.mubr.msk.f32.gmra.mxu1 %vm328_vm0, %v2254_v20  ;;  %1995 = vmatprep.subr.mxu1 %v2303_v31  ;;  %v1440_v1 = vpop.permute.xlu0 %1439  ;;  %v1438_v2 = vpop.permute.xlu1 %1437 }
 0x133   : >> { %1978 = vmatpush3.msra.mxu0 %v2321_v34  ;;  %1996 = vmatpush3.msra.mxu1 %v2303_v31 }
 0x134   : >> { %1979 = vmatprep.subr.mxu0 %v2328_v37  ;;  %1997 = vmatprep.subr.mxu1 %v2296_v30 }
 0x135   : >> { %1980 = vmatpush3.msra.mxu0 %v2328_v37  ;;  %1998 = vmatpush3.msra.mxu1 %v2296_v30 }
 0x136   : >> { %1981 = vmatprep.subr.mxu0 %v2337_v38  ;;  %1999 = vmatprep.subr.mxu1 %v2306_v32  ;;  %v1436_v3 = vpop.permute.xlu0 %1435  ;;  %v1434_v4 = vpop.permute.xlu1 %1433 }
 0x137   : >> { %1982 = vmatpush3.msra.mxu0 %v2337_v38  ;;  %1983 = vmatprep.mubr.msk.f32.mxu0 %vm328_vm0, %v2605_v13 }
 0x138   : >> { %2000 = vmatpush3.msra.mxu1 %v2306_v32  ;;  %2001 = vmatprep.mubr.msk.f32.mxu1 %vm328_vm0, %v2609_v9 }
 0x139   : >> { %1984 = vmatmul.mubr.msk.f32.vlgmr.msra.gmra.mxu0 %vm328_vm0, %v2604_v14  ;;  %2002 = vmatmul.mubr.msk.f32.vlgmr.msra.gmra.mxu1 %vm328_vm0, %v2608_v10 }
 0x13a   : >> { %2007 = vmatprep.subr.mxu0 %v1161_v57  ;;  %2025 = vmatprep.subr.mxu1 %v1161_v57 }
 0x13b   : >> { %2008 = vmatpush3.msra.mxu0 %v1161_v57  ;;  %2026 = vmatpush3.msra.mxu1 %v1161_v57 }
 0x13c   : >> { %2009 = vmatprep.subr.mxu0 %v1159_v58  ;;  %2027 = vmatprep.subr.mxu1 %v1159_v58 }
 0x13d   : >> { %2010 = vmatpush3.msra.mxu0 %v1159_v58  ;;  %2028 = vmatpush3.msra.mxu1 %v1159_v58 }
 0x13e   : >> { %2011 = vmatprep.subr.mxu0 %v1157_v59  ;;  %2029 = vmatprep.subr.mxu1 %v1157_v59 }
 0x13f   : >> { %2012 = vmatpush3.msra.mxu0 %v1157_v59  ;;  %2030 = vmatpush3.msra.mxu1 %v1157_v59 }
 0x140   : >> { %1986 = vmatprep.mubr.msk.f32.mxu0 %vm328_vm0, %v2229_v15  ;;  %2004 = vmatprep.mubr.msk.f32.mxu1 %vm328_vm0, %v2607_v11 }
 0x141   : >> { %2013 = vmatprep.subr.mxu0 %v1155_v60  ;;  %2031 = vmatprep.subr.mxu1 %v1155_v60 }
 0x142   : >> { %1987 = vmatmul.mubr.msk.f32.gmra.mxu0 %vm328_vm0, %v2234_v16  ;;  %2005 = vmatmul.mubr.msk.f32.gmra.mxu1 %vm328_vm0, %v2606_v12 }
 0x143   : >> { %2014 = vmatpush3.msra.mxu0 %v1155_v60  ;;  %2032 = vmatpush3.msra.mxu1 %v1155_v60 }
 0x144   : >> { %2015 = vmatprep.subr.mxu0 %v1153_v61  ;;  %2033 = vmatprep.subr.mxu1 %v1153_v61 }
 0x145   : >> { %2016 = vmatpush3.msra.mxu0 %v1153_v61  ;;  %2034 = vmatpush3.msra.mxu1 %v1153_v61 }
 0x146   : >> { %2017 = vmatprep.subr.mxu0 %v1151_v62  ;;  %2035 = vmatprep.subr.mxu1 %v1151_v62 }
 0x147   : >> { %2018 = vmatpush3.msra.mxu0 %v1151_v62  ;;  %2019 = vmatprep.mubr.msk.f32.mxu0 %vm328_vm0, %v2239_v17 }
 0x148   : >> { %2036 = vmatpush3.msra.mxu1 %v1151_v62  ;;  %2020 = vmatmul.mubr.msk.f32.vlgmr.msra.gmra.mxu0 %vm328_vm0, %v2244_v18 }
 0x149   : >> { %2037 = vmatprep.mubr.msk.f32.mxu1 %vm328_vm0, %v2605_v13  ;;  %2043 = vmatprep.subr.mxu0 %v2401_v43 }
 0x14a   : >> { %2061 = vmatprep.subr.mxu1 %v1444_v63  ;;  %2044 = vmatpush3.msra.mxu0 %v2401_v43 }
 0x14b   : >> { %2038 = vmatmul.mubr.msk.f32.vlgmr.msra.gmra.mxu1 %vm328_vm0, %v2604_v14  ;;  %2045 = vmatprep.subr.mxu0 %v2404_v44 }
 0x14c   : >> { %2062 = vmatpush3.msra.mxu1 %v1444_v63  ;;  %2022 = vmatprep.mubr.msk.f32.mxu0 %vm328_vm0, %v2249_v19 }
 0x14d   : >> { %2063 = vmatprep.subr.mxu1 %v1442_v0  ;;  %2046 = vmatpush3.msra.mxu0 %v2404_v44 }
 0x14e   : >> { %2064 = vmatpush3.msra.mxu1 %v1442_v0  ;;  %2023 = vmatmul.mubr.msk.f32.gmra.mxu0 %vm328_vm0, %v2254_v20 }
 0x14f   : >> { %2047 = vmatprep.subr.mxu0 %v2309_v33  ;;  %2065 = vmatprep.subr.mxu1 %v1440_v1 }
 0x150   : >> { %2048 = vmatpush3.msra.mxu0 %v2309_v33  ;;  %2066 = vmatpush3.msra.mxu1 %v1440_v1 }
 0x151   : >> { %2049 = vmatprep.subr.mxu0 %v2321_v34  ;;  %2067 = vmatprep.subr.mxu1 %v1438_v2 }
 0x152   : >> { %2040 = vmatprep.mubr.msk.f32.mxu1 %vm328_vm0, %v2229_v15  ;;  %2050 = vmatpush3.msra.mxu0 %v2321_v34 }
 0x153   : >> { %2068 = vmatpush3.msra.mxu1 %v1438_v2  ;;  %2051 = vmatprep.subr.mxu0 %v2328_v37 }
 0x154   : >> { %2041 = vmatmul.mubr.msk.f32.gmra.mxu1 %vm328_vm0, %v2234_v16  ;;  %2069 = vmatprep.subr.mxu1 %v1436_v3 }
 0x155   : >> { %2052 = vmatpush3.msra.mxu0 %v2328_v37  ;;  %2070 = vmatpush3.msra.mxu1 %v1436_v3 }
 0x156   : >> { %2053 = vmatprep.subr.mxu0 %v2337_v38  ;;  %2071 = vmatprep.subr.mxu1 %v1434_v4 }
 0x157   : >> { %2054 = vmatpush3.msra.mxu0 %v2337_v38  ;;  %2055 = vmatprep.mubr.msk.f32.mxu0 %vm328_vm0, %v2609_v9 }
 0x158   : >> { %2072 = vmatpush3.msra.mxu1 %v1434_v4  ;;  %2073 = vmatprep.mubr.msk.f32.mxu1 %vm328_vm0, %v2239_v17 }
 0x159   : >> { %2056 = vmatmul.mubr.msk.f32.vlgmr.msra.gmra.mxu0 %vm328_vm0, %v2608_v10  ;;  %2074 = vmatmul.mubr.msk.f32.vlgmr.msra.gmra.mxu1 %vm328_vm0, %v2244_v18 }
 0x15a   : >> { %2058 = vmatprep.mubr.msk.f32.mxu0 %vm328_vm0, %v2607_v11  ;;  %2076 = vmatprep.mubr.msk.f32.mxu1 %vm328_vm0, %v2249_v19 }
 0x15d   : >> { %2059 = vmatmul.mubr.msk.f32.gmra.mxu0 %vm328_vm0, %v2606_v12  ;;  %2077 = vmatmul.mubr.msk.f32.gmra.mxu1 %vm328_vm0, %v2254_v20 }
 0x169   : >> { %v1877_v5 = vpop.f32.mrf.mxu0  ;;  %v1895_v8 = vpop.f32.mrf.mxu1 }
 0x16a   : >> { %v510_v57 = vadd.f32 %v1895_v8, %v1877_v5 }
 0x16b   : >> { %v407_v6 = vpop.f32.mrf.mxu0  ;;  %v504_v30 = vpop.f32.mrf.mxu1 }
 0x16c   : >> { %v505_v59 = vadd.f32 %v504_v30, %v407_v6 }
 0x16d   : >> { %v1880_v7 = vpop.f32.mrf.mxu0  ;;  %v1898_v31 = vpop.f32.mrf.mxu1 }
 0x16e   : >> { %v520_v2 = vadd.f32 %v1898_v31, %v1880_v7 }
 0x16f   : >> { %v417_v29 = vpop.f32.mrf.mxu0  ;;  %v514_v33 = vpop.f32.mrf.mxu1 }
 0x170   : >> { %v515_v13 = vadd.f32 %v514_v33, %v417_v29 }
 0x1d9   : >> { %v1913_v32 = vpop.f32.mrf.mxu0 }
 0x1da   : >> { %v645_v60 = vadd.f32 %v1913_v32, %v510_v57 }
 0x1db   : >> { %v625_v34 = vpop.f32.mrf.mxu0  ;;  %v1931_v35 = vpop.f32.mrf.mxu1 }
 0x1dc   : >> { %v644_v0 = vadd.f32 %v625_v34, %v505_v59  ;;  %v932_v3 = vmul.f32 %v645_v60, %v2262_v24 }
 0x1dd   : >> { %v714_v37 = vpop.f32.mrf.mxu1 }
 0x1de   : >> { %v1916_v36 = vpop.f32.mrf.mxu0  ;;  %v931_v14 = vmul.f32 %v644_v0, %v2258_v22  ;;  %v936_v34 = vadd.f32 %v932_v3, %v2264_v25 }
 0x1df   : >> { %v647_v5 = vadd.f32 %v1916_v36, %v520_v2 }
 0x1e0   : >> { %v635_v39 = vpop.f32.mrf.mxu0  ;;  %v935_v29 = vadd.f32 %v931_v14, %v2266_v26 }
 0x1e1   : >> { %v934_v33 = vmul.f32 %v647_v5, %v2260_v23 }
 0x1e5   : >> { %v1934_v38 = vpop.f32.mrf.mxu1 }
 0x1e7   : >> { %v724_v41 = vpop.f32.mrf.mxu1 }
 0x1e8   : >> { %v1949_v40 = vpop.f32.mrf.mxu0 }
 0x1e9   : >> { %v805_v62 = vadd.f32 %v1949_v40, %v1931_v35 }
 0x1ea   : >> { %v799_v42 = vpop.f32.mrf.mxu0  ;;  %v1967_v43 = vpop.f32.mrf.mxu1 }
 0x1eb   : >> { %v800_v1 = vadd.f32 %v799_v42, %v714_v37  ;;  %v928_v9 = vadd.f32 %v1967_v43, %v805_v62  ;;  %v646_v37 = vadd.f32 %v635_v39, %v515_v13  ;;  %v940_v39 = vmax.f32 %v936_v34, 0.0 }
 0x1ec   : >> { %v908_v45 = vpop.f32.mrf.mxu1 }
 0x1ed   : >> { %v927_v8 = vadd.f32 %v908_v45, %v800_v1  ;;  %v944_v31 = vmul.f32 %v928_v9, %v2262_v24  ;;  %v933_v9 = vmul.f32 %v646_v37, %v2256_v21 }
 0x1ee   : >> { %v1952_v44 = vpop.f32.mrf.mxu0 }
 0x1ef   : >> { %v815_v10 = vadd.f32 %v1952_v44, %v1934_v38  ;;  %v943_v36 = vmul.f32 %v927_v8, %v2258_v22 }
 0x1f0   : >> { %v809_v46 = vpop.f32.mrf.mxu0 }
 0x1f1   : >> { %v810_v30 = vadd.f32 %v809_v46, %v724_v41 }
 0x1f2   : >> { %v1970_v47 = vpop.f32.mrf.mxu1 }
 0x1f3   : >> { %v930_v40 = vadd.f32 %v1970_v47, %v815_v10  ;;  %v948_v47 = vadd.f32 %v944_v31, %v2264_v25 }
 0x1f4   : >> { %v918_v49 = vpop.f32.mrf.mxu1 }
 0x1f5   : >> { %v929_v44 = vadd.f32 %v918_v49, %v810_v30  ;;  %v939_v49 = vmax.f32 %v935_v29, 0.0  ;;  %v952_v1 = vmax.f32 %v948_v47, 0.0 }
 0x1f9   : >> { %v1985_v48 = vpop.f32.mrf.mxu0  ;;  %v2003_v51 = vpop.f32.mrf.mxu1 }
 0x1fa   : >> { %v1131_v11 = vadd.f32 %v2003_v51, %v1985_v48  ;;  %v946_v48 = vmul.f32 %v930_v40, %v2260_v23 }
 0x1fb   : >> { %v1040_v50 = vpop.f32.mrf.mxu0  ;;  %v1125_v53 = vpop.f32.mrf.mxu1 }
 0x1fc   : >> { %v1126_v32 = vadd.f32 %v1125_v53, %v1040_v50  ;;  %v938_v53 = vadd.f32 %v934_v33, %v2268_v27  ;;  %v950_v2 = vadd.f32 %v946_v48, %v2268_v27  ;;  %v956_v33 = vmax.f32 %v940_v39, %v952_v1 }
 0x202   : >> { %v1988_v52 = vpop.f32.mrf.mxu0  ;;  %v2006_v55 = vpop.f32.mrf.mxu1 }
 0x203   : >> { %v1141_v42 = vadd.f32 %v2006_v55, %v1988_v52  ;;  %v947_v55 = vadd.f32 %v943_v36, %v2266_v26  ;;  %v954_v36 = vmax.f32 %v950_v2, 0.0 }
 0x204   : >> { %v1050_v54 = vpop.f32.mrf.mxu0  ;;  %v1135_v58 = vpop.f32.mrf.mxu1 }
 0x205   : >> { %v1136_v41 = vadd.f32 %v1135_v58, %v1050_v54  ;;  %v951_v34 = vmax.f32 %v947_v55, 0.0 }
 0x208   : >> { %v2021_v56 = vpop.f32.mrf.mxu0 }
 0x209   : >> { %v1254_v35 = vadd.f32 %v2021_v56, %v1131_v11  ;;  %v945_v56 = vmul.f32 %v929_v44, %v2256_v21 }
 0x20a   : >> { %v1234_v63 = vpop.f32.mrf.mxu0 }
 0x20b   : >> { %v2039_v61 = vpop.f32.mrf.mxu1  ;;  %v1253_v38 = vadd.f32 %v1234_v63, %v1126_v32  ;;  %v1541_v11 = vmul.f32 %v1254_v35, %v2262_v24  ;;  %v949_v37 = vadd.f32 %v945_v56, %v2270_v28 }
 0x20d   : >> { %v1323_v4 = vpop.f32.mrf.mxu1  ;;  %v1540_v14 = vmul.f32 %v1253_v38, %v2258_v22  ;;  %v1545_v57 = vadd.f32 %v1541_v11, %v2264_v25 }
 0x20e   : >> { %v2024_v12 = vpop.f32.mrf.mxu0 }
 0x20f   : >> { %v1256_v45 = vadd.f32 %v2024_v12, %v1141_v42  ;;  %v1544_v3 = vadd.f32 %v1540_v14, %v2266_v26  ;;  %v1549_v31 = vmax.f32 %v1545_v57, 0.0 }
 0x210   : >> { %v1244_v43 = vpop.f32.mrf.mxu0 }
 0x211   : >> { %v1255_v50 = vadd.f32 %v1244_v43, %v1136_v41  ;;  %v1543_v58 = vmul.f32 %v1256_v45, %v2260_v23  ;;  %v1548_v44 = vmax.f32 %v1544_v3, 0.0 }
 0x214   : >> { %v2042_v6 = vpop.f32.mrf.mxu1 }
 0x216   : >> { %v1333_v7 = vpop.f32.mrf.mxu1 }
 0x219   : >> { %v2057_v46 = vpop.f32.mrf.mxu0  ;;  %v2075_v13 = vpop.f32.mrf.mxu1 }
 0x21a   : >> { %v1414_v10 = vadd.f32 %v2057_v46, %v2039_v61  ;;  %v937_v61 = vadd.f32 %v933_v9, %v2270_v28  ;;  %v955_v9 = vmax.f32 %v939_v49, %v951_v34 }
 0x21b   : >> { %v1408_v51 = vpop.f32.mrf.mxu0  ;;  %v1517_v52 = vpop.f32.mrf.mxu1 }
 0x21c   : >> { %v1537_v54 = vadd.f32 %v2075_v13, %v1414_v10  ;;  %v1409_v12 = vadd.f32 %v1408_v51, %v1323_v4  ;;  %v1542_v4 = vmul.f32 %v1255_v50, %v2256_v21  ;;  %v942_v13 = vmax.f32 %v938_v53, 0.0 }
 0x21d   : >> { %v2060_v59 = vpop.f32.mrf.mxu0  ;;  %v2078_v60 = vpop.f32.mrf.mxu1  ;;  %v953_v10 = vmax.f32 %v949_v37, 0.0  ;;  %v941_v51 = vmax.f32 %v937_v61, 0.0 }
 0x21e   : >> { %v1553_v62 = vmul.f32 %v1537_v54, %v2262_v24  ;;  %v1536_v63 = vadd.f32 %v1517_v52, %v1409_v12  ;;  %v1424_v0 = vadd.f32 %v2060_v59, %v2042_v6  ;;  %v1547_v6 = vadd.f32 %v1543_v58, %v2268_v27 }
 0x21f   : >> { %v1418_v5 = vpop.f32.mrf.mxu0  ;;  %v1527_v40 = vpop.f32.mrf.mxu1  ;;  %v958_v52 = vmax.f32 %v942_v13, %v954_v36  ;;  %v957_v57 = vmax.f32 %v941_v51, %v953_v10 }
 0x220   : >> { %v1557_v8 = vadd.f32 %v1553_v62, %v2264_v25  ;;  %v1552_v30 = vmul.f32 %v1536_v63, %v2258_v22  ;;  %v1539_v32 = vadd.f32 %v2078_v60, %v1424_v0  ;;  %v1419_v35 = vadd.f32 %v1418_v5, %v1333_v7 }
 0x221   : >> { %v1546_v7 = vadd.f32 %v1542_v4, %v2270_v28  ;;  %v1551_v47 = vmax.f32 %v1547_v6, 0.0 }
 0x222   : >> { %v1561_v42 = vmax.f32 %v1557_v8, 0.0  ;;  %v1556_v38 = vadd.f32 %v1552_v30, %v2266_v26  ;;  %v1555_v43 = vmul.f32 %v1539_v32, %v2260_v23  ;;  %v1538_v29 = vadd.f32 %v1527_v40, %v1419_v35 }
 0x223   : >> { %v1550_v54 = vmax.f32 %v1546_v7, 0.0 }
 0x224   : >> { %v1565_v41 = vmax.f32 %v1549_v31, %v1561_v42  ;;  %v1560_v11 = vmax.f32 %v1556_v38, 0.0  ;;  %v1559_v45 = vadd.f32 %v1555_v43, %v2268_v27  ;;  %v1554_v46 = vmul.f32 %v1538_v29, %v2256_v21 }
 0x226   : >> { %v1569_v48 = vmax.f32 %v956_v33, %v1565_v41  ;;  %v1564_v14 = vmax.f32 %v1548_v44, %v1560_v11  ;;  %v1563_v50 = vmax.f32 %v1559_v45, 0.0  ;;  %v1558_v39 = vadd.f32 %v1554_v46, %v2270_v28 }
 0x228   : >> { %1575 = vst.msk [vmem:[%s1572_s6 + $0x8] sm:$0xff] %vm1573_vm1, %v1569_v48  ;;  %v1568_v12 = vmax.f32 %v955_v9, %v1564_v14  ;;  %v1567_v55 = vmax.f32 %v1551_v47, %v1563_v50  ;;  %v1562_v56 = vmax.f32 %v1558_v39, 0.0 }
 0x22a   : >> { %1574 = vst.msk [vmem:[%s1572_s6] sm:$0xff] %vm1573_vm1, %v1568_v12  ;;  %v1571_v49 = vmax.f32 %v958_v52, %v1567_v55  ;;  %v1566_v53 = vmax.f32 %v1550_v54, %v1562_v56  ;;  %311 = sbr.rel (!%p309_p4) target bundleno = 149 (0x95), region = 87 }
 0x22c   : >> { %1577 = vst.msk [vmem:[%s1572_s6 + $0x18] sm:$0xff] %vm1573_vm1, %v1571_v49  ;;  %v1570_v58 = vmax.f32 %v957_v57, %v1566_v53 }
 0x22e   : >> { %1576 = vst.msk [vmem:[%s1572_s6 + $0x10] sm:$0xff] %vm1573_vm1, %v1570_v58 }
 0x22f PF: > { %s15_s18 = sadd.s32 1, %s2111_s18  }
 0x230   : > { %p12_p5 = scmp.ge.s32.totalorder %s15_s18, 4  }
 0x232   :  { %14 = sbr.rel (!%p12_p5) target bundleno = 1 (0x1), region = 98 }

// kernel: bird_drone_cnn_forward.6
= control target key start
LH: loop header
LB: loop body
LE: loop exit
PB: predicated region body
PF: predicated region fallthrough
CT: control target
= control target key end

     0   :  { %s3089_s18 = smov 0   ;;  %s4135_s0 = inlined_call_operand.vmem [shape: f32[2,1856,29], index: 0, kind: input, shape index: {}]   ;;  %s4136_s1 = inlined_call_operand.vmem [shape: f32[2,1856,29], index: 1, kind: input, shape index: {}]   ;;  %s4137_s2 = inlined_call_operand.vmem [shape: f32[3,64,96], index: 2, kind: input, shape index: {}]   ;;  %s4138_s3 = inlined_call_operand.vmem [shape: f32[64,1], index: 3, kind: input, shape index: {}]   ;;  %s4139_s4 = inlined_call_operand.vmem [shape: f32[64,1], index: 4, kind: input, shape index: {}]   ;;  %s4140_s5 = inlined_call_operand.vmem [shape: f32[2,28,64,28], index: 5, kind: output, shape index: {}]  }
   0x1 LB: > { %s2198_s19 = sadd.s32 4294967295, %s3051_s18   ;;  %p2202_p0 = scmp.ge.s32.totalorder %s3051_s18, 1  ;;  %s3051_s18 = sphi %s3089_s18, %s15_s18  }
   0x2   : > { %p197_p1 = scmp.lt.s32.totalorder %s3051_s18, 3 }
   0x4   : > { %p198_p2 = pnand %p2202_p0, %p197_p1 }
   0x5   : > { %p230_p3 = scmp.lt.s32.totalorder (!%p198_p2), %s2198_s19, 1  ;;  %s3316_s22 = smov (!%p198_p2), 0  }
   0x6   : > { %201 = sbr.rel (%p198_p2) target bundleno = 666 (0x29a), region = 40 }
   0xb   : > { %v273_v0 = vld [vmem:[%s4138_s3 + $0x10] sm:$0xff]  ;;  %v271_v1 = vld [vmem:[%s4138_s3] sm:$0xff]  ;;  %v3057_v2 = vmov 0   ;;  %v274_v3 = vld [vmem:[%s4138_s3 + $0x18] sm:$0xff]  ;;  %s4262_s19 = smov (!%p230_p3, %s2198_s19), 1 }
   0xc   : > { %3040 = vset.pattern.permute.xlu1 %v3057_v2  ;;  %3039 = vset.pattern.permute.xlu0 %v3057_v2  ;;  %v272_v4 = vld [vmem:[%s4138_s3 + $0x8] sm:$0xff]  ;;  %v275_v6 = vld [vmem:[%s4138_s3 + $0x20] sm:$0xff]  ;;  %v278_v7 = vld [vmem:[%s4138_s3 + $0x38] sm:$0xff]  ;;  %s3019_s25 = smul.u32 1856, %s4262_s19 }
   0xd   : > { %291 = vperm.xlu1 %3040, %v273_v0   ;;  %281 = vperm.xlu0 %3039, %v271_v1   ;;  %v276_v5 = vld [vmem:[%s4138_s3 + $0x28] sm:$0xff]  ;;  %v277_v8 = vld [vmem:[%s4138_s3 + $0x30] sm:$0xff]  ;;  %v319_v10 = vld [vmem:[%s4139_s4] sm:$0xff]  ;;  %s3020_s26 = smul.u32 1792, %s4262_s19 }
   0xe   : > { %v320_v9 = vld [vmem:[%s4139_s4 + $0x8] sm:$0xff]  ;;  %v322_v11 = vld [vmem:[%s4139_s4 + $0x18] sm:$0xff]  ;;  %v321_v12 = vld [vmem:[%s4139_s4 + $0x10] sm:$0xff]  ;;  %s3152_s8 = scalar_lea.vmem %s4135_s0, %s3019_s25  ;;  %s3157_s11 = scalar_lea.vmem %s4136_s1, %s3019_s25 }
   0xf   : > { %v324_v13 = vld [vmem:[%s4139_s4 + $0x28] sm:$0xff]  ;;  %v323_v14 = vld [vmem:[%s4139_s4 + $0x20] sm:$0xff]  ;;  %v326_v15 = vld [vmem:[%s4139_s4 + $0x38] sm:$0xff]  ;;  %s3177_s21 = scalar_lea.vmem %s4140_s5, %s3020_s26 }
  0x10   : > { %v325_v16 = vld [vmem:[%s4139_s4 + $0x30] sm:$0xff]  ;;  %v3162_v17 = vld [vmem:[%s4137_s2] sm:$0xff]  ;;  %v3167_v18 = vld [vmem:[%s4137_s2 + $0x8] sm:$0xff] }
  0x11   : > { %296 = vperm.xlu1 %3040, %v274_v3   ;;  %286 = vperm.xlu0 %3039, %v272_v4   ;;  %4176 = vst [vmem:[#allocation2_spill] sm:$0xff] %v3162_v17  ;;  %4177 = vst [vmem:[#allocation3_spill] sm:$0xff] %v3167_v18  ;;  %v3172_v19 = vld [vmem:[%s4137_s2 + $0x10] sm:$0xff]  ;;  %v3182_v20 = vld [vmem:[%s4137_s2 + $0x18] sm:$0xff] }
  0x12   : > { %4178 = vst [vmem:[#allocation4_spill] sm:$0xff] %v3172_v19  ;;  %4179 = vst [vmem:[#allocation5_spill] sm:$0xff] %v3182_v20  ;;  %v3187_v21 = vld [vmem:[%s4137_s2 + $0x20] sm:$0xff]  ;;  %v3192_v22 = vld [vmem:[%s4137_s2 + $0x28] sm:$0xff] }
  0x13   : > { %4180 = vst [vmem:[#allocation6_spill] sm:$0xff] %v3187_v21  ;;  %4181 = vst [vmem:[#allocation7_spill] sm:$0xff] %v3192_v22  ;;  %v3197_v23 = vld [vmem:[%s4137_s2 + $0x30] sm:$0xff]  ;;  %v3202_v24 = vld [vmem:[%s4137_s2 + $0x38] sm:$0xff] }
  0x14   : > { %4182 = vst [vmem:[#allocation8_spill] sm:$0xff] %v3197_v23  ;;  %4183 = vst [vmem:[#allocation9_spill] sm:$0xff] %v3202_v24  ;;  %v3207_v25 = vld [vmem:[%s4137_s2 + $0x40] sm:$0xff]  ;;  %v3212_v26 = vld [vmem:[%s4137_s2 + $0x48] sm:$0xff] }
  0x15   : > { %306 = vperm.xlu1 %3040, %v276_v5   ;;  %301 = vperm.xlu0 %3039, %v275_v6   ;;  %4184 = vst [vmem:[#allocation10_spill] sm:$0xff] %v3207_v25  ;;  %4185 = vst [vmem:[#allocation11_spill] sm:$0xff] %v3212_v26  ;;  %v3217_v27 = vld [vmem:[%s4137_s2 + $0x50] sm:$0xff]  ;;  %v3222_v28 = vld [vmem:[%s4137_s2 + $0x58] sm:$0xff] }
  0x16   : > { %4186 = vst [vmem:[#allocation12_spill] sm:$0xff] %v3217_v27  ;;  %4187 = vst [vmem:[#allocation13_spill] sm:$0xff] %v3222_v28  ;;  %v3227_v29 = vld [vmem:[%s4137_s2 + $0x60] sm:$0xff]  ;;  %v3232_v30 = vld [vmem:[%s4137_s2 + $0x68] sm:$0xff] }
  0x17   : > { %4188 = vst [vmem:[#allocation14_spill] sm:$0xff] %v3227_v29  ;;  %4189 = vst [vmem:[#allocation15_spill] sm:$0xff] %v3232_v30  ;;  %v3237_v31 = vld [vmem:[%s4137_s2 + $0x70] sm:$0xff]  ;;  %v3242_v32 = vld [vmem:[%s4137_s2 + $0x78] sm:$0xff] }
  0x18   : > { %4190 = vst [vmem:[#allocation16_spill] sm:$0xff] %v3237_v31  ;;  %4191 = vst [vmem:[#allocation17_spill] sm:$0xff] %v3242_v32  ;;  %v3247_v33 = vld [vmem:[%s4137_s2 + $0x80] sm:$0xff]  ;;  %v3252_v34 = vld [vmem:[%s4137_s2 + $0x88] sm:$0xff] }
  0x19   : > { %316 = vperm.xlu1 %3040, %v278_v7   ;;  %311 = vperm.xlu0 %3039, %v277_v8   ;;  %4192 = vst [vmem:[#allocation18_spill] sm:$0xff] %v3247_v33  ;;  %4193 = vst [vmem:[#allocation19_spill] sm:$0xff] %v3252_v34  ;;  %v3257_v35 = vld [vmem:[%s4137_s2 + $0x90] sm:$0xff]  ;;  %v3262_v36 = vld [vmem:[%s4137_s2 + $0x98] sm:$0xff] }
  0x1a   : > { %4194 = vst [vmem:[#allocation20_spill] sm:$0xff] %v3257_v35  ;;  %4195 = vst [vmem:[#allocation21_spill] sm:$0xff] %v3262_v36  ;;  %v3267_v37 = vld [vmem:[%s4137_s2 + $0xa0] sm:$0xff]  ;;  %v3272_v38 = vld [vmem:[%s4137_s2 + $0xa8] sm:$0xff] }
  0x1b   : > { %4196 = vst [vmem:[#allocation22_spill] sm:$0xff] %v3267_v37  ;;  %4197 = vst [vmem:[#allocation23_spill] sm:$0xff] %v3272_v38  ;;  %v3277_v39 = vld [vmem:[%s4137_s2 + $0xb0] sm:$0xff]  ;;  %v3282_v40 = vld [vmem:[%s4137_s2 + $0xb8] sm:$0xff] }
  0x1c   : > { %4198 = vst [vmem:[#allocation24_spill] sm:$0xff] %v3277_v39  ;;  %4199 = vst [vmem:[#allocation25_spill] sm:$0xff] %v3282_v40 }
  0x1d   : > { %334 = vperm.xlu1 %3040, %v320_v9   ;;  %329 = vperm.xlu0 %3039, %v319_v10  }
  0x21   : > { %344 = vperm.xlu1 %3040, %v322_v11   ;;  %339 = vperm.xlu0 %3039, %v321_v12  }
  0x25   : > { %354 = vperm.xlu1 %3040, %v324_v13   ;;  %349 = vperm.xlu0 %3039, %v323_v14  }
  0x29   : > { %364 = vperm.xlu1 %3040, %v326_v15   ;;  %359 = vperm.xlu0 %3039, %v325_v16  }
  0x88   : > { %v3284_v41 = vpop.permute.xlu1 %291  ;;  %v3286_v42 = vpop.permute.xlu0 %281 }
  0x8c   : > { %v3288_v43 = vpop.permute.xlu1 %296  ;;  %v3290_v44 = vpop.permute.xlu0 %286 }
  0x90   : > { %v3292_v45 = vpop.permute.xlu1 %306  ;;  %v3294_v46 = vpop.permute.xlu0 %301 }
  0x91   : > { %4200 = vst [vmem:[#allocation26_spill] sm:$0xff] %v3294_v46 }
  0x94   : > { %v3296_v47 = vpop.permute.xlu1 %316  ;;  %v3298_v48 = vpop.permute.xlu0 %311 }
  0x95   : > { %4201 = vst [vmem:[#allocation27_spill] sm:$0xff] %v3296_v47  ;;  %4202 = vst [vmem:[#allocation28_spill] sm:$0xff] %v3298_v48 }
  0x98   : > { %v3300_v49 = vpop.permute.xlu1 %334  ;;  %v3302_v50 = vpop.permute.xlu0 %329 }
  0x99   : > { %4203 = vst [vmem:[#allocation29_spill] sm:$0xff] %v3300_v49  ;;  %4204 = vst [vmem:[#allocation30_spill] sm:$0xff] %v3302_v50 }
  0x9c   : > { %v3304_v51 = vpop.permute.xlu1 %344  ;;  %v3306_v52 = vpop.permute.xlu0 %339 }
  0x9d   : > { %4205 = vst [vmem:[#allocation31_spill] sm:$0xff] %v3304_v51  ;;  %4206 = vst [vmem:[#allocation32_spill] sm:$0xff] %v3306_v52 }
  0xa0   : > { %v3308_v53 = vpop.permute.xlu1 %354  ;;  %v3310_v54 = vpop.permute.xlu0 %349 }
  0xa1   : > { %4207 = vst [vmem:[#allocation33_spill] sm:$0xff] %v3308_v53  ;;  %4208 = vst [vmem:[#allocation34_spill] sm:$0xff] %v3310_v54 }
  0xa4   : > { %v3312_v55 = vpop.permute.xlu1 %364  ;;  %v3314_v56 = vpop.permute.xlu0 %359 }
  0xa5   : > { %4209 = vst [vmem:[#allocation35_spill] sm:$0xff] %v3312_v55  ;;  %4210 = vst [vmem:[#allocation36_spill] sm:$0xff] %v3314_v56 }
  0xa6 LB: >> { %v4211_v40 = vld [vmem:[#allocation25_spill] sm:$0xff]  ;;  %v4212_v39 = vld [vmem:[#allocation24_spill] sm:$0xff]  ;;  %v4213_v38 = vld [vmem:[#allocation23_spill] sm:$0xff]  ;;  %vm400_vm0 = vcmask 785408   ;;  %s3326_s23 = sshll.u32 %s3055_s22, 6  ;;  %s3058_s25 = smov 127   ;;  %s3055_s22 = sphi %s3316_s22, %s372_s22  }
  0xa7   : >> { %v4214_v37 = vld [vmem:[#allocation22_spill] sm:$0xff]  ;;  %v4215_v36 = vld [vmem:[#allocation21_spill] sm:$0xff]  ;;  %v4216_v35 = vld [vmem:[#allocation20_spill] sm:$0xff]  ;;  %s3330_s24 = scalar_lea.vmem %s3152_s8, %s3326_s23  ;;  %s3350_s27 = scalar_lea.vmem %s3157_s11, %s3326_s23  ;;  %vm2105_vm1 = vcmask 228352  }
  0xa8   : >> { %v4217_v34 = vld [vmem:[#allocation19_spill] sm:$0xff]  ;;  %v4218_v33 = vld [vmem:[#allocation18_spill] sm:$0xff]  ;;  %v4219_v32 = vld [vmem:[#allocation17_spill] sm:$0xff]  ;;  %s4082_s28 = scalar_lea.vmem %s3177_s21, %s3326_s23  ;;  %s372_s22 = sadd.s32 1, %s3055_s22  }
  0xa9   : >> { %v4220_v31 = vld [vmem:[#allocation16_spill] sm:$0xff]  ;;  %v4221_v30 = vld [vmem:[#allocation15_spill] sm:$0xff]  ;;  %v4222_v29 = vld [vmem:[#allocation14_spill] sm:$0xff]  ;;  %p369_p4 = scmp.ge.s32.totalorder %s372_s22, 28  }
  0xaa   : >> { %v4223_v28 = vld [vmem:[#allocation13_spill] sm:$0xff]  ;;  %v4224_v27 = vld [vmem:[#allocation12_spill] sm:$0xff]  ;;  %v4225_v26 = vld [vmem:[#allocation11_spill] sm:$0xff] }
  0xab   : >> { %v4226_v25 = vld [vmem:[#allocation10_spill] sm:$0xff]  ;;  %v4227_v24 = vld [vmem:[#allocation9_spill] sm:$0xff]  ;;  %v4228_v23 = vld [vmem:[#allocation8_spill] sm:$0xff] }
  0xac   : >> { %v4229_v22 = vld [vmem:[#allocation7_spill] sm:$0xff]  ;;  %v4230_v21 = vld [vmem:[#allocation6_spill] sm:$0xff]  ;;  %v4231_v20 = vld [vmem:[#allocation5_spill] sm:$0xff]  ;;  %2611 = vmatprep.mubr.msk.f32.mxu0 %vm400_vm0, %v4226_v25 }
  0xad   : >> { %v4232_v19 = vld [vmem:[#allocation4_spill] sm:$0xff]  ;;  %v4233_v18 = vld [vmem:[#allocation3_spill] sm:$0xff]  ;;  %v4234_v17 = vld [vmem:[#allocation2_spill] sm:$0xff] }
  0xae   : >> { %2647 = vmatprep.mubr.msk.f32.mxu1 %vm400_vm0, %v4234_v17  ;;  %v3333_v57 = vld [vmem:[%s3330_s24 + $0x58] sm:$0xff]  ;;  %v3336_v58 = vld [vmem:[%s3330_s24 + $0x48] sm:$0xff]  ;;  %v3343_v59 = vld [vmem:[%s3330_s24 + $0x50] sm:$0xff] }
  0xaf   : >> { %693 = vrot.lane.b32.xlu0 %v3333_v57, %s3058_s25  ;;  %689 = vrot.lane.b32.xlu1 %v3336_v58, %s3058_s25  ;;  %v3346_v60 = vld [vmem:[%s3330_s24 + $0x40] sm:$0xff]  ;;  %v3360_v61 = vld [vmem:[%s3350_s27 + $0x58] sm:$0xff] }
  0xb0   : >> { %2623 = vmatprep.subr.mxu1 %v3333_v57  ;;  %v3363_v62 = vld [vmem:[%s3330_s24 + $0x38] sm:$0xff]  ;;  %v3366_v63 = vld [vmem:[%s3330_s24 + $0x30] sm:$0xff]  ;;  %2587 = vmatprep.subr.mxu0 %v3360_v61  ;;  %v3382_v1 = vld [vmem:[%s3330_s24 + $0x28] sm:$0xff] }
  0xb1   : >> { %2624 = vmatpush3.msra.mxu1 %v3333_v57  ;;  %v3371_v0 = vld [vmem:[%s3350_s27 + $0x50] sm:$0xff]  ;;  %2588 = vmatpush3.msra.mxu0 %v3360_v61  ;;  %v3385_v2 = vld [vmem:[%s3330_s24 + $0x20] sm:$0xff]  ;;  %v3388_v3 = vld [vmem:[%s3350_s27 + $0x48] sm:$0xff] }
  0xb2   : >> { %2625 = vmatprep.subr.mxu1 %v3343_v59  ;;  %2589 = vmatprep.subr.mxu0 %v3371_v0  ;;  %v3401_v4 = vld [vmem:[%s3350_s27 + $0x40] sm:$0xff]  ;;  %v378_v5 = vld [vmem:[%s3330_s24 + $0x18] sm:$0xff]  ;;  %v377_v6 = vld [vmem:[%s3330_s24 + $0x10] sm:$0xff] }
  0xb3   : >> { %691 = vrot.lane.b32.xlu0 %v3343_v59, %s3058_s25  ;;  %687 = vrot.lane.b32.xlu1 %v3346_v60, %s3058_s25  ;;  %v3408_v7 = vld [vmem:[%s3350_s27 + $0x38] sm:$0xff]  ;;  %v376_v8 = vld [vmem:[%s3330_s24 + $0x8] sm:$0xff] }
  0xb4   : >> { %2626 = vmatpush3.msra.mxu1 %v3343_v59  ;;  %2590 = vmatpush3.msra.mxu0 %v3371_v0  ;;  %v375_v9 = vld [vmem:[%s3330_s24] sm:$0xff]  ;;  %v3419_v10 = vld [vmem:[%s3350_s27 + $0x30] sm:$0xff]  ;;  %v3430_v11 = vld [vmem:[%s3350_s27 + $0x28] sm:$0xff] }
  0xb5   : >> { %2627 = vmatprep.subr.mxu1 %v3336_v58  ;;  %2591 = vmatprep.subr.mxu0 %v3388_v3  ;;  %v3435_v12 = vld [vmem:[%s3350_s27 + $0x20] sm:$0xff]  ;;  %v3444_v13 = vld [vmem:[%s3350_s27 + $0x18] sm:$0xff]  ;;  %v3454_v14 = vld [vmem:[%s3350_s27 + $0x10] sm:$0xff] }
  0xb6   : >> { %2628 = vmatpush3.msra.mxu1 %v3336_v58  ;;  %2592 = vmatpush3.msra.mxu0 %v3388_v3  ;;  %v3458_v15 = vld [vmem:[%s3350_s27 + $0x8] sm:$0xff]  ;;  %v3467_v16 = vld [vmem:[%s3350_s27] sm:$0xff]  ;;  %v3553_v56 = vld [vmem:[%s3350_s27 + $0x78] sm:$0xff] }
  0xb7   : >> { %685 = vrot.lane.b32.xlu0 %v3363_v62, %s3058_s25  ;;  %683 = vrot.lane.b32.xlu1 %v3366_v63, %s3058_s25  ;;  %v3556_v55 = vld [vmem:[%s3350_s27 + $0x70] sm:$0xff]  ;;  %v3563_v48 = vld [vmem:[%s3350_s27 + $0x68] sm:$0xff] }
  0xb8   : >> { %2629 = vmatprep.subr.mxu1 %v3346_v60  ;;  %2593 = vmatprep.subr.mxu0 %v3401_v4  ;;  %v3566_v47 = vld [vmem:[%s3350_s27 + $0x60] sm:$0xff] }
  0xb9   : >> { %2630 = vmatpush3.msra.mxu1 %v3346_v60  ;;  %2594 = vmatpush3.msra.mxu0 %v3401_v4 }
  0xba   : >> { %2631 = vmatprep.subr.mxu1 %v3363_v62  ;;  %2595 = vmatprep.subr.mxu0 %v3408_v7 }
  0xbb   : >> { %681 = vrot.lane.b32.xlu0 %v3382_v1, %s3058_s25  ;;  %679 = vrot.lane.b32.xlu1 %v3385_v2, %s3058_s25 }
  0xbc   : >> { %2632 = vmatpush3.msra.mxu1 %v3363_v62  ;;  %2596 = vmatpush3.msra.mxu0 %v3408_v7 }
  0xbd   : >> { %2633 = vmatprep.subr.mxu1 %v3366_v63  ;;  %2597 = vmatprep.subr.mxu0 %v3419_v10 }
  0xbe   : >> { %2634 = vmatpush3.msra.mxu1 %v3366_v63  ;;  %2598 = vmatpush3.msra.mxu0 %v3419_v10 }
  0xbf   : >> { %677 = vrot.lane.b32.xlu0 %v378_v5, %s3058_s25  ;;  %675 = vrot.lane.b32.xlu1 %v377_v6, %s3058_s25 }
  0xc0   : >> { %2635 = vmatprep.subr.mxu1 %v3382_v1  ;;  %2599 = vmatprep.subr.mxu0 %v3430_v11 }
  0xc1   : >> { %2636 = vmatpush3.msra.mxu1 %v3382_v1  ;;  %2600 = vmatpush3.msra.mxu0 %v3430_v11 }
  0xc2   : >> { %2637 = vmatprep.subr.mxu1 %v3385_v2  ;;  %2601 = vmatprep.subr.mxu0 %v3435_v12 }
  0xc3   : >> { %673 = vrot.lane.b32.xlu0 %v376_v8, %s3058_s25  ;;  %671 = vrot.lane.b32.xlu1 %v375_v9, %s3058_s25 }
  0xc4   : >> { %2638 = vmatpush3.msra.mxu1 %v3385_v2  ;;  %2602 = vmatpush3.msra.mxu0 %v3435_v12 }
  0xc5   : >> { %2639 = vmatprep.subr.mxu1 %v378_v5  ;;  %2603 = vmatprep.subr.mxu0 %v3444_v13 }
  0xc6   : >> { %2640 = vmatpush3.msra.mxu1 %v378_v5  ;;  %2604 = vmatpush3.msra.mxu0 %v3444_v13  ;;  %v3505_v5 = vld [vmem:[%s3330_s24 + $0x78] sm:$0xff] }
  0xc7   : >> { %1088 = vrot.lane.b32.xlu0 %v3360_v61, %s3058_s25  ;;  %1086 = vrot.lane.b32.xlu1 %v3371_v0, %s3058_s25 }
  0xc8   : >> { %2641 = vmatprep.subr.mxu1 %v377_v6  ;;  %2605 = vmatprep.subr.mxu0 %v3454_v14 }
  0xc9   : >> { %2642 = vmatpush3.msra.mxu1 %v377_v6  ;;  %2606 = vmatpush3.msra.mxu0 %v3454_v14  ;;  %v3508_v6 = vld [vmem:[%s3330_s24 + $0x70] sm:$0xff] }
  0xca   : >> { %2643 = vmatprep.subr.mxu1 %v376_v8  ;;  %2607 = vmatprep.subr.mxu0 %v3458_v15 }
  0xcb   : >> { %1084 = vrot.lane.b32.xlu0 %v3388_v3, %s3058_s25  ;;  %1082 = vrot.lane.b32.xlu1 %v3401_v4, %s3058_s25 }
  0xcc   : >> { %2644 = vmatpush3.msra.mxu1 %v376_v8  ;;  %2608 = vmatpush3.msra.mxu0 %v3458_v15  ;;  %v3523_v8 = vld [vmem:[%s3330_s24 + $0x68] sm:$0xff] }
  0xcd   : >> { %2645 = vmatprep.subr.mxu1 %v375_v9  ;;  %2609 = vmatprep.subr.mxu0 %v3467_v16 }
  0xce   : >> { %2646 = vmatpush3.msra.mxu1 %v375_v9  ;;  %2610 = vmatpush3.msra.mxu0 %v3467_v16  ;;  %v3526_v9 = vld [vmem:[%s3330_s24 + $0x60] sm:$0xff] }
  0xcf   : >> { %1080 = vrot.lane.b32.xlu0 %v3408_v7, %s3058_s25  ;;  %1078 = vrot.lane.b32.xlu1 %v3419_v10, %s3058_s25 }
  0xd0   : >> { %2648 = vmatmul.mubr.msk.f32.vlgmr.msra.gmra.mxu1 %vm400_vm0, %v4233_v18  ;;  %2612 = vmatmul.mubr.msk.f32.vlgmr.msra.gmra.mxu0 %vm400_vm0, %v4225_v26 }
  0xd1   : >> { %2650 = vmatprep.mubr.msk.f32.mxu1 %vm400_vm0, %v4232_v19  ;;  %2614 = vmatprep.mubr.msk.f32.mxu0 %vm400_vm0, %v4224_v27 }
  0xd3   : >> { %1076 = vrot.lane.b32.xlu0 %v3430_v11, %s3058_s25  ;;  %1074 = vrot.lane.b32.xlu1 %v3435_v12, %s3058_s25 }
  0xd4   : >> { %2651 = vmatmul.mubr.msk.f32.gmra.mxu1 %vm400_vm0, %v4231_v20  ;;  %2615 = vmatmul.mubr.msk.f32.gmra.mxu0 %vm400_vm0, %v4223_v28 }
  0xd5   : >> { %2653 = vmatprep.mubr.msk.f32.mxu1 %vm400_vm0, %v4230_v21  ;;  %2617 = vmatprep.mubr.msk.f32.mxu0 %vm400_vm0, %v4222_v29 }
  0xd7   : >> { %1072 = vrot.lane.b32.xlu0 %v3444_v13, %s3058_s25  ;;  %1070 = vrot.lane.b32.xlu1 %v3454_v14, %s3058_s25 }
  0xd8   : >> { %2654 = vmatmul.mubr.msk.f32.gmra.mxu1 %vm400_vm0, %v4229_v22  ;;  %2618 = vmatmul.mubr.msk.f32.gmra.mxu0 %vm400_vm0, %v4221_v30 }
  0xd9   : >> { %2656 = vmatprep.mubr.msk.f32.mxu1 %vm400_vm0, %v4228_v23  ;;  %2620 = vmatprep.mubr.msk.f32.mxu0 %vm400_vm0, %v4220_v31 }
  0xdb   : >> { %1068 = vrot.lane.b32.xlu0 %v3458_v15, %s3058_s25  ;;  %1066 = vrot.lane.b32.xlu1 %v3467_v16, %s3058_s25 }
  0xdc   : >> { %2657 = vmatmul.mubr.msk.f32.gmra.mxu1 %vm400_vm0, %v4227_v24  ;;  %2621 = vmatmul.mubr.msk.f32.gmra.mxu0 %vm400_vm0, %v4219_v32 }
  0xdd   : >> { %2719 = vmatprep.mubr.msk.f32.mxu1 %vm400_vm0, %v4226_v25  ;;  %2683 = vmatprep.mubr.msk.f32.mxu0 %vm400_vm0, %v4218_v33 }
  0xdf   : >> { %1542 = vrot.lane.b32.xlu0 %v3505_v5, %s3058_s25  ;;  %1540 = vrot.lane.b32.xlu1 %v3508_v6, %s3058_s25 }
  0xe3   : >> { %1538 = vrot.lane.b32.xlu0 %v3523_v8, %s3058_s25  ;;  %1536 = vrot.lane.b32.xlu1 %v3526_v9, %s3058_s25 }
  0xe7   : >> { %1534 = vrot.lane.b32.xlu0 %v3333_v57, %s3058_s25  ;;  %1532 = vrot.lane.b32.xlu1 %v3343_v59, %s3058_s25 }
  0xeb   : >> { %1530 = vrot.lane.b32.xlu0 %v3336_v58, %s3058_s25  ;;  %1528 = vrot.lane.b32.xlu1 %v3346_v60, %s3058_s25 }
  0xef   : >> { %1526 = vrot.lane.b32.xlu0 %v3363_v62, %s3058_s25  ;;  %1524 = vrot.lane.b32.xlu1 %v3366_v63, %s3058_s25 }
  0xf3   : >> { %1522 = vrot.lane.b32.xlu0 %v3382_v1, %s3058_s25  ;;  %1520 = vrot.lane.b32.xlu1 %v3385_v2, %s3058_s25 }
  0xf7   : >> { %1913 = vrot.lane.b32.xlu0 %v3553_v56, %s3058_s25  ;;  %1911 = vrot.lane.b32.xlu1 %v3556_v55, %s3058_s25 }
  0xfb   : >> { %1909 = vrot.lane.b32.xlu0 %v3563_v48, %s3058_s25  ;;  %1907 = vrot.lane.b32.xlu1 %v3566_v47, %s3058_s25 }
  0xff   : >> { %1905 = vrot.lane.b32.xlu0 %v3360_v61, %s3058_s25  ;;  %1903 = vrot.lane.b32.xlu1 %v3371_v0, %s3058_s25 }
 0x103   : >> { %1901 = vrot.lane.b32.xlu0 %v3388_v3, %s3058_s25  ;;  %1899 = vrot.lane.b32.xlu1 %v3401_v4, %s3058_s25 }
 0x107   : >> { %1897 = vrot.lane.b32.xlu0 %v3408_v7, %s3058_s25  ;;  %1895 = vrot.lane.b32.xlu1 %v3419_v10, %s3058_s25 }
 0x10b   : >> { %1893 = vrot.lane.b32.xlu0 %v3430_v11, %s3058_s25  ;;  %1891 = vrot.lane.b32.xlu1 %v3435_v12, %s3058_s25 }
 0x121   : >> { %v694_v54 = vpop.permute.xlu0 %693  ;;  %v690_v46 = vpop.permute.xlu1 %689 }
 0x122   : >> { %2659 = vmatprep.subr.mxu0 %v694_v54  ;;  %2695 = vmatprep.subr.mxu1 %v694_v54 }
 0x123   : >> { %2660 = vmatpush3.msra.mxu0 %v694_v54  ;;  %2696 = vmatpush3.msra.mxu1 %v694_v54 }
 0x125   : >> { %v692_v53 = vpop.permute.xlu0 %691  ;;  %v688_v52 = vpop.permute.xlu1 %687 }
 0x126   : >> { %2661 = vmatprep.subr.mxu0 %v692_v53  ;;  %2697 = vmatprep.subr.mxu1 %v692_v53 }
 0x127   : >> { %2662 = vmatpush3.msra.mxu0 %v692_v53  ;;  %2698 = vmatpush3.msra.mxu1 %v692_v53 }
 0x128   : >> { %2663 = vmatprep.subr.mxu0 %v690_v46  ;;  %2699 = vmatprep.subr.mxu1 %v690_v46 }
 0x129   : >> { %2664 = vmatpush3.msra.mxu0 %v690_v46  ;;  %2700 = vmatpush3.msra.mxu1 %v690_v46  ;;  %v686_v51 = vpop.permute.xlu0 %685  ;;  %v684_v50 = vpop.permute.xlu1 %683 }
 0x12a   : >> { %2665 = vmatprep.subr.mxu0 %v688_v52  ;;  %2701 = vmatprep.subr.mxu1 %v688_v52 }
 0x12b   : >> { %2666 = vmatpush3.msra.mxu0 %v688_v52  ;;  %2702 = vmatpush3.msra.mxu1 %v688_v52 }
 0x12c   : >> { %2667 = vmatprep.subr.mxu0 %v686_v51  ;;  %2703 = vmatprep.subr.mxu1 %v686_v51 }
 0x12d   : >> { %2668 = vmatpush3.msra.mxu0 %v686_v51  ;;  %2704 = vmatpush3.msra.mxu1 %v686_v51  ;;  %v682_v54 = vpop.permute.xlu0 %681  ;;  %v680_v49 = vpop.permute.xlu1 %679 }
 0x12e   : >> { %2669 = vmatprep.subr.mxu0 %v684_v50  ;;  %2705 = vmatprep.subr.mxu1 %v684_v50 }
 0x12f   : >> { %2670 = vmatpush3.msra.mxu0 %v684_v50  ;;  %2706 = vmatpush3.msra.mxu1 %v684_v50 }
 0x130   : >> { %2671 = vmatprep.subr.mxu0 %v682_v54  ;;  %2707 = vmatprep.subr.mxu1 %v682_v54 }
 0x131   : >> { %2672 = vmatpush3.msra.mxu0 %v682_v54  ;;  %2708 = vmatpush3.msra.mxu1 %v682_v54  ;;  %v678_v46 = vpop.permute.xlu0 %677  ;;  %v676_v53 = vpop.permute.xlu1 %675 }
 0x132   : >> { %2673 = vmatprep.subr.mxu0 %v680_v49  ;;  %2709 = vmatprep.subr.mxu1 %v680_v49 }
 0x133   : >> { %2674 = vmatpush3.msra.mxu0 %v680_v49  ;;  %2710 = vmatpush3.msra.mxu1 %v680_v49 }
 0x134   : >> { %2675 = vmatprep.subr.mxu0 %v678_v46  ;;  %2711 = vmatprep.subr.mxu1 %v678_v46 }
 0x135   : >> { %2676 = vmatpush3.msra.mxu0 %v678_v46  ;;  %2712 = vmatpush3.msra.mxu1 %v678_v46  ;;  %v674_v51 = vpop.permute.xlu0 %673  ;;  %v672_v52 = vpop.permute.xlu1 %671 }
 0x136   : >> { %2677 = vmatprep.subr.mxu0 %v676_v53  ;;  %2713 = vmatprep.subr.mxu1 %v676_v53 }
 0x137   : >> { %2678 = vmatpush3.msra.mxu0 %v676_v53  ;;  %2714 = vmatpush3.msra.mxu1 %v676_v53 }
 0x138   : >> { %2679 = vmatprep.subr.mxu0 %v674_v51  ;;  %2715 = vmatprep.subr.mxu1 %v674_v51 }
 0x139   : >> { %2680 = vmatpush3.msra.mxu0 %v674_v51  ;;  %2716 = vmatpush3.msra.mxu1 %v674_v51  ;;  %v1089_v50 = vpop.permute.xlu0 %1088  ;;  %v1087_v54 = vpop.permute.xlu1 %1086 }
 0x13a   : >> { %2681 = vmatprep.subr.mxu0 %v672_v52  ;;  %2717 = vmatprep.subr.mxu1 %v672_v52 }
 0x13b   : >> { %2682 = vmatpush3.msra.mxu0 %v672_v52  ;;  %2718 = vmatpush3.msra.mxu1 %v672_v52 }
 0x13c   : >> { %2684 = vmatmul.mubr.msk.f32.vlgmr.msra.gmra.mxu0 %vm400_vm0, %v4217_v34  ;;  %2731 = vmatprep.subr.mxu0 %v3360_v61 }
 0x13d   : >> { %2767 = vmatprep.subr.mxu1 %v1089_v50  ;;  %2732 = vmatpush3.msra.mxu0 %v3360_v61  ;;  %v1085_v49 = vpop.permute.xlu0 %1084  ;;  %v1083_v46 = vpop.permute.xlu1 %1082 }
 0x13e   : >> { %2720 = vmatmul.mubr.msk.f32.vlgmr.msra.gmra.mxu1 %vm400_vm0, %v4225_v26  ;;  %2733 = vmatprep.subr.mxu0 %v3371_v0 }
 0x13f   : >> { %2768 = vmatpush3.msra.mxu1 %v1089_v50  ;;  %2686 = vmatprep.mubr.msk.f32.mxu0 %vm400_vm0, %v4216_v35 }
 0x140   : >> { %2769 = vmatprep.subr.mxu1 %v1087_v54  ;;  %2734 = vmatpush3.msra.mxu0 %v3371_v0 }
 0x141   : >> { %2770 = vmatpush3.msra.mxu1 %v1087_v54  ;;  %2687 = vmatmul.mubr.msk.f32.gmra.mxu0 %vm400_vm0, %v4215_v36  ;;  %v1081_v53 = vpop.permute.xlu0 %1080  ;;  %v1079_v51 = vpop.permute.xlu1 %1078 }
 0x142   : >> { %2735 = vmatprep.subr.mxu0 %v3388_v3  ;;  %2771 = vmatprep.subr.mxu1 %v1085_v49 }
 0x143   : >> { %2736 = vmatpush3.msra.mxu0 %v3388_v3  ;;  %2772 = vmatpush3.msra.mxu1 %v1085_v49 }
 0x144   : >> { %2737 = vmatprep.subr.mxu0 %v3401_v4  ;;  %2773 = vmatprep.subr.mxu1 %v1083_v46 }
 0x145   : >> { %2689 = vmatprep.mubr.msk.f32.mxu0 %vm400_vm0, %v4214_v37  ;;  %2738 = vmatpush3.msra.mxu0 %v3401_v4  ;;  %v1077_v52 = vpop.permute.xlu0 %1076  ;;  %v1075_v50 = vpop.permute.xlu1 %1074 }
 0x146   : >> { %2774 = vmatpush3.msra.mxu1 %v1083_v46  ;;  %2690 = vmatmul.mubr.msk.f32.gmra.mxu0 %vm400_vm0, %v4213_v38 }
 0x147   : >> { %2739 = vmatprep.subr.mxu0 %v3408_v7  ;;  %2775 = vmatprep.subr.mxu1 %v1081_v53 }
 0x148   : >> { %2740 = vmatpush3.msra.mxu0 %v3408_v7  ;;  %2776 = vmatpush3.msra.mxu1 %v1081_v53 }
 0x149   : >> { %2741 = vmatprep.subr.mxu0 %v3419_v10  ;;  %2777 = vmatprep.subr.mxu1 %v1079_v51  ;;  %v1073_v54 = vpop.permute.xlu0 %1072  ;;  %v1071_v49 = vpop.permute.xlu1 %1070 }
 0x14a   : >> { %2692 = vmatprep.mubr.msk.f32.mxu0 %vm400_vm0, %v4212_v39  ;;  %2742 = vmatpush3.msra.mxu0 %v3419_v10 }
 0x14b   : >> { %2778 = vmatpush3.msra.mxu1 %v1079_v51  ;;  %2693 = vmatmul.mubr.msk.f32.gmra.mxu0 %vm400_vm0, %v4211_v40 }
 0x14c   : >> { %2722 = vmatprep.mubr.msk.f32.mxu1 %vm400_vm0, %v4224_v27  ;;  %2743 = vmatprep.subr.mxu0 %v3430_v11 }
 0x14d   : >> { %2779 = vmatprep.subr.mxu1 %v1077_v52  ;;  %2744 = vmatpush3.msra.mxu0 %v3430_v11  ;;  %v1069_v46 = vpop.permute.xlu0 %1068 }
 0x14e   : >> { %2723 = vmatmul.mubr.msk.f32.gmra.mxu1 %vm400_vm0, %v4223_v28  ;;  %2745 = vmatprep.subr.mxu0 %v3435_v12 }
 0x14f   : >> { %2780 = vmatpush3.msra.mxu1 %v1077_v52  ;;  %2746 = vmatpush3.msra.mxu0 %v3435_v12 }
 0x150   : >> { %2781 = vmatprep.subr.mxu1 %v1075_v50  ;;  %2725 = vmatprep.mubr.msk.f32.mxu1 %vm400_vm0, %v4222_v29 }
 0x151   : >> { %2782 = vmatpush3.msra.mxu1 %v1075_v50  ;;  %2747 = vmatprep.subr.mxu0 %v3444_v13 }
 0x152   : >> { %2783 = vmatprep.subr.mxu1 %v1073_v54  ;;  %2748 = vmatpush3.msra.mxu0 %v3444_v13  ;;  %v1067_v13 = vpop.permute.xlu1 %1066 }
 0x153   : >> { %2726 = vmatmul.mubr.msk.f32.gmra.mxu1 %vm400_vm0, %v4221_v30  ;;  %2749 = vmatprep.subr.mxu0 %v3454_v14 }
 0x154   : >> { %2784 = vmatpush3.msra.mxu1 %v1073_v54  ;;  %2750 = vmatpush3.msra.mxu0 %v3454_v14 }
 0x155   : >> { %2785 = vmatprep.subr.mxu1 %v1071_v49  ;;  %2728 = vmatprep.mubr.msk.f32.mxu1 %vm400_vm0, %v4220_v31 }
 0x156   : >> { %2786 = vmatpush3.msra.mxu1 %v1071_v49  ;;  %2751 = vmatprep.subr.mxu0 %v3458_v15 }
 0x157   : >> { %2787 = vmatprep.subr.mxu1 %v1069_v46  ;;  %2752 = vmatpush3.msra.mxu0 %v3458_v15 }
 0x158   : >> { %2729 = vmatmul.mubr.msk.f32.gmra.mxu1 %vm400_vm0, %v4219_v32  ;;  %2753 = vmatprep.subr.mxu0 %v3467_v16 }
 0x159   : >> { %2788 = vmatpush3.msra.mxu1 %v1069_v46  ;;  %2754 = vmatpush3.msra.mxu0 %v3467_v16 }
 0x15a   : >> { %2789 = vmatprep.subr.mxu1 %v1067_v13  ;;  %2755 = vmatprep.mubr.msk.f32.mxu0 %vm400_vm0, %v4234_v17 }
 0x15b   : >> { %2790 = vmatpush3.msra.mxu1 %v1067_v13  ;;  %2756 = vmatmul.mubr.msk.f32.vlgmr.msra.gmra.mxu0 %vm400_vm0, %v4233_v18 }
 0x15c   : >> { %2791 = vmatprep.mubr.msk.f32.mxu1 %vm400_vm0, %v4218_v33  ;;  %2803 = vmatprep.subr.mxu0 %v3553_v56 }
 0x15d   : >> { %2839 = vmatprep.subr.mxu1 %v3505_v5  ;;  %2792 = vmatmul.mubr.msk.f32.vlgmr.msra.gmra.mxu1 %vm400_vm0, %v4217_v34 }
 0x15e   : >> { %2804 = vmatpush3.msra.mxu0 %v3553_v56  ;;  %2840 = vmatpush3.msra.mxu1 %v3505_v5 }
 0x15f   : >> { %2805 = vmatprep.subr.mxu0 %v3556_v55  ;;  %2841 = vmatprep.subr.mxu1 %v3508_v6 }
 0x160   : >> { %2758 = vmatprep.mubr.msk.f32.mxu0 %vm400_vm0, %v4232_v19  ;;  %2806 = vmatpush3.msra.mxu0 %v3556_v55 }
 0x161   : >> { %2842 = vmatpush3.msra.mxu1 %v3508_v6  ;;  %2759 = vmatmul.mubr.msk.f32.gmra.mxu0 %vm400_vm0, %v4231_v20 }
 0x162   : >> { %2807 = vmatprep.subr.mxu0 %v3563_v48  ;;  %2843 = vmatprep.subr.mxu1 %v3523_v8 }
 0x163   : >> { %2794 = vmatprep.mubr.msk.f32.mxu1 %vm400_vm0, %v4216_v35  ;;  %2808 = vmatpush3.msra.mxu0 %v3563_v48 }
 0x164   : >> { %2844 = vmatpush3.msra.mxu1 %v3523_v8  ;;  %2809 = vmatprep.subr.mxu0 %v3566_v47 }
 0x165   : >> { %2795 = vmatmul.mubr.msk.f32.gmra.mxu1 %vm400_vm0, %v4215_v36  ;;  %2845 = vmatprep.subr.mxu1 %v3526_v9 }
 0x166   : >> { %2761 = vmatprep.mubr.msk.f32.mxu0 %vm400_vm0, %v4230_v21  ;;  %2810 = vmatpush3.msra.mxu0 %v3566_v47 }
 0x167   : >> { %2846 = vmatpush3.msra.mxu1 %v3526_v9  ;;  %2762 = vmatmul.mubr.msk.f32.gmra.mxu0 %vm400_vm0, %v4229_v22 }
 0x168   : >> { %2811 = vmatprep.subr.mxu0 %v3360_v61  ;;  %2847 = vmatprep.subr.mxu1 %v3333_v57 }
 0x169   : >> { %2797 = vmatprep.mubr.msk.f32.mxu1 %vm400_vm0, %v4214_v37  ;;  %2812 = vmatpush3.msra.mxu0 %v3360_v61 }
 0x16a   : >> { %2848 = vmatpush3.msra.mxu1 %v3333_v57  ;;  %2813 = vmatprep.subr.mxu0 %v3371_v0  ;;  %v1543_v57 = vpop.permute.xlu0 %1542 }
 0x16b   : >> { %2798 = vmatmul.mubr.msk.f32.gmra.mxu1 %vm400_vm0, %v4213_v38  ;;  %2849 = vmatprep.subr.mxu1 %v3343_v59 }
 0x16c   : >> { %2764 = vmatprep.mubr.msk.f32.mxu0 %vm400_vm0, %v4228_v23  ;;  %2814 = vmatpush3.msra.mxu0 %v3371_v0 }
 0x16d   : >> { %2850 = vmatpush3.msra.mxu1 %v3343_v59  ;;  %2765 = vmatmul.mubr.msk.f32.gmra.mxu0 %vm400_vm0, %v4227_v24  ;;  %v1541_v59 = vpop.permute.xlu1 %1540 }
 0x16e   : >> { %2815 = vmatprep.subr.mxu0 %v3388_v3  ;;  %2851 = vmatprep.subr.mxu1 %v3336_v58 }
 0x16f   : >> { %2800 = vmatprep.mubr.msk.f32.mxu1 %vm400_vm0, %v4212_v39  ;;  %2816 = vmatpush3.msra.mxu0 %v3388_v3 }
 0x170   : >> { %2852 = vmatpush3.msra.mxu1 %v3336_v58  ;;  %2817 = vmatprep.subr.mxu0 %v3401_v4  ;;  %v1539_v58 = vpop.permute.xlu0 %1538 }
 0x171   : >> { %2801 = vmatmul.mubr.msk.f32.gmra.mxu1 %vm400_vm0, %v4211_v40  ;;  %2853 = vmatprep.subr.mxu1 %v3346_v60 }
 0x172   : >> { %2818 = vmatpush3.msra.mxu0 %v3401_v4  ;;  %2854 = vmatpush3.msra.mxu1 %v3346_v60  ;;  %v1537_v60 = vpop.permute.xlu1 %1536 }
 0x173   : >> { %2819 = vmatprep.subr.mxu0 %v3408_v7  ;;  %2855 = vmatprep.subr.mxu1 %v3363_v62 }
 0x174   : >> { %2820 = vmatpush3.msra.mxu0 %v3408_v7  ;;  %2856 = vmatpush3.msra.mxu1 %v3363_v62  ;;  %v1535_v62 = vpop.permute.xlu0 %1534 }
 0x175   : >> { %2821 = vmatprep.subr.mxu0 %v3419_v10  ;;  %2857 = vmatprep.subr.mxu1 %v3366_v63 }
 0x176   : >> { %2822 = vmatpush3.msra.mxu0 %v3419_v10  ;;  %2858 = vmatpush3.msra.mxu1 %v3366_v63  ;;  %v1533_v63 = vpop.permute.xlu1 %1532 }
 0x177   : >> { %2823 = vmatprep.subr.mxu0 %v3430_v11  ;;  %2859 = vmatprep.subr.mxu1 %v3382_v1 }
 0x178   : >> { %2824 = vmatpush3.msra.mxu0 %v3430_v11  ;;  %2860 = vmatpush3.msra.mxu1 %v3382_v1  ;;  %v1531_v1 = vpop.permute.xlu0 %1530 }
 0x179   : >> { %2825 = vmatprep.subr.mxu0 %v3435_v12  ;;  %2861 = vmatprep.subr.mxu1 %v3385_v2 }
 0x17a   : >> { %2826 = vmatpush3.msra.mxu0 %v3435_v12  ;;  %2827 = vmatprep.mubr.msk.f32.mxu0 %vm400_vm0, %v4226_v25 }
 0x17b   : >> { %2862 = vmatpush3.msra.mxu1 %v3385_v2  ;;  %2863 = vmatprep.mubr.msk.f32.mxu1 %vm400_vm0, %v4234_v17  ;;  %v1529_v2 = vpop.permute.xlu1 %1528 }
 0x17c   : >> { %2828 = vmatmul.mubr.msk.f32.vlgmr.msra.gmra.mxu0 %vm400_vm0, %v4225_v26  ;;  %2864 = vmatmul.mubr.msk.f32.vlgmr.msra.gmra.mxu1 %vm400_vm0, %v4233_v18  ;;  %v1527_v14 = vpop.permute.xlu0 %1526 }
 0x17d   : >> { %2875 = vmatprep.subr.mxu0 %v1543_v57  ;;  %2911 = vmatprep.subr.mxu1 %v1543_v57 }
 0x17e   : >> { %2876 = vmatpush3.msra.mxu0 %v1543_v57  ;;  %2912 = vmatpush3.msra.mxu1 %v1543_v57 }
 0x17f   : >> { %2877 = vmatprep.subr.mxu0 %v1541_v59  ;;  %2913 = vmatprep.subr.mxu1 %v1541_v59  ;;  %v1525_v15 = vpop.permute.xlu1 %1524 }
 0x180   : >> { %2878 = vmatpush3.msra.mxu0 %v1541_v59  ;;  %2914 = vmatpush3.msra.mxu1 %v1541_v59  ;;  %v1523_v16 = vpop.permute.xlu0 %1522 }
 0x181   : >> { %2879 = vmatprep.subr.mxu0 %v1539_v58  ;;  %2915 = vmatprep.subr.mxu1 %v1539_v58 }
 0x182   : >> { %2880 = vmatpush3.msra.mxu0 %v1539_v58  ;;  %2916 = vmatpush3.msra.mxu1 %v1539_v58 }
 0x183   : >> { %2881 = vmatprep.subr.mxu0 %v1537_v60  ;;  %2917 = vmatprep.subr.mxu1 %v1537_v60  ;;  %v1521_v6 = vpop.permute.xlu1 %1520 }
 0x184   : >> { %2882 = vmatpush3.msra.mxu0 %v1537_v60  ;;  %2918 = vmatpush3.msra.mxu1 %v1537_v60  ;;  %v1914_v51 = vpop.permute.xlu0 %1913 }
 0x185   : >> { %2883 = vmatprep.subr.mxu0 %v1535_v62  ;;  %2919 = vmatprep.subr.mxu1 %v1535_v62 }
 0x186   : >> { %2884 = vmatpush3.msra.mxu0 %v1535_v62  ;;  %2920 = vmatpush3.msra.mxu1 %v1535_v62 }
 0x187   : >> { %2830 = vmatprep.mubr.msk.f32.mxu0 %vm400_vm0, %v4224_v27  ;;  %2866 = vmatprep.mubr.msk.f32.mxu1 %vm400_vm0, %v4232_v19  ;;  %v1912_v49 = vpop.permute.xlu1 %1911 }
 0x188   : >> { %2885 = vmatprep.subr.mxu0 %v1533_v63  ;;  %2921 = vmatprep.subr.mxu1 %v1533_v63  ;;  %v1910_v60 = vpop.permute.xlu0 %1909 }
 0x189   : >> { %2831 = vmatmul.mubr.msk.f32.gmra.mxu0 %vm400_vm0, %v4223_v28  ;;  %2867 = vmatmul.mubr.msk.f32.gmra.mxu1 %vm400_vm0, %v4231_v20 }
 0x18a   : >> { %2886 = vmatpush3.msra.mxu0 %v1533_v63  ;;  %2922 = vmatpush3.msra.mxu1 %v1533_v63 }
 0x18b   : >> { %2887 = vmatprep.subr.mxu0 %v1531_v1  ;;  %2923 = vmatprep.subr.mxu1 %v1531_v1 }
 0x18c   : >> { %2888 = vmatpush3.msra.mxu0 %v1531_v1  ;;  %2924 = vmatpush3.msra.mxu1 %v1531_v1 }
 0x18d   : >> { %2833 = vmatprep.mubr.msk.f32.mxu0 %vm400_vm0, %v4222_v29  ;;  %2869 = vmatprep.mubr.msk.f32.mxu1 %vm400_vm0, %v4230_v21 }
 0x18e   : >> { %2889 = vmatprep.subr.mxu0 %v1529_v2  ;;  %2925 = vmatprep.subr.mxu1 %v1529_v2 }
 0x18f   : >> { %2834 = vmatmul.mubr.msk.f32.gmra.mxu0 %vm400_vm0, %v4221_v30  ;;  %2870 = vmatmul.mubr.msk.f32.gmra.mxu1 %vm400_vm0, %v4229_v22 }
 0x190   : >> { %2890 = vmatpush3.msra.mxu0 %v1529_v2  ;;  %2926 = vmatpush3.msra.mxu1 %v1529_v2  ;;  %v2649_v5 = vpop.f32.mrf.mxu1  ;;  %v2613_v9 = vpop.f32.mrf.mxu0 }
 0x191   : >> { %2891 = vmatprep.subr.mxu0 %v1527_v14  ;;  %2927 = vmatprep.subr.mxu1 %v1527_v14  ;;  %v3752_v52 = vadd.f32 %v2649_v5, %v2613_v9 }
 0x192   : >> { %2892 = vmatpush3.msra.mxu0 %v1527_v14  ;;  %2928 = vmatpush3.msra.mxu1 %v1527_v14  ;;  %v620_v8 = vpop.f32.mrf.mxu1  ;;  %v491_v50 = vpop.f32.mrf.mxu0 }
 0x193   : >> { %2836 = vmatprep.mubr.msk.f32.mxu0 %vm400_vm0, %v4220_v31  ;;  %2872 = vmatprep.mubr.msk.f32.mxu1 %vm400_vm0, %v4228_v23  ;;  %v3754_v46 = vadd.f32 %v620_v8, %v491_v50  ;;  %v1908_v14 = vpop.permute.xlu1 %1907  ;;  %v1906_v8 = vpop.permute.xlu0 %1905 }
 0x194   : >> { %2893 = vmatprep.subr.mxu0 %v1525_v15  ;;  %2929 = vmatprep.subr.mxu1 %v1525_v15  ;;  %v2652_v53 = vpop.f32.mrf.mxu1  ;;  %v2616_v13 = vpop.f32.mrf.mxu0 }
 0x195   : >> { %2837 = vmatmul.mubr.msk.f32.gmra.mxu0 %vm400_vm0, %v4219_v32  ;;  %2873 = vmatmul.mubr.msk.f32.gmra.mxu1 %vm400_vm0, %v4227_v24  ;;  %v3756_v59 = vadd.f32 %v2652_v53, %v2616_v13 }
 0x196   : >> { %2894 = vmatpush3.msra.mxu0 %v1525_v15  ;;  %2930 = vmatpush3.msra.mxu1 %v1525_v15  ;;  %v630_v54 = vpop.f32.mrf.mxu1  ;;  %v501_v58 = vpop.f32.mrf.mxu0 }
 0x197   : >> { %2895 = vmatprep.subr.mxu0 %v1523_v16  ;;  %2931 = vmatprep.subr.mxu1 %v1523_v16  ;;  %v3762_v62 = vadd.f32 %v630_v54, %v501_v58  ;;  %v1904_v9 = vpop.permute.xlu1 %1903 }
 0x198   : >> { %2896 = vmatpush3.msra.mxu0 %v1523_v16  ;;  %2932 = vmatpush3.msra.mxu1 %v1523_v16  ;;  %v2655_v57 = vpop.f32.mrf.mxu1  ;;  %v2619_v63 = vpop.f32.mrf.mxu0 }
 0x199   : >> { %2897 = vmatprep.subr.mxu0 %v1521_v6  ;;  %2933 = vmatprep.subr.mxu1 %v1521_v6  ;;  %v3768_v2 = vadd.f32 %v2655_v57, %v2619_v63 }
 0x19a   : >> { %2898 = vmatpush3.msra.mxu0 %v1521_v6  ;;  %2899 = vmatprep.mubr.msk.f32.mxu0 %vm400_vm0, %v4218_v33  ;;  %v640_v1 = vpop.f32.mrf.mxu1  ;;  %v511_v15 = vpop.f32.mrf.mxu0 }
 0x19b   : >> { %2934 = vmatpush3.msra.mxu1 %v1521_v6  ;;  %2900 = vmatmul.mubr.msk.f32.vlgmr.msra.gmra.mxu0 %vm400_vm0, %v4217_v34  ;;  %v3775_v16 = vadd.f32 %v640_v1, %v511_v15 }
 0x19c   : >> { %2935 = vmatprep.mubr.msk.f32.mxu1 %vm400_vm0, %v4226_v25  ;;  %2947 = vmatprep.subr.mxu0 %v3553_v56  ;;  %v2622_v5 = vpop.f32.mrf.mxu0 }
 0x19d   : >> { %2983 = vmatprep.subr.mxu1 %v1914_v51  ;;  %2948 = vmatpush3.msra.mxu0 %v3553_v56  ;;  %v2658_v56 = vpop.f32.mrf.mxu1 }
 0x19e   : >> { %2936 = vmatmul.mubr.msk.f32.vlgmr.msra.gmra.mxu1 %vm400_vm0, %v4225_v26  ;;  %2949 = vmatprep.subr.mxu0 %v3556_v55  ;;  %v3780_v6 = vadd.f32 %v2658_v56, %v2622_v5 }
 0x19f   : >> { %2984 = vmatpush3.msra.mxu1 %v1914_v51  ;;  %2902 = vmatprep.mubr.msk.f32.mxu0 %vm400_vm0, %v4216_v35  ;;  %v3866_v63 = vpop.f32.mrf.mxu1 }
 0x1a0   : >> { %2985 = vmatprep.subr.mxu1 %v1912_v49  ;;  %2950 = vmatpush3.msra.mxu0 %v3556_v55 }
 0x1a1   : >> { %2986 = vmatpush3.msra.mxu1 %v1912_v49  ;;  %2903 = vmatmul.mubr.msk.f32.gmra.mxu0 %vm400_vm0, %v4215_v36 }
 0x1a2   : >> { %2951 = vmatprep.subr.mxu0 %v3563_v48  ;;  %2987 = vmatprep.subr.mxu1 %v1910_v60 }
 0x1a3   : >> { %2952 = vmatpush3.msra.mxu0 %v3563_v48  ;;  %2988 = vmatpush3.msra.mxu1 %v1910_v60  ;;  %v1902_v48 = vpop.permute.xlu0 %1901 }
 0x1a4   : >> { %2953 = vmatprep.subr.mxu0 %v3566_v47  ;;  %2989 = vmatprep.subr.mxu1 %v1908_v14 }
 0x1a5   : >> { %2905 = vmatprep.mubr.msk.f32.mxu0 %vm400_vm0, %v4214_v37  ;;  %2954 = vmatpush3.msra.mxu0 %v3566_v47  ;;  %v1900_v47 = vpop.permute.xlu1 %1899 }
 0x1a6   : >> { %2990 = vmatpush3.msra.mxu1 %v1908_v14  ;;  %2906 = vmatmul.mubr.msk.f32.gmra.mxu0 %vm400_vm0, %v4213_v38 }
 0x1a7   : >> { %2955 = vmatprep.subr.mxu0 %v3360_v61  ;;  %2991 = vmatprep.subr.mxu1 %v1906_v8  ;;  %v1898_v55 = vpop.permute.xlu0 %1897 }
 0x1a8   : >> { %2956 = vmatpush3.msra.mxu0 %v3360_v61  ;;  %2992 = vmatpush3.msra.mxu1 %v1906_v8 }
 0x1a9   : >> { %2957 = vmatprep.subr.mxu0 %v3371_v0  ;;  %2993 = vmatprep.subr.mxu1 %v1904_v9  ;;  %v1896_v61 = vpop.permute.xlu1 %1895 }
 0x1aa   : >> { %2908 = vmatprep.mubr.msk.f32.mxu0 %vm400_vm0, %v4212_v39  ;;  %2938 = vmatprep.mubr.msk.f32.mxu1 %vm400_vm0, %v4224_v27 }
 0x1ab   : >> { %2958 = vmatpush3.msra.mxu0 %v3371_v0  ;;  %2994 = vmatpush3.msra.mxu1 %v1904_v9  ;;  %v1894_v0 = vpop.permute.xlu0 %1893 }
 0x1ac   : >> { %2909 = vmatmul.mubr.msk.f32.gmra.mxu0 %vm400_vm0, %v4211_v40  ;;  %2939 = vmatmul.mubr.msk.f32.gmra.mxu1 %vm400_vm0, %v4223_v28 }
 0x1ad   : >> { %2959 = vmatprep.subr.mxu0 %v3388_v3  ;;  %2995 = vmatprep.subr.mxu1 %v1902_v48 }
 0x1ae   : >> { %2960 = vmatpush3.msra.mxu0 %v3388_v3  ;;  %2996 = vmatpush3.msra.mxu1 %v1902_v48  ;;  %v1892_v3 = vpop.permute.xlu1 %1891 }
 0x1af   : >> { %2961 = vmatprep.subr.mxu0 %v3401_v4  ;;  %2997 = vmatprep.subr.mxu1 %v1900_v47 }
 0x1b0   : >> { %2941 = vmatprep.mubr.msk.f32.mxu1 %vm400_vm0, %v4222_v29  ;;  %2962 = vmatpush3.msra.mxu0 %v3401_v4  ;;  %v3854_v4 = vpop.f32.mrf.mxu0 }
 0x1b1   : >> { %2998 = vmatpush3.msra.mxu1 %v1900_v47  ;;  %2963 = vmatprep.subr.mxu0 %v3408_v7 }
 0x1b2   : >> { %2942 = vmatmul.mubr.msk.f32.gmra.mxu1 %vm400_vm0, %v4221_v30  ;;  %2999 = vmatprep.subr.mxu1 %v1898_v55 }
 0x1b3   : >> { %2964 = vmatpush3.msra.mxu0 %v3408_v7  ;;  %3000 = vmatpush3.msra.mxu1 %v1898_v55 }
 0x1b4   : >> { %2965 = vmatprep.subr.mxu0 %v3419_v10  ;;  %3001 = vmatprep.subr.mxu1 %v1896_v61 }
 0x1b5   : >> { %2944 = vmatprep.mubr.msk.f32.mxu1 %vm400_vm0, %v4220_v31  ;;  %2966 = vmatpush3.msra.mxu0 %v3419_v10 }
 0x1b6   : >> { %3002 = vmatpush3.msra.mxu1 %v1896_v61  ;;  %2967 = vmatprep.subr.mxu0 %v3430_v11 }
 0x1b7   : >> { %2945 = vmatmul.mubr.msk.f32.gmra.mxu1 %vm400_vm0, %v4219_v32  ;;  %3003 = vmatprep.subr.mxu1 %v1894_v0 }
 0x1b8   : >> { %2968 = vmatpush3.msra.mxu0 %v3430_v11  ;;  %3004 = vmatpush3.msra.mxu1 %v1894_v0 }
 0x1b9   : >> { %2969 = vmatprep.subr.mxu0 %v3435_v12  ;;  %3005 = vmatprep.subr.mxu1 %v1892_v3 }
 0x1ba   : >> { %2970 = vmatpush3.msra.mxu0 %v3435_v12  ;;  %2971 = vmatprep.mubr.msk.f32.mxu0 %vm400_vm0, %v4234_v17 }
 0x1bb   : >> { %3006 = vmatpush3.msra.mxu1 %v1892_v3  ;;  %3007 = vmatprep.mubr.msk.f32.mxu1 %vm400_vm0, %v4218_v33 }
 0x1bc   : >> { %2972 = vmatmul.mubr.msk.f32.vlgmr.msra.gmra.mxu0 %vm400_vm0, %v4233_v18  ;;  %3008 = vmatmul.mubr.msk.f32.vlgmr.msra.gmra.mxu1 %vm400_vm0, %v4217_v34 }
 0x1bd   : >> { %2974 = vmatprep.mubr.msk.f32.mxu0 %vm400_vm0, %v4232_v19  ;;  %3010 = vmatprep.mubr.msk.f32.mxu1 %vm400_vm0, %v4216_v35 }
 0x1c0   : >> { %2975 = vmatmul.mubr.msk.f32.gmra.mxu0 %vm400_vm0, %v4231_v20  ;;  %3011 = vmatmul.mubr.msk.f32.gmra.mxu1 %vm400_vm0, %v4215_v36 }
 0x1c1   : >> { %2977 = vmatprep.mubr.msk.f32.mxu0 %vm400_vm0, %v4230_v21  ;;  %3013 = vmatprep.mubr.msk.f32.mxu1 %vm400_vm0, %v4214_v37 }
 0x1c4   : >> { %2978 = vmatmul.mubr.msk.f32.gmra.mxu0 %vm400_vm0, %v4229_v22  ;;  %3014 = vmatmul.mubr.msk.f32.gmra.mxu1 %vm400_vm0, %v4213_v38 }
 0x1c5   : >> { %2980 = vmatprep.mubr.msk.f32.mxu0 %vm400_vm0, %v4228_v23  ;;  %3016 = vmatprep.mubr.msk.f32.mxu1 %vm400_vm0, %v4212_v39 }
 0x1c8   : >> { %2981 = vmatmul.mubr.msk.f32.gmra.mxu0 %vm400_vm0, %v4227_v24  ;;  %3017 = vmatmul.mubr.msk.f32.gmra.mxu1 %vm400_vm0, %v4211_v40 }
 0x1fc   : >> { %v2685_v7 = vpop.f32.mrf.mxu0 }
 0x1fd   : >> { %v837_v10 = vadd.f32 %v2685_v7, %v3752_v52 }
 0x1fe   : >> { %v797_v11 = vpop.f32.mrf.mxu0 }
 0x1ff   : >> { %v836_v12 = vadd.f32 %v797_v11, %v3754_v46  ;;  %v2721_v46 = vpop.f32.mrf.mxu1  ;;  %v1216_v37 = vmul.f32 %v837_v10, %v3290_v44  ;;  %v4242_v10 = vld [vmem:[#allocation29_spill] sm:$0xff] }
 0x201   : >> { %v2688_v53 = vpop.f32.mrf.mxu0  ;;  %v910_v1 = vpop.f32.mrf.mxu1 }
 0x202   : >> { %v839_v51 = vadd.f32 %v2688_v53, %v3756_v59 }
 0x203   : >> { %v807_v50 = vpop.f32.mrf.mxu0 }
 0x204   : >> { %v838_v54 = vadd.f32 %v807_v50, %v3762_v62 }
 0x206   : >> { %v2691_v49 = vpop.f32.mrf.mxu0 }
 0x207   : >> { %v3861_v13 = vadd.f32 %v2691_v49, %v3768_v2 }
 0x208   : >> { %v817_v57 = vpop.f32.mrf.mxu0 }
 0x209   : >> { %v3864_v58 = vadd.f32 %v817_v57, %v3775_v16 }
 0x20b   : >> { %v2694_v60 = vpop.f32.mrf.mxu0 }
 0x20c   : >> { %v3869_v52 = vadd.f32 %v2694_v60, %v3780_v6 }
 0x20d   : >> { %v3873_v5 = vpop.f32.mrf.mxu0 }
 0x20e   : >> { %v2724_v59 = vpop.f32.mrf.mxu1 }
 0x210   : >> { %v920_v14 = vpop.f32.mrf.mxu1 }
 0x213   : >> { %v2727_v15 = vpop.f32.mrf.mxu1 }
 0x215   : >> { %v3871_v62 = vpop.f32.mrf.mxu1 }
 0x218   : >> { %v3875_v2 = vpop.f32.mrf.mxu1 }
 0x21a   : >> { %v3877_v16 = vpop.f32.mrf.mxu1 }
 0x21b   : >> { %v2757_v56 = vpop.f32.mrf.mxu0 }
 0x21c   : >> { %v1021_v36 = vadd.f32 %v2757_v56, %v2721_v46  ;;  %v1220_v46 = vmul.f32 %v3861_v13, %v3292_v45 }
 0x21d   : >> { %v1015_v8 = vpop.f32.mrf.mxu0  ;;  %v2793_v9 = vpop.f32.mrf.mxu1 }
 0x21e   : >> { %v1016_v38 = vadd.f32 %v1015_v8, %v910_v1  ;;  %v3940_v1 = vadd.f32 %v1216_v37, %v4242_v10 }
 0x21f   : >> { %v1168_v47 = vpop.f32.mrf.mxu1 }
 0x221   : >> { %v2760_v48 = vpop.f32.mrf.mxu0 }
 0x222   : >> { %v1031_v39 = vadd.f32 %v2760_v48, %v2724_v59  ;;  %v1207_v59 = vadd.f32 %v1168_v47, %v1016_v38  ;;  %v4245_v48 = vld [vmem:[#allocation32_spill] sm:$0xff] }
 0x223   : >> { %v1025_v6 = vpop.f32.mrf.mxu0 }
 0x224   : >> { %v1026_v40 = vadd.f32 %v1025_v6, %v920_v14 }
 0x225   : >> { %v2796_v55 = vpop.f32.mrf.mxu1 }
 0x227   : >> { %v2763_v61 = vpop.f32.mrf.mxu0  ;;  %v1178_v0 = vpop.f32.mrf.mxu1 }
 0x228   : >> { %v1209_v14 = vadd.f32 %v1178_v0, %v1026_v40 }
 0x229   : >> { %v1035_v3 = vpop.f32.mrf.mxu0 }
 0x22a   : >> { %v1036_v38 = vadd.f32 %v1035_v3, %v3871_v62 }
 0x22b   : >> { %v2799_v7 = vpop.f32.mrf.mxu1 }
 0x22d   : >> { %v3879_v11 = vpop.f32.mrf.mxu0  ;;  %v3881_v53 = vpop.f32.mrf.mxu1 }
 0x22f   : >> { %v3883_v50 = vpop.f32.mrf.mxu0 }
 0x231   : >> { %v3887_v57 = vpop.f32.mrf.mxu1 }
 0x233   : >> { %v3891_v17 = vpop.f32.mrf.mxu1 }
 0x23c   : >> { %v3885_v49 = vpop.f32.mrf.mxu0  ;;  %v3895_v19 = vpop.f32.mrf.mxu1 }
 0x23e   : >> { %v3889_v60 = vpop.f32.mrf.mxu0  ;;  %v3899_v21 = vpop.f32.mrf.mxu1 }
 0x249   : >> { %v3893_v18 = vpop.f32.mrf.mxu0  ;;  %v3903_v23 = vpop.f32.mrf.mxu1 }
 0x24b   : >> { %v3897_v20 = vpop.f32.mrf.mxu0  ;;  %v3907_v25 = vpop.f32.mrf.mxu1 }
 0x24f   : >> { %v3901_v22 = vpop.f32.mrf.mxu0  ;;  %v3911_v27 = vpop.f32.mrf.mxu1 }
 0x251   : >> { %v3905_v24 = vpop.f32.mrf.mxu0  ;;  %v3915_v29 = vpop.f32.mrf.mxu1 }
 0x252   : >> { %4235 = vst [vmem:[#allocation37_spill] sm:$0xff] %v3905_v24  ;;  %4238 = vst [vmem:[#allocation40_spill] sm:$0xff] %v3915_v29  ;;  %v1041_v29 = vadd.f32 %v2763_v61, %v2727_v15  ;;  %v1241_v61 = vmul.f32 %v1209_v14, %v3284_v41 }
 0x255   : >> { %v3909_v26 = vpop.f32.mrf.mxu0  ;;  %v3917_v31 = vpop.f32.mrf.mxu1 }
 0x256   : >> { %4236 = vst [vmem:[#allocation38_spill] sm:$0xff] %v3909_v26  ;;  %4239 = vst [vmem:[#allocation41_spill] sm:$0xff] %v3917_v31  ;;  %v1218_v26 = vmul.f32 %v839_v51, %v3288_v43  ;;  %v1217_v31 = vmul.f32 %v838_v54, %v3284_v41  ;;  %v4243_v51 = vld [vmem:[#allocation30_spill] sm:$0xff]  ;;  %v4244_v54 = vld [vmem:[#allocation31_spill] sm:$0xff] }
 0x257   : >> { %v3913_v28 = vpop.f32.mrf.mxu0  ;;  %v3921_v33 = vpop.f32.mrf.mxu1 }
 0x258   : >> { %4237 = vst [vmem:[#allocation39_spill] sm:$0xff] %v3913_v28  ;;  %4240 = vst [vmem:[#allocation42_spill] sm:$0xff] %v3921_v33  ;;  %v1215_v28 = vmul.f32 %v836_v12, %v3286_v42  ;;  %v1210_v12 = vadd.f32 %v2796_v55, %v1031_v39  ;;  %v3946_v15 = vadd.f32 %v1218_v26, %v4244_v54  ;;  %v4247_v26 = vld [vmem:[#allocation26_spill] sm:$0xff] }
 0x259   : >> { %v3949_v6 = vadd.f32 %v1217_v31, %v4245_v48  ;;  %v651_v39 = vadd.f32 %v3866_v63, %v3854_v4  ;;  %v1219_v47 = vmul.f32 %v3864_v58, %v4247_v26  ;;  %v1232_v31 = vmax.f32 %v3940_v1, 0.0 }
 0x25a   : >> { %v3943_v8 = vadd.f32 %v1215_v28, %v4243_v51  ;;  %v4246_v28 = vld [vmem:[#allocation33_spill] sm:$0xff]  ;;  %v1242_v55 = vmul.f32 %v1210_v12, %v3288_v43  ;;  %v1234_v62 = vmax.f32 %v3946_v15, 0.0  ;;  %v1211_v1 = vadd.f32 %v3881_v53, %v1036_v38  ;;  %v4248_v12 = vld [vmem:[#allocation34_spill] sm:$0xff] }
 0x25b   : >> { %v2901_v30 = vpop.f32.mrf.mxu0  ;;  %v3960_v40 = vadd.f32 %v1220_v46, %v4246_v28  ;;  %v1233_v4 = vmax.f32 %v3949_v6, 0.0  ;;  %v842_v58 = vadd.f32 %v3873_v5, %v651_v39  ;;  %v1051_v46 = vadd.f32 %v3879_v11, %v3875_v2  ;;  %v4249_v5 = vld [vmem:[#allocation27_spill] sm:$0xff] }
 0x25c   : >> { %v3983_v14 = vadd.f32 %v1219_v47, %v4248_v12  ;;  %v1475_v15 = vadd.f32 %v3895_v19, %v3885_v49  ;;  %v1250_v11 = vadd.f32 %v1242_v55, %v4244_v54  ;;  %v1249_v53 = vadd.f32 %v1241_v61, %v4245_v48  ;;  %v4250_v49 = vld [vmem:[#allocation28_spill] sm:$0xff] }
 0x25d   : >> { %v3919_v32 = vpop.f32.mrf.mxu0  ;;  %v1470_v38 = vadd.f32 %v3899_v21, %v3889_v60  ;;  %v1221_v39 = vmul.f32 %v842_v58, %v4250_v49  ;;  %v1214_v47 = vadd.f32 %v3887_v57, %v1051_v46  ;;  %v1480_v21 = vadd.f32 %v3907_v25, %v3897_v20  ;;  %v4252_v25 = vld [vmem:[#allocation36_spill] sm:$0xff] }
 0x25e   : >> { %v3923_v34 = vpop.f32.mrf.mxu1  ;;  %v1662_v19 = vadd.f32 %v2901_v30, %v1475_v15  ;;  %v1258_v61 = vmax.f32 %v1250_v11, 0.0 }
 0x25f   : >> { %4241 = vst [vmem:[#allocation43_spill] sm:$0xff] %v3923_v34  ;;  %v1208_v34 = vadd.f32 %v2793_v9, %v1021_v36  ;;  %v1212_v36 = vadd.f32 %v2799_v7, %v1041_v29  ;;  %v1239_v29 = vmul.f32 %v1207_v59, %v3286_v42  ;;  %v1236_v59 = vmax.f32 %v3960_v40, 0.0 }
 0x260   : >> { %v3931_v24 = vpop.f32.mrf.mxu1  ;;  %v1243_v40 = vmul.f32 %v1211_v1, %v4247_v26  ;;  %v1661_v60 = vadd.f32 %v3919_v32, %v1470_v38  ;;  %v4022_v32 = vadd.f32 %v1221_v39, %v4252_v25  ;;  %v1246_v15 = vmul.f32 %v1214_v47, %v4249_v5 }
 0x261   : >> { %v3925_v35 = vpop.f32.mrf.mxu0  ;;  %v1240_v37 = vmul.f32 %v1208_v34, %v3290_v44  ;;  %v1231_v34 = vmax.f32 %v3943_v8, 0.0  ;;  %v1244_v63 = vmul.f32 %v1212_v36, %v3292_v45  ;;  %v1046_v8 = vadd.f32 %v3883_v50, %v3877_v16 }
 0x262   : >> { %v1222_v36 = vmul.f32 %v3869_v52, %v4249_v5  ;;  %v1247_v2 = vadd.f32 %v1239_v29, %v4243_v51  ;;  %v1485_v16 = vadd.f32 %v3903_v23, %v3893_v18  ;;  %v2040_v11 = vmul.f32 %v1661_v60, %v3286_v42 }
 0x263   : >> { %v3933_v33 = vpop.f32.mrf.mxu0  ;;  %v1248_v7 = vadd.f32 %v1240_v37, %v4242_v10  ;;  %v1252_v37 = vadd.f32 %v1244_v63, %v4246_v28  ;;  %v1213_v55 = vadd.f32 %v3891_v17, %v1046_v8  ;;  %v1257_v63 = vmax.f32 %v1249_v53, 0.0 }
 0x264   : >> { %v1664_v18 = vadd.f32 %v3925_v35, %v1485_v16  ;;  %v1255_v30 = vmax.f32 %v1247_v2, 0.0  ;;  %v2041_v17 = vmul.f32 %v1662_v19, %v3290_v44  ;;  %v1663_v1 = vadd.f32 %v3933_v33, %v1480_v21 }
 0x265   : >> { %v1256_v52 = vmax.f32 %v1248_v7, 0.0  ;;  %v4251_v7 = vld [vmem:[#allocation35_spill] sm:$0xff]  ;;  %v1260_v46 = vmax.f32 %v1252_v37, 0.0  ;;  %v4027_v8 = vadd.f32 %v1243_v40, %v4248_v12  ;;  %v1245_v2 = vmul.f32 %v1213_v55, %v4250_v49 }
 0x266   : >> { %v3951_v9 = vpop.f32.mrf.mxu0  ;;  %v4017_v57 = vadd.f32 %v1222_v36, %v4251_v7  ;;  %v1495_v36 = vadd.f32 %v3911_v27, %v3901_v22  ;;  %v2043_v33 = vmul.f32 %v1664_v18, %v3288_v43  ;;  %v4035_v38 = vmax.f32 %v1231_v34, %v1255_v30  ;;  %v4253_v19 = vld [vmem:[#allocation43_spill] sm:$0xff]  ;;  %v4255_v18 = vld [vmem:[#allocation40_spill] sm:$0xff] }
 0x267   : >> { %v4024_v35 = vmax.f32 %v1232_v31, %v1256_v52  ;;  %v4037_v31 = vmax.f32 %v1234_v62, %v1258_v61  ;;  %v4039_v16 = vmax.f32 %v1233_v4, %v1257_v63  ;;  %v4042_v52 = vmax.f32 %v1236_v59, %v1260_v46  ;;  %v4254_v59 = vld [vmem:[#allocation37_spill] sm:$0xff] }
 0x268   : >> { %v3972_v0 = vpop.f32.mrf.mxu0  ;;  %v2049_v40 = vadd.f32 %v2041_v17, %v4242_v10  ;;  %v2042_v22 = vmul.f32 %v1663_v1, %v3284_v41  ;;  %v1666_v27 = vadd.f32 %v3951_v9, %v1495_v36  ;;  %v1259_v21 = vmax.f32 %v4027_v8, 0.0  ;;  %v4256_v17 = vld [vmem:[#allocation38_spill] sm:$0xff]  ;;  %v4257_v1 = vld [vmem:[#allocation41_spill] sm:$0xff] }
 0x269   : >> { %v4049_v34 = vadd.f32 %v1246_v15, %v4251_v7  ;;  %v4053_v60 = vadd.f32 %v1245_v2, %v4252_v25  ;;  %v1490_v30 = vadd.f32 %v4255_v18, %v4254_v59  ;;  %v2048_v61 = vadd.f32 %v2040_v11, %v4243_v51  ;;  %v4258_v2 = vld [vmem:[#allocation39_spill] sm:$0xff] }
 0x26a   : >> { %v2051_v9 = vadd.f32 %v2043_v33, %v4244_v54  ;;  %v1505_v15 = vadd.f32 %v4257_v1, %v4256_v17  ;;  %v2045_v11 = vmul.f32 %v1666_v27, %v3292_v45 }
 0x26c   : >> { %v3937_v56 = vpop.f32.mrf.mxu1  ;;  %v4001_v50 = vpop.f32.mrf.mxu0 }
 0x26e   : >> { %v3953_v13 = vpop.f32.mrf.mxu1  ;;  %v1652_v20 = vpop.f32.mrf.mxu0 }
 0x272   : >> { %v3974_v3 = vpop.f32.mrf.mxu1 }
 0x274   : >> { %v3989_v6 = vpop.f32.mrf.mxu1 }
 0x277   : >> { %v4006_v29 = vpop.f32.mrf.mxu1 }
 0x279   : >> { %v4014_v58 = vpop.f32.mrf.mxu1 }
 0x27c   : >> { %v2973_v53 = vpop.f32.mrf.mxu0  ;;  %v3009_v37 = vpop.f32.mrf.mxu1 }
 0x27d   : >> { %v1846_v39 = vadd.f32 %v2973_v53, %v4253_v19 }
 0x27e   : >> { %v1840_v47 = vpop.f32.mrf.mxu0  ;;  %v1993_v55 = vpop.f32.mrf.mxu1 }
 0x27f   : >> { %v2033_v62 = vadd.f32 %v3009_v37, %v1846_v39  ;;  %v1841_v4 = vadd.f32 %v1840_v47, %v3931_v24  ;;  %v4259_v37 = vld [vmem:[#allocation42_spill] sm:$0xff]  ;;  %v2057_v39 = vmax.f32 %v2049_v40, 0.0  ;;  %v2050_v47 = vadd.f32 %v2042_v22, %v4245_v48 }
 0x280   : >> { %v2976_v63 = vpop.f32.mrf.mxu0  ;;  %v3012_v46 = vpop.f32.mrf.mxu1  ;;  %v1500_v19 = vadd.f32 %v4259_v37, %v4258_v2 }
 0x281   : >> { %v2065_v36 = vmul.f32 %v2033_v62, %v3290_v44  ;;  %v2032_v53 = vadd.f32 %v1993_v55, %v1841_v4  ;;  %v1856_v24 = vadd.f32 %v2976_v63, %v3937_v56  ;;  %v2056_v55 = vmax.f32 %v2048_v61, 0.0 }
 0x282   : >> { %v1850_v33 = vpop.f32.mrf.mxu0  ;;  %v2003_v59 = vpop.f32.mrf.mxu1  ;;  %v2059_v4 = vmax.f32 %v2051_v9, 0.0  ;;  %v1665_v56 = vadd.f32 %v3972_v0, %v1490_v30  ;;  %v1668_v63 = vadd.f32 %v4001_v50, %v1505_v15 }
 0x283   : >> { %v2073_v18 = vadd.f32 %v2065_v36, %v4242_v10  ;;  %v2064_v23 = vmul.f32 %v2032_v53, %v3286_v42  ;;  %v2035_v17 = vadd.f32 %v3012_v46, %v1856_v24  ;;  %v1851_v62 = vadd.f32 %v1850_v33, %v3953_v13 }
 0x284   : >> { %v2979_v40 = vpop.f32.mrf.mxu0  ;;  %v3015_v1 = vpop.f32.mrf.mxu1  ;;  %v2058_v53 = vmax.f32 %v2050_v47, 0.0  ;;  %v2053_v46 = vadd.f32 %v2045_v11, %v4246_v28  ;;  %v1667_v13 = vadd.f32 %v1652_v20, %v1500_v19  ;;  %v2044_v37 = vmul.f32 %v1665_v56, %v4247_v26 }
 0x285   : >> { %v2081_v22 = vmax.f32 %v2073_v18, 0.0  ;;  %v2072_v27 = vadd.f32 %v2064_v23, %v4243_v51  ;;  %v2067_v36 = vmul.f32 %v2035_v17, %v3288_v43  ;;  %v2034_v2 = vadd.f32 %v2003_v59, %v1851_v62 }
 0x286   : >> { %v1866_v61 = vadd.f32 %v2979_v40, %v3974_v3  ;;  %v1860_v9 = vpop.f32.mrf.mxu0  ;;  %v2013_v0 = vpop.f32.mrf.mxu1  ;;  %v2047_v23 = vmul.f32 %v1668_v63, %v4249_v5  ;;  %v2046_v18 = vmul.f32 %v1667_v13, %v4250_v49  ;;  %v2061_v13 = vmax.f32 %v2053_v46, 0.0 }
 0x287   : >> { %v2089_v30 = vmax.f32 %v2057_v39, %v2081_v22  ;;  %v2080_v50 = vmax.f32 %v2072_v27, 0.0  ;;  %v2075_v15 = vadd.f32 %v2067_v36, %v4244_v54  ;;  %v2066_v24 = vmul.f32 %v2034_v2, %v3284_v41 }
 0x288   : >> { %v2037_v47 = vadd.f32 %v3015_v1, %v1866_v61  ;;  %v1861_v20 = vadd.f32 %v1860_v9, %v3989_v6  ;;  %v2982_v19 = vpop.f32.mrf.mxu0  ;;  %v3018_v3 = vpop.f32.mrf.mxu1 }
 0x289   : >> { %v2097_v11 = vmax.f32 %v4024_v35, %v2089_v30  ;;  %v2088_v39 = vmax.f32 %v2056_v55, %v2080_v50  ;;  %v2083_v33 = vmax.f32 %v2075_v15, 0.0  ;;  %v2074_v59 = vadd.f32 %v2066_v24, %v4245_v48 }
 0x28a   : >> { %v2069_v17 = vmul.f32 %v2037_v47, %v3292_v45  ;;  %v2036_v62 = vadd.f32 %v2013_v0, %v1861_v20  ;;  %v1876_v56 = vadd.f32 %v2982_v19, %v4006_v29  ;;  %v1870_v63 = vpop.f32.mrf.mxu0  ;;  %v2052_v55 = vadd.f32 %v2044_v37, %v4248_v12  ;;  %v2023_v2 = vpop.f32.mrf.mxu1 }
 0x28b   : >> { %2107 = vst.msk [vmem:[%s4082_s28 + $0x8] sm:$0xff] %vm2105_vm1, %v2097_v11  ;;  %v2096_v6 = vmax.f32 %v4035_v38, %v2088_v39  ;;  %v2091_v40 = vmax.f32 %v2059_v4, %v2083_v33  ;;  %v2082_v1 = vmax.f32 %v2074_v59, 0.0  ;;  %v1871_v35 = vadd.f32 %v1870_v63, %v4014_v58 }
 0x28c   : >> { %v2077_v22 = vadd.f32 %v2069_v17, %v4246_v28  ;;  %v2068_v27 = vmul.f32 %v2036_v62, %v4247_v26  ;;  %v2039_v36 = vadd.f32 %v3018_v3, %v1876_v56  ;;  %v2055_v4 = vadd.f32 %v2047_v23, %v4251_v7 }
 0x28d   : >> { %2106 = vst.msk [vmem:[%s4082_s28] sm:$0xff] %vm2105_vm1, %v2096_v6  ;;  %v2099_v29 = vmax.f32 %v4037_v31, %v2091_v40  ;;  %v2090_v61 = vmax.f32 %v2058_v53, %v2082_v1  ;;  %v2038_v38 = vadd.f32 %v2023_v2, %v1871_v35  ;;  %v1262_v30 = vmax.f32 %v4049_v34, 0.0 }
 0x28e   : >> { %v2085_v58 = vmax.f32 %v2077_v22, 0.0  ;;  %v2076_v9 = vadd.f32 %v2068_v27, %v4248_v12  ;;  %v2071_v0 = vmul.f32 %v2039_v36, %v4249_v5  ;;  %v2054_v50 = vadd.f32 %v2046_v18, %v4252_v25 }
 0x28f   : >> { %2109 = vst.msk [vmem:[%s4082_s28 + $0x18] sm:$0xff] %vm2105_vm1, %v2099_v29  ;;  %v2098_v46 = vmax.f32 %v4039_v16, %v2090_v61  ;;  %v2070_v31 = vmul.f32 %v2038_v38, %v4250_v49  ;;  %v2060_v53 = vmax.f32 %v2052_v55, 0.0  ;;  %v1238_v23 = vmax.f32 %v4017_v57, 0.0 }
 0x290   : >> { %v2093_v15 = vmax.f32 %v2061_v13, %v2085_v58  ;;  %v2084_v24 = vmax.f32 %v2076_v9, 0.0  ;;  %v2079_v37 = vadd.f32 %v2071_v0, %v4251_v7  ;;  %v4260_v34 = vmax.f32 %v3983_v14, 0.0 }
 0x291   : >> { %v1261_v20 = vmax.f32 %v4053_v60, 0.0  ;;  %2108 = vst.msk [vmem:[%s4082_s28 + $0x10] sm:$0xff] %vm2105_vm1, %v2098_v46  ;;  %v2078_v16 = vadd.f32 %v2070_v31, %v4252_v25  ;;  %v2063_v19 = vmax.f32 %v2055_v4, 0.0  ;;  %v1237_v57 = vmax.f32 %v4022_v32, 0.0 }
 0x292   : >> { %v1267_v47 = vmax.f32 %v4260_v34, %v1259_v21  ;;  %v2101_v3 = vmax.f32 %v4042_v52, %v2093_v15  ;;  %v2092_v11 = vmax.f32 %v2060_v53, %v2084_v24  ;;  %v2087_v39 = vmax.f32 %v2079_v37, 0.0 }
 0x293   : >> { %v2062_v8 = vmax.f32 %v2054_v50, 0.0  ;;  %v2086_v33 = vmax.f32 %v2078_v16, 0.0  ;;  %v1270_v14 = vmax.f32 %v1238_v23, %v1262_v30  ;;  %v1269_v59 = vmax.f32 %v1237_v57, %v1261_v20 }
 0x294   : >> { %2111 = vst.msk [vmem:[%s4082_s28 + $0x28] sm:$0xff] %vm2105_vm1, %v2101_v3  ;;  %v2100_v21 = vmax.f32 %v1267_v47, %v2092_v11  ;;  %v2095_v60 = vmax.f32 %v2063_v19, %v2087_v39 }
 0x295   : >> { %v2094_v18 = vmax.f32 %v2062_v8, %v2086_v33  ;;  %371 = sbr.rel (!%p369_p4) target bundleno = 166 (0xa6), region = 87 }
 0x296   : >> { %2110 = vst.msk [vmem:[%s4082_s28 + $0x20] sm:$0xff] %vm2105_vm1, %v2100_v21  ;;  %v2103_v17 = vmax.f32 %v1270_v14, %v2095_v60 }
 0x297   : >> { %v2102_v62 = vmax.f32 %v1269_v59, %v2094_v18 }
 0x298   : >> { %2113 = vst.msk [vmem:[%s4082_s28 + $0x38] sm:$0xff] %vm2105_vm1, %v2103_v17 }
 0x299   : >> { %2112 = vst.msk [vmem:[%s4082_s28 + $0x30] sm:$0xff] %vm2105_vm1, %v2102_v62 }
 0x29a PF: > { %s15_s18 = sadd.s32 1, %s3051_s18  }
 0x29b   : > { %p12_p5 = scmp.ge.s32.totalorder %s15_s18, 4  }
 0x29d   :  { %14 = sbr.rel (!%p12_p5) target bundleno = 1 (0x1), region = 98 }

// kernel: bird_drone_cnn_forward.7
= control target key start
LH: loop header
LB: loop body
LE: loop exit
PB: predicated region body
PF: predicated region fallthrough
CT: control target
= control target key end

     0   :  { %s4696_s20 = smov 0   ;;  %s5717_s0 = inlined_call_operand.vmem [shape: f32[2,50176], index: 0, kind: input, shape index: {}]   ;;  %s5718_s1 = inlined_call_operand.vmem [shape: f32[50176,128], index: 1, kind: input, shape index: {}]   ;;  %s5719_s2 = inlined_call_operand.vmem [shape: f32[1,128], index: 2, kind: input, shape index: {}]   ;;  %s5720_s3 = inlined_call_operand.vmem [shape: f32[128,1], index: 3, kind: input, shape index: {}]   ;;  %s5721_s4 = inlined_call_operand.<no memory space> [shape: f32[1,1], index: 4, kind: input, shape index: {}]   ;;  %s5722_s5 = inlined_call_operand.vmem [shape: f32[2,1], index: 5, kind: output, shape index: {}]  }
   0x1   :  { %v10_v0 = vstv %s5721_s4 }
   0x2   :  { %11 = vst [vmem:[#allocation3] sm:$0x1] %v10_v0 }
   0x3 LB: > { %s4702_s21 = sadd.s32 4294967295, %s4657_s20   ;;  %p3580_p0 = scmp.ge.s32.totalorder %s4657_s20, 1  ;;  %s4657_s20 = sphi %s4696_s20, %s17_s20  }
   0x4   : > { %p196_p1 = scmp.lt.s32.totalorder %s4657_s20, 8 }
   0x6   : > { %p197_p2 = pnand %p3580_p0, %p196_p1 }
   0x7   : > { %s224_s4 = smul.u32 (!%p197_p2), 56, %s4702_s21  ;;  %p3583_p5 = scmp.ne.s32.totalorder (!%p197_p2), %s4702_s21, 0 }
   0x8   : > { %200 = sbr.rel (%p197_p2) target bundleno = 967 (0x3c7), region = 40 }
   0x9   : > { %s230_s22 = smul.u32 (!%p197_p2), 896, %s4702_s21  ;;  %p225_p3 = scmp.lt.s32.totalorder (!%p197_p2), %s224_s4, 391 }
   0xb   : > { %p231_p4 = scmp.lt.s32.totalorder (!%p197_p2), %s230_s22, 6271 }
   0xd   : > { %s5724_s4 = smov (!%p225_p3, %s224_s4), 391  ;;  %s5726_s22 = smov (!%p231_p4, %s230_s22), 6271 }
   0xe   : > { %s3581_s23 = sshll.u32 %s5724_s4, 1  ;;  %s3582_s27 = sshll.u32 %s5726_s22, 3 }
   0xf   : > { %s4711_s26 = scalar_lea.vmem %s5717_s0, %s3581_s23  ;;  %s4716_s30 = scalar_lea.vmem %s5718_s1, %s3582_s27 }
  0x10   : > { %239 = sbr.rel (%p3583_p5) target bundleno = 23 (0x17), region = 44 }
  0x15   : > { %v4659_v1 = vmov 0.0  }
  0x16   : > { %240 = vst [vmem:[#allocation2] sm:$0x3] %v4659_v1 }
  0x17 PF: > { %v287_v2 = vld [vmem:[%s4716_s30 + $0xf8] sm:$0xff]  ;;  %v286_v6 = vld [vmem:[%s4716_s30 + $0xf0] sm:$0xff]  ;;  %v285_v10 = vld [vmem:[%s4716_s30 + $0xe8] sm:$0xff]  ;;  %v4660_v32 = vmov 1983009808   ;;  %v1170_v34 = vlaneseq  ;;  %p3584_p6 = scmp.ne.s32.totalorder %s4702_s21, 6 }
  0x18   : > { %v319_v3 = vld [vmem:[%s4716_s30 + $0x1f8] sm:$0xff]  ;;  %3589 = vmatprep.subr.mxu0 %v287_v2  ;;  %v318_v7 = vld [vmem:[%s4716_s30 + $0x1f0] sm:$0xff]  ;;  %v317_v11 = vld [vmem:[%s4716_s30 + $0x1e8] sm:$0xff]  ;;  %v1168_v33 = vunpack.c.l.s4 %v4660_v32 }
  0x19   : > { %v271_v4 = vld [vmem:[%s4716_s30 + $0x78] sm:$0xff]  ;;  %3624 = vmatprep.subr.mxu1 %v319_v3  ;;  %v270_v8 = vld [vmem:[%s4716_s30 + $0x70] sm:$0xff]  ;;  %v269_v12 = vld [vmem:[%s4716_s30 + $0x68] sm:$0xff]  ;;  %v1171_v44 = vshrl.u32 %v1170_v34, 7 }
  0x1a   : > { %v303_v5 = vld [vmem:[%s4716_s30 + $0x178] sm:$0xff]  ;;  %3590 = vmatpush3.msra.mxu0 %v271_v4  ;;  %v302_v9 = vld [vmem:[%s4716_s30 + $0x170] sm:$0xff]  ;;  %v301_v13 = vld [vmem:[%s4716_s30 + $0x168] sm:$0xff]  ;;  %v1169_v43 = vunpack.c.0.s8 %v1168_v33 }
  0x1b   : > { %3625 = vmatpush3.msra.mxu1 %v303_v5  ;;  %3591 = vmatprep.subr.mxu0 %v286_v6  ;;  %v284_v14 = vld [vmem:[%s4716_s30 + $0xe0] sm:$0xff]  ;;  %v283_v18 = vld [vmem:[%s4716_s30 + $0xd8] sm:$0xff]  ;;  %v282_v22 = vld [vmem:[%s4716_s30 + $0xd0] sm:$0xff] }
  0x1c   : > { %3626 = vmatprep.subr.mxu1 %v318_v7  ;;  %3592 = vmatpush3.msra.mxu0 %v270_v8  ;;  %v316_v15 = vld [vmem:[%s4716_s30 + $0x1e0] sm:$0xff]  ;;  %v315_v19 = vld [vmem:[%s4716_s30 + $0x1d8] sm:$0xff]  ;;  %v314_v23 = vld [vmem:[%s4716_s30 + $0x1d0] sm:$0xff]  ;;  %v4765_v53 = vsub.s32 %v1169_v43, %v1171_v44 }
  0x1d   : > { %3627 = vmatpush3.msra.mxu1 %v302_v9  ;;  %3593 = vmatprep.subr.mxu0 %v285_v10  ;;  %v268_v16 = vld [vmem:[%s4716_s30 + $0x60] sm:$0xff]  ;;  %v267_v20 = vld [vmem:[%s4716_s30 + $0x58] sm:$0xff]  ;;  %v266_v24 = vld [vmem:[%s4716_s30 + $0x50] sm:$0xff] }
  0x1e   : > { %3628 = vmatprep.subr.mxu1 %v317_v11  ;;  %v300_v17 = vld [vmem:[%s4716_s30 + $0x160] sm:$0xff]  ;;  %3594 = vmatpush3.msra.mxu0 %v269_v12  ;;  %v299_v21 = vld [vmem:[%s4716_s30 + $0x158] sm:$0xff]  ;;  %v298_v25 = vld [vmem:[%s4716_s30 + $0x150] sm:$0xff] }
  0x1f   : > { %3629 = vmatpush3.msra.mxu1 %v301_v13  ;;  %3595 = vmatprep.subr.mxu0 %v284_v14  ;;  %v281_v26 = vld [vmem:[%s4716_s30 + $0xc8] sm:$0xff]  ;;  %v280_v30 = vld [vmem:[%s4716_s30 + $0xc0] sm:$0xff]  ;;  %v279_v37 = vld [vmem:[%s4716_s30 + $0xb8] sm:$0xff] }
  0x20   : > { %3630 = vmatprep.subr.mxu1 %v316_v15  ;;  %3596 = vmatpush3.msra.mxu0 %v268_v16  ;;  %v313_v27 = vld [vmem:[%s4716_s30 + $0x1c8] sm:$0xff]  ;;  %v312_v31 = vld [vmem:[%s4716_s30 + $0x1c0] sm:$0xff]  ;;  %v311_v38 = vld [vmem:[%s4716_s30 + $0x1b8] sm:$0xff] }
  0x21   : > { %3631 = vmatpush3.msra.mxu1 %v300_v17  ;;  %3597 = vmatprep.subr.mxu0 %v283_v18  ;;  %v265_v28 = vld [vmem:[%s4716_s30 + $0x48] sm:$0xff]  ;;  %v264_v35 = vld [vmem:[%s4716_s30 + $0x40] sm:$0xff]  ;;  %v263_v39 = vld [vmem:[%s4716_s30 + $0x38] sm:$0xff] }
  0x22   : > { %3632 = vmatprep.subr.mxu1 %v315_v19  ;;  %3598 = vmatpush3.msra.mxu0 %v267_v20  ;;  %v297_v29 = vld [vmem:[%s4716_s30 + $0x148] sm:$0xff]  ;;  %v296_v36 = vld [vmem:[%s4716_s30 + $0x140] sm:$0xff]  ;;  %v295_v40 = vld [vmem:[%s4716_s30 + $0x138] sm:$0xff] }
  0x23   : > { %3633 = vmatpush3.msra.mxu1 %v299_v21  ;;  %3599 = vmatprep.subr.mxu0 %v282_v22  ;;  %v278_v41 = vld [vmem:[%s4716_s30 + $0xb0] sm:$0xff]  ;;  %v277_v47 = vld [vmem:[%s4716_s30 + $0xa8] sm:$0xff]  ;;  %v276_v51 = vld [vmem:[%s4716_s30 + $0xa0] sm:$0xff] }
  0x24   : > { %3634 = vmatprep.subr.mxu1 %v314_v23  ;;  %3600 = vmatpush3.msra.mxu0 %v266_v24  ;;  %v310_v42 = vld [vmem:[%s4716_s30 + $0x1b0] sm:$0xff]  ;;  %v309_v48 = vld [vmem:[%s4716_s30 + $0x1a8] sm:$0xff]  ;;  %v308_v52 = vld [vmem:[%s4716_s30 + $0x1a0] sm:$0xff] }
  0x25   : > { %3635 = vmatpush3.msra.mxu1 %v298_v25  ;;  %3601 = vmatprep.subr.mxu0 %v281_v26  ;;  %v262_v45 = vld [vmem:[%s4716_s30 + $0x30] sm:$0xff]  ;;  %v261_v49 = vld [vmem:[%s4716_s30 + $0x28] sm:$0xff]  ;;  %v260_v54 = vld [vmem:[%s4716_s30 + $0x20] sm:$0xff] }
  0x26   : > { %3636 = vmatprep.subr.mxu1 %v313_v27  ;;  %3602 = vmatpush3.msra.mxu0 %v265_v28  ;;  %v294_v46 = vld [vmem:[%s4716_s30 + $0x130] sm:$0xff]  ;;  %v293_v50 = vld [vmem:[%s4716_s30 + $0x128] sm:$0xff]  ;;  %v292_v55 = vld [vmem:[%s4716_s30 + $0x120] sm:$0xff] }
  0x27   : > { %3637 = vmatpush3.msra.mxu1 %v297_v29  ;;  %3603 = vmatprep.subr.mxu0 %v280_v30  ;;  %v242_v56 = vld [vmem:[%s4711_s26] sm:$0xff]  ;;  %v275_v57 = vld [vmem:[%s4716_s30 + $0x98] sm:$0xff]  ;;  %v274_v62 = vld [vmem:[%s4716_s30 + $0x90] sm:$0xff] }
  0x28   : > { %3638 = vmatprep.subr.mxu1 %v312_v31  ;;  %3604 = vmatpush3.msra.mxu0 %v264_v35  ;;  %v307_v58 = vld [vmem:[%s4716_s30 + $0x198] sm:$0xff]  ;;  %v1166_v59 = vcombine.high %v242_v56, %v242_v56  ;;  %v306_v63 = vld [vmem:[%s4716_s30 + $0x190] sm:$0xff]  ;;  %v1173_v0 = vrot.slane %v242_v56, %v4765_v53  ;;  %v273_v4 = vld [vmem:[%s4716_s30 + $0x88] sm:$0xff] }
  0x29   : > { %3639 = vmatpush3.msra.mxu1 %v296_v36  ;;  %3605 = vmatprep.subr.mxu0 %v279_v37  ;;  %v259_v60 = vld [vmem:[%s4716_s30 + $0x18] sm:$0xff]  ;;  %v258_v1 = vld [vmem:[%s4716_s30 + $0x10] sm:$0xff]  ;;  %v305_v5 = vld [vmem:[%s4716_s30 + $0x188] sm:$0xff] }
  0x2a   : > { %3640 = vmatprep.subr.mxu1 %v311_v38  ;;  %3606 = vmatpush3.msra.mxu0 %v263_v39  ;;  %v291_v61 = vld [vmem:[%s4716_s30 + $0x118] sm:$0xff]  ;;  %v290_v2 = vld [vmem:[%s4716_s30 + $0x110] sm:$0xff]  ;;  %v1180_v3 = vrot.slane %v1166_v59, %v4765_v53  ;;  %v257_v6 = vld [vmem:[%s4716_s30 + $0x8] sm:$0xff]  ;;  %v1181_v10 = vcombine.high %v1173_v0, %v1173_v0 }
  0x2b   : > { %3641 = vmatpush3.msra.mxu1 %v295_v40  ;;  %3607 = vmatprep.subr.mxu0 %v278_v41  ;;  %v289_v7 = vld [vmem:[%s4716_s30 + $0x108] sm:$0xff]  ;;  %v272_v8 = vld [vmem:[%s4716_s30 + $0x80] sm:$0xff]  ;;  %v351_v14 = vld [vmem:[%s4716_s30 + $0x2f8] sm:$0xff] }
  0x2c   : > { %3642 = vmatprep.subr.mxu1 %v310_v42  ;;  %3608 = vmatpush3.msra.mxu0 %v262_v45  ;;  %v304_v9 = vld [vmem:[%s4716_s30 + $0x180] sm:$0xff]  ;;  %v1182_v12 = vcombine.high %v1180_v3, %v1180_v3  ;;  %v383_v15 = vld [vmem:[%s4716_s30 + $0x3f8] sm:$0xff]  ;;  %v350_v18 = vld [vmem:[%s4716_s30 + $0x2f0] sm:$0xff] }
  0x2d   : > { %3643 = vmatpush3.msra.mxu1 %v294_v46  ;;  %3609 = vmatprep.subr.mxu0 %v277_v47  ;;  %v256_v11 = vld [vmem:[%s4716_s30] sm:$0xff]  ;;  %v335_v16 = vld [vmem:[%s4716_s30 + $0x278] sm:$0xff]  ;;  %v382_v19 = vld [vmem:[%s4716_s30 + $0x3f0] sm:$0xff] }
  0x2e   : > { %3644 = vmatprep.subr.mxu1 %v309_v48  ;;  %3610 = vmatpush3.msra.mxu0 %v261_v49  ;;  %v288_v13 = vld [vmem:[%s4716_s30 + $0x100] sm:$0xff]  ;;  %v367_v17 = vld [vmem:[%s4716_s30 + $0x378] sm:$0xff]  ;;  %v334_v20 = vld [vmem:[%s4716_s30 + $0x270] sm:$0xff] }
  0x2f   : > { %3645 = vmatpush3.msra.mxu1 %v293_v50  ;;  %3611 = vmatprep.subr.mxu0 %v276_v51  ;;  %v366_v21 = vld [vmem:[%s4716_s30 + $0x370] sm:$0xff]  ;;  %v349_v22 = vld [vmem:[%s4716_s30 + $0x2e8] sm:$0xff]  ;;  %v348_v26 = vld [vmem:[%s4716_s30 + $0x2e0] sm:$0xff] }
  0x30   : > { %3646 = vmatprep.subr.mxu1 %v308_v52  ;;  %3612 = vmatpush3.msra.mxu0 %v260_v54  ;;  %v381_v23 = vld [vmem:[%s4716_s30 + $0x3e8] sm:$0xff]  ;;  %v380_v27 = vld [vmem:[%s4716_s30 + $0x3e0] sm:$0xff]  ;;  %v347_v30 = vld [vmem:[%s4716_s30 + $0x2d8] sm:$0xff] }
  0x31   : > { %3647 = vmatpush3.msra.mxu1 %v292_v55  ;;  %3613 = vmatprep.subr.mxu0 %v275_v57  ;;  %v333_v24 = vld [vmem:[%s4716_s30 + $0x268] sm:$0xff]  ;;  %v332_v28 = vld [vmem:[%s4716_s30 + $0x260] sm:$0xff]  ;;  %v379_v31 = vld [vmem:[%s4716_s30 + $0x3d8] sm:$0xff] }
  0x32   : > { %3648 = vmatprep.subr.mxu1 %v307_v58  ;;  %3614 = vmatpush3.msra.mxu0 %v259_v60  ;;  %v365_v25 = vld [vmem:[%s4716_s30 + $0x368] sm:$0xff]  ;;  %v364_v29 = vld [vmem:[%s4716_s30 + $0x360] sm:$0xff]  ;;  %v331_v32 = vld [vmem:[%s4716_s30 + $0x258] sm:$0xff] }
  0x33   : > { %3649 = vmatpush3.msra.mxu1 %v291_v61  ;;  %3615 = vmatprep.subr.mxu0 %v274_v62  ;;  %v363_v33 = vld [vmem:[%s4716_s30 + $0x358] sm:$0xff]  ;;  %v346_v34 = vld [vmem:[%s4716_s30 + $0x2d0] sm:$0xff]  ;;  %v345_v38 = vld [vmem:[%s4716_s30 + $0x2c8] sm:$0xff] }
  0x34   : > { %3650 = vmatprep.subr.mxu1 %v306_v63  ;;  %3616 = vmatpush3.msra.mxu0 %v258_v1  ;;  %v378_v35 = vld [vmem:[%s4716_s30 + $0x3d0] sm:$0xff]  ;;  %v377_v39 = vld [vmem:[%s4716_s30 + $0x3c8] sm:$0xff]  ;;  %v344_v42 = vld [vmem:[%s4716_s30 + $0x2c0] sm:$0xff] }
  0x35   : > { %3651 = vmatpush3.msra.mxu1 %v290_v2  ;;  %3617 = vmatprep.subr.mxu0 %v273_v4  ;;  %v330_v36 = vld [vmem:[%s4716_s30 + $0x250] sm:$0xff]  ;;  %v329_v40 = vld [vmem:[%s4716_s30 + $0x248] sm:$0xff]  ;;  %v376_v43 = vld [vmem:[%s4716_s30 + $0x3c0] sm:$0xff] }
  0x36   : > { %3652 = vmatprep.subr.mxu1 %v305_v5  ;;  %3618 = vmatpush3.msra.mxu0 %v257_v6  ;;  %v362_v37 = vld [vmem:[%s4716_s30 + $0x350] sm:$0xff]  ;;  %v361_v41 = vld [vmem:[%s4716_s30 + $0x348] sm:$0xff]  ;;  %v328_v44 = vld [vmem:[%s4716_s30 + $0x240] sm:$0xff] }
  0x37   : > { %3653 = vmatpush3.msra.mxu1 %v289_v7  ;;  %3619 = vmatprep.subr.mxu0 %v272_v8  ;;  %v360_v45 = vld [vmem:[%s4716_s30 + $0x340] sm:$0xff]  ;;  %v343_v46 = vld [vmem:[%s4716_s30 + $0x2b8] sm:$0xff]  ;;  %v342_v50 = vld [vmem:[%s4716_s30 + $0x2b0] sm:$0xff] }
  0x38   : > { %3654 = vmatprep.subr.mxu1 %v304_v9  ;;  %3620 = vmatpush3.msra.mxu0 %v256_v11  ;;  %v375_v47 = vld [vmem:[%s4716_s30 + $0x3b8] sm:$0xff]  ;;  %v374_v51 = vld [vmem:[%s4716_s30 + $0x3b0] sm:$0xff]  ;;  %v341_v55 = vld [vmem:[%s4716_s30 + $0x2a8] sm:$0xff] }
  0x39   : > { %1524 = vmatprep.mubr.f32.mxu0 %v1181_v10  ;;  %3655 = vmatpush3.msra.mxu1 %v288_v13  ;;  %v327_v48 = vld [vmem:[%s4716_s30 + $0x238] sm:$0xff]  ;;  %v326_v52 = vld [vmem:[%s4716_s30 + $0x230] sm:$0xff]  ;;  %v373_v56 = vld [vmem:[%s4716_s30 + $0x3a8] sm:$0xff] }
  0x3a   : > { %1594 = vmatprep.mubr.f32.mxu1 %v1182_v12  ;;  %1525 = vmatmul.mubr.f32.vlgmr.msra.gmra.mxu0 %v1173_v0  ;;  %v359_v49 = vld [vmem:[%s4716_s30 + $0x338] sm:$0xff]  ;;  %v358_v54 = vld [vmem:[%s4716_s30 + $0x330] sm:$0xff]  ;;  %v325_v57 = vld [vmem:[%s4716_s30 + $0x228] sm:$0xff] }
  0x3b   : > { %1595 = vmatmul.mubr.f32.vlgmr.msra.gmra.mxu1 %v1180_v3  ;;  %3659 = vmatprep.subr.mxu0 %v351_v14  ;;  %v357_v58 = vld [vmem:[%s4716_s30 + $0x328] sm:$0xff]  ;;  %v340_v60 = vld [vmem:[%s4716_s30 + $0x2a0] sm:$0xff]  ;;  %v339_v0 = vld [vmem:[%s4716_s30 + $0x298] sm:$0xff] }
  0x3c   : > { %3694 = vmatprep.subr.mxu1 %v383_v15  ;;  %3660 = vmatpush3.msra.mxu0 %v335_v16  ;;  %v243_v59 = vld [vmem:[%s4711_s26 + $0x8] sm:$0xff]  ;;  %v372_v61 = vld [vmem:[%s4716_s30 + $0x3a0] sm:$0xff]  ;;  %v371_v1 = vld [vmem:[%s4716_s30 + $0x398] sm:$0xff] }
  0x3d   : > { %3695 = vmatpush3.msra.mxu1 %v367_v17  ;;  %3661 = vmatprep.subr.mxu0 %v350_v18  ;;  %v324_v62 = vld [vmem:[%s4716_s30 + $0x220] sm:$0xff]  ;;  %v1183_v2 = vcombine.high %v243_v59, %v243_v59  ;;  %v323_v3 = vld [vmem:[%s4716_s30 + $0x218] sm:$0xff]  ;;  %v338_v5 = vld [vmem:[%s4716_s30 + $0x290] sm:$0xff]  ;;  %v1190_v7 = vrot.slane %v243_v59, %v4765_v53 }
  0x3e   : > { %3696 = vmatprep.subr.mxu1 %v382_v19  ;;  %3662 = vmatpush3.msra.mxu0 %v334_v20  ;;  %v356_v63 = vld [vmem:[%s4716_s30 + $0x320] sm:$0xff]  ;;  %v355_v4 = vld [vmem:[%s4716_s30 + $0x318] sm:$0xff]  ;;  %v370_v6 = vld [vmem:[%s4716_s30 + $0x390] sm:$0xff] }
  0x3f   : > { %3697 = vmatpush3.msra.mxu1 %v366_v21  ;;  %3663 = vmatprep.subr.mxu0 %v349_v22  ;;  %v322_v8 = vld [vmem:[%s4716_s30 + $0x210] sm:$0xff]  ;;  %v337_v10 = vld [vmem:[%s4716_s30 + $0x288] sm:$0xff]  ;;  %v1197_v12 = vrot.slane %v1183_v2, %v4765_v53  ;;  %v336_v15 = vld [vmem:[%s4716_s30 + $0x280] sm:$0xff]  ;;  %v1198_v17 = vcombine.high %v1190_v7, %v1190_v7 }
  0x40   : > { %3698 = vmatprep.subr.mxu1 %v381_v23  ;;  %3664 = vmatpush3.msra.mxu0 %v333_v24  ;;  %v354_v9 = vld [vmem:[%s4716_s30 + $0x310] sm:$0xff]  ;;  %v369_v11 = vld [vmem:[%s4716_s30 + $0x388] sm:$0xff]  ;;  %v368_v16 = vld [vmem:[%s4716_s30 + $0x380] sm:$0xff] }
  0x41   : > { %3699 = vmatpush3.msra.mxu1 %v365_v25  ;;  %3665 = vmatprep.subr.mxu0 %v348_v26  ;;  %v321_v13 = vld [vmem:[%s4716_s30 + $0x208] sm:$0xff]  ;;  %v320_v18 = vld [vmem:[%s4716_s30 + $0x200] sm:$0xff]  ;;  %v1199_v20 = vcombine.high %v1197_v12, %v1197_v12  ;;  %v415_v21 = vld [vmem:[%s4716_s30 + $0x4f8] sm:$0xff] }
  0x42   : > { %3700 = vmatprep.subr.mxu1 %v380_v27  ;;  %3666 = vmatpush3.msra.mxu0 %v332_v28  ;;  %v353_v14 = vld [vmem:[%s4716_s30 + $0x308] sm:$0xff]  ;;  %v352_v19 = vld [vmem:[%s4716_s30 + $0x300] sm:$0xff]  ;;  %v447_v22 = vld [vmem:[%s4716_s30 + $0x5f8] sm:$0xff] }
  0x43   : > { %3701 = vmatpush3.msra.mxu1 %v364_v29  ;;  %3667 = vmatprep.subr.mxu0 %v347_v30  ;;  %v399_v23 = vld [vmem:[%s4716_s30 + $0x478] sm:$0xff]  ;;  %v414_v25 = vld [vmem:[%s4716_s30 + $0x4f0] sm:$0xff]  ;;  %v413_v29 = vld [vmem:[%s4716_s30 + $0x4e8] sm:$0xff] }
  0x44   : > { %3702 = vmatprep.subr.mxu1 %v379_v31  ;;  %3668 = vmatpush3.msra.mxu0 %v331_v32  ;;  %v431_v24 = vld [vmem:[%s4716_s30 + $0x578] sm:$0xff]  ;;  %v446_v26 = vld [vmem:[%s4716_s30 + $0x5f0] sm:$0xff]  ;;  %v445_v30 = vld [vmem:[%s4716_s30 + $0x5e8] sm:$0xff] }
  0x45   : > { %3703 = vmatpush3.msra.mxu1 %v363_v33  ;;  %3669 = vmatprep.subr.mxu0 %v346_v34  ;;  %v398_v27 = vld [vmem:[%s4716_s30 + $0x470] sm:$0xff]  ;;  %v397_v31 = vld [vmem:[%s4716_s30 + $0x468] sm:$0xff]  ;;  %v412_v33 = vld [vmem:[%s4716_s30 + $0x4e0] sm:$0xff] }
  0x46   : > { %3704 = vmatprep.subr.mxu1 %v378_v35  ;;  %3670 = vmatpush3.msra.mxu0 %v330_v36  ;;  %v430_v28 = vld [vmem:[%s4716_s30 + $0x570] sm:$0xff]  ;;  %v429_v32 = vld [vmem:[%s4716_s30 + $0x568] sm:$0xff]  ;;  %v444_v34 = vld [vmem:[%s4716_s30 + $0x5e0] sm:$0xff] }
  0x47   : > { %3705 = vmatpush3.msra.mxu1 %v362_v37  ;;  %3671 = vmatprep.subr.mxu0 %v345_v38  ;;  %v396_v35 = vld [vmem:[%s4716_s30 + $0x460] sm:$0xff]  ;;  %v411_v37 = vld [vmem:[%s4716_s30 + $0x4d8] sm:$0xff]  ;;  %v438_v59 = vld [vmem:[%s4716_s30 + $0x5b0] sm:$0xff] }
  0x48   : > { %3706 = vmatprep.subr.mxu1 %v377_v39  ;;  %3672 = vmatpush3.msra.mxu0 %v329_v40  ;;  %v428_v36 = vld [vmem:[%s4716_s30 + $0x560] sm:$0xff]  ;;  %v443_v38 = vld [vmem:[%s4716_s30 + $0x5d8] sm:$0xff]  ;;  %v244_v2 = vld [vmem:[%s4711_s26 + $0x10] sm:$0xff] }
  0x49   : > { %3707 = vmatpush3.msra.mxu1 %v361_v41  ;;  %3673 = vmatprep.subr.mxu0 %v344_v42  ;;  %v395_v39 = vld [vmem:[%s4716_s30 + $0x458] sm:$0xff]  ;;  %v410_v41 = vld [vmem:[%s4716_s30 + $0x4d0] sm:$0xff] }
  0x4a   : > { %3708 = vmatprep.subr.mxu1 %v376_v43  ;;  %3674 = vmatpush3.msra.mxu0 %v328_v44  ;;  %v427_v40 = vld [vmem:[%s4716_s30 + $0x558] sm:$0xff]  ;;  %v442_v42 = vld [vmem:[%s4716_s30 + $0x5d0] sm:$0xff] }
  0x4b   : > { %3709 = vmatpush3.msra.mxu1 %v360_v45  ;;  %3675 = vmatprep.subr.mxu0 %v343_v46  ;;  %v394_v43 = vld [vmem:[%s4716_s30 + $0x450] sm:$0xff]  ;;  %v409_v45 = vld [vmem:[%s4716_s30 + $0x4c8] sm:$0xff] }
  0x4c   : > { %3710 = vmatprep.subr.mxu1 %v375_v47  ;;  %3676 = vmatpush3.msra.mxu0 %v327_v48  ;;  %v426_v44 = vld [vmem:[%s4716_s30 + $0x550] sm:$0xff]  ;;  %v441_v46 = vld [vmem:[%s4716_s30 + $0x5c8] sm:$0xff] }
  0x4d   : > { %3711 = vmatpush3.msra.mxu1 %v359_v49  ;;  %3677 = vmatprep.subr.mxu0 %v342_v50  ;;  %v393_v47 = vld [vmem:[%s4716_s30 + $0x448] sm:$0xff]  ;;  %v408_v49 = vld [vmem:[%s4716_s30 + $0x4c0] sm:$0xff] }
  0x4e   : > { %3712 = vmatprep.subr.mxu1 %v374_v51  ;;  %3678 = vmatpush3.msra.mxu0 %v326_v52  ;;  %v425_v48 = vld [vmem:[%s4716_s30 + $0x548] sm:$0xff]  ;;  %v440_v50 = vld [vmem:[%s4716_s30 + $0x5c0] sm:$0xff] }
  0x4f   : > { %3713 = vmatpush3.msra.mxu1 %v358_v54  ;;  %3679 = vmatprep.subr.mxu0 %v341_v55  ;;  %v392_v51 = vld [vmem:[%s4716_s30 + $0x440] sm:$0xff]  ;;  %v407_v54 = vld [vmem:[%s4716_s30 + $0x4b8] sm:$0xff] }
  0x50   : > { %3714 = vmatprep.subr.mxu1 %v373_v56  ;;  %3680 = vmatpush3.msra.mxu0 %v325_v57  ;;  %v424_v52 = vld [vmem:[%s4716_s30 + $0x540] sm:$0xff]  ;;  %v439_v55 = vld [vmem:[%s4716_s30 + $0x5b8] sm:$0xff] }
  0x51   : > { %3715 = vmatpush3.msra.mxu1 %v357_v58  ;;  %3681 = vmatprep.subr.mxu0 %v340_v60  ;;  %v391_v56 = vld [vmem:[%s4716_s30 + $0x438] sm:$0xff]  ;;  %v406_v58 = vld [vmem:[%s4716_s30 + $0x4b0] sm:$0xff] }
  0x52   : > { %3716 = vmatprep.subr.mxu1 %v372_v61  ;;  %3682 = vmatpush3.msra.mxu0 %v324_v62  ;;  %v423_v57 = vld [vmem:[%s4716_s30 + $0x538] sm:$0xff]  ;;  %v390_v60 = vld [vmem:[%s4716_s30 + $0x430] sm:$0xff]  ;;  %v405_v62 = vld [vmem:[%s4716_s30 + $0x4a8] sm:$0xff] }
  0x53   : > { %3717 = vmatpush3.msra.mxu1 %v356_v63  ;;  %3683 = vmatprep.subr.mxu0 %v339_v0  ;;  %v422_v61 = vld [vmem:[%s4716_s30 + $0x530] sm:$0xff]  ;;  %v437_v63 = vld [vmem:[%s4716_s30 + $0x5a8] sm:$0xff] }
  0x54   : > { %3718 = vmatprep.subr.mxu1 %v371_v1  ;;  %3684 = vmatpush3.msra.mxu0 %v323_v3  ;;  %v389_v0 = vld [vmem:[%s4716_s30 + $0x428] sm:$0xff]  ;;  %v404_v3 = vld [vmem:[%s4716_s30 + $0x4a0] sm:$0xff] }
  0x55   : > { %3719 = vmatpush3.msra.mxu1 %v355_v4  ;;  %3685 = vmatprep.subr.mxu0 %v338_v5  ;;  %v421_v1 = vld [vmem:[%s4716_s30 + $0x528] sm:$0xff]  ;;  %v436_v4 = vld [vmem:[%s4716_s30 + $0x5a0] sm:$0xff] }
  0x56   : > { %3720 = vmatprep.subr.mxu1 %v370_v6  ;;  %3686 = vmatpush3.msra.mxu0 %v322_v8  ;;  %v388_v5 = vld [vmem:[%s4716_s30 + $0x420] sm:$0xff]  ;;  %v435_v8 = vld [vmem:[%s4716_s30 + $0x598] sm:$0xff] }
  0x57   : > { %3721 = vmatpush3.msra.mxu1 %v354_v9  ;;  %3687 = vmatprep.subr.mxu0 %v337_v10  ;;  %v420_v6 = vld [vmem:[%s4716_s30 + $0x520] sm:$0xff]  ;;  %v1200_v9 = vcombine.high %v244_v2, %v244_v2  ;;  %v387_v10 = vld [vmem:[%s4716_s30 + $0x418] sm:$0xff] }
  0x58   : > { %3722 = vmatprep.subr.mxu1 %v369_v11  ;;  %3688 = vmatpush3.msra.mxu0 %v321_v13  ;;  %v419_v11 = vld [vmem:[%s4716_s30 + $0x518] sm:$0xff]  ;;  %v434_v13 = vld [vmem:[%s4716_s30 + $0x590] sm:$0xff] }
  0x59   : > { %3723 = vmatpush3.msra.mxu1 %v353_v14  ;;  %3689 = vmatprep.subr.mxu0 %v336_v15  ;;  %v1207_v14 = vrot.slane %v244_v2, %v4765_v53  ;;  %v386_v15 = vld [vmem:[%s4716_s30 + $0x410] sm:$0xff] }
  0x5a   : > { %3724 = vmatprep.subr.mxu1 %v368_v16  ;;  %3690 = vmatpush3.msra.mxu0 %v320_v18  ;;  %v418_v16 = vld [vmem:[%s4716_s30 + $0x510] sm:$0xff]  ;;  %v433_v18 = vld [vmem:[%s4716_s30 + $0x588] sm:$0xff] }
  0x5b   : > { %1664 = vmatprep.mubr.f32.mxu0 %v1198_v17  ;;  %3725 = vmatpush3.msra.mxu1 %v352_v19  ;;  %v401_v17 = vld [vmem:[%s4716_s30 + $0x488] sm:$0xff]  ;;  %v1214_v19 = vrot.slane %v1200_v9, %v4765_v53  ;;  %v502_v2 = vld [vmem:[%s4716_s30 + $0x7b0] sm:$0xff]  ;;  %v245_v9 = vld [vmem:[%s4711_s26 + $0x18] sm:$0xff] }
  0x5c   : > { %1665 = vmatmul.mubr.f32.vlgmr.msra.gmra.mxu0 %v1190_v7  ;;  %1734 = vmatprep.mubr.f32.mxu1 %v1199_v20  ;;  %v403_v7 = vld [vmem:[%s4716_s30 + $0x498] sm:$0xff]  ;;  %v385_v20 = vld [vmem:[%s4716_s30 + $0x408] sm:$0xff] }
  0x5d   : > { %3729 = vmatprep.subr.mxu0 %v415_v21  ;;  %3764 = vmatprep.subr.mxu1 %v447_v22  ;;  %v417_v21 = vld [vmem:[%s4716_s30 + $0x508] sm:$0xff]  ;;  %v400_v22 = vld [vmem:[%s4716_s30 + $0x480] sm:$0xff] }
  0x5e   : > { %1735 = vmatmul.mubr.f32.vlgmr.msra.gmra.mxu1 %v1197_v12  ;;  %3730 = vmatpush3.msra.mxu0 %v399_v23  ;;  %v402_v12 = vld [vmem:[%s4716_s30 + $0x490] sm:$0xff]  ;;  %v432_v23 = vld [vmem:[%s4716_s30 + $0x580] sm:$0xff] }
  0x5f   : > { %3765 = vmatpush3.msra.mxu1 %v431_v24  ;;  %3731 = vmatprep.subr.mxu0 %v414_v25  ;;  %v1215_v24 = vcombine.high %v1207_v14, %v1207_v14  ;;  %v384_v25 = vld [vmem:[%s4716_s30 + $0x400] sm:$0xff] }
  0x60   : > { %3766 = vmatprep.subr.mxu1 %v446_v26  ;;  %3732 = vmatpush3.msra.mxu0 %v398_v27  ;;  %v416_v26 = vld [vmem:[%s4716_s30 + $0x500] sm:$0xff]  ;;  %v1216_v27 = vcombine.high %v1214_v19, %v1214_v19 }
  0x61   : > { %3767 = vmatpush3.msra.mxu1 %v430_v28  ;;  %3733 = vmatprep.subr.mxu0 %v413_v29  ;;  %v479_v28 = vld [vmem:[%s4716_s30 + $0x6f8] sm:$0xff] }
  0x62   : > { %3768 = vmatprep.subr.mxu1 %v445_v30  ;;  %3734 = vmatpush3.msra.mxu0 %v397_v31  ;;  %v511_v29 = vld [vmem:[%s4716_s30 + $0x7f8] sm:$0xff] }
  0x63   : > { %3769 = vmatpush3.msra.mxu1 %v429_v32  ;;  %3735 = vmatprep.subr.mxu0 %v412_v33  ;;  %v463_v30 = vld [vmem:[%s4716_s30 + $0x678] sm:$0xff]  ;;  %v478_v32 = vld [vmem:[%s4716_s30 + $0x6f0] sm:$0xff] }
  0x64   : > { %3770 = vmatprep.subr.mxu1 %v444_v34  ;;  %3736 = vmatpush3.msra.mxu0 %v396_v35  ;;  %v495_v31 = vld [vmem:[%s4716_s30 + $0x778] sm:$0xff]  ;;  %v510_v33 = vld [vmem:[%s4716_s30 + $0x7f0] sm:$0xff] }
  0x65   : > { %3771 = vmatpush3.msra.mxu1 %v428_v36  ;;  %3737 = vmatprep.subr.mxu0 %v411_v37  ;;  %v462_v34 = vld [vmem:[%s4716_s30 + $0x670] sm:$0xff]  ;;  %v477_v36 = vld [vmem:[%s4716_s30 + $0x6e8] sm:$0xff] }
  0x66   : > { %3772 = vmatprep.subr.mxu1 %v443_v38  ;;  %3738 = vmatpush3.msra.mxu0 %v395_v39  ;;  %v494_v35 = vld [vmem:[%s4716_s30 + $0x770] sm:$0xff]  ;;  %v509_v37 = vld [vmem:[%s4716_s30 + $0x7e8] sm:$0xff] }
  0x67   : > { %3773 = vmatpush3.msra.mxu1 %v427_v40  ;;  %3739 = vmatprep.subr.mxu0 %v410_v41  ;;  %v461_v38 = vld [vmem:[%s4716_s30 + $0x668] sm:$0xff]  ;;  %v476_v40 = vld [vmem:[%s4716_s30 + $0x6e0] sm:$0xff] }
  0x68   : > { %3774 = vmatprep.subr.mxu1 %v442_v42  ;;  %3740 = vmatpush3.msra.mxu0 %v394_v43  ;;  %v493_v39 = vld [vmem:[%s4716_s30 + $0x768] sm:$0xff]  ;;  %v508_v41 = vld [vmem:[%s4716_s30 + $0x7e0] sm:$0xff] }
  0x69   : > { %3775 = vmatpush3.msra.mxu1 %v426_v44  ;;  %3741 = vmatprep.subr.mxu0 %v409_v45  ;;  %v460_v42 = vld [vmem:[%s4716_s30 + $0x660] sm:$0xff]  ;;  %v475_v44 = vld [vmem:[%s4716_s30 + $0x6d8] sm:$0xff] }
  0x6a   : > { %3776 = vmatprep.subr.mxu1 %v441_v46  ;;  %3742 = vmatpush3.msra.mxu0 %v393_v47  ;;  %v492_v43 = vld [vmem:[%s4716_s30 + $0x760] sm:$0xff]  ;;  %v507_v45 = vld [vmem:[%s4716_s30 + $0x7d8] sm:$0xff] }
  0x6b   : > { %3777 = vmatpush3.msra.mxu1 %v425_v48  ;;  %3743 = vmatprep.subr.mxu0 %v408_v49  ;;  %v459_v46 = vld [vmem:[%s4716_s30 + $0x658] sm:$0xff]  ;;  %v474_v48 = vld [vmem:[%s4716_s30 + $0x6d0] sm:$0xff] }
  0x6c   : > { %3778 = vmatprep.subr.mxu1 %v440_v50  ;;  %3744 = vmatpush3.msra.mxu0 %v392_v51  ;;  %v491_v47 = vld [vmem:[%s4716_s30 + $0x758] sm:$0xff]  ;;  %v506_v49 = vld [vmem:[%s4716_s30 + $0x7d0] sm:$0xff] }
  0x6d   : > { %3779 = vmatpush3.msra.mxu1 %v424_v52  ;;  %3745 = vmatprep.subr.mxu0 %v407_v54  ;;  %v458_v50 = vld [vmem:[%s4716_s30 + $0x650] sm:$0xff]  ;;  %v473_v52 = vld [vmem:[%s4716_s30 + $0x6c8] sm:$0xff] }
  0x6e   : > { %3780 = vmatprep.subr.mxu1 %v439_v55  ;;  %3746 = vmatpush3.msra.mxu0 %v391_v56  ;;  %v490_v51 = vld [vmem:[%s4716_s30 + $0x750] sm:$0xff]  ;;  %v505_v54 = vld [vmem:[%s4716_s30 + $0x7c8] sm:$0xff] }
  0x6f   : > { %3781 = vmatpush3.msra.mxu1 %v423_v57  ;;  %3747 = vmatprep.subr.mxu0 %v406_v58  ;;  %v457_v55 = vld [vmem:[%s4716_s30 + $0x648] sm:$0xff]  ;;  %v472_v57 = vld [vmem:[%s4716_s30 + $0x6c0] sm:$0xff] }
  0x70   : > { %3782 = vmatprep.subr.mxu1 %v438_v59  ;;  %3748 = vmatpush3.msra.mxu0 %v390_v60  ;;  %v489_v56 = vld [vmem:[%s4716_s30 + $0x748] sm:$0xff]  ;;  %v504_v58 = vld [vmem:[%s4716_s30 + $0x7c0] sm:$0xff] }
  0x71   : > { %3783 = vmatpush3.msra.mxu1 %v422_v61  ;;  %3749 = vmatprep.subr.mxu0 %v405_v62  ;;  %v456_v59 = vld [vmem:[%s4716_s30 + $0x640] sm:$0xff]  ;;  %v471_v61 = vld [vmem:[%s4716_s30 + $0x6b8] sm:$0xff] }
  0x72   : > { %3784 = vmatprep.subr.mxu1 %v437_v63  ;;  %3750 = vmatpush3.msra.mxu0 %v389_v0  ;;  %v488_v60 = vld [vmem:[%s4716_s30 + $0x740] sm:$0xff]  ;;  %v503_v62 = vld [vmem:[%s4716_s30 + $0x7b8] sm:$0xff] }
  0x73   : > { %3785 = vmatpush3.msra.mxu1 %v421_v1  ;;  %3751 = vmatprep.subr.mxu0 %v404_v3  ;;  %v455_v63 = vld [vmem:[%s4716_s30 + $0x638] sm:$0xff]  ;;  %v470_v1 = vld [vmem:[%s4716_s30 + $0x6b0] sm:$0xff] }
  0x74   : > { %3786 = vmatprep.subr.mxu1 %v436_v4  ;;  %3752 = vmatpush3.msra.mxu0 %v388_v5  ;;  %v487_v0 = vld [vmem:[%s4716_s30 + $0x738] sm:$0xff]  ;;  %v454_v3 = vld [vmem:[%s4716_s30 + $0x630] sm:$0xff]  ;;  %v469_v5 = vld [vmem:[%s4716_s30 + $0x6a8] sm:$0xff] }
  0x75   : > { %3787 = vmatpush3.msra.mxu1 %v420_v6  ;;  %3753 = vmatprep.subr.mxu0 %v403_v7  ;;  %v486_v4 = vld [vmem:[%s4716_s30 + $0x730] sm:$0xff]  ;;  %v501_v6 = vld [vmem:[%s4716_s30 + $0x7a8] sm:$0xff] }
  0x76   : > { %3788 = vmatprep.subr.mxu1 %v435_v8  ;;  %3754 = vmatpush3.msra.mxu0 %v387_v10  ;;  %v453_v7 = vld [vmem:[%s4716_s30 + $0x628] sm:$0xff]  ;;  %v468_v10 = vld [vmem:[%s4716_s30 + $0x6a0] sm:$0xff] }
  0x77   : > { %3789 = vmatpush3.msra.mxu1 %v419_v11  ;;  %3755 = vmatprep.subr.mxu0 %v402_v12  ;;  %v485_v8 = vld [vmem:[%s4716_s30 + $0x728] sm:$0xff]  ;;  %v500_v11 = vld [vmem:[%s4716_s30 + $0x7a0] sm:$0xff] }
  0x78   : > { %3790 = vmatprep.subr.mxu1 %v434_v13  ;;  %3756 = vmatpush3.msra.mxu0 %v386_v15  ;;  %v452_v12 = vld [vmem:[%s4716_s30 + $0x620] sm:$0xff]  ;;  %v499_v15 = vld [vmem:[%s4716_s30 + $0x798] sm:$0xff] }
  0x79   : > { %3791 = vmatpush3.msra.mxu1 %v418_v16  ;;  %3757 = vmatprep.subr.mxu0 %v401_v17  ;;  %v484_v13 = vld [vmem:[%s4716_s30 + $0x720] sm:$0xff]  ;;  %v1217_v16 = vcombine.high %v245_v9, %v245_v9  ;;  %v451_v17 = vld [vmem:[%s4716_s30 + $0x618] sm:$0xff] }
  0x7a   : > { %3792 = vmatprep.subr.mxu1 %v433_v18  ;;  %3758 = vmatpush3.msra.mxu0 %v385_v20  ;;  %v483_v18 = vld [vmem:[%s4716_s30 + $0x718] sm:$0xff]  ;;  %v498_v20 = vld [vmem:[%s4716_s30 + $0x790] sm:$0xff] }
  0x7b   : > { %3793 = vmatpush3.msra.mxu1 %v417_v21  ;;  %3759 = vmatprep.subr.mxu0 %v400_v22  ;;  %v1224_v21 = vrot.slane %v245_v9, %v4765_v53  ;;  %v450_v22 = vld [vmem:[%s4716_s30 + $0x610] sm:$0xff] }
  0x7c   : > { %3794 = vmatprep.subr.mxu1 %v432_v23  ;;  %3760 = vmatpush3.msra.mxu0 %v384_v25  ;;  %v482_v23 = vld [vmem:[%s4716_s30 + $0x710] sm:$0xff]  ;;  %v497_v25 = vld [vmem:[%s4716_s30 + $0x788] sm:$0xff] }
  0x7d   : > { %1804 = vmatprep.mubr.f32.mxu0 %v1215_v24  ;;  %3795 = vmatpush3.msra.mxu1 %v416_v26  ;;  %v465_v24 = vld [vmem:[%s4716_s30 + $0x688] sm:$0xff]  ;;  %v1231_v26 = vrot.slane %v1217_v16, %v4765_v53  ;;  %v566_v9 = vld [vmem:[%s4716_s30 + $0x9b0] sm:$0xff]  ;;  %v246_v16 = vld [vmem:[%s4711_s26 + $0x20] sm:$0xff] }
  0x7e   : > { %1805 = vmatmul.mubr.f32.vlgmr.msra.gmra.mxu0 %v1207_v14  ;;  %1874 = vmatprep.mubr.f32.mxu1 %v1216_v27  ;;  %v467_v14 = vld [vmem:[%s4716_s30 + $0x698] sm:$0xff]  ;;  %v449_v27 = vld [vmem:[%s4716_s30 + $0x608] sm:$0xff] }
  0x7f   : > { %3799 = vmatprep.subr.mxu0 %v479_v28  ;;  %3834 = vmatprep.subr.mxu1 %v511_v29  ;;  %v481_v28 = vld [vmem:[%s4716_s30 + $0x708] sm:$0xff]  ;;  %v464_v29 = vld [vmem:[%s4716_s30 + $0x680] sm:$0xff] }
  0x80   : > { %1875 = vmatmul.mubr.f32.vlgmr.msra.gmra.mxu1 %v1214_v19  ;;  %3800 = vmatpush3.msra.mxu0 %v463_v30  ;;  %v466_v19 = vld [vmem:[%s4716_s30 + $0x690] sm:$0xff]  ;;  %v496_v30 = vld [vmem:[%s4716_s30 + $0x780] sm:$0xff] }
  0x81   : > { %3835 = vmatpush3.msra.mxu1 %v495_v31  ;;  %3801 = vmatprep.subr.mxu0 %v478_v32  ;;  %v1232_v31 = vcombine.high %v1224_v21, %v1224_v21  ;;  %v448_v32 = vld [vmem:[%s4716_s30 + $0x600] sm:$0xff] }
  0x82   : > { %3836 = vmatprep.subr.mxu1 %v510_v33  ;;  %3802 = vmatpush3.msra.mxu0 %v462_v34  ;;  %v480_v33 = vld [vmem:[%s4716_s30 + $0x700] sm:$0xff]  ;;  %v1233_v34 = vcombine.high %v1231_v26, %v1231_v26 }
  0x83   : > { %3837 = vmatpush3.msra.mxu1 %v494_v35  ;;  %3803 = vmatprep.subr.mxu0 %v477_v36  ;;  %v543_v35 = vld [vmem:[%s4716_s30 + $0x8f8] sm:$0xff] }
  0x84   : > { %3838 = vmatprep.subr.mxu1 %v509_v37  ;;  %3804 = vmatpush3.msra.mxu0 %v461_v38  ;;  %v575_v36 = vld [vmem:[%s4716_s30 + $0x9f8] sm:$0xff] }
  0x85   : > { %3839 = vmatpush3.msra.mxu1 %v493_v39  ;;  %3805 = vmatprep.subr.mxu0 %v476_v40  ;;  %v527_v37 = vld [vmem:[%s4716_s30 + $0x878] sm:$0xff]  ;;  %v542_v39 = vld [vmem:[%s4716_s30 + $0x8f0] sm:$0xff] }
  0x86   : > { %3840 = vmatprep.subr.mxu1 %v508_v41  ;;  %3806 = vmatpush3.msra.mxu0 %v460_v42  ;;  %v559_v38 = vld [vmem:[%s4716_s30 + $0x978] sm:$0xff]  ;;  %v574_v40 = vld [vmem:[%s4716_s30 + $0x9f0] sm:$0xff] }
  0x87   : > { %3841 = vmatpush3.msra.mxu1 %v492_v43  ;;  %3807 = vmatprep.subr.mxu0 %v475_v44  ;;  %v526_v41 = vld [vmem:[%s4716_s30 + $0x870] sm:$0xff]  ;;  %v541_v43 = vld [vmem:[%s4716_s30 + $0x8e8] sm:$0xff] }
  0x88   : > { %3842 = vmatprep.subr.mxu1 %v507_v45  ;;  %3808 = vmatpush3.msra.mxu0 %v459_v46  ;;  %v558_v42 = vld [vmem:[%s4716_s30 + $0x970] sm:$0xff]  ;;  %v573_v44 = vld [vmem:[%s4716_s30 + $0x9e8] sm:$0xff] }
  0x89   : > { %3843 = vmatpush3.msra.mxu1 %v491_v47  ;;  %3809 = vmatprep.subr.mxu0 %v474_v48  ;;  %v525_v45 = vld [vmem:[%s4716_s30 + $0x868] sm:$0xff]  ;;  %v540_v47 = vld [vmem:[%s4716_s30 + $0x8e0] sm:$0xff] }
  0x8a   : > { %3844 = vmatprep.subr.mxu1 %v506_v49  ;;  %3810 = vmatpush3.msra.mxu0 %v458_v50  ;;  %v557_v46 = vld [vmem:[%s4716_s30 + $0x968] sm:$0xff]  ;;  %v572_v48 = vld [vmem:[%s4716_s30 + $0x9e0] sm:$0xff] }
  0x8b   : > { %3845 = vmatpush3.msra.mxu1 %v490_v51  ;;  %3811 = vmatprep.subr.mxu0 %v473_v52  ;;  %v524_v49 = vld [vmem:[%s4716_s30 + $0x860] sm:$0xff]  ;;  %v539_v51 = vld [vmem:[%s4716_s30 + $0x8d8] sm:$0xff] }
  0x8c   : > { %3846 = vmatprep.subr.mxu1 %v505_v54  ;;  %3812 = vmatpush3.msra.mxu0 %v457_v55  ;;  %v556_v50 = vld [vmem:[%s4716_s30 + $0x960] sm:$0xff]  ;;  %v571_v52 = vld [vmem:[%s4716_s30 + $0x9d8] sm:$0xff] }
  0x8d   : > { %3847 = vmatpush3.msra.mxu1 %v489_v56  ;;  %3813 = vmatprep.subr.mxu0 %v472_v57  ;;  %v523_v54 = vld [vmem:[%s4716_s30 + $0x858] sm:$0xff]  ;;  %v538_v56 = vld [vmem:[%s4716_s30 + $0x8d0] sm:$0xff] }
  0x8e   : > { %3848 = vmatprep.subr.mxu1 %v504_v58  ;;  %3814 = vmatpush3.msra.mxu0 %v456_v59  ;;  %v555_v55 = vld [vmem:[%s4716_s30 + $0x958] sm:$0xff]  ;;  %v570_v57 = vld [vmem:[%s4716_s30 + $0x9d0] sm:$0xff] }
  0x8f   : > { %3849 = vmatpush3.msra.mxu1 %v488_v60  ;;  %3815 = vmatprep.subr.mxu0 %v471_v61  ;;  %v522_v58 = vld [vmem:[%s4716_s30 + $0x850] sm:$0xff]  ;;  %v537_v60 = vld [vmem:[%s4716_s30 + $0x8c8] sm:$0xff] }
  0x90   : > { %3850 = vmatprep.subr.mxu1 %v503_v62  ;;  %3816 = vmatpush3.msra.mxu0 %v455_v63  ;;  %v554_v59 = vld [vmem:[%s4716_s30 + $0x950] sm:$0xff]  ;;  %v569_v61 = vld [vmem:[%s4716_s30 + $0x9c8] sm:$0xff] }
  0x91   : > { %3851 = vmatpush3.msra.mxu1 %v487_v0  ;;  %3817 = vmatprep.subr.mxu0 %v470_v1  ;;  %v521_v62 = vld [vmem:[%s4716_s30 + $0x848] sm:$0xff]  ;;  %v536_v0 = vld [vmem:[%s4716_s30 + $0x8c0] sm:$0xff] }
  0x92   : > { %3852 = vmatprep.subr.mxu1 %v502_v2  ;;  %3818 = vmatpush3.msra.mxu0 %v454_v3  ;;  %v553_v63 = vld [vmem:[%s4716_s30 + $0x948] sm:$0xff]  ;;  %v568_v1 = vld [vmem:[%s4716_s30 + $0x9c0] sm:$0xff] }
  0x93   : > { %3853 = vmatpush3.msra.mxu1 %v486_v4  ;;  %3819 = vmatprep.subr.mxu0 %v469_v5  ;;  %v520_v2 = vld [vmem:[%s4716_s30 + $0x840] sm:$0xff]  ;;  %v535_v4 = vld [vmem:[%s4716_s30 + $0x8b8] sm:$0xff] }
  0x94   : > { %3854 = vmatprep.subr.mxu1 %v501_v6  ;;  %3820 = vmatpush3.msra.mxu0 %v453_v7  ;;  %v552_v3 = vld [vmem:[%s4716_s30 + $0x940] sm:$0xff]  ;;  %v567_v5 = vld [vmem:[%s4716_s30 + $0x9b8] sm:$0xff] }
  0x95   : > { %3855 = vmatpush3.msra.mxu1 %v485_v8  ;;  %3821 = vmatprep.subr.mxu0 %v468_v10  ;;  %v519_v6 = vld [vmem:[%s4716_s30 + $0x838] sm:$0xff]  ;;  %v534_v8 = vld [vmem:[%s4716_s30 + $0x8b0] sm:$0xff] }
  0x96   : > { %3856 = vmatprep.subr.mxu1 %v500_v11  ;;  %3822 = vmatpush3.msra.mxu0 %v452_v12  ;;  %v551_v7 = vld [vmem:[%s4716_s30 + $0x938] sm:$0xff]  ;;  %v518_v10 = vld [vmem:[%s4716_s30 + $0x830] sm:$0xff]  ;;  %v533_v12 = vld [vmem:[%s4716_s30 + $0x8a8] sm:$0xff] }
  0x97   : > { %3857 = vmatpush3.msra.mxu1 %v484_v13  ;;  %3823 = vmatprep.subr.mxu0 %v467_v14  ;;  %v550_v11 = vld [vmem:[%s4716_s30 + $0x930] sm:$0xff]  ;;  %v565_v13 = vld [vmem:[%s4716_s30 + $0x9a8] sm:$0xff] }
  0x98   : > { %3858 = vmatprep.subr.mxu1 %v499_v15  ;;  %3824 = vmatpush3.msra.mxu0 %v451_v17  ;;  %v517_v14 = vld [vmem:[%s4716_s30 + $0x828] sm:$0xff]  ;;  %v532_v17 = vld [vmem:[%s4716_s30 + $0x8a0] sm:$0xff] }
  0x99   : > { %3859 = vmatpush3.msra.mxu1 %v483_v18  ;;  %3825 = vmatprep.subr.mxu0 %v466_v19  ;;  %v549_v15 = vld [vmem:[%s4716_s30 + $0x928] sm:$0xff]  ;;  %v564_v18 = vld [vmem:[%s4716_s30 + $0x9a0] sm:$0xff] }
  0x9a   : > { %3860 = vmatprep.subr.mxu1 %v498_v20  ;;  %3826 = vmatpush3.msra.mxu0 %v450_v22  ;;  %v516_v19 = vld [vmem:[%s4716_s30 + $0x820] sm:$0xff]  ;;  %v563_v22 = vld [vmem:[%s4716_s30 + $0x998] sm:$0xff] }
  0x9b   : > { %3861 = vmatpush3.msra.mxu1 %v482_v23  ;;  %3827 = vmatprep.subr.mxu0 %v465_v24  ;;  %v548_v20 = vld [vmem:[%s4716_s30 + $0x920] sm:$0xff]  ;;  %v1234_v23 = vcombine.high %v246_v16, %v246_v16  ;;  %v515_v24 = vld [vmem:[%s4716_s30 + $0x818] sm:$0xff] }
  0x9c   : > { %3862 = vmatprep.subr.mxu1 %v497_v25  ;;  %3828 = vmatpush3.msra.mxu0 %v449_v27  ;;  %v547_v25 = vld [vmem:[%s4716_s30 + $0x918] sm:$0xff]  ;;  %v562_v27 = vld [vmem:[%s4716_s30 + $0x990] sm:$0xff] }
  0x9d   : > { %3863 = vmatpush3.msra.mxu1 %v481_v28  ;;  %3829 = vmatprep.subr.mxu0 %v464_v29  ;;  %v1241_v28 = vrot.slane %v246_v16, %v4765_v53  ;;  %v514_v29 = vld [vmem:[%s4716_s30 + $0x810] sm:$0xff] }
  0x9e   : > { %3864 = vmatprep.subr.mxu1 %v496_v30  ;;  %3830 = vmatpush3.msra.mxu0 %v448_v32  ;;  %v546_v30 = vld [vmem:[%s4716_s30 + $0x910] sm:$0xff]  ;;  %v561_v32 = vld [vmem:[%s4716_s30 + $0x988] sm:$0xff] }
  0x9f   : > { %1944 = vmatprep.mubr.f32.mxu0 %v1232_v31  ;;  %3865 = vmatpush3.msra.mxu1 %v480_v33  ;;  %v529_v31 = vld [vmem:[%s4716_s30 + $0x888] sm:$0xff]  ;;  %v1248_v33 = vrot.slane %v1234_v23, %v4765_v53  ;;  %v630_v16 = vld [vmem:[%s4716_s30 + $0xbb0] sm:$0xff] }
  0xa0   : > { %1945 = vmatmul.mubr.f32.vlgmr.msra.gmra.mxu0 %v1224_v21  ;;  %2014 = vmatprep.mubr.f32.mxu1 %v1233_v34  ;;  %v531_v21 = vld [vmem:[%s4716_s30 + $0x898] sm:$0xff]  ;;  %v513_v34 = vld [vmem:[%s4716_s30 + $0x808] sm:$0xff] }
  0xa1   : > { %3869 = vmatprep.subr.mxu0 %v543_v35  ;;  %3904 = vmatprep.subr.mxu1 %v575_v36  ;;  %v545_v35 = vld [vmem:[%s4716_s30 + $0x908] sm:$0xff]  ;;  %v528_v36 = vld [vmem:[%s4716_s30 + $0x880] sm:$0xff] }
  0xa2   : > { %2015 = vmatmul.mubr.f32.vlgmr.msra.gmra.mxu1 %v1231_v26  ;;  %3870 = vmatpush3.msra.mxu0 %v527_v37  ;;  %v530_v26 = vld [vmem:[%s4716_s30 + $0x890] sm:$0xff]  ;;  %v560_v37 = vld [vmem:[%s4716_s30 + $0x980] sm:$0xff]  ;;  %v247_v23 = vld [vmem:[%s4711_s26 + $0x28] sm:$0xff] }
  0xa3   : > { %3905 = vmatpush3.msra.mxu1 %v559_v38  ;;  %3871 = vmatprep.subr.mxu0 %v542_v39  ;;  %v1249_v38 = vcombine.high %v1241_v28, %v1241_v28  ;;  %v512_v39 = vld [vmem:[%s4716_s30 + $0x800] sm:$0xff] }
  0xa4   : > { %3906 = vmatprep.subr.mxu1 %v574_v40  ;;  %3872 = vmatpush3.msra.mxu0 %v526_v41  ;;  %v544_v40 = vld [vmem:[%s4716_s30 + $0x900] sm:$0xff]  ;;  %v1250_v41 = vcombine.high %v1248_v33, %v1248_v33 }
  0xa5   : > { %3907 = vmatpush3.msra.mxu1 %v558_v42  ;;  %3873 = vmatprep.subr.mxu0 %v541_v43  ;;  %v607_v42 = vld [vmem:[%s4716_s30 + $0xaf8] sm:$0xff] }
  0xa6   : > { %3908 = vmatprep.subr.mxu1 %v573_v44  ;;  %3874 = vmatpush3.msra.mxu0 %v525_v45  ;;  %v639_v43 = vld [vmem:[%s4716_s30 + $0xbf8] sm:$0xff] }
  0xa7   : > { %3909 = vmatpush3.msra.mxu1 %v557_v46  ;;  %3875 = vmatprep.subr.mxu0 %v540_v47  ;;  %v591_v44 = vld [vmem:[%s4716_s30 + $0xa78] sm:$0xff]  ;;  %v606_v46 = vld [vmem:[%s4716_s30 + $0xaf0] sm:$0xff] }
  0xa8   : > { %3910 = vmatprep.subr.mxu1 %v572_v48  ;;  %3876 = vmatpush3.msra.mxu0 %v524_v49  ;;  %v623_v45 = vld [vmem:[%s4716_s30 + $0xb78] sm:$0xff]  ;;  %v638_v47 = vld [vmem:[%s4716_s30 + $0xbf0] sm:$0xff] }
  0xa9   : > { %3911 = vmatpush3.msra.mxu1 %v556_v50  ;;  %3877 = vmatprep.subr.mxu0 %v539_v51  ;;  %v590_v48 = vld [vmem:[%s4716_s30 + $0xa70] sm:$0xff]  ;;  %v605_v50 = vld [vmem:[%s4716_s30 + $0xae8] sm:$0xff] }
  0xaa   : > { %3912 = vmatprep.subr.mxu1 %v571_v52  ;;  %3878 = vmatpush3.msra.mxu0 %v523_v54  ;;  %v622_v49 = vld [vmem:[%s4716_s30 + $0xb70] sm:$0xff]  ;;  %v637_v51 = vld [vmem:[%s4716_s30 + $0xbe8] sm:$0xff] }
  0xab   : > { %3913 = vmatpush3.msra.mxu1 %v555_v55  ;;  %3879 = vmatprep.subr.mxu0 %v538_v56  ;;  %v589_v52 = vld [vmem:[%s4716_s30 + $0xa68] sm:$0xff]  ;;  %v604_v55 = vld [vmem:[%s4716_s30 + $0xae0] sm:$0xff] }
  0xac   : > { %3914 = vmatprep.subr.mxu1 %v570_v57  ;;  %3880 = vmatpush3.msra.mxu0 %v522_v58  ;;  %v621_v54 = vld [vmem:[%s4716_s30 + $0xb68] sm:$0xff]  ;;  %v636_v56 = vld [vmem:[%s4716_s30 + $0xbe0] sm:$0xff] }
  0xad   : > { %3915 = vmatpush3.msra.mxu1 %v554_v59  ;;  %3881 = vmatprep.subr.mxu0 %v537_v60  ;;  %v588_v57 = vld [vmem:[%s4716_s30 + $0xa60] sm:$0xff]  ;;  %v603_v59 = vld [vmem:[%s4716_s30 + $0xad8] sm:$0xff] }
  0xae   : > { %3916 = vmatprep.subr.mxu1 %v569_v61  ;;  %3882 = vmatpush3.msra.mxu0 %v521_v62  ;;  %v620_v58 = vld [vmem:[%s4716_s30 + $0xb60] sm:$0xff]  ;;  %v635_v60 = vld [vmem:[%s4716_s30 + $0xbd8] sm:$0xff] }
  0xaf   : > { %3917 = vmatpush3.msra.mxu1 %v553_v63  ;;  %3883 = vmatprep.subr.mxu0 %v536_v0  ;;  %v587_v61 = vld [vmem:[%s4716_s30 + $0xa58] sm:$0xff]  ;;  %v602_v63 = vld [vmem:[%s4716_s30 + $0xad0] sm:$0xff] }
  0xb0   : > { %3918 = vmatprep.subr.mxu1 %v568_v1  ;;  %3884 = vmatpush3.msra.mxu0 %v520_v2  ;;  %v619_v62 = vld [vmem:[%s4716_s30 + $0xb58] sm:$0xff]  ;;  %v634_v0 = vld [vmem:[%s4716_s30 + $0xbd0] sm:$0xff] }
  0xb1   : > { %3919 = vmatpush3.msra.mxu1 %v552_v3  ;;  %3885 = vmatprep.subr.mxu0 %v535_v4  ;;  %v586_v1 = vld [vmem:[%s4716_s30 + $0xa50] sm:$0xff]  ;;  %v601_v3 = vld [vmem:[%s4716_s30 + $0xac8] sm:$0xff] }
  0xb2   : > { %3920 = vmatprep.subr.mxu1 %v567_v5  ;;  %3886 = vmatpush3.msra.mxu0 %v519_v6  ;;  %v618_v2 = vld [vmem:[%s4716_s30 + $0xb50] sm:$0xff]  ;;  %v633_v4 = vld [vmem:[%s4716_s30 + $0xbc8] sm:$0xff] }
  0xb3   : > { %3921 = vmatpush3.msra.mxu1 %v551_v7  ;;  %3887 = vmatprep.subr.mxu0 %v534_v8  ;;  %v585_v5 = vld [vmem:[%s4716_s30 + $0xa48] sm:$0xff]  ;;  %v600_v7 = vld [vmem:[%s4716_s30 + $0xac0] sm:$0xff] }
  0xb4   : > { %3922 = vmatprep.subr.mxu1 %v566_v9  ;;  %3888 = vmatpush3.msra.mxu0 %v518_v10  ;;  %v617_v6 = vld [vmem:[%s4716_s30 + $0xb48] sm:$0xff]  ;;  %v632_v8 = vld [vmem:[%s4716_s30 + $0xbc0] sm:$0xff] }
  0xb5   : > { %3923 = vmatpush3.msra.mxu1 %v550_v11  ;;  %3889 = vmatprep.subr.mxu0 %v533_v12  ;;  %v584_v9 = vld [vmem:[%s4716_s30 + $0xa40] sm:$0xff]  ;;  %v599_v11 = vld [vmem:[%s4716_s30 + $0xab8] sm:$0xff] }
  0xb6   : > { %3924 = vmatprep.subr.mxu1 %v565_v13  ;;  %3890 = vmatpush3.msra.mxu0 %v517_v14  ;;  %v616_v10 = vld [vmem:[%s4716_s30 + $0xb40] sm:$0xff]  ;;  %v631_v12 = vld [vmem:[%s4716_s30 + $0xbb8] sm:$0xff] }
  0xb7   : > { %3925 = vmatpush3.msra.mxu1 %v549_v15  ;;  %3891 = vmatprep.subr.mxu0 %v532_v17  ;;  %v583_v13 = vld [vmem:[%s4716_s30 + $0xa38] sm:$0xff]  ;;  %v598_v15 = vld [vmem:[%s4716_s30 + $0xab0] sm:$0xff] }
  0xb8   : > { %3926 = vmatprep.subr.mxu1 %v564_v18  ;;  %3892 = vmatpush3.msra.mxu0 %v516_v19  ;;  %v615_v14 = vld [vmem:[%s4716_s30 + $0xb38] sm:$0xff]  ;;  %v582_v17 = vld [vmem:[%s4716_s30 + $0xa30] sm:$0xff]  ;;  %v597_v19 = vld [vmem:[%s4716_s30 + $0xaa8] sm:$0xff] }
  0xb9   : > { %3927 = vmatpush3.msra.mxu1 %v548_v20  ;;  %3893 = vmatprep.subr.mxu0 %v531_v21  ;;  %v614_v18 = vld [vmem:[%s4716_s30 + $0xb30] sm:$0xff]  ;;  %v629_v20 = vld [vmem:[%s4716_s30 + $0xba8] sm:$0xff] }
  0xba   : > { %3928 = vmatprep.subr.mxu1 %v563_v22  ;;  %3894 = vmatpush3.msra.mxu0 %v515_v24  ;;  %v581_v21 = vld [vmem:[%s4716_s30 + $0xa28] sm:$0xff]  ;;  %v596_v24 = vld [vmem:[%s4716_s30 + $0xaa0] sm:$0xff] }
  0xbb   : > { %3929 = vmatpush3.msra.mxu1 %v547_v25  ;;  %3895 = vmatprep.subr.mxu0 %v530_v26  ;;  %v613_v22 = vld [vmem:[%s4716_s30 + $0xb28] sm:$0xff]  ;;  %v628_v25 = vld [vmem:[%s4716_s30 + $0xba0] sm:$0xff] }
  0xbc   : > { %3930 = vmatprep.subr.mxu1 %v562_v27  ;;  %3896 = vmatpush3.msra.mxu0 %v514_v29  ;;  %v580_v26 = vld [vmem:[%s4716_s30 + $0xa20] sm:$0xff]  ;;  %v627_v29 = vld [vmem:[%s4716_s30 + $0xb98] sm:$0xff] }
  0xbd   : > { %3931 = vmatpush3.msra.mxu1 %v546_v30  ;;  %3897 = vmatprep.subr.mxu0 %v529_v31  ;;  %v612_v27 = vld [vmem:[%s4716_s30 + $0xb20] sm:$0xff]  ;;  %v1251_v30 = vcombine.high %v247_v23, %v247_v23  ;;  %v579_v31 = vld [vmem:[%s4716_s30 + $0xa18] sm:$0xff] }
  0xbe   : > { %3932 = vmatprep.subr.mxu1 %v561_v32  ;;  %3898 = vmatpush3.msra.mxu0 %v513_v34  ;;  %v611_v32 = vld [vmem:[%s4716_s30 + $0xb18] sm:$0xff]  ;;  %v626_v34 = vld [vmem:[%s4716_s30 + $0xb90] sm:$0xff] }
  0xbf   : > { %3933 = vmatpush3.msra.mxu1 %v545_v35  ;;  %3899 = vmatprep.subr.mxu0 %v528_v36  ;;  %v1258_v35 = vrot.slane %v247_v23, %v4765_v53  ;;  %v578_v36 = vld [vmem:[%s4716_s30 + $0xa10] sm:$0xff] }
  0xc0   : > { %3934 = vmatprep.subr.mxu1 %v560_v37  ;;  %3900 = vmatpush3.msra.mxu0 %v512_v39  ;;  %v610_v37 = vld [vmem:[%s4716_s30 + $0xb10] sm:$0xff]  ;;  %v625_v39 = vld [vmem:[%s4716_s30 + $0xb88] sm:$0xff] }
  0xc1   : > { %2084 = vmatprep.mubr.f32.mxu0 %v1249_v38  ;;  %3935 = vmatpush3.msra.mxu1 %v544_v40  ;;  %v593_v38 = vld [vmem:[%s4716_s30 + $0xa88] sm:$0xff]  ;;  %v1265_v40 = vrot.slane %v1251_v30, %v4765_v53  ;;  %v694_v23 = vld [vmem:[%s4716_s30 + $0xdb0] sm:$0xff] }
  0xc2   : > { %2085 = vmatmul.mubr.f32.vlgmr.msra.gmra.mxu0 %v1241_v28  ;;  %2154 = vmatprep.mubr.f32.mxu1 %v1250_v41  ;;  %v595_v28 = vld [vmem:[%s4716_s30 + $0xa98] sm:$0xff]  ;;  %v577_v41 = vld [vmem:[%s4716_s30 + $0xa08] sm:$0xff]  ;;  %v248_v30 = vld [vmem:[%s4711_s26 + $0x30] sm:$0xff] }
  0xc3   : > { %3939 = vmatprep.subr.mxu0 %v607_v42  ;;  %3974 = vmatprep.subr.mxu1 %v639_v43  ;;  %v609_v42 = vld [vmem:[%s4716_s30 + $0xb08] sm:$0xff]  ;;  %v592_v43 = vld [vmem:[%s4716_s30 + $0xa80] sm:$0xff] }
  0xc4   : > { %2155 = vmatmul.mubr.f32.vlgmr.msra.gmra.mxu1 %v1248_v33  ;;  %3940 = vmatpush3.msra.mxu0 %v591_v44  ;;  %v594_v33 = vld [vmem:[%s4716_s30 + $0xa90] sm:$0xff]  ;;  %v624_v44 = vld [vmem:[%s4716_s30 + $0xb80] sm:$0xff] }
  0xc5   : > { %3975 = vmatpush3.msra.mxu1 %v623_v45  ;;  %3941 = vmatprep.subr.mxu0 %v606_v46  ;;  %v1266_v45 = vcombine.high %v1258_v35, %v1258_v35  ;;  %v576_v46 = vld [vmem:[%s4716_s30 + $0xa00] sm:$0xff] }
  0xc6   : > { %3976 = vmatprep.subr.mxu1 %v638_v47  ;;  %3942 = vmatpush3.msra.mxu0 %v590_v48  ;;  %v608_v47 = vld [vmem:[%s4716_s30 + $0xb00] sm:$0xff]  ;;  %v1267_v48 = vcombine.high %v1265_v40, %v1265_v40 }
  0xc7   : > { %3977 = vmatpush3.msra.mxu1 %v622_v49  ;;  %3943 = vmatprep.subr.mxu0 %v605_v50  ;;  %v671_v49 = vld [vmem:[%s4716_s30 + $0xcf8] sm:$0xff] }
  0xc8   : > { %3978 = vmatprep.subr.mxu1 %v637_v51  ;;  %3944 = vmatpush3.msra.mxu0 %v589_v52  ;;  %v703_v50 = vld [vmem:[%s4716_s30 + $0xdf8] sm:$0xff] }
  0xc9   : > { %3979 = vmatpush3.msra.mxu1 %v621_v54  ;;  %3945 = vmatprep.subr.mxu0 %v604_v55  ;;  %v655_v51 = vld [vmem:[%s4716_s30 + $0xc78] sm:$0xff]  ;;  %v670_v54 = vld [vmem:[%s4716_s30 + $0xcf0] sm:$0xff] }
  0xca   : > { %3980 = vmatprep.subr.mxu1 %v636_v56  ;;  %3946 = vmatpush3.msra.mxu0 %v588_v57  ;;  %v687_v52 = vld [vmem:[%s4716_s30 + $0xd78] sm:$0xff]  ;;  %v702_v55 = vld [vmem:[%s4716_s30 + $0xdf0] sm:$0xff] }
  0xcb   : > { %3981 = vmatpush3.msra.mxu1 %v620_v58  ;;  %3947 = vmatprep.subr.mxu0 %v603_v59  ;;  %v654_v56 = vld [vmem:[%s4716_s30 + $0xc70] sm:$0xff]  ;;  %v669_v58 = vld [vmem:[%s4716_s30 + $0xce8] sm:$0xff] }
  0xcc   : > { %3982 = vmatprep.subr.mxu1 %v635_v60  ;;  %3948 = vmatpush3.msra.mxu0 %v587_v61  ;;  %v686_v57 = vld [vmem:[%s4716_s30 + $0xd70] sm:$0xff]  ;;  %v701_v59 = vld [vmem:[%s4716_s30 + $0xde8] sm:$0xff] }
  0xcd   : > { %3983 = vmatpush3.msra.mxu1 %v619_v62  ;;  %3949 = vmatprep.subr.mxu0 %v602_v63  ;;  %v653_v60 = vld [vmem:[%s4716_s30 + $0xc68] sm:$0xff]  ;;  %v668_v62 = vld [vmem:[%s4716_s30 + $0xce0] sm:$0xff] }
  0xce   : > { %3984 = vmatprep.subr.mxu1 %v634_v0  ;;  %3950 = vmatpush3.msra.mxu0 %v586_v1  ;;  %v685_v61 = vld [vmem:[%s4716_s30 + $0xd68] sm:$0xff]  ;;  %v700_v63 = vld [vmem:[%s4716_s30 + $0xde0] sm:$0xff] }
  0xcf   : > { %3985 = vmatpush3.msra.mxu1 %v618_v2  ;;  %3951 = vmatprep.subr.mxu0 %v601_v3  ;;  %v652_v0 = vld [vmem:[%s4716_s30 + $0xc60] sm:$0xff]  ;;  %v667_v2 = vld [vmem:[%s4716_s30 + $0xcd8] sm:$0xff] }
  0xd0   : > { %3986 = vmatprep.subr.mxu1 %v633_v4  ;;  %3952 = vmatpush3.msra.mxu0 %v585_v5  ;;  %v684_v1 = vld [vmem:[%s4716_s30 + $0xd60] sm:$0xff]  ;;  %v699_v3 = vld [vmem:[%s4716_s30 + $0xdd8] sm:$0xff] }
  0xd1   : > { %3987 = vmatpush3.msra.mxu1 %v617_v6  ;;  %3953 = vmatprep.subr.mxu0 %v600_v7  ;;  %v651_v4 = vld [vmem:[%s4716_s30 + $0xc58] sm:$0xff]  ;;  %v666_v6 = vld [vmem:[%s4716_s30 + $0xcd0] sm:$0xff] }
  0xd2   : > { %3988 = vmatprep.subr.mxu1 %v632_v8  ;;  %3954 = vmatpush3.msra.mxu0 %v584_v9  ;;  %v683_v5 = vld [vmem:[%s4716_s30 + $0xd58] sm:$0xff]  ;;  %v698_v7 = vld [vmem:[%s4716_s30 + $0xdd0] sm:$0xff] }
  0xd3   : > { %3989 = vmatpush3.msra.mxu1 %v616_v10  ;;  %3955 = vmatprep.subr.mxu0 %v599_v11  ;;  %v650_v8 = vld [vmem:[%s4716_s30 + $0xc50] sm:$0xff]  ;;  %v665_v10 = vld [vmem:[%s4716_s30 + $0xcc8] sm:$0xff] }
  0xd4   : > { %3990 = vmatprep.subr.mxu1 %v631_v12  ;;  %3956 = vmatpush3.msra.mxu0 %v583_v13  ;;  %v682_v9 = vld [vmem:[%s4716_s30 + $0xd50] sm:$0xff]  ;;  %v697_v11 = vld [vmem:[%s4716_s30 + $0xdc8] sm:$0xff] }
  0xd5   : > { %3991 = vmatpush3.msra.mxu1 %v615_v14  ;;  %3957 = vmatprep.subr.mxu0 %v598_v15  ;;  %v649_v12 = vld [vmem:[%s4716_s30 + $0xc48] sm:$0xff]  ;;  %v664_v14 = vld [vmem:[%s4716_s30 + $0xcc0] sm:$0xff] }
  0xd6   : > { %3992 = vmatprep.subr.mxu1 %v630_v16  ;;  %3958 = vmatpush3.msra.mxu0 %v582_v17  ;;  %v681_v13 = vld [vmem:[%s4716_s30 + $0xd48] sm:$0xff]  ;;  %v696_v15 = vld [vmem:[%s4716_s30 + $0xdc0] sm:$0xff] }
  0xd7   : > { %3993 = vmatpush3.msra.mxu1 %v614_v18  ;;  %3959 = vmatprep.subr.mxu0 %v597_v19  ;;  %v648_v16 = vld [vmem:[%s4716_s30 + $0xc40] sm:$0xff]  ;;  %v663_v18 = vld [vmem:[%s4716_s30 + $0xcb8] sm:$0xff] }
  0xd8   : > { %3994 = vmatprep.subr.mxu1 %v629_v20  ;;  %3960 = vmatpush3.msra.mxu0 %v581_v21  ;;  %v680_v17 = vld [vmem:[%s4716_s30 + $0xd40] sm:$0xff]  ;;  %v695_v19 = vld [vmem:[%s4716_s30 + $0xdb8] sm:$0xff] }
  0xd9   : > { %3995 = vmatpush3.msra.mxu1 %v613_v22  ;;  %3961 = vmatprep.subr.mxu0 %v596_v24  ;;  %v647_v20 = vld [vmem:[%s4716_s30 + $0xc38] sm:$0xff]  ;;  %v662_v22 = vld [vmem:[%s4716_s30 + $0xcb0] sm:$0xff] }
  0xda   : > { %3996 = vmatprep.subr.mxu1 %v628_v25  ;;  %3962 = vmatpush3.msra.mxu0 %v580_v26  ;;  %v679_v21 = vld [vmem:[%s4716_s30 + $0xd38] sm:$0xff]  ;;  %v646_v24 = vld [vmem:[%s4716_s30 + $0xc30] sm:$0xff]  ;;  %v661_v26 = vld [vmem:[%s4716_s30 + $0xca8] sm:$0xff] }
  0xdb   : > { %3997 = vmatpush3.msra.mxu1 %v612_v27  ;;  %3963 = vmatprep.subr.mxu0 %v595_v28  ;;  %v678_v25 = vld [vmem:[%s4716_s30 + $0xd30] sm:$0xff]  ;;  %v693_v27 = vld [vmem:[%s4716_s30 + $0xda8] sm:$0xff] }
  0xdc   : > { %3998 = vmatprep.subr.mxu1 %v627_v29  ;;  %3964 = vmatpush3.msra.mxu0 %v579_v31  ;;  %v645_v28 = vld [vmem:[%s4716_s30 + $0xc28] sm:$0xff]  ;;  %v660_v31 = vld [vmem:[%s4716_s30 + $0xca0] sm:$0xff] }
  0xdd   : > { %3999 = vmatpush3.msra.mxu1 %v611_v32  ;;  %3965 = vmatprep.subr.mxu0 %v594_v33  ;;  %v677_v29 = vld [vmem:[%s4716_s30 + $0xd28] sm:$0xff]  ;;  %v692_v32 = vld [vmem:[%s4716_s30 + $0xda0] sm:$0xff] }
  0xde   : > { %4000 = vmatprep.subr.mxu1 %v626_v34  ;;  %3966 = vmatpush3.msra.mxu0 %v578_v36  ;;  %v644_v33 = vld [vmem:[%s4716_s30 + $0xc20] sm:$0xff]  ;;  %v691_v36 = vld [vmem:[%s4716_s30 + $0xd98] sm:$0xff] }
  0xdf   : > { %4001 = vmatpush3.msra.mxu1 %v610_v37  ;;  %3967 = vmatprep.subr.mxu0 %v593_v38  ;;  %v676_v34 = vld [vmem:[%s4716_s30 + $0xd20] sm:$0xff]  ;;  %v1268_v37 = vcombine.high %v248_v30, %v248_v30  ;;  %v643_v38 = vld [vmem:[%s4716_s30 + $0xc18] sm:$0xff] }
  0xe0   : > { %4002 = vmatprep.subr.mxu1 %v625_v39  ;;  %3968 = vmatpush3.msra.mxu0 %v577_v41  ;;  %v675_v39 = vld [vmem:[%s4716_s30 + $0xd18] sm:$0xff]  ;;  %v690_v41 = vld [vmem:[%s4716_s30 + $0xd90] sm:$0xff] }
  0xe1   : > { %4003 = vmatpush3.msra.mxu1 %v609_v42  ;;  %3969 = vmatprep.subr.mxu0 %v592_v43  ;;  %v1275_v42 = vrot.slane %v248_v30, %v4765_v53  ;;  %v642_v43 = vld [vmem:[%s4716_s30 + $0xc10] sm:$0xff] }
  0xe2   : > { %4004 = vmatprep.subr.mxu1 %v624_v44  ;;  %3970 = vmatpush3.msra.mxu0 %v576_v46  ;;  %v674_v44 = vld [vmem:[%s4716_s30 + $0xd10] sm:$0xff]  ;;  %v689_v46 = vld [vmem:[%s4716_s30 + $0xd88] sm:$0xff] }
  0xe3   : > { %2224 = vmatprep.mubr.f32.mxu0 %v1266_v45  ;;  %4005 = vmatpush3.msra.mxu1 %v608_v47  ;;  %v657_v45 = vld [vmem:[%s4716_s30 + $0xc88] sm:$0xff]  ;;  %v1282_v47 = vrot.slane %v1268_v37, %v4765_v53  ;;  %v758_v30 = vld [vmem:[%s4716_s30 + $0xfb0] sm:$0xff]  ;;  %v249_v37 = vld [vmem:[%s4711_s26 + $0x38] sm:$0xff] }
  0xe4   : > { %2225 = vmatmul.mubr.f32.vlgmr.msra.gmra.mxu0 %v1258_v35  ;;  %2294 = vmatprep.mubr.f32.mxu1 %v1267_v48  ;;  %v659_v35 = vld [vmem:[%s4716_s30 + $0xc98] sm:$0xff]  ;;  %v641_v48 = vld [vmem:[%s4716_s30 + $0xc08] sm:$0xff] }
  0xe5   : > { %4009 = vmatprep.subr.mxu0 %v671_v49  ;;  %4044 = vmatprep.subr.mxu1 %v703_v50  ;;  %v673_v49 = vld [vmem:[%s4716_s30 + $0xd08] sm:$0xff]  ;;  %v656_v50 = vld [vmem:[%s4716_s30 + $0xc80] sm:$0xff] }
  0xe6   : > { %2295 = vmatmul.mubr.f32.vlgmr.msra.gmra.mxu1 %v1265_v40  ;;  %4010 = vmatpush3.msra.mxu0 %v655_v51  ;;  %v658_v40 = vld [vmem:[%s4716_s30 + $0xc90] sm:$0xff]  ;;  %v688_v51 = vld [vmem:[%s4716_s30 + $0xd80] sm:$0xff] }
  0xe7   : > { %4045 = vmatpush3.msra.mxu1 %v687_v52  ;;  %4011 = vmatprep.subr.mxu0 %v670_v54  ;;  %v1283_v52 = vcombine.high %v1275_v42, %v1275_v42  ;;  %v640_v54 = vld [vmem:[%s4716_s30 + $0xc00] sm:$0xff] }
  0xe8   : > { %4046 = vmatprep.subr.mxu1 %v702_v55  ;;  %4012 = vmatpush3.msra.mxu0 %v654_v56  ;;  %v672_v55 = vld [vmem:[%s4716_s30 + $0xd00] sm:$0xff]  ;;  %v1284_v56 = vcombine.high %v1282_v47, %v1282_v47 }
  0xe9   : > { %4047 = vmatpush3.msra.mxu1 %v686_v57  ;;  %4013 = vmatprep.subr.mxu0 %v669_v58  ;;  %v735_v57 = vld [vmem:[%s4716_s30 + $0xef8] sm:$0xff] }
  0xea   : > { %4048 = vmatprep.subr.mxu1 %v701_v59  ;;  %4014 = vmatpush3.msra.mxu0 %v653_v60  ;;  %v767_v58 = vld [vmem:[%s4716_s30 + $0xff8] sm:$0xff] }
  0xeb   : > { %4049 = vmatpush3.msra.mxu1 %v685_v61  ;;  %4015 = vmatprep.subr.mxu0 %v668_v62  ;;  %v719_v59 = vld [vmem:[%s4716_s30 + $0xe78] sm:$0xff]  ;;  %v734_v61 = vld [vmem:[%s4716_s30 + $0xef0] sm:$0xff] }
  0xec   : > { %4050 = vmatprep.subr.mxu1 %v700_v63  ;;  %4016 = vmatpush3.msra.mxu0 %v652_v0  ;;  %v751_v60 = vld [vmem:[%s4716_s30 + $0xf78] sm:$0xff]  ;;  %v766_v62 = vld [vmem:[%s4716_s30 + $0xff0] sm:$0xff] }
  0xed   : > { %4051 = vmatpush3.msra.mxu1 %v684_v1  ;;  %4017 = vmatprep.subr.mxu0 %v667_v2  ;;  %v718_v63 = vld [vmem:[%s4716_s30 + $0xe70] sm:$0xff]  ;;  %v733_v1 = vld [vmem:[%s4716_s30 + $0xee8] sm:$0xff] }
  0xee   : > { %4052 = vmatprep.subr.mxu1 %v699_v3  ;;  %4018 = vmatpush3.msra.mxu0 %v651_v4  ;;  %v750_v0 = vld [vmem:[%s4716_s30 + $0xf70] sm:$0xff]  ;;  %v765_v2 = vld [vmem:[%s4716_s30 + $0xfe8] sm:$0xff] }
  0xef   : > { %4053 = vmatpush3.msra.mxu1 %v683_v5  ;;  %4019 = vmatprep.subr.mxu0 %v666_v6  ;;  %v717_v3 = vld [vmem:[%s4716_s30 + $0xe68] sm:$0xff]  ;;  %v732_v5 = vld [vmem:[%s4716_s30 + $0xee0] sm:$0xff] }
  0xf0   : > { %4054 = vmatprep.subr.mxu1 %v698_v7  ;;  %4020 = vmatpush3.msra.mxu0 %v650_v8  ;;  %v749_v4 = vld [vmem:[%s4716_s30 + $0xf68] sm:$0xff]  ;;  %v764_v6 = vld [vmem:[%s4716_s30 + $0xfe0] sm:$0xff] }
  0xf1   : > { %4055 = vmatpush3.msra.mxu1 %v682_v9  ;;  %4021 = vmatprep.subr.mxu0 %v665_v10  ;;  %v716_v7 = vld [vmem:[%s4716_s30 + $0xe60] sm:$0xff]  ;;  %v731_v9 = vld [vmem:[%s4716_s30 + $0xed8] sm:$0xff] }
  0xf2   : > { %4056 = vmatprep.subr.mxu1 %v697_v11  ;;  %4022 = vmatpush3.msra.mxu0 %v649_v12  ;;  %v748_v8 = vld [vmem:[%s4716_s30 + $0xf60] sm:$0xff]  ;;  %v763_v10 = vld [vmem:[%s4716_s30 + $0xfd8] sm:$0xff] }
  0xf3   : > { %4057 = vmatpush3.msra.mxu1 %v681_v13  ;;  %4023 = vmatprep.subr.mxu0 %v664_v14  ;;  %v715_v11 = vld [vmem:[%s4716_s30 + $0xe58] sm:$0xff]  ;;  %v730_v13 = vld [vmem:[%s4716_s30 + $0xed0] sm:$0xff] }
  0xf4   : > { %4058 = vmatprep.subr.mxu1 %v696_v15  ;;  %4024 = vmatpush3.msra.mxu0 %v648_v16  ;;  %v747_v12 = vld [vmem:[%s4716_s30 + $0xf58] sm:$0xff]  ;;  %v762_v14 = vld [vmem:[%s4716_s30 + $0xfd0] sm:$0xff] }
  0xf5   : > { %4059 = vmatpush3.msra.mxu1 %v680_v17  ;;  %4025 = vmatprep.subr.mxu0 %v663_v18  ;;  %v714_v15 = vld [vmem:[%s4716_s30 + $0xe50] sm:$0xff]  ;;  %v729_v17 = vld [vmem:[%s4716_s30 + $0xec8] sm:$0xff] }
  0xf6   : > { %4060 = vmatprep.subr.mxu1 %v695_v19  ;;  %4026 = vmatpush3.msra.mxu0 %v647_v20  ;;  %v746_v16 = vld [vmem:[%s4716_s30 + $0xf50] sm:$0xff]  ;;  %v761_v18 = vld [vmem:[%s4716_s30 + $0xfc8] sm:$0xff] }
  0xf7   : > { %4061 = vmatpush3.msra.mxu1 %v679_v21  ;;  %4027 = vmatprep.subr.mxu0 %v662_v22  ;;  %v713_v19 = vld [vmem:[%s4716_s30 + $0xe48] sm:$0xff]  ;;  %v728_v21 = vld [vmem:[%s4716_s30 + $0xec0] sm:$0xff] }
  0xf8   : > { %4062 = vmatprep.subr.mxu1 %v694_v23  ;;  %4028 = vmatpush3.msra.mxu0 %v646_v24  ;;  %v745_v20 = vld [vmem:[%s4716_s30 + $0xf48] sm:$0xff]  ;;  %v760_v22 = vld [vmem:[%s4716_s30 + $0xfc0] sm:$0xff] }
  0xf9   : > { %4063 = vmatpush3.msra.mxu1 %v678_v25  ;;  %4029 = vmatprep.subr.mxu0 %v661_v26  ;;  %v712_v23 = vld [vmem:[%s4716_s30 + $0xe40] sm:$0xff]  ;;  %v727_v25 = vld [vmem:[%s4716_s30 + $0xeb8] sm:$0xff] }
  0xfa   : > { %4064 = vmatprep.subr.mxu1 %v693_v27  ;;  %4030 = vmatpush3.msra.mxu0 %v645_v28  ;;  %v744_v24 = vld [vmem:[%s4716_s30 + $0xf40] sm:$0xff]  ;;  %v759_v26 = vld [vmem:[%s4716_s30 + $0xfb8] sm:$0xff] }
  0xfb   : > { %4065 = vmatpush3.msra.mxu1 %v677_v29  ;;  %4031 = vmatprep.subr.mxu0 %v660_v31  ;;  %v711_v27 = vld [vmem:[%s4716_s30 + $0xe38] sm:$0xff]  ;;  %v726_v29 = vld [vmem:[%s4716_s30 + $0xeb0] sm:$0xff] }
  0xfc   : > { %4066 = vmatprep.subr.mxu1 %v692_v32  ;;  %4032 = vmatpush3.msra.mxu0 %v644_v33  ;;  %v743_v28 = vld [vmem:[%s4716_s30 + $0xf38] sm:$0xff]  ;;  %v710_v31 = vld [vmem:[%s4716_s30 + $0xe30] sm:$0xff]  ;;  %v725_v33 = vld [vmem:[%s4716_s30 + $0xea8] sm:$0xff] }
  0xfd   : > { %4067 = vmatpush3.msra.mxu1 %v676_v34  ;;  %4033 = vmatprep.subr.mxu0 %v659_v35  ;;  %v742_v32 = vld [vmem:[%s4716_s30 + $0xf30] sm:$0xff]  ;;  %v757_v34 = vld [vmem:[%s4716_s30 + $0xfa8] sm:$0xff] }
  0xfe   : > { %4068 = vmatprep.subr.mxu1 %v691_v36  ;;  %4034 = vmatpush3.msra.mxu0 %v643_v38  ;;  %v709_v35 = vld [vmem:[%s4716_s30 + $0xe28] sm:$0xff]  ;;  %v724_v38 = vld [vmem:[%s4716_s30 + $0xea0] sm:$0xff] }
  0xff   : > { %4069 = vmatpush3.msra.mxu1 %v675_v39  ;;  %4035 = vmatprep.subr.mxu0 %v658_v40  ;;  %v741_v36 = vld [vmem:[%s4716_s30 + $0xf28] sm:$0xff]  ;;  %v756_v39 = vld [vmem:[%s4716_s30 + $0xfa0] sm:$0xff] }
 0x100   : > { %4070 = vmatprep.subr.mxu1 %v690_v41  ;;  %4036 = vmatpush3.msra.mxu0 %v642_v43  ;;  %v708_v40 = vld [vmem:[%s4716_s30 + $0xe20] sm:$0xff]  ;;  %v755_v43 = vld [vmem:[%s4716_s30 + $0xf98] sm:$0xff] }
 0x101   : > { %4071 = vmatpush3.msra.mxu1 %v674_v44  ;;  %4037 = vmatprep.subr.mxu0 %v657_v45  ;;  %v740_v41 = vld [vmem:[%s4716_s30 + $0xf20] sm:$0xff]  ;;  %v1285_v44 = vcombine.high %v249_v37, %v249_v37  ;;  %v707_v45 = vld [vmem:[%s4716_s30 + $0xe18] sm:$0xff] }
 0x102   : > { %4072 = vmatprep.subr.mxu1 %v689_v46  ;;  %4038 = vmatpush3.msra.mxu0 %v641_v48  ;;  %v739_v46 = vld [vmem:[%s4716_s30 + $0xf18] sm:$0xff]  ;;  %v754_v48 = vld [vmem:[%s4716_s30 + $0xf90] sm:$0xff] }
 0x103   : > { %4073 = vmatpush3.msra.mxu1 %v673_v49  ;;  %4039 = vmatprep.subr.mxu0 %v656_v50  ;;  %v1292_v49 = vrot.slane %v249_v37, %v4765_v53  ;;  %v706_v50 = vld [vmem:[%s4716_s30 + $0xe10] sm:$0xff] }
 0x104   : > { %4074 = vmatprep.subr.mxu1 %v688_v51  ;;  %4040 = vmatpush3.msra.mxu0 %v640_v54  ;;  %v738_v51 = vld [vmem:[%s4716_s30 + $0xf10] sm:$0xff]  ;;  %v753_v54 = vld [vmem:[%s4716_s30 + $0xf88] sm:$0xff] }
 0x105   : > { %2364 = vmatprep.mubr.f32.mxu0 %v1283_v52  ;;  %4075 = vmatpush3.msra.mxu1 %v672_v55  ;;  %v721_v52 = vld [vmem:[%s4716_s30 + $0xe88] sm:$0xff]  ;;  %v1299_v55 = vrot.slane %v1285_v44, %v4765_v53  ;;  %v822_v37 = vld [vmem:[%s4716_s30 + $0x11b0] sm:$0xff]  ;;  %v250_v44 = vld [vmem:[%s4711_s26 + $0x40] sm:$0xff] }
 0x106   : > { %2365 = vmatmul.mubr.f32.vlgmr.msra.gmra.mxu0 %v1275_v42  ;;  %2434 = vmatprep.mubr.f32.mxu1 %v1284_v56  ;;  %v723_v42 = vld [vmem:[%s4716_s30 + $0xe98] sm:$0xff]  ;;  %v705_v56 = vld [vmem:[%s4716_s30 + $0xe08] sm:$0xff] }
 0x107   : > { %4079 = vmatprep.subr.mxu0 %v735_v57  ;;  %4114 = vmatprep.subr.mxu1 %v767_v58  ;;  %v737_v57 = vld [vmem:[%s4716_s30 + $0xf08] sm:$0xff]  ;;  %v720_v58 = vld [vmem:[%s4716_s30 + $0xe80] sm:$0xff] }
 0x108   : > { %2435 = vmatmul.mubr.f32.vlgmr.msra.gmra.mxu1 %v1282_v47  ;;  %4080 = vmatpush3.msra.mxu0 %v719_v59  ;;  %v722_v47 = vld [vmem:[%s4716_s30 + $0xe90] sm:$0xff]  ;;  %v752_v59 = vld [vmem:[%s4716_s30 + $0xf80] sm:$0xff] }
 0x109   : > { %4115 = vmatpush3.msra.mxu1 %v751_v60  ;;  %4081 = vmatprep.subr.mxu0 %v734_v61  ;;  %v1300_v60 = vcombine.high %v1292_v49, %v1292_v49  ;;  %v704_v61 = vld [vmem:[%s4716_s30 + $0xe00] sm:$0xff] }
 0x10a   : > { %4116 = vmatprep.subr.mxu1 %v766_v62  ;;  %4082 = vmatpush3.msra.mxu0 %v718_v63  ;;  %v736_v62 = vld [vmem:[%s4716_s30 + $0xf00] sm:$0xff]  ;;  %v1301_v63 = vcombine.high %v1299_v55, %v1299_v55 }
 0x10b   : > { %4117 = vmatpush3.msra.mxu1 %v750_v0  ;;  %4083 = vmatprep.subr.mxu0 %v733_v1  ;;  %v799_v0 = vld [vmem:[%s4716_s30 + $0x10f8] sm:$0xff] }
 0x10c   : > { %4118 = vmatprep.subr.mxu1 %v765_v2  ;;  %4084 = vmatpush3.msra.mxu0 %v717_v3  ;;  %v831_v1 = vld [vmem:[%s4716_s30 + $0x11f8] sm:$0xff] }
 0x10d   : > { %4119 = vmatpush3.msra.mxu1 %v749_v4  ;;  %4085 = vmatprep.subr.mxu0 %v732_v5  ;;  %v783_v2 = vld [vmem:[%s4716_s30 + $0x1078] sm:$0xff]  ;;  %v798_v4 = vld [vmem:[%s4716_s30 + $0x10f0] sm:$0xff] }
 0x10e   : > { %4120 = vmatprep.subr.mxu1 %v764_v6  ;;  %4086 = vmatpush3.msra.mxu0 %v716_v7  ;;  %v815_v3 = vld [vmem:[%s4716_s30 + $0x1178] sm:$0xff]  ;;  %v830_v5 = vld [vmem:[%s4716_s30 + $0x11f0] sm:$0xff] }
 0x10f   : > { %4121 = vmatpush3.msra.mxu1 %v748_v8  ;;  %4087 = vmatprep.subr.mxu0 %v731_v9  ;;  %v782_v6 = vld [vmem:[%s4716_s30 + $0x1070] sm:$0xff]  ;;  %v797_v8 = vld [vmem:[%s4716_s30 + $0x10e8] sm:$0xff] }
 0x110   : > { %4122 = vmatprep.subr.mxu1 %v763_v10  ;;  %4088 = vmatpush3.msra.mxu0 %v715_v11  ;;  %v814_v7 = vld [vmem:[%s4716_s30 + $0x1170] sm:$0xff]  ;;  %v829_v9 = vld [vmem:[%s4716_s30 + $0x11e8] sm:$0xff] }
 0x111   : > { %4123 = vmatpush3.msra.mxu1 %v747_v12  ;;  %4089 = vmatprep.subr.mxu0 %v730_v13  ;;  %v781_v10 = vld [vmem:[%s4716_s30 + $0x1068] sm:$0xff]  ;;  %v796_v12 = vld [vmem:[%s4716_s30 + $0x10e0] sm:$0xff] }
 0x112   : > { %4124 = vmatprep.subr.mxu1 %v762_v14  ;;  %4090 = vmatpush3.msra.mxu0 %v714_v15  ;;  %v813_v11 = vld [vmem:[%s4716_s30 + $0x1168] sm:$0xff]  ;;  %v828_v13 = vld [vmem:[%s4716_s30 + $0x11e0] sm:$0xff] }
 0x113   : > { %4125 = vmatpush3.msra.mxu1 %v746_v16  ;;  %4091 = vmatprep.subr.mxu0 %v729_v17  ;;  %v780_v14 = vld [vmem:[%s4716_s30 + $0x1060] sm:$0xff]  ;;  %v795_v16 = vld [vmem:[%s4716_s30 + $0x10d8] sm:$0xff] }
 0x114   : > { %4126 = vmatprep.subr.mxu1 %v761_v18  ;;  %4092 = vmatpush3.msra.mxu0 %v713_v19  ;;  %v812_v15 = vld [vmem:[%s4716_s30 + $0x1160] sm:$0xff]  ;;  %v827_v17 = vld [vmem:[%s4716_s30 + $0x11d8] sm:$0xff] }
 0x115   : > { %4127 = vmatpush3.msra.mxu1 %v745_v20  ;;  %4093 = vmatprep.subr.mxu0 %v728_v21  ;;  %v779_v18 = vld [vmem:[%s4716_s30 + $0x1058] sm:$0xff]  ;;  %v794_v20 = vld [vmem:[%s4716_s30 + $0x10d0] sm:$0xff] }
 0x116   : > { %4128 = vmatprep.subr.mxu1 %v760_v22  ;;  %4094 = vmatpush3.msra.mxu0 %v712_v23  ;;  %v811_v19 = vld [vmem:[%s4716_s30 + $0x1158] sm:$0xff]  ;;  %v826_v21 = vld [vmem:[%s4716_s30 + $0x11d0] sm:$0xff] }
 0x117   : > { %4129 = vmatpush3.msra.mxu1 %v744_v24  ;;  %4095 = vmatprep.subr.mxu0 %v727_v25  ;;  %v778_v22 = vld [vmem:[%s4716_s30 + $0x1050] sm:$0xff]  ;;  %v793_v24 = vld [vmem:[%s4716_s30 + $0x10c8] sm:$0xff] }
 0x118   : > { %4130 = vmatprep.subr.mxu1 %v759_v26  ;;  %4096 = vmatpush3.msra.mxu0 %v711_v27  ;;  %v810_v23 = vld [vmem:[%s4716_s30 + $0x1150] sm:$0xff]  ;;  %v825_v25 = vld [vmem:[%s4716_s30 + $0x11c8] sm:$0xff] }
 0x119   : > { %4131 = vmatpush3.msra.mxu1 %v743_v28  ;;  %4097 = vmatprep.subr.mxu0 %v726_v29  ;;  %v777_v26 = vld [vmem:[%s4716_s30 + $0x1048] sm:$0xff]  ;;  %v792_v28 = vld [vmem:[%s4716_s30 + $0x10c0] sm:$0xff] }
 0x11a   : > { %4132 = vmatprep.subr.mxu1 %v758_v30  ;;  %4098 = vmatpush3.msra.mxu0 %v710_v31  ;;  %v809_v27 = vld [vmem:[%s4716_s30 + $0x1148] sm:$0xff]  ;;  %v824_v29 = vld [vmem:[%s4716_s30 + $0x11c0] sm:$0xff] }
 0x11b   : > { %4133 = vmatpush3.msra.mxu1 %v742_v32  ;;  %4099 = vmatprep.subr.mxu0 %v725_v33  ;;  %v776_v30 = vld [vmem:[%s4716_s30 + $0x1040] sm:$0xff]  ;;  %v791_v32 = vld [vmem:[%s4716_s30 + $0x10b8] sm:$0xff] }
 0x11c   : > { %4134 = vmatprep.subr.mxu1 %v757_v34  ;;  %4100 = vmatpush3.msra.mxu0 %v709_v35  ;;  %v808_v31 = vld [vmem:[%s4716_s30 + $0x1140] sm:$0xff]  ;;  %v823_v33 = vld [vmem:[%s4716_s30 + $0x11b8] sm:$0xff] }
 0x11d   : > { %4135 = vmatpush3.msra.mxu1 %v741_v36  ;;  %4101 = vmatprep.subr.mxu0 %v724_v38  ;;  %v775_v34 = vld [vmem:[%s4716_s30 + $0x1038] sm:$0xff]  ;;  %v790_v36 = vld [vmem:[%s4716_s30 + $0x10b0] sm:$0xff] }
 0x11e   : > { %4136 = vmatprep.subr.mxu1 %v756_v39  ;;  %4102 = vmatpush3.msra.mxu0 %v708_v40  ;;  %v807_v35 = vld [vmem:[%s4716_s30 + $0x1138] sm:$0xff]  ;;  %v774_v38 = vld [vmem:[%s4716_s30 + $0x1030] sm:$0xff]  ;;  %v789_v40 = vld [vmem:[%s4716_s30 + $0x10a8] sm:$0xff] }
 0x11f   : > { %4137 = vmatpush3.msra.mxu1 %v740_v41  ;;  %4103 = vmatprep.subr.mxu0 %v723_v42  ;;  %v806_v39 = vld [vmem:[%s4716_s30 + $0x1130] sm:$0xff]  ;;  %v821_v41 = vld [vmem:[%s4716_s30 + $0x11a8] sm:$0xff] }
 0x120   : > { %4138 = vmatprep.subr.mxu1 %v755_v43  ;;  %4104 = vmatpush3.msra.mxu0 %v707_v45  ;;  %v773_v42 = vld [vmem:[%s4716_s30 + $0x1028] sm:$0xff]  ;;  %v788_v45 = vld [vmem:[%s4716_s30 + $0x10a0] sm:$0xff] }
 0x121   : > { %4139 = vmatpush3.msra.mxu1 %v739_v46  ;;  %4105 = vmatprep.subr.mxu0 %v722_v47  ;;  %v805_v43 = vld [vmem:[%s4716_s30 + $0x1128] sm:$0xff]  ;;  %v820_v46 = vld [vmem:[%s4716_s30 + $0x11a0] sm:$0xff] }
 0x122   : > { %4140 = vmatprep.subr.mxu1 %v754_v48  ;;  %4106 = vmatpush3.msra.mxu0 %v706_v50  ;;  %v772_v47 = vld [vmem:[%s4716_s30 + $0x1020] sm:$0xff]  ;;  %v819_v50 = vld [vmem:[%s4716_s30 + $0x1198] sm:$0xff] }
 0x123   : > { %4141 = vmatpush3.msra.mxu1 %v738_v51  ;;  %4107 = vmatprep.subr.mxu0 %v721_v52  ;;  %v804_v48 = vld [vmem:[%s4716_s30 + $0x1120] sm:$0xff]  ;;  %v1302_v51 = vcombine.high %v250_v44, %v250_v44  ;;  %v771_v52 = vld [vmem:[%s4716_s30 + $0x1018] sm:$0xff] }
 0x124   : > { %4142 = vmatprep.subr.mxu1 %v753_v54  ;;  %4108 = vmatpush3.msra.mxu0 %v705_v56  ;;  %v803_v54 = vld [vmem:[%s4716_s30 + $0x1118] sm:$0xff]  ;;  %v818_v56 = vld [vmem:[%s4716_s30 + $0x1190] sm:$0xff] }
 0x125   : > { %4143 = vmatpush3.msra.mxu1 %v737_v57  ;;  %4109 = vmatprep.subr.mxu0 %v720_v58  ;;  %v1309_v57 = vrot.slane %v250_v44, %v4765_v53  ;;  %v770_v58 = vld [vmem:[%s4716_s30 + $0x1010] sm:$0xff] }
 0x126   : > { %4144 = vmatprep.subr.mxu1 %v752_v59  ;;  %4110 = vmatpush3.msra.mxu0 %v704_v61  ;;  %v802_v59 = vld [vmem:[%s4716_s30 + $0x1110] sm:$0xff]  ;;  %v817_v61 = vld [vmem:[%s4716_s30 + $0x1188] sm:$0xff] }
 0x127   : > { %2504 = vmatprep.mubr.f32.mxu0 %v1300_v60  ;;  %4145 = vmatpush3.msra.mxu1 %v736_v62  ;;  %v785_v60 = vld [vmem:[%s4716_s30 + $0x1088] sm:$0xff]  ;;  %v1316_v62 = vrot.slane %v1302_v51, %v4765_v53  ;;  %v886_v44 = vld [vmem:[%s4716_s30 + $0x13b0] sm:$0xff] }
 0x128   : > { %2505 = vmatmul.mubr.f32.vlgmr.msra.gmra.mxu0 %v1292_v49  ;;  %2574 = vmatprep.mubr.f32.mxu1 %v1301_v63  ;;  %v787_v49 = vld [vmem:[%s4716_s30 + $0x1098] sm:$0xff]  ;;  %v769_v63 = vld [vmem:[%s4716_s30 + $0x1008] sm:$0xff] }
 0x129   : > { %4149 = vmatprep.subr.mxu0 %v799_v0  ;;  %4184 = vmatprep.subr.mxu1 %v831_v1  ;;  %v801_v0 = vld [vmem:[%s4716_s30 + $0x1108] sm:$0xff]  ;;  %v784_v1 = vld [vmem:[%s4716_s30 + $0x1080] sm:$0xff] }
 0x12a   : > { %2575 = vmatmul.mubr.f32.vlgmr.msra.gmra.mxu1 %v1299_v55  ;;  %4150 = vmatpush3.msra.mxu0 %v783_v2  ;;  %v786_v55 = vld [vmem:[%s4716_s30 + $0x1090] sm:$0xff]  ;;  %v816_v2 = vld [vmem:[%s4716_s30 + $0x1180] sm:$0xff]  ;;  %v251_v51 = vld [vmem:[%s4711_s26 + $0x48] sm:$0xff] }
 0x12b   : > { %4185 = vmatpush3.msra.mxu1 %v815_v3  ;;  %4151 = vmatprep.subr.mxu0 %v798_v4  ;;  %v1317_v3 = vcombine.high %v1309_v57, %v1309_v57  ;;  %v768_v4 = vld [vmem:[%s4716_s30 + $0x1000] sm:$0xff] }
 0x12c   : > { %4186 = vmatprep.subr.mxu1 %v830_v5  ;;  %4152 = vmatpush3.msra.mxu0 %v782_v6  ;;  %v800_v5 = vld [vmem:[%s4716_s30 + $0x1100] sm:$0xff]  ;;  %v1318_v6 = vcombine.high %v1316_v62, %v1316_v62 }
 0x12d   : > { %4187 = vmatpush3.msra.mxu1 %v814_v7  ;;  %4153 = vmatprep.subr.mxu0 %v797_v8  ;;  %v863_v7 = vld [vmem:[%s4716_s30 + $0x12f8] sm:$0xff] }
 0x12e   : > { %4188 = vmatprep.subr.mxu1 %v829_v9  ;;  %4154 = vmatpush3.msra.mxu0 %v781_v10  ;;  %v895_v8 = vld [vmem:[%s4716_s30 + $0x13f8] sm:$0xff] }
 0x12f   : > { %4189 = vmatpush3.msra.mxu1 %v813_v11  ;;  %4155 = vmatprep.subr.mxu0 %v796_v12  ;;  %v847_v9 = vld [vmem:[%s4716_s30 + $0x1278] sm:$0xff]  ;;  %v862_v11 = vld [vmem:[%s4716_s30 + $0x12f0] sm:$0xff] }
 0x130   : > { %4190 = vmatprep.subr.mxu1 %v828_v13  ;;  %4156 = vmatpush3.msra.mxu0 %v780_v14  ;;  %v879_v10 = vld [vmem:[%s4716_s30 + $0x1378] sm:$0xff]  ;;  %v894_v12 = vld [vmem:[%s4716_s30 + $0x13f0] sm:$0xff] }
 0x131   : > { %4191 = vmatpush3.msra.mxu1 %v812_v15  ;;  %4157 = vmatprep.subr.mxu0 %v795_v16  ;;  %v846_v13 = vld [vmem:[%s4716_s30 + $0x1270] sm:$0xff]  ;;  %v861_v15 = vld [vmem:[%s4716_s30 + $0x12e8] sm:$0xff] }
 0x132   : > { %4192 = vmatprep.subr.mxu1 %v827_v17  ;;  %4158 = vmatpush3.msra.mxu0 %v779_v18  ;;  %v878_v14 = vld [vmem:[%s4716_s30 + $0x1370] sm:$0xff]  ;;  %v893_v16 = vld [vmem:[%s4716_s30 + $0x13e8] sm:$0xff] }
 0x133   : > { %4193 = vmatpush3.msra.mxu1 %v811_v19  ;;  %4159 = vmatprep.subr.mxu0 %v794_v20  ;;  %v845_v17 = vld [vmem:[%s4716_s30 + $0x1268] sm:$0xff]  ;;  %v860_v19 = vld [vmem:[%s4716_s30 + $0x12e0] sm:$0xff] }
 0x134   : > { %4194 = vmatprep.subr.mxu1 %v826_v21  ;;  %4160 = vmatpush3.msra.mxu0 %v778_v22  ;;  %v877_v18 = vld [vmem:[%s4716_s30 + $0x1368] sm:$0xff]  ;;  %v892_v20 = vld [vmem:[%s4716_s30 + $0x13e0] sm:$0xff] }
 0x135   : > { %4195 = vmatpush3.msra.mxu1 %v810_v23  ;;  %4161 = vmatprep.subr.mxu0 %v793_v24  ;;  %v844_v21 = vld [vmem:[%s4716_s30 + $0x1260] sm:$0xff]  ;;  %v859_v23 = vld [vmem:[%s4716_s30 + $0x12d8] sm:$0xff] }
 0x136   : > { %4196 = vmatprep.subr.mxu1 %v825_v25  ;;  %4162 = vmatpush3.msra.mxu0 %v777_v26  ;;  %v876_v22 = vld [vmem:[%s4716_s30 + $0x1360] sm:$0xff]  ;;  %v891_v24 = vld [vmem:[%s4716_s30 + $0x13d8] sm:$0xff] }
 0x137   : > { %4197 = vmatpush3.msra.mxu1 %v809_v27  ;;  %4163 = vmatprep.subr.mxu0 %v792_v28  ;;  %v843_v25 = vld [vmem:[%s4716_s30 + $0x1258] sm:$0xff]  ;;  %v858_v27 = vld [vmem:[%s4716_s30 + $0x12d0] sm:$0xff] }
 0x138   : > { %4198 = vmatprep.subr.mxu1 %v824_v29  ;;  %4164 = vmatpush3.msra.mxu0 %v776_v30  ;;  %v875_v26 = vld [vmem:[%s4716_s30 + $0x1358] sm:$0xff]  ;;  %v890_v28 = vld [vmem:[%s4716_s30 + $0x13d0] sm:$0xff] }
 0x139   : > { %4199 = vmatpush3.msra.mxu1 %v808_v31  ;;  %4165 = vmatprep.subr.mxu0 %v791_v32  ;;  %v842_v29 = vld [vmem:[%s4716_s30 + $0x1250] sm:$0xff]  ;;  %v857_v31 = vld [vmem:[%s4716_s30 + $0x12c8] sm:$0xff] }
 0x13a   : > { %4200 = vmatprep.subr.mxu1 %v823_v33  ;;  %4166 = vmatpush3.msra.mxu0 %v775_v34  ;;  %v874_v30 = vld [vmem:[%s4716_s30 + $0x1350] sm:$0xff]  ;;  %v889_v32 = vld [vmem:[%s4716_s30 + $0x13c8] sm:$0xff] }
 0x13b   : > { %4201 = vmatpush3.msra.mxu1 %v807_v35  ;;  %4167 = vmatprep.subr.mxu0 %v790_v36  ;;  %v841_v33 = vld [vmem:[%s4716_s30 + $0x1248] sm:$0xff]  ;;  %v856_v35 = vld [vmem:[%s4716_s30 + $0x12c0] sm:$0xff] }
 0x13c   : > { %4202 = vmatprep.subr.mxu1 %v822_v37  ;;  %4168 = vmatpush3.msra.mxu0 %v774_v38  ;;  %v873_v34 = vld [vmem:[%s4716_s30 + $0x1348] sm:$0xff]  ;;  %v888_v36 = vld [vmem:[%s4716_s30 + $0x13c0] sm:$0xff] }
 0x13d   : > { %4203 = vmatpush3.msra.mxu1 %v806_v39  ;;  %4169 = vmatprep.subr.mxu0 %v789_v40  ;;  %v840_v37 = vld [vmem:[%s4716_s30 + $0x1240] sm:$0xff]  ;;  %v855_v39 = vld [vmem:[%s4716_s30 + $0x12b8] sm:$0xff] }
 0x13e   : > { %4204 = vmatprep.subr.mxu1 %v821_v41  ;;  %4170 = vmatpush3.msra.mxu0 %v773_v42  ;;  %v872_v38 = vld [vmem:[%s4716_s30 + $0x1340] sm:$0xff]  ;;  %v887_v40 = vld [vmem:[%s4716_s30 + $0x13b8] sm:$0xff] }
 0x13f   : > { %4205 = vmatpush3.msra.mxu1 %v805_v43  ;;  %4171 = vmatprep.subr.mxu0 %v788_v45  ;;  %v839_v41 = vld [vmem:[%s4716_s30 + $0x1238] sm:$0xff]  ;;  %v854_v43 = vld [vmem:[%s4716_s30 + $0x12b0] sm:$0xff] }
 0x140   : > { %4206 = vmatprep.subr.mxu1 %v820_v46  ;;  %4172 = vmatpush3.msra.mxu0 %v772_v47  ;;  %v871_v42 = vld [vmem:[%s4716_s30 + $0x1338] sm:$0xff]  ;;  %v838_v45 = vld [vmem:[%s4716_s30 + $0x1230] sm:$0xff]  ;;  %v853_v47 = vld [vmem:[%s4716_s30 + $0x12a8] sm:$0xff] }
 0x141   : > { %4207 = vmatpush3.msra.mxu1 %v804_v48  ;;  %4173 = vmatprep.subr.mxu0 %v787_v49  ;;  %v870_v46 = vld [vmem:[%s4716_s30 + $0x1330] sm:$0xff]  ;;  %v885_v48 = vld [vmem:[%s4716_s30 + $0x13a8] sm:$0xff] }
 0x142   : > { %4208 = vmatprep.subr.mxu1 %v819_v50  ;;  %4174 = vmatpush3.msra.mxu0 %v771_v52  ;;  %v837_v49 = vld [vmem:[%s4716_s30 + $0x1228] sm:$0xff]  ;;  %v852_v52 = vld [vmem:[%s4716_s30 + $0x12a0] sm:$0xff] }
 0x143   : > { %4209 = vmatpush3.msra.mxu1 %v803_v54  ;;  %4175 = vmatprep.subr.mxu0 %v786_v55  ;;  %v869_v50 = vld [vmem:[%s4716_s30 + $0x1328] sm:$0xff]  ;;  %v884_v54 = vld [vmem:[%s4716_s30 + $0x13a0] sm:$0xff] }
 0x144   : > { %4210 = vmatprep.subr.mxu1 %v818_v56  ;;  %4176 = vmatpush3.msra.mxu0 %v770_v58  ;;  %v836_v55 = vld [vmem:[%s4716_s30 + $0x1220] sm:$0xff]  ;;  %v883_v58 = vld [vmem:[%s4716_s30 + $0x1398] sm:$0xff] }
 0x145   : > { %4211 = vmatpush3.msra.mxu1 %v802_v59  ;;  %4177 = vmatprep.subr.mxu0 %v785_v60  ;;  %v868_v56 = vld [vmem:[%s4716_s30 + $0x1320] sm:$0xff]  ;;  %v1319_v59 = vcombine.high %v251_v51, %v251_v51  ;;  %v835_v60 = vld [vmem:[%s4716_s30 + $0x1218] sm:$0xff] }
 0x146   : > { %4212 = vmatprep.subr.mxu1 %v817_v61  ;;  %4178 = vmatpush3.msra.mxu0 %v769_v63  ;;  %v867_v61 = vld [vmem:[%s4716_s30 + $0x1318] sm:$0xff]  ;;  %v882_v63 = vld [vmem:[%s4716_s30 + $0x1390] sm:$0xff] }
 0x147   : > { %4213 = vmatpush3.msra.mxu1 %v801_v0  ;;  %4179 = vmatprep.subr.mxu0 %v784_v1  ;;  %v1326_v0 = vrot.slane %v251_v51, %v4765_v53  ;;  %v834_v1 = vld [vmem:[%s4716_s30 + $0x1210] sm:$0xff] }
 0x148   : > { %4214 = vmatprep.subr.mxu1 %v816_v2  ;;  %4180 = vmatpush3.msra.mxu0 %v768_v4  ;;  %v866_v2 = vld [vmem:[%s4716_s30 + $0x1310] sm:$0xff]  ;;  %v881_v4 = vld [vmem:[%s4716_s30 + $0x1388] sm:$0xff] }
 0x149   : > { %2644 = vmatprep.mubr.f32.mxu0 %v1317_v3  ;;  %4215 = vmatpush3.msra.mxu1 %v800_v5  ;;  %v849_v3 = vld [vmem:[%s4716_s30 + $0x1288] sm:$0xff]  ;;  %v1333_v5 = vrot.slane %v1319_v59, %v4765_v53  ;;  %v950_v51 = vld [vmem:[%s4716_s30 + $0x15b0] sm:$0xff] }
 0x14a   : > { %2645 = vmatmul.mubr.f32.vlgmr.msra.gmra.mxu0 %v1309_v57  ;;  %2714 = vmatprep.mubr.f32.mxu1 %v1318_v6  ;;  %v851_v57 = vld [vmem:[%s4716_s30 + $0x1298] sm:$0xff]  ;;  %v833_v6 = vld [vmem:[%s4716_s30 + $0x1208] sm:$0xff]  ;;  %v252_v59 = vld [vmem:[%s4711_s26 + $0x50] sm:$0xff] }
 0x14b   : > { %4219 = vmatprep.subr.mxu0 %v863_v7  ;;  %4254 = vmatprep.subr.mxu1 %v895_v8  ;;  %v865_v7 = vld [vmem:[%s4716_s30 + $0x1308] sm:$0xff]  ;;  %v848_v8 = vld [vmem:[%s4716_s30 + $0x1280] sm:$0xff] }
 0x14c   : > { %2715 = vmatmul.mubr.f32.vlgmr.msra.gmra.mxu1 %v1316_v62  ;;  %4220 = vmatpush3.msra.mxu0 %v847_v9  ;;  %v850_v62 = vld [vmem:[%s4716_s30 + $0x1290] sm:$0xff]  ;;  %v880_v9 = vld [vmem:[%s4716_s30 + $0x1380] sm:$0xff] }
 0x14d   : > { %4255 = vmatpush3.msra.mxu1 %v879_v10  ;;  %4221 = vmatprep.subr.mxu0 %v862_v11  ;;  %v1334_v10 = vcombine.high %v1326_v0, %v1326_v0  ;;  %v832_v11 = vld [vmem:[%s4716_s30 + $0x1200] sm:$0xff] }
 0x14e   : > { %4256 = vmatprep.subr.mxu1 %v894_v12  ;;  %4222 = vmatpush3.msra.mxu0 %v846_v13  ;;  %v864_v12 = vld [vmem:[%s4716_s30 + $0x1300] sm:$0xff]  ;;  %v1335_v13 = vcombine.high %v1333_v5, %v1333_v5 }
 0x14f   : > { %4257 = vmatpush3.msra.mxu1 %v878_v14  ;;  %4223 = vmatprep.subr.mxu0 %v861_v15  ;;  %v927_v14 = vld [vmem:[%s4716_s30 + $0x14f8] sm:$0xff] }
 0x150   : > { %4258 = vmatprep.subr.mxu1 %v893_v16  ;;  %4224 = vmatpush3.msra.mxu0 %v845_v17  ;;  %v959_v15 = vld [vmem:[%s4716_s30 + $0x15f8] sm:$0xff] }
 0x151   : > { %4259 = vmatpush3.msra.mxu1 %v877_v18  ;;  %4225 = vmatprep.subr.mxu0 %v860_v19  ;;  %v911_v16 = vld [vmem:[%s4716_s30 + $0x1478] sm:$0xff]  ;;  %v926_v18 = vld [vmem:[%s4716_s30 + $0x14f0] sm:$0xff] }
 0x152   : > { %4260 = vmatprep.subr.mxu1 %v892_v20  ;;  %4226 = vmatpush3.msra.mxu0 %v844_v21  ;;  %v943_v17 = vld [vmem:[%s4716_s30 + $0x1578] sm:$0xff]  ;;  %v958_v19 = vld [vmem:[%s4716_s30 + $0x15f0] sm:$0xff] }
 0x153   : > { %4261 = vmatpush3.msra.mxu1 %v876_v22  ;;  %4227 = vmatprep.subr.mxu0 %v859_v23  ;;  %v910_v20 = vld [vmem:[%s4716_s30 + $0x1470] sm:$0xff]  ;;  %v925_v22 = vld [vmem:[%s4716_s30 + $0x14e8] sm:$0xff] }
 0x154   : > { %4262 = vmatprep.subr.mxu1 %v891_v24  ;;  %4228 = vmatpush3.msra.mxu0 %v843_v25  ;;  %v942_v21 = vld [vmem:[%s4716_s30 + $0x1570] sm:$0xff]  ;;  %v957_v23 = vld [vmem:[%s4716_s30 + $0x15e8] sm:$0xff] }
 0x155   : > { %4263 = vmatpush3.msra.mxu1 %v875_v26  ;;  %4229 = vmatprep.subr.mxu0 %v858_v27  ;;  %v909_v24 = vld [vmem:[%s4716_s30 + $0x1468] sm:$0xff]  ;;  %v924_v26 = vld [vmem:[%s4716_s30 + $0x14e0] sm:$0xff] }
 0x156   : > { %4264 = vmatprep.subr.mxu1 %v890_v28  ;;  %4230 = vmatpush3.msra.mxu0 %v842_v29  ;;  %v941_v25 = vld [vmem:[%s4716_s30 + $0x1568] sm:$0xff]  ;;  %v956_v27 = vld [vmem:[%s4716_s30 + $0x15e0] sm:$0xff] }
 0x157   : > { %4265 = vmatpush3.msra.mxu1 %v874_v30  ;;  %4231 = vmatprep.subr.mxu0 %v857_v31  ;;  %v908_v28 = vld [vmem:[%s4716_s30 + $0x1460] sm:$0xff]  ;;  %v923_v30 = vld [vmem:[%s4716_s30 + $0x14d8] sm:$0xff] }
 0x158   : > { %4266 = vmatprep.subr.mxu1 %v889_v32  ;;  %4232 = vmatpush3.msra.mxu0 %v841_v33  ;;  %v940_v29 = vld [vmem:[%s4716_s30 + $0x1560] sm:$0xff]  ;;  %v955_v31 = vld [vmem:[%s4716_s30 + $0x15d8] sm:$0xff] }
 0x159   : > { %4267 = vmatpush3.msra.mxu1 %v873_v34  ;;  %4233 = vmatprep.subr.mxu0 %v856_v35  ;;  %v907_v32 = vld [vmem:[%s4716_s30 + $0x1458] sm:$0xff]  ;;  %v922_v34 = vld [vmem:[%s4716_s30 + $0x14d0] sm:$0xff] }
 0x15a   : > { %4268 = vmatprep.subr.mxu1 %v888_v36  ;;  %4234 = vmatpush3.msra.mxu0 %v840_v37  ;;  %v939_v33 = vld [vmem:[%s4716_s30 + $0x1558] sm:$0xff]  ;;  %v954_v35 = vld [vmem:[%s4716_s30 + $0x15d0] sm:$0xff] }
 0x15b   : > { %4269 = vmatpush3.msra.mxu1 %v872_v38  ;;  %4235 = vmatprep.subr.mxu0 %v855_v39  ;;  %v906_v36 = vld [vmem:[%s4716_s30 + $0x1450] sm:$0xff]  ;;  %v921_v38 = vld [vmem:[%s4716_s30 + $0x14c8] sm:$0xff] }
 0x15c   : > { %4270 = vmatprep.subr.mxu1 %v887_v40  ;;  %4236 = vmatpush3.msra.mxu0 %v839_v41  ;;  %v938_v37 = vld [vmem:[%s4716_s30 + $0x1550] sm:$0xff]  ;;  %v953_v39 = vld [vmem:[%s4716_s30 + $0x15c8] sm:$0xff] }
 0x15d   : > { %4271 = vmatpush3.msra.mxu1 %v871_v42  ;;  %4237 = vmatprep.subr.mxu0 %v854_v43  ;;  %v905_v40 = vld [vmem:[%s4716_s30 + $0x1448] sm:$0xff]  ;;  %v920_v42 = vld [vmem:[%s4716_s30 + $0x14c0] sm:$0xff] }
 0x15e   : > { %4272 = vmatprep.subr.mxu1 %v886_v44  ;;  %4238 = vmatpush3.msra.mxu0 %v838_v45  ;;  %v937_v41 = vld [vmem:[%s4716_s30 + $0x1548] sm:$0xff]  ;;  %v952_v43 = vld [vmem:[%s4716_s30 + $0x15c0] sm:$0xff] }
 0x15f   : > { %4273 = vmatpush3.msra.mxu1 %v870_v46  ;;  %4239 = vmatprep.subr.mxu0 %v853_v47  ;;  %v904_v44 = vld [vmem:[%s4716_s30 + $0x1440] sm:$0xff]  ;;  %v919_v46 = vld [vmem:[%s4716_s30 + $0x14b8] sm:$0xff] }
 0x160   : > { %4274 = vmatprep.subr.mxu1 %v885_v48  ;;  %4240 = vmatpush3.msra.mxu0 %v837_v49  ;;  %v936_v45 = vld [vmem:[%s4716_s30 + $0x1540] sm:$0xff]  ;;  %v951_v47 = vld [vmem:[%s4716_s30 + $0x15b8] sm:$0xff] }
 0x161   : > { %4275 = vmatpush3.msra.mxu1 %v869_v50  ;;  %4241 = vmatprep.subr.mxu0 %v852_v52  ;;  %v903_v48 = vld [vmem:[%s4716_s30 + $0x1438] sm:$0xff]  ;;  %v918_v50 = vld [vmem:[%s4716_s30 + $0x14b0] sm:$0xff] }
 0x162   : > { %4276 = vmatprep.subr.mxu1 %v884_v54  ;;  %4242 = vmatpush3.msra.mxu0 %v836_v55  ;;  %v935_v49 = vld [vmem:[%s4716_s30 + $0x1538] sm:$0xff]  ;;  %v902_v52 = vld [vmem:[%s4716_s30 + $0x1430] sm:$0xff]  ;;  %v917_v55 = vld [vmem:[%s4716_s30 + $0x14a8] sm:$0xff] }
 0x163   : > { %4277 = vmatpush3.msra.mxu1 %v868_v56  ;;  %4243 = vmatprep.subr.mxu0 %v851_v57  ;;  %v934_v54 = vld [vmem:[%s4716_s30 + $0x1530] sm:$0xff]  ;;  %v949_v56 = vld [vmem:[%s4716_s30 + $0x15a8] sm:$0xff] }
 0x164   : > { %4278 = vmatprep.subr.mxu1 %v883_v58  ;;  %4244 = vmatpush3.msra.mxu0 %v835_v60  ;;  %v901_v57 = vld [vmem:[%s4716_s30 + $0x1428] sm:$0xff]  ;;  %v916_v60 = vld [vmem:[%s4716_s30 + $0x14a0] sm:$0xff] }
 0x165   : > { %4279 = vmatpush3.msra.mxu1 %v867_v61  ;;  %4245 = vmatprep.subr.mxu0 %v850_v62  ;;  %v933_v58 = vld [vmem:[%s4716_s30 + $0x1528] sm:$0xff]  ;;  %v948_v61 = vld [vmem:[%s4716_s30 + $0x15a0] sm:$0xff] }
 0x166   : > { %4280 = vmatprep.subr.mxu1 %v882_v63  ;;  %4246 = vmatpush3.msra.mxu0 %v834_v1  ;;  %v900_v62 = vld [vmem:[%s4716_s30 + $0x1420] sm:$0xff]  ;;  %v947_v1 = vld [vmem:[%s4716_s30 + $0x1598] sm:$0xff] }
 0x167   : > { %4281 = vmatpush3.msra.mxu1 %v866_v2  ;;  %4247 = vmatprep.subr.mxu0 %v849_v3  ;;  %v932_v63 = vld [vmem:[%s4716_s30 + $0x1520] sm:$0xff]  ;;  %v1336_v2 = vcombine.high %v252_v59, %v252_v59  ;;  %v899_v3 = vld [vmem:[%s4716_s30 + $0x1418] sm:$0xff] }
 0x168   : > { %4282 = vmatprep.subr.mxu1 %v881_v4  ;;  %4248 = vmatpush3.msra.mxu0 %v833_v6  ;;  %v931_v4 = vld [vmem:[%s4716_s30 + $0x1518] sm:$0xff]  ;;  %v946_v6 = vld [vmem:[%s4716_s30 + $0x1590] sm:$0xff] }
 0x169   : > { %4283 = vmatpush3.msra.mxu1 %v865_v7  ;;  %4249 = vmatprep.subr.mxu0 %v848_v8  ;;  %v1343_v7 = vrot.slane %v252_v59, %v4765_v53  ;;  %v898_v8 = vld [vmem:[%s4716_s30 + $0x1410] sm:$0xff] }
 0x16a   : > { %4284 = vmatprep.subr.mxu1 %v880_v9  ;;  %4250 = vmatpush3.msra.mxu0 %v832_v11  ;;  %v930_v9 = vld [vmem:[%s4716_s30 + $0x1510] sm:$0xff]  ;;  %v945_v11 = vld [vmem:[%s4716_s30 + $0x1588] sm:$0xff] }
 0x16b   : > { %2784 = vmatprep.mubr.f32.mxu0 %v1334_v10  ;;  %4285 = vmatpush3.msra.mxu1 %v864_v12  ;;  %v913_v10 = vld [vmem:[%s4716_s30 + $0x1488] sm:$0xff]  ;;  %v1350_v12 = vrot.slane %v1336_v2, %v4765_v53  ;;  %v1014_v59 = vld [vmem:[%s4716_s30 + $0x17b0] sm:$0xff]  ;;  %v253_v2 = vld [vmem:[%s4711_s26 + $0x58] sm:$0xff] }
 0x16c   : > { %2785 = vmatmul.mubr.f32.vlgmr.msra.gmra.mxu0 %v1326_v0  ;;  %2854 = vmatprep.mubr.f32.mxu1 %v1335_v13  ;;  %v915_v0 = vld [vmem:[%s4716_s30 + $0x1498] sm:$0xff]  ;;  %v897_v13 = vld [vmem:[%s4716_s30 + $0x1408] sm:$0xff] }
 0x16d   : > { %4289 = vmatprep.subr.mxu0 %v927_v14  ;;  %4324 = vmatprep.subr.mxu1 %v959_v15  ;;  %v929_v14 = vld [vmem:[%s4716_s30 + $0x1508] sm:$0xff]  ;;  %v912_v15 = vld [vmem:[%s4716_s30 + $0x1480] sm:$0xff] }
 0x16e   : > { %2855 = vmatmul.mubr.f32.vlgmr.msra.gmra.mxu1 %v1333_v5  ;;  %4290 = vmatpush3.msra.mxu0 %v911_v16  ;;  %v914_v5 = vld [vmem:[%s4716_s30 + $0x1490] sm:$0xff]  ;;  %v944_v16 = vld [vmem:[%s4716_s30 + $0x1580] sm:$0xff] }
 0x16f   : > { %4325 = vmatpush3.msra.mxu1 %v943_v17  ;;  %4291 = vmatprep.subr.mxu0 %v926_v18  ;;  %v1351_v17 = vcombine.high %v1343_v7, %v1343_v7  ;;  %v896_v18 = vld [vmem:[%s4716_s30 + $0x1400] sm:$0xff] }
 0x170   : > { %4326 = vmatprep.subr.mxu1 %v958_v19  ;;  %4292 = vmatpush3.msra.mxu0 %v910_v20  ;;  %v928_v19 = vld [vmem:[%s4716_s30 + $0x1500] sm:$0xff]  ;;  %v1352_v20 = vcombine.high %v1350_v12, %v1350_v12 }
 0x171   : > { %4327 = vmatpush3.msra.mxu1 %v942_v21  ;;  %4293 = vmatprep.subr.mxu0 %v925_v22  ;;  %v991_v21 = vld [vmem:[%s4716_s30 + $0x16f8] sm:$0xff] }
 0x172   : > { %4328 = vmatprep.subr.mxu1 %v957_v23  ;;  %4294 = vmatpush3.msra.mxu0 %v909_v24  ;;  %v1023_v22 = vld [vmem:[%s4716_s30 + $0x17f8] sm:$0xff] }
 0x173   : > { %4329 = vmatpush3.msra.mxu1 %v941_v25  ;;  %4295 = vmatprep.subr.mxu0 %v924_v26  ;;  %v975_v23 = vld [vmem:[%s4716_s30 + $0x1678] sm:$0xff]  ;;  %v990_v25 = vld [vmem:[%s4716_s30 + $0x16f0] sm:$0xff] }
 0x174   : > { %4330 = vmatprep.subr.mxu1 %v956_v27  ;;  %4296 = vmatpush3.msra.mxu0 %v908_v28  ;;  %v1007_v24 = vld [vmem:[%s4716_s30 + $0x1778] sm:$0xff]  ;;  %v1022_v26 = vld [vmem:[%s4716_s30 + $0x17f0] sm:$0xff] }
 0x175   : > { %4331 = vmatpush3.msra.mxu1 %v940_v29  ;;  %4297 = vmatprep.subr.mxu0 %v923_v30  ;;  %v974_v27 = vld [vmem:[%s4716_s30 + $0x1670] sm:$0xff]  ;;  %v989_v29 = vld [vmem:[%s4716_s30 + $0x16e8] sm:$0xff] }
 0x176   : > { %4332 = vmatprep.subr.mxu1 %v955_v31  ;;  %4298 = vmatpush3.msra.mxu0 %v907_v32  ;;  %v1006_v28 = vld [vmem:[%s4716_s30 + $0x1770] sm:$0xff]  ;;  %v1021_v30 = vld [vmem:[%s4716_s30 + $0x17e8] sm:$0xff] }
 0x177   : > { %4333 = vmatpush3.msra.mxu1 %v939_v33  ;;  %4299 = vmatprep.subr.mxu0 %v922_v34  ;;  %v973_v31 = vld [vmem:[%s4716_s30 + $0x1668] sm:$0xff]  ;;  %v988_v33 = vld [vmem:[%s4716_s30 + $0x16e0] sm:$0xff] }
 0x178   : > { %4334 = vmatprep.subr.mxu1 %v954_v35  ;;  %4300 = vmatpush3.msra.mxu0 %v906_v36  ;;  %v1005_v32 = vld [vmem:[%s4716_s30 + $0x1768] sm:$0xff]  ;;  %v1020_v34 = vld [vmem:[%s4716_s30 + $0x17e0] sm:$0xff] }
 0x179   : > { %4335 = vmatpush3.msra.mxu1 %v938_v37  ;;  %4301 = vmatprep.subr.mxu0 %v921_v38  ;;  %v972_v35 = vld [vmem:[%s4716_s30 + $0x1660] sm:$0xff]  ;;  %v987_v37 = vld [vmem:[%s4716_s30 + $0x16d8] sm:$0xff] }
 0x17a   : > { %4336 = vmatprep.subr.mxu1 %v953_v39  ;;  %4302 = vmatpush3.msra.mxu0 %v905_v40  ;;  %v1004_v36 = vld [vmem:[%s4716_s30 + $0x1760] sm:$0xff]  ;;  %v1019_v38 = vld [vmem:[%s4716_s30 + $0x17d8] sm:$0xff] }
 0x17b   : > { %4337 = vmatpush3.msra.mxu1 %v937_v41  ;;  %4303 = vmatprep.subr.mxu0 %v920_v42  ;;  %v971_v39 = vld [vmem:[%s4716_s30 + $0x1658] sm:$0xff]  ;;  %v986_v41 = vld [vmem:[%s4716_s30 + $0x16d0] sm:$0xff] }
 0x17c   : > { %4338 = vmatprep.subr.mxu1 %v952_v43  ;;  %4304 = vmatpush3.msra.mxu0 %v904_v44  ;;  %v1003_v40 = vld [vmem:[%s4716_s30 + $0x1758] sm:$0xff]  ;;  %v1018_v42 = vld [vmem:[%s4716_s30 + $0x17d0] sm:$0xff] }
 0x17d   : > { %4339 = vmatpush3.msra.mxu1 %v936_v45  ;;  %4305 = vmatprep.subr.mxu0 %v919_v46  ;;  %v970_v43 = vld [vmem:[%s4716_s30 + $0x1650] sm:$0xff]  ;;  %v985_v45 = vld [vmem:[%s4716_s30 + $0x16c8] sm:$0xff] }
 0x17e   : > { %4340 = vmatprep.subr.mxu1 %v951_v47  ;;  %4306 = vmatpush3.msra.mxu0 %v903_v48  ;;  %v1002_v44 = vld [vmem:[%s4716_s30 + $0x1750] sm:$0xff]  ;;  %v1017_v46 = vld [vmem:[%s4716_s30 + $0x17c8] sm:$0xff] }
 0x17f   : > { %4341 = vmatpush3.msra.mxu1 %v935_v49  ;;  %4307 = vmatprep.subr.mxu0 %v918_v50  ;;  %v969_v47 = vld [vmem:[%s4716_s30 + $0x1648] sm:$0xff]  ;;  %v984_v49 = vld [vmem:[%s4716_s30 + $0x16c0] sm:$0xff] }
 0x180   : > { %4342 = vmatprep.subr.mxu1 %v950_v51  ;;  %4308 = vmatpush3.msra.mxu0 %v902_v52  ;;  %v1001_v48 = vld [vmem:[%s4716_s30 + $0x1748] sm:$0xff]  ;;  %v1016_v50 = vld [vmem:[%s4716_s30 + $0x17c0] sm:$0xff] }
 0x181   : > { %4343 = vmatpush3.msra.mxu1 %v934_v54  ;;  %4309 = vmatprep.subr.mxu0 %v917_v55  ;;  %v968_v51 = vld [vmem:[%s4716_s30 + $0x1640] sm:$0xff]  ;;  %v983_v54 = vld [vmem:[%s4716_s30 + $0x16b8] sm:$0xff] }
 0x182   : > { %4344 = vmatprep.subr.mxu1 %v949_v56  ;;  %4310 = vmatpush3.msra.mxu0 %v901_v57  ;;  %v1000_v52 = vld [vmem:[%s4716_s30 + $0x1740] sm:$0xff]  ;;  %v1015_v55 = vld [vmem:[%s4716_s30 + $0x17b8] sm:$0xff] }
 0x183   : > { %4345 = vmatpush3.msra.mxu1 %v933_v58  ;;  %4311 = vmatprep.subr.mxu0 %v916_v60  ;;  %v967_v56 = vld [vmem:[%s4716_s30 + $0x1638] sm:$0xff]  ;;  %v982_v58 = vld [vmem:[%s4716_s30 + $0x16b0] sm:$0xff] }
 0x184   : > { %4346 = vmatprep.subr.mxu1 %v948_v61  ;;  %4312 = vmatpush3.msra.mxu0 %v900_v62  ;;  %v999_v57 = vld [vmem:[%s4716_s30 + $0x1738] sm:$0xff]  ;;  %v966_v60 = vld [vmem:[%s4716_s30 + $0x1630] sm:$0xff]  ;;  %v981_v62 = vld [vmem:[%s4716_s30 + $0x16a8] sm:$0xff] }
 0x185   : > { %4347 = vmatpush3.msra.mxu1 %v932_v63  ;;  %4313 = vmatprep.subr.mxu0 %v915_v0  ;;  %v998_v61 = vld [vmem:[%s4716_s30 + $0x1730] sm:$0xff]  ;;  %v1013_v63 = vld [vmem:[%s4716_s30 + $0x17a8] sm:$0xff] }
 0x186   : > { %4348 = vmatprep.subr.mxu1 %v947_v1  ;;  %4314 = vmatpush3.msra.mxu0 %v899_v3  ;;  %v965_v0 = vld [vmem:[%s4716_s30 + $0x1628] sm:$0xff]  ;;  %v980_v3 = vld [vmem:[%s4716_s30 + $0x16a0] sm:$0xff] }
 0x187   : > { %4349 = vmatpush3.msra.mxu1 %v931_v4  ;;  %4315 = vmatprep.subr.mxu0 %v914_v5  ;;  %v997_v1 = vld [vmem:[%s4716_s30 + $0x1728] sm:$0xff]  ;;  %v1012_v4 = vld [vmem:[%s4716_s30 + $0x17a0] sm:$0xff] }
 0x188   : > { %4350 = vmatprep.subr.mxu1 %v946_v6  ;;  %4316 = vmatpush3.msra.mxu0 %v898_v8  ;;  %v964_v5 = vld [vmem:[%s4716_s30 + $0x1620] sm:$0xff]  ;;  %v1011_v8 = vld [vmem:[%s4716_s30 + $0x1798] sm:$0xff] }
 0x189   : > { %4351 = vmatpush3.msra.mxu1 %v930_v9  ;;  %4317 = vmatprep.subr.mxu0 %v913_v10  ;;  %v996_v6 = vld [vmem:[%s4716_s30 + $0x1720] sm:$0xff]  ;;  %v1353_v9 = vcombine.high %v253_v2, %v253_v2  ;;  %v963_v10 = vld [vmem:[%s4716_s30 + $0x1618] sm:$0xff] }
 0x18a   : > { %4352 = vmatprep.subr.mxu1 %v945_v11  ;;  %4318 = vmatpush3.msra.mxu0 %v897_v13  ;;  %v995_v11 = vld [vmem:[%s4716_s30 + $0x1718] sm:$0xff]  ;;  %v1010_v13 = vld [vmem:[%s4716_s30 + $0x1790] sm:$0xff] }
 0x18b   : > { %4353 = vmatpush3.msra.mxu1 %v929_v14  ;;  %4319 = vmatprep.subr.mxu0 %v912_v15  ;;  %v1360_v14 = vrot.slane %v253_v2, %v4765_v53  ;;  %v962_v15 = vld [vmem:[%s4716_s30 + $0x1610] sm:$0xff] }
 0x18c   : > { %4354 = vmatprep.subr.mxu1 %v944_v16  ;;  %4320 = vmatpush3.msra.mxu0 %v896_v18  ;;  %v994_v16 = vld [vmem:[%s4716_s30 + $0x1710] sm:$0xff]  ;;  %v1009_v18 = vld [vmem:[%s4716_s30 + $0x1788] sm:$0xff] }
 0x18d   : > { %2924 = vmatprep.mubr.f32.mxu0 %v1351_v17  ;;  %4355 = vmatpush3.msra.mxu1 %v928_v19  ;;  %v977_v17 = vld [vmem:[%s4716_s30 + $0x1688] sm:$0xff]  ;;  %v1367_v19 = vrot.slane %v1353_v9, %v4765_v53  ;;  %v1078_v2 = vld [vmem:[%s4716_s30 + $0x19b0] sm:$0xff]  ;;  %v254_v9 = vld [vmem:[%s4711_s26 + $0x60] sm:$0xff] }
 0x18e   : > { %2925 = vmatmul.mubr.f32.vlgmr.msra.gmra.mxu0 %v1343_v7  ;;  %2994 = vmatprep.mubr.f32.mxu1 %v1352_v20  ;;  %v979_v7 = vld [vmem:[%s4716_s30 + $0x1698] sm:$0xff]  ;;  %v961_v20 = vld [vmem:[%s4716_s30 + $0x1608] sm:$0xff] }
 0x18f   : > { %4359 = vmatprep.subr.mxu0 %v991_v21  ;;  %4394 = vmatprep.subr.mxu1 %v1023_v22  ;;  %v993_v21 = vld [vmem:[%s4716_s30 + $0x1708] sm:$0xff]  ;;  %v976_v22 = vld [vmem:[%s4716_s30 + $0x1680] sm:$0xff] }
 0x190   : > { %2995 = vmatmul.mubr.f32.vlgmr.msra.gmra.mxu1 %v1350_v12  ;;  %4360 = vmatpush3.msra.mxu0 %v975_v23  ;;  %v978_v12 = vld [vmem:[%s4716_s30 + $0x1690] sm:$0xff]  ;;  %v1008_v23 = vld [vmem:[%s4716_s30 + $0x1780] sm:$0xff] }
 0x191   : > { %4395 = vmatpush3.msra.mxu1 %v1007_v24  ;;  %4361 = vmatprep.subr.mxu0 %v990_v25  ;;  %v1368_v24 = vcombine.high %v1360_v14, %v1360_v14  ;;  %v960_v25 = vld [vmem:[%s4716_s30 + $0x1600] sm:$0xff] }
 0x192   : > { %4396 = vmatprep.subr.mxu1 %v1022_v26  ;;  %4362 = vmatpush3.msra.mxu0 %v974_v27  ;;  %v992_v26 = vld [vmem:[%s4716_s30 + $0x1700] sm:$0xff]  ;;  %v1369_v27 = vcombine.high %v1367_v19, %v1367_v19 }
 0x193   : > { %4397 = vmatpush3.msra.mxu1 %v1006_v28  ;;  %4363 = vmatprep.subr.mxu0 %v989_v29  ;;  %v1055_v28 = vld [vmem:[%s4716_s30 + $0x18f8] sm:$0xff] }
 0x194   : > { %4398 = vmatprep.subr.mxu1 %v1021_v30  ;;  %4364 = vmatpush3.msra.mxu0 %v973_v31  ;;  %v1087_v29 = vld [vmem:[%s4716_s30 + $0x19f8] sm:$0xff] }
 0x195   : > { %4399 = vmatpush3.msra.mxu1 %v1005_v32  ;;  %4365 = vmatprep.subr.mxu0 %v988_v33  ;;  %v1039_v30 = vld [vmem:[%s4716_s30 + $0x1878] sm:$0xff]  ;;  %v1054_v32 = vld [vmem:[%s4716_s30 + $0x18f0] sm:$0xff] }
 0x196   : > { %4400 = vmatprep.subr.mxu1 %v1020_v34  ;;  %4366 = vmatpush3.msra.mxu0 %v972_v35  ;;  %v1071_v31 = vld [vmem:[%s4716_s30 + $0x1978] sm:$0xff]  ;;  %v1086_v33 = vld [vmem:[%s4716_s30 + $0x19f0] sm:$0xff] }
 0x197   : > { %4401 = vmatpush3.msra.mxu1 %v1004_v36  ;;  %4367 = vmatprep.subr.mxu0 %v987_v37  ;;  %v1038_v34 = vld [vmem:[%s4716_s30 + $0x1870] sm:$0xff]  ;;  %v1053_v36 = vld [vmem:[%s4716_s30 + $0x18e8] sm:$0xff] }
 0x198   : > { %4402 = vmatprep.subr.mxu1 %v1019_v38  ;;  %4368 = vmatpush3.msra.mxu0 %v971_v39  ;;  %v1070_v35 = vld [vmem:[%s4716_s30 + $0x1970] sm:$0xff]  ;;  %v1085_v37 = vld [vmem:[%s4716_s30 + $0x19e8] sm:$0xff] }
 0x199   : > { %4403 = vmatpush3.msra.mxu1 %v1003_v40  ;;  %4369 = vmatprep.subr.mxu0 %v986_v41  ;;  %v1037_v38 = vld [vmem:[%s4716_s30 + $0x1868] sm:$0xff]  ;;  %v1052_v40 = vld [vmem:[%s4716_s30 + $0x18e0] sm:$0xff] }
 0x19a   : > { %4404 = vmatprep.subr.mxu1 %v1018_v42  ;;  %4370 = vmatpush3.msra.mxu0 %v970_v43  ;;  %v1069_v39 = vld [vmem:[%s4716_s30 + $0x1968] sm:$0xff]  ;;  %v1084_v41 = vld [vmem:[%s4716_s30 + $0x19e0] sm:$0xff] }
 0x19b   : > { %4405 = vmatpush3.msra.mxu1 %v1002_v44  ;;  %4371 = vmatprep.subr.mxu0 %v985_v45  ;;  %v1036_v42 = vld [vmem:[%s4716_s30 + $0x1860] sm:$0xff]  ;;  %v1051_v44 = vld [vmem:[%s4716_s30 + $0x18d8] sm:$0xff] }
 0x19c   : > { %4406 = vmatprep.subr.mxu1 %v1017_v46  ;;  %4372 = vmatpush3.msra.mxu0 %v969_v47  ;;  %v1068_v43 = vld [vmem:[%s4716_s30 + $0x1960] sm:$0xff]  ;;  %v1083_v45 = vld [vmem:[%s4716_s30 + $0x19d8] sm:$0xff] }
 0x19d   : > { %4407 = vmatpush3.msra.mxu1 %v1001_v48  ;;  %4373 = vmatprep.subr.mxu0 %v984_v49  ;;  %v1035_v46 = vld [vmem:[%s4716_s30 + $0x1858] sm:$0xff]  ;;  %v1050_v48 = vld [vmem:[%s4716_s30 + $0x18d0] sm:$0xff] }
 0x19e   : > { %4408 = vmatprep.subr.mxu1 %v1016_v50  ;;  %4374 = vmatpush3.msra.mxu0 %v968_v51  ;;  %v1067_v47 = vld [vmem:[%s4716_s30 + $0x1958] sm:$0xff]  ;;  %v1082_v49 = vld [vmem:[%s4716_s30 + $0x19d0] sm:$0xff] }
 0x19f   : > { %4409 = vmatpush3.msra.mxu1 %v1000_v52  ;;  %4375 = vmatprep.subr.mxu0 %v983_v54  ;;  %v1034_v50 = vld [vmem:[%s4716_s30 + $0x1850] sm:$0xff]  ;;  %v1049_v52 = vld [vmem:[%s4716_s30 + $0x18c8] sm:$0xff] }
 0x1a0   : > { %4410 = vmatprep.subr.mxu1 %v1015_v55  ;;  %4376 = vmatpush3.msra.mxu0 %v967_v56  ;;  %v1066_v51 = vld [vmem:[%s4716_s30 + $0x1950] sm:$0xff]  ;;  %v1081_v54 = vld [vmem:[%s4716_s30 + $0x19c8] sm:$0xff] }
 0x1a1   : > { %4411 = vmatpush3.msra.mxu1 %v999_v57  ;;  %4377 = vmatprep.subr.mxu0 %v982_v58  ;;  %v1033_v55 = vld [vmem:[%s4716_s30 + $0x1848] sm:$0xff]  ;;  %v1048_v57 = vld [vmem:[%s4716_s30 + $0x18c0] sm:$0xff] }
 0x1a2   : > { %4412 = vmatprep.subr.mxu1 %v1014_v59  ;;  %4378 = vmatpush3.msra.mxu0 %v966_v60  ;;  %v1065_v56 = vld [vmem:[%s4716_s30 + $0x1948] sm:$0xff]  ;;  %v1080_v58 = vld [vmem:[%s4716_s30 + $0x19c0] sm:$0xff] }
 0x1a3   : > { %4413 = vmatpush3.msra.mxu1 %v998_v61  ;;  %4379 = vmatprep.subr.mxu0 %v981_v62  ;;  %v1032_v59 = vld [vmem:[%s4716_s30 + $0x1840] sm:$0xff]  ;;  %v1047_v61 = vld [vmem:[%s4716_s30 + $0x18b8] sm:$0xff] }
 0x1a4   : > { %4414 = vmatprep.subr.mxu1 %v1013_v63  ;;  %4380 = vmatpush3.msra.mxu0 %v965_v0  ;;  %v1064_v60 = vld [vmem:[%s4716_s30 + $0x1940] sm:$0xff]  ;;  %v1079_v62 = vld [vmem:[%s4716_s30 + $0x19b8] sm:$0xff] }
 0x1a5   : > { %4415 = vmatpush3.msra.mxu1 %v997_v1  ;;  %4381 = vmatprep.subr.mxu0 %v980_v3  ;;  %v1031_v63 = vld [vmem:[%s4716_s30 + $0x1838] sm:$0xff]  ;;  %v1046_v1 = vld [vmem:[%s4716_s30 + $0x18b0] sm:$0xff] }
 0x1a6   : > { %4416 = vmatprep.subr.mxu1 %v1012_v4  ;;  %4382 = vmatpush3.msra.mxu0 %v964_v5  ;;  %v1063_v0 = vld [vmem:[%s4716_s30 + $0x1938] sm:$0xff]  ;;  %v1030_v3 = vld [vmem:[%s4716_s30 + $0x1830] sm:$0xff]  ;;  %v1045_v5 = vld [vmem:[%s4716_s30 + $0x18a8] sm:$0xff] }
 0x1a7   : > { %4417 = vmatpush3.msra.mxu1 %v996_v6  ;;  %4383 = vmatprep.subr.mxu0 %v979_v7  ;;  %v1062_v4 = vld [vmem:[%s4716_s30 + $0x1930] sm:$0xff]  ;;  %v1077_v6 = vld [vmem:[%s4716_s30 + $0x19a8] sm:$0xff] }
 0x1a8   : > { %4418 = vmatprep.subr.mxu1 %v1011_v8  ;;  %4384 = vmatpush3.msra.mxu0 %v963_v10  ;;  %v1029_v7 = vld [vmem:[%s4716_s30 + $0x1828] sm:$0xff]  ;;  %v1044_v10 = vld [vmem:[%s4716_s30 + $0x18a0] sm:$0xff] }
 0x1a9   : > { %4419 = vmatpush3.msra.mxu1 %v995_v11  ;;  %4385 = vmatprep.subr.mxu0 %v978_v12  ;;  %v1061_v8 = vld [vmem:[%s4716_s30 + $0x1928] sm:$0xff]  ;;  %v1076_v11 = vld [vmem:[%s4716_s30 + $0x19a0] sm:$0xff] }
 0x1aa   : > { %4420 = vmatprep.subr.mxu1 %v1010_v13  ;;  %4386 = vmatpush3.msra.mxu0 %v962_v15  ;;  %v1028_v12 = vld [vmem:[%s4716_s30 + $0x1820] sm:$0xff]  ;;  %v1075_v15 = vld [vmem:[%s4716_s30 + $0x1998] sm:$0xff] }
 0x1ab   : > { %4421 = vmatpush3.msra.mxu1 %v994_v16  ;;  %4387 = vmatprep.subr.mxu0 %v977_v17  ;;  %v1060_v13 = vld [vmem:[%s4716_s30 + $0x1920] sm:$0xff]  ;;  %v1370_v16 = vcombine.high %v254_v9, %v254_v9  ;;  %v1027_v17 = vld [vmem:[%s4716_s30 + $0x1818] sm:$0xff] }
 0x1ac   : > { %4422 = vmatprep.subr.mxu1 %v1009_v18  ;;  %4388 = vmatpush3.msra.mxu0 %v961_v20  ;;  %v1059_v18 = vld [vmem:[%s4716_s30 + $0x1918] sm:$0xff]  ;;  %v1074_v20 = vld [vmem:[%s4716_s30 + $0x1990] sm:$0xff] }
 0x1ad   : > { %4423 = vmatpush3.msra.mxu1 %v993_v21  ;;  %4389 = vmatprep.subr.mxu0 %v976_v22  ;;  %v1377_v21 = vrot.slane %v254_v9, %v4765_v53  ;;  %v1026_v22 = vld [vmem:[%s4716_s30 + $0x1810] sm:$0xff] }
 0x1ae   : > { %4424 = vmatprep.subr.mxu1 %v1008_v23  ;;  %4390 = vmatpush3.msra.mxu0 %v960_v25  ;;  %v1058_v23 = vld [vmem:[%s4716_s30 + $0x1910] sm:$0xff]  ;;  %v1073_v25 = vld [vmem:[%s4716_s30 + $0x1988] sm:$0xff] }
 0x1af   : > { %3064 = vmatprep.mubr.f32.mxu0 %v1368_v24  ;;  %4425 = vmatpush3.msra.mxu1 %v992_v26  ;;  %v1041_v24 = vld [vmem:[%s4716_s30 + $0x1888] sm:$0xff]  ;;  %v1384_v26 = vrot.slane %v1370_v16, %v4765_v53  ;;  %v1142_v9 = vld [vmem:[%s4716_s30 + $0x1bb0] sm:$0xff] }
 0x1b0   : > { %3065 = vmatmul.mubr.f32.vlgmr.msra.gmra.mxu0 %v1360_v14  ;;  %3134 = vmatprep.mubr.f32.mxu1 %v1369_v27  ;;  %v1043_v14 = vld [vmem:[%s4716_s30 + $0x1898] sm:$0xff]  ;;  %v1025_v27 = vld [vmem:[%s4716_s30 + $0x1808] sm:$0xff] }
 0x1b1   : > { %4429 = vmatprep.subr.mxu0 %v1055_v28  ;;  %4464 = vmatprep.subr.mxu1 %v1087_v29  ;;  %v1057_v28 = vld [vmem:[%s4716_s30 + $0x1908] sm:$0xff]  ;;  %v1040_v29 = vld [vmem:[%s4716_s30 + $0x1880] sm:$0xff] }
 0x1b2   : > { %3135 = vmatmul.mubr.f32.vlgmr.msra.gmra.mxu1 %v1367_v19  ;;  %4430 = vmatpush3.msra.mxu0 %v1039_v30  ;;  %v1042_v19 = vld [vmem:[%s4716_s30 + $0x1890] sm:$0xff]  ;;  %v1072_v30 = vld [vmem:[%s4716_s30 + $0x1980] sm:$0xff]  ;;  %v1125_v16 = vld [vmem:[%s4716_s30 + $0x1b28] sm:$0xff] }
 0x1b3   : > { %4465 = vmatpush3.msra.mxu1 %v1071_v31  ;;  %4431 = vmatprep.subr.mxu0 %v1054_v32  ;;  %v1385_v31 = vcombine.high %v1377_v21, %v1377_v21  ;;  %v1024_v32 = vld [vmem:[%s4716_s30 + $0x1800] sm:$0xff] }
 0x1b4   : > { %4466 = vmatprep.subr.mxu1 %v1086_v33  ;;  %4432 = vmatpush3.msra.mxu0 %v1038_v34  ;;  %v1056_v33 = vld [vmem:[%s4716_s30 + $0x1900] sm:$0xff]  ;;  %v1386_v34 = vcombine.high %v1384_v26, %v1384_v26 }
 0x1b5   : > { %4467 = vmatpush3.msra.mxu1 %v1070_v35  ;;  %4433 = vmatprep.subr.mxu0 %v1053_v36  ;;  %v1119_v35 = vld [vmem:[%s4716_s30 + $0x1af8] sm:$0xff] }
 0x1b6   : > { %4468 = vmatprep.subr.mxu1 %v1085_v37  ;;  %4434 = vmatpush3.msra.mxu0 %v1037_v38  ;;  %v1151_v36 = vld [vmem:[%s4716_s30 + $0x1bf8] sm:$0xff] }
 0x1b7   : > { %4469 = vmatpush3.msra.mxu1 %v1069_v39  ;;  %4435 = vmatprep.subr.mxu0 %v1052_v40  ;;  %v1103_v37 = vld [vmem:[%s4716_s30 + $0x1a78] sm:$0xff]  ;;  %v1118_v39 = vld [vmem:[%s4716_s30 + $0x1af0] sm:$0xff] }
 0x1b8   : > { %4470 = vmatprep.subr.mxu1 %v1084_v41  ;;  %4436 = vmatpush3.msra.mxu0 %v1036_v42  ;;  %v1135_v38 = vld [vmem:[%s4716_s30 + $0x1b78] sm:$0xff]  ;;  %v1150_v40 = vld [vmem:[%s4716_s30 + $0x1bf0] sm:$0xff] }
 0x1b9   : > { %4471 = vmatpush3.msra.mxu1 %v1068_v43  ;;  %4437 = vmatprep.subr.mxu0 %v1051_v44  ;;  %v1102_v41 = vld [vmem:[%s4716_s30 + $0x1a70] sm:$0xff]  ;;  %v1117_v43 = vld [vmem:[%s4716_s30 + $0x1ae8] sm:$0xff] }
 0x1ba   : > { %4472 = vmatprep.subr.mxu1 %v1083_v45  ;;  %4438 = vmatpush3.msra.mxu0 %v1035_v46  ;;  %v1134_v42 = vld [vmem:[%s4716_s30 + $0x1b70] sm:$0xff]  ;;  %v1149_v44 = vld [vmem:[%s4716_s30 + $0x1be8] sm:$0xff] }
 0x1bb   : > { %4473 = vmatpush3.msra.mxu1 %v1067_v47  ;;  %4439 = vmatprep.subr.mxu0 %v1050_v48  ;;  %v1101_v45 = vld [vmem:[%s4716_s30 + $0x1a68] sm:$0xff]  ;;  %v1116_v47 = vld [vmem:[%s4716_s30 + $0x1ae0] sm:$0xff] }
 0x1bc   : > { %4474 = vmatprep.subr.mxu1 %v1082_v49  ;;  %4440 = vmatpush3.msra.mxu0 %v1034_v50  ;;  %v1133_v46 = vld [vmem:[%s4716_s30 + $0x1b68] sm:$0xff]  ;;  %v1148_v48 = vld [vmem:[%s4716_s30 + $0x1be0] sm:$0xff] }
 0x1bd   : > { %4475 = vmatpush3.msra.mxu1 %v1066_v51  ;;  %4441 = vmatprep.subr.mxu0 %v1049_v52  ;;  %v1100_v49 = vld [vmem:[%s4716_s30 + $0x1a60] sm:$0xff]  ;;  %v1115_v51 = vld [vmem:[%s4716_s30 + $0x1ad8] sm:$0xff] }
 0x1be   : > { %4476 = vmatprep.subr.mxu1 %v1081_v54  ;;  %4442 = vmatpush3.msra.mxu0 %v1033_v55  ;;  %v1132_v50 = vld [vmem:[%s4716_s30 + $0x1b60] sm:$0xff]  ;;  %v1147_v52 = vld [vmem:[%s4716_s30 + $0x1bd8] sm:$0xff] }
 0x1bf   : > { %4477 = vmatpush3.msra.mxu1 %v1065_v56  ;;  %4443 = vmatprep.subr.mxu0 %v1048_v57  ;;  %v1099_v54 = vld [vmem:[%s4716_s30 + $0x1a58] sm:$0xff]  ;;  %v1114_v56 = vld [vmem:[%s4716_s30 + $0x1ad0] sm:$0xff] }
 0x1c0   : > { %4478 = vmatprep.subr.mxu1 %v1080_v58  ;;  %4444 = vmatpush3.msra.mxu0 %v1032_v59  ;;  %v1131_v55 = vld [vmem:[%s4716_s30 + $0x1b58] sm:$0xff]  ;;  %v1146_v57 = vld [vmem:[%s4716_s30 + $0x1bd0] sm:$0xff] }
 0x1c1   : > { %4479 = vmatpush3.msra.mxu1 %v1064_v60  ;;  %4445 = vmatprep.subr.mxu0 %v1047_v61  ;;  %v1098_v58 = vld [vmem:[%s4716_s30 + $0x1a50] sm:$0xff]  ;;  %v1113_v60 = vld [vmem:[%s4716_s30 + $0x1ac8] sm:$0xff] }
 0x1c2   : > { %4480 = vmatprep.subr.mxu1 %v1079_v62  ;;  %4446 = vmatpush3.msra.mxu0 %v1031_v63  ;;  %v1130_v59 = vld [vmem:[%s4716_s30 + $0x1b50] sm:$0xff]  ;;  %v1145_v61 = vld [vmem:[%s4716_s30 + $0x1bc8] sm:$0xff] }
 0x1c3   : > { %4481 = vmatpush3.msra.mxu1 %v1063_v0  ;;  %4447 = vmatprep.subr.mxu0 %v1046_v1  ;;  %v1097_v62 = vld [vmem:[%s4716_s30 + $0x1a48] sm:$0xff]  ;;  %v1112_v0 = vld [vmem:[%s4716_s30 + $0x1ac0] sm:$0xff] }
 0x1c4   : > { %4482 = vmatprep.subr.mxu1 %v1078_v2  ;;  %4448 = vmatpush3.msra.mxu0 %v1030_v3  ;;  %v1129_v63 = vld [vmem:[%s4716_s30 + $0x1b48] sm:$0xff]  ;;  %v1144_v1 = vld [vmem:[%s4716_s30 + $0x1bc0] sm:$0xff] }
 0x1c5   : > { %4483 = vmatpush3.msra.mxu1 %v1062_v4  ;;  %4449 = vmatprep.subr.mxu0 %v1045_v5  ;;  %v1096_v2 = vld [vmem:[%s4716_s30 + $0x1a40] sm:$0xff]  ;;  %v1111_v4 = vld [vmem:[%s4716_s30 + $0x1ab8] sm:$0xff] }
 0x1c6   : > { %4484 = vmatprep.subr.mxu1 %v1077_v6  ;;  %4450 = vmatpush3.msra.mxu0 %v1029_v7  ;;  %v1128_v3 = vld [vmem:[%s4716_s30 + $0x1b40] sm:$0xff]  ;;  %v1143_v5 = vld [vmem:[%s4716_s30 + $0x1bb8] sm:$0xff] }
 0x1c7   : > { %4485 = vmatpush3.msra.mxu1 %v1061_v8  ;;  %4451 = vmatprep.subr.mxu0 %v1044_v10  ;;  %v1095_v6 = vld [vmem:[%s4716_s30 + $0x1a38] sm:$0xff]  ;;  %v1110_v8 = vld [vmem:[%s4716_s30 + $0x1ab0] sm:$0xff] }
 0x1c8   : > { %4486 = vmatprep.subr.mxu1 %v1076_v11  ;;  %4452 = vmatpush3.msra.mxu0 %v1028_v12  ;;  %v1127_v7 = vld [vmem:[%s4716_s30 + $0x1b38] sm:$0xff]  ;;  %v1094_v10 = vld [vmem:[%s4716_s30 + $0x1a30] sm:$0xff]  ;;  %v1109_v12 = vld [vmem:[%s4716_s30 + $0x1aa8] sm:$0xff] }
 0x1c9   : > { %4487 = vmatpush3.msra.mxu1 %v1060_v13  ;;  %4453 = vmatprep.subr.mxu0 %v1043_v14  ;;  %v1126_v11 = vld [vmem:[%s4716_s30 + $0x1b30] sm:$0xff]  ;;  %v1141_v13 = vld [vmem:[%s4716_s30 + $0x1ba8] sm:$0xff] }
 0x1ca   : > { %4488 = vmatprep.subr.mxu1 %v1075_v15  ;;  %4454 = vmatpush3.msra.mxu0 %v1027_v17  ;;  %v255_v14 = vld [vmem:[%s4711_s26 + $0x68] sm:$0xff]  ;;  %v1108_v17 = vld [vmem:[%s4716_s30 + $0x1aa0] sm:$0xff] }
 0x1cb   : > { %4489 = vmatpush3.msra.mxu1 %v1059_v18  ;;  %4455 = vmatprep.subr.mxu0 %v1042_v19  ;;  %v1093_v15 = vld [vmem:[%s4716_s30 + $0x1a28] sm:$0xff]  ;;  %v1140_v18 = vld [vmem:[%s4716_s30 + $0x1ba0] sm:$0xff] }
 0x1cc   : > { %4490 = vmatprep.subr.mxu1 %v1074_v20  ;;  %4456 = vmatpush3.msra.mxu0 %v1026_v22  ;;  %v1092_v19 = vld [vmem:[%s4716_s30 + $0x1a20] sm:$0xff]  ;;  %v1107_v22 = vld [vmem:[%s4716_s30 + $0x1a98] sm:$0xff] }
 0x1cd   : > { %4491 = vmatpush3.msra.mxu1 %v1058_v23  ;;  %4457 = vmatprep.subr.mxu0 %v1041_v24  ;;  %v1124_v20 = vld [vmem:[%s4716_s30 + $0x1b20] sm:$0xff]  ;;  %v1139_v23 = vld [vmem:[%s4716_s30 + $0x1b98] sm:$0xff] }
 0x1ce   : > { %4492 = vmatprep.subr.mxu1 %v1073_v25  ;;  %4458 = vmatpush3.msra.mxu0 %v1025_v27  ;;  %v1091_v24 = vld [vmem:[%s4716_s30 + $0x1a18] sm:$0xff]  ;;  %v1138_v27 = vld [vmem:[%s4716_s30 + $0x1b90] sm:$0xff] }
 0x1cf   : > { %4493 = vmatpush3.msra.mxu1 %v1057_v28  ;;  %4459 = vmatprep.subr.mxu0 %v1040_v29  ;;  %v1123_v25 = vld [vmem:[%s4716_s30 + $0x1b18] sm:$0xff]  ;;  %v1394_v28 = vrot.slane %v255_v14, %v4765_v53  ;;  %v1090_v29 = vld [vmem:[%s4716_s30 + $0x1a10] sm:$0xff] }
 0x1d0   : > { %4494 = vmatprep.subr.mxu1 %v1072_v30  ;;  %4460 = vmatpush3.msra.mxu0 %v1024_v32  ;;  %v1122_v30 = vld [vmem:[%s4716_s30 + $0x1b10] sm:$0xff]  ;;  %v1105_v32 = vld [vmem:[%s4716_s30 + $0x1a88] sm:$0xff] }
 0x1d1   : > { %3204 = vmatprep.mubr.f32.mxu0 %v1385_v31  ;;  %4495 = vmatpush3.msra.mxu1 %v1056_v33  ;;  %v1137_v33 = vld [vmem:[%s4716_s30 + $0x1b88] sm:$0xff] }
 0x1d2   : > { %3205 = vmatmul.mubr.f32.vlgmr.msra.gmra.mxu0 %v1377_v21  ;;  %3274 = vmatprep.mubr.f32.mxu1 %v1386_v34  ;;  %v1387_v21 = vcombine.high %v255_v14, %v255_v14  ;;  %v1089_v34 = vld [vmem:[%s4716_s30 + $0x1a08] sm:$0xff] }
 0x1d3   : > { %4499 = vmatprep.subr.mxu0 %v1119_v35  ;;  %4534 = vmatprep.subr.mxu1 %v1151_v36  ;;  %v1121_v35 = vld [vmem:[%s4716_s30 + $0x1b08] sm:$0xff]  ;;  %v1104_v36 = vld [vmem:[%s4716_s30 + $0x1a80] sm:$0xff] }
 0x1d4   : > { %3275 = vmatmul.mubr.f32.vlgmr.msra.gmra.mxu1 %v1384_v26  ;;  %4500 = vmatpush3.msra.mxu0 %v1103_v37  ;;  %v1106_v26 = vld [vmem:[%s4716_s30 + $0x1a90] sm:$0xff]  ;;  %v1401_v31 = vrot.slane %v1387_v21, %v4765_v53  ;;  %v1136_v37 = vld [vmem:[%s4716_s30 + $0x1b80] sm:$0xff] }
 0x1d5   : > { %4535 = vmatpush3.msra.mxu1 %v1135_v38  ;;  %4501 = vmatprep.subr.mxu0 %v1118_v39  ;;  %v1402_v38 = vcombine.high %v1394_v28, %v1394_v28  ;;  %v1088_v39 = vld [vmem:[%s4716_s30 + $0x1a00] sm:$0xff] }
 0x1d6   : > { %4536 = vmatprep.subr.mxu1 %v1150_v40  ;;  %4502 = vmatpush3.msra.mxu0 %v1102_v41  ;;  %v1403_v40 = vcombine.high %v1401_v31, %v1401_v31  ;;  %v1120_v53 = vld [vmem:[%s4716_s30 + $0x1b00] sm:$0xff]  ;;  %v3621_v41 = vpop.f32.mrf.mxu0 }
 0x1d7   : > { %4537 = vmatpush3.msra.mxu1 %v1134_v42  ;;  %4503 = vmatprep.subr.mxu0 %v1117_v43  ;;  %v3656_v42 = vpop.f32.mrf.mxu1 }
 0x1d8   : > { %4538 = vmatprep.subr.mxu1 %v1149_v44  ;;  %4504 = vmatpush3.msra.mxu0 %v1101_v45  ;;  %v3622_v43 = vpop.f32.mrf.mxu0 }
 0x1d9   : > { %4539 = vmatpush3.msra.mxu1 %v1133_v46  ;;  %4505 = vmatprep.subr.mxu0 %v1116_v47  ;;  %v3657_v45 = vpop.f32.mrf.mxu1 }
 0x1da   : > { %4540 = vmatprep.subr.mxu1 %v1148_v48  ;;  %4506 = vmatpush3.msra.mxu0 %v1100_v49  ;;  %v3691_v44 = vpop.f32.mrf.mxu0  ;;  %v3623_v48 = vadd.f32 %v3622_v43, %v3621_v41  ;;  %v3658_v49 = vadd.f32 %v3657_v45, %v3656_v42 }
 0x1db   : > { %4541 = vmatpush3.msra.mxu1 %v1132_v50  ;;  %4507 = vmatprep.subr.mxu0 %v1115_v51  ;;  %v3726_v46 = vpop.f32.mrf.mxu1 }
 0x1dc   : > { %4542 = vmatprep.subr.mxu1 %v1147_v52  ;;  %4508 = vmatpush3.msra.mxu0 %v1099_v54  ;;  %v3692_v47 = vpop.f32.mrf.mxu0  ;;  %v1597_v54 = vadd.f32 %v3658_v49, %v3623_v48 }
 0x1dd   : > { %4543 = vmatpush3.msra.mxu1 %v1131_v55  ;;  %4509 = vmatprep.subr.mxu0 %v1114_v56  ;;  %v3693_v51 = vadd.f32 %v3692_v47, %v3691_v44  ;;  %v3727_v52 = vpop.f32.mrf.mxu1 }
 0x1de   : > { %4544 = vmatprep.subr.mxu1 %v1146_v57  ;;  %4510 = vmatpush3.msra.mxu0 %v1098_v58  ;;  %v3761_v50 = vpop.f32.mrf.mxu0  ;;  %v3728_v58 = vadd.f32 %v3727_v52, %v3726_v46 }
 0x1df   : > { %4545 = vmatpush3.msra.mxu1 %v1130_v59  ;;  %4511 = vmatprep.subr.mxu0 %v1113_v60  ;;  %v3796_v55 = vpop.f32.mrf.mxu1  ;;  %v1667_v57 = vadd.f32 %v3693_v51, %v1597_v54 }
 0x1e0   : > { %4546 = vmatprep.subr.mxu1 %v1145_v61  ;;  %4512 = vmatpush3.msra.mxu0 %v1097_v62  ;;  %v3762_v56 = vpop.f32.mrf.mxu0 }
 0x1e1   : > { %4547 = vmatpush3.msra.mxu1 %v1129_v63  ;;  %4513 = vmatprep.subr.mxu0 %v1112_v0  ;;  %v3763_v60 = vadd.f32 %v3762_v56, %v3761_v50  ;;  %v3797_v61 = vpop.f32.mrf.mxu1  ;;  %v1737_v62 = vadd.f32 %v3728_v58, %v1667_v57 }
 0x1e2   : > { %4548 = vmatprep.subr.mxu1 %v1144_v1  ;;  %4514 = vmatpush3.msra.mxu0 %v1096_v2  ;;  %v3831_v59 = vpop.f32.mrf.mxu0  ;;  %v3798_v2 = vadd.f32 %v3797_v61, %v3796_v55 }
 0x1e3   : > { %4549 = vmatpush3.msra.mxu1 %v1128_v3  ;;  %4515 = vmatprep.subr.mxu0 %v1111_v4  ;;  %v3866_v63 = vpop.f32.mrf.mxu1  ;;  %v1807_v1 = vadd.f32 %v3763_v60, %v1737_v62 }
 0x1e4   : > { %4550 = vmatprep.subr.mxu1 %v1143_v5  ;;  %4516 = vmatpush3.msra.mxu0 %v1095_v6  ;;  %v3832_v0 = vpop.f32.mrf.mxu0 }
 0x1e5   : > { %4551 = vmatpush3.msra.mxu1 %v1127_v7  ;;  %4517 = vmatprep.subr.mxu0 %v1110_v8  ;;  %v3833_v4 = vadd.f32 %v3832_v0, %v3831_v59  ;;  %v3867_v5 = vpop.f32.mrf.mxu1  ;;  %v1877_v6 = vadd.f32 %v3798_v2, %v1807_v1 }
 0x1e6   : > { %4552 = vmatprep.subr.mxu1 %v1142_v9  ;;  %4518 = vmatpush3.msra.mxu0 %v1094_v10  ;;  %v3901_v3 = vpop.f32.mrf.mxu0  ;;  %v3868_v10 = vadd.f32 %v3867_v5, %v3866_v63 }
 0x1e7   : > { %4553 = vmatpush3.msra.mxu1 %v1126_v11  ;;  %4519 = vmatprep.subr.mxu0 %v1109_v12  ;;  %v3936_v7 = vpop.f32.mrf.mxu1  ;;  %v1947_v9 = vadd.f32 %v3833_v4, %v1877_v6 }
 0x1e8   : > { %4554 = vmatprep.subr.mxu1 %v1141_v13  ;;  %4520 = vmatpush3.msra.mxu0 %v1093_v15  ;;  %v3902_v8 = vpop.f32.mrf.mxu0 }
 0x1e9   : > { %4555 = vmatpush3.msra.mxu1 %v1125_v16  ;;  %4521 = vmatprep.subr.mxu0 %v1108_v17  ;;  %v3903_v12 = vadd.f32 %v3902_v8, %v3901_v3  ;;  %v3937_v13 = vpop.f32.mrf.mxu1  ;;  %v2017_v14 = vadd.f32 %v3868_v10, %v1947_v9 }
 0x1ea   : > { %4556 = vmatprep.subr.mxu1 %v1140_v18  ;;  %4522 = vmatpush3.msra.mxu0 %v1092_v19  ;;  %v3971_v11 = vpop.f32.mrf.mxu0  ;;  %v3938_v18 = vadd.f32 %v3937_v13, %v3936_v7 }
 0x1eb   : > { %4557 = vmatpush3.msra.mxu1 %v1124_v20  ;;  %4523 = vmatprep.subr.mxu0 %v1107_v22  ;;  %v4006_v15 = vpop.f32.mrf.mxu1  ;;  %v2087_v17 = vadd.f32 %v3903_v12, %v2017_v14 }
 0x1ec   : > { %4558 = vmatprep.subr.mxu1 %v1139_v23  ;;  %4524 = vmatpush3.msra.mxu0 %v1091_v24  ;;  %v3972_v16 = vpop.f32.mrf.mxu0 }
 0x1ed   : > { %4559 = vmatpush3.msra.mxu1 %v1123_v25  ;;  %4525 = vmatprep.subr.mxu0 %v1106_v26  ;;  %v3973_v20 = vadd.f32 %v3972_v16, %v3971_v11  ;;  %v4007_v21 = vpop.f32.mrf.mxu1  ;;  %v2157_v22 = vadd.f32 %v3938_v18, %v2087_v17 }
 0x1ee   : > { %4560 = vmatprep.subr.mxu1 %v1138_v27  ;;  %4526 = vmatpush3.msra.mxu0 %v1090_v29  ;;  %v4041_v19 = vpop.f32.mrf.mxu0  ;;  %v4008_v26 = vadd.f32 %v4007_v21, %v4006_v15 }
 0x1ef   : > { %4561 = vmatpush3.msra.mxu1 %v1122_v30  ;;  %4527 = vmatprep.subr.mxu0 %v1105_v32  ;;  %v4076_v23 = vpop.f32.mrf.mxu1  ;;  %v2227_v25 = vadd.f32 %v3973_v20, %v2157_v22 }
 0x1f0   : > { %4562 = vmatprep.subr.mxu1 %v1137_v33  ;;  %4528 = vmatpush3.msra.mxu0 %v1089_v34  ;;  %v4042_v24 = vpop.f32.mrf.mxu0 }
 0x1f1   : > { %4563 = vmatpush3.msra.mxu1 %v1121_v35  ;;  %4529 = vmatprep.subr.mxu0 %v1104_v36  ;;  %v4077_v29 = vpop.f32.mrf.mxu1  ;;  %v2297_v30 = vadd.f32 %v4008_v26, %v2227_v25 }
 0x1f2   : > { %4564 = vmatprep.subr.mxu1 %v1136_v37  ;;  %4530 = vmatpush3.msra.mxu0 %v1088_v39  ;;  %v4111_v27 = vpop.f32.mrf.mxu0  ;;  %v4078_v34 = vadd.f32 %v4077_v29, %v4076_v23 }
 0x1f3   : > { %3344 = vmatprep.mubr.f32.mxu0 %v1402_v38  ;;  %4565 = vmatpush3.msra.mxu1 %v1120_v53 }
 0x1f4   : > { %3414 = vmatprep.mubr.f32.mxu1 %v1403_v40  ;;  %3345 = vmatmul.mubr.f32.vlgmr.msra.gmra.mxu0 %v1394_v28  ;;  %v4043_v28 = vadd.f32 %v4042_v24, %v4041_v19  ;;  %v4112_v32 = vpop.f32.mrf.mxu0  ;;  %v241_v24 = vld [vmem:[#allocation2] sm:$0x3] }
 0x1f5   : > { %3415 = vmatmul.mubr.f32.vlgmr.msra.gmra.mxu1 %v1401_v31  ;;  %v4146_v31 = vpop.f32.mrf.mxu1  ;;  %v4113_v36 = vadd.f32 %v4112_v32, %v4111_v27 }
 0x1f6   : > { %v2367_v33 = vadd.f32 %v4043_v28, %v2297_v30 }
 0x1f7   : > { %v4147_v37 = vpop.f32.mrf.mxu1 }
 0x1f8   : > { %v2437_v38 = vadd.f32 %v4078_v34, %v2367_v33  ;;  %v4148_v41 = vadd.f32 %v4147_v37, %v4146_v31 }
 0x1fa   : > { %v2507_v53 = vadd.f32 %v4113_v36, %v2437_v38 }
 0x1fc   : > { %v2577_v45 = vadd.f32 %v4148_v41, %v2507_v53 }
 0x20a   : > { %v4181_v35 = vpop.f32.mrf.mxu0 }
 0x20c   : > { %v4216_v39 = vpop.f32.mrf.mxu1  ;;  %v4182_v40 = vpop.f32.mrf.mxu0 }
 0x20d   : > { %v4183_v43 = vadd.f32 %v4182_v40, %v4181_v35 }
 0x20e   : > { %v4217_v44 = vpop.f32.mrf.mxu1 }
 0x20f   : > { %v2647_v48 = vadd.f32 %v4183_v43, %v2577_v45  ;;  %v4218_v49 = vadd.f32 %v4217_v44, %v4216_v39 }
 0x211   : > { %v2717_v54 = vadd.f32 %v4218_v49, %v2647_v48 }
 0x22c   : > { %v4251_v42 = vpop.f32.mrf.mxu0 }
 0x22e   : > { %v4286_v46 = vpop.f32.mrf.mxu1  ;;  %v4252_v47 = vpop.f32.mrf.mxu0 }
 0x22f   : > { %v4253_v51 = vadd.f32 %v4252_v47, %v4251_v42 }
 0x230   : > { %v4287_v52 = vpop.f32.mrf.mxu1 }
 0x231   : > { %v2787_v57 = vadd.f32 %v4253_v51, %v2717_v54  ;;  %v4288_v58 = vadd.f32 %v4287_v52, %v4286_v46 }
 0x233   : > { %v2857_v62 = vadd.f32 %v4288_v58, %v2787_v57 }
 0x24e   : > { %v4321_v50 = vpop.f32.mrf.mxu0 }
 0x250   : > { %v4356_v55 = vpop.f32.mrf.mxu1  ;;  %v4322_v56 = vpop.f32.mrf.mxu0 }
 0x251   : > { %v4323_v60 = vadd.f32 %v4322_v56, %v4321_v50 }
 0x252   : > { %v4357_v61 = vpop.f32.mrf.mxu1 }
 0x253   : > { %v2927_v1 = vadd.f32 %v4323_v60, %v2857_v62  ;;  %v4358_v2 = vadd.f32 %v4357_v61, %v4356_v55 }
 0x255   : > { %v2997_v6 = vadd.f32 %v4358_v2, %v2927_v1 }
 0x270   : > { %v4391_v59 = vpop.f32.mrf.mxu0 }
 0x272   : > { %v4426_v63 = vpop.f32.mrf.mxu1  ;;  %v4392_v0 = vpop.f32.mrf.mxu0 }
 0x273   : > { %v4393_v4 = vadd.f32 %v4392_v0, %v4391_v59 }
 0x274   : > { %v4427_v5 = vpop.f32.mrf.mxu1 }
 0x275   : > { %v3067_v9 = vadd.f32 %v4393_v4, %v2997_v6  ;;  %v4428_v10 = vadd.f32 %v4427_v5, %v4426_v63 }
 0x277   : > { %v3137_v13 = vadd.f32 %v4428_v10, %v3067_v9 }
 0x292   : > { %v4461_v3 = vpop.f32.mrf.mxu0 }
 0x294   : > { %v4496_v7 = vpop.f32.mrf.mxu1  ;;  %v4462_v8 = vpop.f32.mrf.mxu0 }
 0x295   : > { %v4463_v11 = vadd.f32 %v4462_v8, %v4461_v3 }
 0x296   : > { %v4497_v12 = vpop.f32.mrf.mxu1 }
 0x297   : > { %v3207_v14 = vadd.f32 %v4463_v11, %v3137_v13  ;;  %v4498_v15 = vadd.f32 %v4497_v12, %v4496_v7 }
 0x299   : > { %v3277_v20 = vadd.f32 %v4498_v15, %v3207_v14 }
 0x2b4   : > { %v4531_v16 = vpop.f32.mrf.mxu0 }
 0x2b5   : > { %v4566_v17 = vpop.f32.mrf.mxu1 }
 0x2b6   : > { %v4532_v18 = vpop.f32.mrf.mxu0 }
 0x2b7   : > { %v4567_v19 = vpop.f32.mrf.mxu1  ;;  %v4533_v21 = vadd.f32 %v4532_v18, %v4531_v16 }
 0x2b8   : > { %v4568_v23 = vadd.f32 %v4567_v19, %v4566_v17 }
 0x2b9   : > { %v3347_v22 = vadd.f32 %v4533_v21, %v3277_v20 }
 0x2bb   : > { %v3417_v25 = vadd.f32 %v4568_v23, %v3347_v22  ;;  %3425 = sbr.rel (%p3584_p6) target bundleno = 967 (0x3c7), region = 48 }
 0x2bd   : > { %v3420_v26 = vadd.f32 %v3417_v25, %v241_v24 }
 0x2bf   : > { %3421 = vst [vmem:[#allocation2] sm:$0x3] %v3420_v26 }
 0x2c0   : > { %v3451_v27 = vld [vmem:[%s5720_s3 + $0x78] sm:$0xff]  ;;  %v4661_v28 = vmov 0.0   ;;  %v3450_v29 = vld [vmem:[%s5720_s3 + $0x70] sm:$0xff]  ;;  %vm4662_vm0 = vmmov 0   ;;  %v3449_v30 = vld [vmem:[%s5720_s3 + $0x68] sm:$0xff]  ;;  %vm3535_vm1 = vcmask 1024  }
 0x2c1   : > { %4586 = vmatprep.subr.mxu0 %v4661_v28  ;;  %4618 = vmatprep.mubr.msk.f32.mxu0 %vm4662_vm0, %v4661_v28  ;;  %v3448_v31 = vld [vmem:[%s5720_s3 + $0x60] sm:$0xff]  ;;  %v3447_v32 = vld [vmem:[%s5720_s3 + $0x58] sm:$0xff]  ;;  %v3446_v33 = vld [vmem:[%s5720_s3 + $0x50] sm:$0xff] }
 0x2c2   : > { %4587 = vmatpush3.msra.mxu0 %v3451_v27  ;;  %v3445_v34 = vld [vmem:[%s5720_s3 + $0x48] sm:$0xff]  ;;  %v3444_v35 = vld [vmem:[%s5720_s3 + $0x40] sm:$0xff]  ;;  %v3443_v36 = vld [vmem:[%s5720_s3 + $0x38] sm:$0xff] }
 0x2c3   : > { %4588 = vmatprep.subr.mxu0 %v4661_v28  ;;  %v3442_v37 = vld [vmem:[%s5720_s3 + $0x30] sm:$0xff]  ;;  %v3441_v38 = vld [vmem:[%s5720_s3 + $0x28] sm:$0xff]  ;;  %v3440_v39 = vld [vmem:[%s5720_s3 + $0x20] sm:$0xff] }
 0x2c4   : > { %4589 = vmatpush3.msra.mxu0 %v3450_v29  ;;  %v3585_v53 = vld [vmem:[%s5719_s2] ss:$0 sm:$0xff]  ;;  %v3439_v41 = vld [vmem:[%s5720_s3 + $0x18] sm:$0xff]  ;;  %v3438_v42 = vld [vmem:[%s5720_s3 + $0x10] sm:$0xff] }
 0x2c5   : > { %4590 = vmatprep.subr.mxu0 %v4661_v28  ;;  %v3437_v44 = vld [vmem:[%s5720_s3 + $0x8] sm:$0xff]  ;;  %v3436_v45 = vld [vmem:[%s5720_s3] sm:$0xff] }
 0x2c6   : > { %4591 = vmatpush3.msra.mxu0 %v3449_v30  ;;  %v3426_v40 = vld [vmem:[#allocation2] sm:$0x3]  ;;  %v3586_v47 = vld [vmem:[#allocation3] ss:$0 sm:$0xff] }
 0x2c7   : > { %4592 = vmatprep.subr.mxu0 %v4661_v28  ;;  %v3434_v43 = vadd.f32 %v3585_v53, %v3426_v40 }
 0x2c8   : > { %4593 = vmatpush3.msra.mxu0 %v3448_v31 }
 0x2c9   : > { %4594 = vmatprep.subr.mxu0 %v4661_v28  ;;  %v3435_v46 = vmax.f32 %v3434_v43, 0.0 }
 0x2ca   : > { %4595 = vmatpush3.msra.mxu0 %v3447_v32 }
 0x2cb   : > { %4596 = vmatprep.subr.mxu0 %v4661_v28 }
 0x2cc   : > { %4597 = vmatpush3.msra.mxu0 %v3446_v33 }
 0x2cd   : > { %4598 = vmatprep.subr.mxu0 %v4661_v28 }
 0x2ce   : > { %4599 = vmatpush3.msra.mxu0 %v3445_v34 }
 0x2cf   : > { %4600 = vmatprep.subr.mxu0 %v4661_v28 }
 0x2d0   : > { %4601 = vmatpush3.msra.mxu0 %v3444_v35 }
 0x2d1   : > { %4602 = vmatprep.subr.mxu0 %v4661_v28 }
 0x2d2   : > { %4603 = vmatpush3.msra.mxu0 %v3443_v36 }
 0x2d3   : > { %4604 = vmatprep.subr.mxu0 %v4661_v28 }
 0x2d4   : > { %4605 = vmatpush3.msra.mxu0 %v3442_v37 }
 0x2d5   : > { %4606 = vmatprep.subr.mxu0 %v4661_v28 }
 0x2d6   : > { %4607 = vmatpush3.msra.mxu0 %v3441_v38 }
 0x2d7   : > { %4608 = vmatprep.subr.mxu0 %v4661_v28 }
 0x2d8   : > { %4609 = vmatpush3.msra.mxu0 %v3440_v39 }
 0x2d9   : > { %4610 = vmatprep.subr.mxu0 %v4661_v28 }
 0x2da   : > { %4611 = vmatpush3.msra.mxu0 %v3439_v41 }
 0x2db   : > { %4612 = vmatprep.subr.mxu0 %v4661_v28 }
 0x2dc   : > { %4613 = vmatpush3.msra.mxu0 %v3438_v42 }
 0x2dd   : > { %4614 = vmatprep.subr.mxu0 %v4661_v28 }
 0x2de   : > { %4615 = vmatpush3.msra.mxu0 %v3437_v44 }
 0x2df   : > { %4616 = vmatprep.subr.mxu0 %v4661_v28 }
 0x2e0   : > { %4617 = vmatpush3.msra.mxu0 %v3436_v45 }
 0x2e1   : > { %4619 = vmatmul.mubr.f32.vlgmr.msra.gmra.mxu0 %v3435_v46 }
 0x3a1   : > { %v3525_v48 = vpop.f32.mrf.mxu0 }
 0x3a2   : > { %v3526_v49 = vadd.f32 %v3586_v47, %v3525_v48 }
 0x3a3   : > { %v4620_v50 = vpop.f32.mrf.mxu0 }
 0x3a4   : > { %v3529_v51 = vsub.f32 0.0, %v3526_v49 }
 0x3a6   : > { %v3530_v52 = vmul.f32 1.442695, %v3529_v51 }
 0x3a8   : > { %4647 = vpow2.f32 %v3530_v52 }
 0x3b5   : > { %v4648_v54 = vpop.eup %4647 }
 0x3b6   : > { %v3532_v55 = vadd.f32 1.0, %v4648_v54 }
 0x3b8   : > { %4649 = vrcp.f32 %v3532_v55 }
 0x3c5   : > { %v4650_v56 = vpop.eup %4649 }
 0x3c6   : > { %3536 = vst.msk [vmem:[%s5722_s5] sm:$0x3] %vm3535_vm1, %v4650_v56 }
 0x3c7 PF: > { %s17_s20 = sadd.s32 1, %s4657_s20  }
 0x3c8   : > { %p14_p7 = scmp.ge.s32.totalorder %s17_s20, 9  }
 0x3ca   :  { %16 = sbr.rel (!%p14_p7) target bundleno = 3 (0x3), region = 77 }

</bundles_post_ra>
